<compile_context>
chip_gen: v5e
topology: v5e:2x2
jax: 0.10.0
libtpu: 0.0.40
codegen_flags: <defaults>
</compile_context>

<pallas_src>
import functools

import jax
import jax.numpy as jnp
from jax.experimental import pallas as pl
from jax.experimental.pallas import tpu as pltpu

# ---------------- small synthetic ELMo config ----------------
B, S, F = 2, 8, 8                      # batch, seq_len, fix_len (chars per word)
N_CHARS = 64                           # char vocab
CHAR_DIM = 16                          # char embedding dim
FILTERS = ((1, 8), (2, 8), (3, 16))    # (kernel width, out channels)
N_FILTERS = sum(c for _, c in FILTERS)     # 32
N_HIGHWAY = 2
PROJ_DIM = 16                          # ELMo projection_dim
CELL = 32                              # LSTM cell size
N_LSTM_LAYERS = 2
HIDDEN = 2 * PROJ_DIM                  # ELMo output dim (bi-directional)
N_OUT = HIDDEN                         # n_out=0 -> hidden size (square Linear, no bias)
CLIP = 3.0                             # memory / state projection clip values
BOS_CHAR, EOS_CHAR = 1, 2
T = S + 2                              # seq length with sentence boundaries kept


def _vmem():
    return pl.BlockSpec(memory_space=pltpu.MemorySpace.VMEM)


def _smem():
    return pl.BlockSpec(memory_space=pltpu.MemorySpace.SMEM)


# ---------------- LSTM cell gates (LstmCellWithProjection, projection done outside) ----------------
def _lstm_gates(gates, c_prev):
    # gates: [B, 4*CELL] pre-activations (input + recurrent contributions + bias)
    s = jax.nn.sigmoid(gates)                       # one EUP pass over a single vreg
    i = s[:, 0 * CELL:1 * CELL]
    f = s[:, 1 * CELL:2 * CELL]
    o = s[:, 3 * CELL:4 * CELL]
    g = jnp.tanh(gates[:, 2 * CELL:3 * CELL])
    c_new = jnp.clip(i * g + f * c_prev, -CLIP, CLIP)
    return o * jnp.tanh(c_new), c_new               # (pre-projection output, new cell)


# ---------------- THE fused ELMo kernel (no grid, fully unrolled time loop) ----------------
def _elmo_kernel(ce_ref, wtoe_ref, btoe_ref,
                 whw1_ref, bhw1_ref, whw2_ref, bhw2_ref,
                 wpr_ref, bpr_ref,
                 wi1_ref, b1_ref,
                 wh_ref, wp1_ref, wi2_ref, b2_ref, wp2_ref,
                 gw_ref, wout_ref,
                 out_ref, h1_sc, h2_sc, *, b_n, t_n):
    P, C = PROJ_DIM, CELL

    # ---- char CNN: one padded block-Toeplitz matmul, uniform position-major pooling ----
    conv = (jnp.dot(ce_ref[...], wtoe_ref[...], preferred_element_type=jnp.float32)
            + btoe_ref[...])                                     # [N, n_pos*N_FILTERS]
    n_pos = conv.shape[1] // N_FILTERS
    acc = conv[:, 0:N_FILTERS]
    for p in range(1, n_pos):
        acc = jnp.maximum(acc, conv[:, p * N_FILTERS:(p + 1) * N_FILTERS])
    h = jnp.maximum(acc, 0.0)                                    # [N, N_FILTERS]

    # ---- 2 highway layers: one merged [32,64] dot each, slice the two halves ----
    for whw, bhw in ((whw1_ref, bhw1_ref), (whw2_ref, bhw2_ref)):
        proj = jnp.dot(h, whw[...], preferred_element_type=jnp.float32) + bhw[...]
        nl = jnp.maximum(proj[:, :N_FILTERS], 0.0)
        g = jax.nn.sigmoid(proj[:, N_FILTERS:])
        h = g * h + (1.0 - g) * nl

    # ---- projection to PROJ_DIM + layer-1 input-gate precompute (fwd|bwd one dot) ----
    tok = jnp.dot(h, wpr_ref[...], preferred_element_type=jnp.float32) + bpr_ref[...]   # [N, P]
    gx1 = jnp.dot(tok, wi1_ref[...], preferred_element_type=jnp.float32) + b1_ref[...]  # [N, 8C]

    # ---- fused 2-layer biLSTM, fully unrolled over time (static indices everywhere) ----
    h1f = h1b = h2f = h2b = jnp.zeros((b_n, P), jnp.float32)
    c1f = c1b = c2f = c2b = jnp.zeros((b_n, C), jnp.float32)
    for t in range(t_n):
        tb = t_n - 1 - t
        # ONE block-diag recurrent dot feeding all 4 (direction x layer) cells
        hcat = jnp.concatenate([h1f, h1b, h2f, h2b], axis=-1)                 # [B, 4P]
        rec = jnp.dot(hcat, wh_ref[...], preferred_element_type=jnp.float32)  # [B, 16C]

        # layer 1 (fwd token t, bwd token tb)
        p1f, c1f = _lstm_gates(gx1[t * b_n:(t + 1) * b_n, 0:4 * C] + rec[:, 0:4 * C], c1f)
        p1b, c1b = _lstm_gates(gx1[tb * b_n:(tb + 1) * b_n, 4 * C:8 * C] + rec[:, 4 * C:8 * C], c1b)
        h1 = jnp.clip(jnp.dot(jnp.concatenate([p1f, p1b], axis=-1), wp1_ref[...],
                              preferred_element_type=jnp.float32), -CLIP, CLIP)  # [B, 2P]
        h1f, h1b = h1[:, :P], h1[:, P:]

        # layer-2 input gates from the just-computed layer-1 output (one block-diag dot)
        gx2 = jnp.dot(h1, wi2_ref[...], preferred_element_type=jnp.float32) + b2_ref[...]  # [B, 8C]
        p2f, c2f = _lstm_gates(gx2[:, 0:4 * C] + rec[:, 8 * C:12 * C], c2f)
        p2b, c2b = _lstm_gates(gx2[:, 4 * C:8 * C] + rec[:, 12 * C:16 * C], c2b)
        h2 = jnp.clip(jnp.dot(jnp.concatenate([p2f, p2b], axis=-1), wp2_ref[...],
                              preferred_element_type=jnp.float32), -CLIP, CLIP)
        h2f, h2b = h2[:, :P], h2[:, P:]

        # record layer outputs (VMEM-resident only; layer 2 gets the ElmoLstm skip connection)
        h1_sc[t * b_n:(t + 1) * b_n, 0:P] = h1f
        h1_sc[tb * b_n:(tb + 1) * b_n, P:2 * P] = h1b
        h2_sc[t * b_n:(t + 1) * b_n, 0:P] = h2f + h1f
        h2_sc[tb * b_n:(tb + 1) * b_n, P:2 * P] = h2b + h1b

    # ---- scalar mix (gamma folded into gw at trace time) + output projection (ONE dot) ----
    tok2 = jnp.concatenate([tok, tok], axis=-1)                  # layer-0 rep [N, 2P]
    mixed = gw_ref[0] * tok2 + gw_ref[1] * h1_sc[...] + gw_ref[2] * h2_sc[...]
    out_ref[...] = jnp.dot(mixed, wout_ref[...], preferred_element_type=jnp.float32)


def elmo_fused(ce_flat, wtoe, btoe, whw1, bhw1, whw2, bhw2, wpr, bpr,
               wi1, b1, wh, wp1, wi2, b2, wp2, gw, wout, *, b_n, t_n):
    n_tok = t_n * b_n
    return pl.pallas_call(
        functools.partial(_elmo_kernel, b_n=b_n, t_n=t_n),
        out_shape=jax.ShapeDtypeStruct((n_tok, N_OUT), jnp.float32),
        in_specs=[_vmem()] * 16 + [_smem(), _vmem()],
        out_specs=_vmem(),
        scratch_shapes=[pltpu.VMEM((n_tok, 2 * PROJ_DIM), jnp.float32),
                        pltpu.VMEM((n_tok, 2 * PROJ_DIM), jnp.float32)],
    )(ce_flat, wtoe, btoe, whw1, bhw1, whw2, bhw2, wpr, bpr,
      wi1, b1, wh, wp1, wi2, b2, wp2, gw, wout)


# ---------------- parameter init (deterministic, synthetic) ----------------
def init_params(key):
    keys = iter(jax.random.split(key, 32))
    p = {}
    p['char_emb'] = jax.random.normal(next(keys), (N_CHARS, CHAR_DIM), jnp.float32) * 0.1
    p['cnn'] = []
    for w, ch in FILTERS:
        wk = jax.random.normal(next(keys), (w * CHAR_DIM, ch), jnp.float32) / (w * CHAR_DIM) ** 0.5
        bk = jnp.zeros((1, ch), jnp.float32)
        p['cnn'].append((wk, bk))
    p['highway'] = []
    for _ in range(N_HIGHWAY):
        wk = jax.random.normal(next(keys), (N_FILTERS, 2 * N_FILTERS), jnp.float32) / N_FILTERS ** 0.5
        bk = jnp.zeros((1, 2 * N_FILTERS), jnp.float32)
        p['highway'].append((wk, bk))
    p['proj_w'] = jax.random.normal(next(keys), (N_FILTERS, PROJ_DIM), jnp.float32) / N_FILTERS ** 0.5
    p['proj_b'] = jnp.zeros((1, PROJ_DIM), jnp.float32)
    p['lstm'] = []
    for _ in range(N_LSTM_LAYERS):
        dirs = []
        for _ in range(2):  # forward / backward
            wi = jax.random.normal(next(keys), (PROJ_DIM, 4 * CELL), jnp.float32) / PROJ_DIM ** 0.5
            wh = jax.random.normal(next(keys), (PROJ_DIM, 4 * CELL), jnp.float32) / PROJ_DIM ** 0.5
            # AllenNLP LstmCellWithProjection initializes the forget-gate bias to 1.0
            bb = jnp.zeros((1, 4 * CELL), jnp.float32).at[:, CELL:2 * CELL].set(1.0)
            wp = jax.random.normal(next(keys), (CELL, PROJ_DIM), jnp.float32) / CELL ** 0.5
            dirs.append((wi, wh, bb, wp))
        p['lstm'].append(tuple(dirs))
    p['scalar_w'] = jnp.zeros((3,), jnp.float32)
    p['gamma'] = jnp.ones((), jnp.float32)
    p['out_w'] = jax.random.normal(next(keys), (HIDDEN, N_OUT), jnp.float32) / HIDDEN ** 0.5
    return p


def build_toeplitz(cnn_params, f_n):
    # Padded, position-major block-Toeplitz conv weight: every filter is padded to
    # f_n positions so each position owns a uniform N_FILTERS-wide channel block.
    # Padded positions get zero weights AND zero bias -> safe because ReLU follows
    # the position max: relu(max(reals U {0})) == relu(max(reals)).
    cols, bias_cols = [], []
    for p in range(f_n):
        for (w, ch), (wk, bk) in zip(FILTERS, cnn_params):
            col = jnp.zeros((f_n * CHAR_DIM, ch), jnp.float32)
            if p + w <= f_n:
                col = col.at[p * CHAR_DIM:(p + w) * CHAR_DIM, :].set(wk)
                bias_cols.append(bk)
            else:
                bias_cols.append(jnp.zeros_like(bk))
            cols.append(col)
    return jnp.concatenate(cols, axis=1), jnp.concatenate(bias_cols, axis=1)


def blockdiag(blocks):
    rows = sum(b.shape[0] for b in blocks)
    cols = sum(b.shape[1] for b in blocks)
    out = jnp.zeros((rows, cols), jnp.float32)
    r = c = 0
    for b in blocks:
        out = out.at[r:r + b.shape[0], c:c + b.shape[1]].set(b)
        r += b.shape[0]
        c += b.shape[1]
    return out


# ---------------- forward ----------------
def elmo_embedding_forward(chars, params, bos_eos=(True, True)):
    b_n, s_n, f_n = chars.shape
    t_n = s_n + 2
    n_tok = b_n * t_n

    # add sentence boundaries (Elmo keep_sentence_boundaries=True)
    bos_row = jnp.zeros((f_n,), jnp.int32).at[0].set(BOS_CHAR)
    eos_row = jnp.zeros((f_n,), jnp.int32).at[0].set(EOS_CHAR)
    bos = jnp.broadcast_to(bos_row, (b_n, 1, f_n))
    eos = jnp.broadcast_to(eos_row, (b_n, 1, f_n))
    chars_b = jnp.concatenate([bos, chars, eos], axis=1)               # [B, T, F]

    # time-major token layout (token n = t*B + b) so no transposes between stages
    chars_tm = jnp.transpose(chars_b, (1, 0, 2)).reshape(-1)           # [T*B*F]
    ce = jnp.take(params['char_emb'], chars_tm, axis=0)                # XLA gather glue
    ce_flat = ce.reshape(n_tok, f_n * CHAR_DIM)                        # [N, 128] lane-dense

    # trace-time weight packing (block-Toeplitz conv, concat / block-diag LSTM weights)
    wtoe, btoe = build_toeplitz(params['cnn'], f_n)
    (whw1, bhw1), (whw2, bhw2) = params['highway']
    (wi1f, wh1f, b1f, wp1f), (wi1b, wh1b, b1b, wp1b) = params['lstm'][0]
    (wi2f, wh2f, b2f, wp2f), (wi2b, wh2b, b2b, wp2b) = params['lstm'][1]
    wi1 = jnp.concatenate([wi1f, wi1b], axis=1)                        # [P, 8C]
    b1 = jnp.concatenate([b1f, b1b], axis=1)                           # [1, 8C]
    wh = blockdiag([wh1f, wh1b, wh2f, wh2b])                           # [4P, 16C]
    wp1 = blockdiag([wp1f, wp1b])                                      # [2C, 2P]
    wi2 = blockdiag([wi2f, wi2b])                                      # [2P, 8C]
    b2 = jnp.concatenate([b2f, b2b], axis=1)                           # [1, 8C]
    wp2 = blockdiag([wp2f, wp2b])                                      # [2C, 2P]
    gw = params['gamma'] * jax.nn.softmax(params['scalar_w'])          # gamma folded in, [3]

    out = elmo_fused(ce_flat, wtoe, btoe, whw1, bhw1, whw2, bhw2,
                     params['proj_w'], params['proj_b'],
                     wi1, b1, wh, wp1, wi2, b2, wp2, gw, params['out_w'],
                     b_n=b_n, t_n=t_n)                                 # [N, N_OUT]

    out = jnp.transpose(out.reshape(t_n, b_n, N_OUT), (1, 0, 2))       # [B, T, N_OUT]
    if not bos_eos[0]:
        out = out[:, 1:]
    if not bos_eos[1]:
        out = out[:, :-1]
    return out


if __name__ == "__main__":
    key = jax.random.PRNGKey(0)
    pkey, ckey = jax.random.split(key)
    params = init_params(pkey)
    chars = jax.random.randint(ckey, (B, S, F), 3, N_CHARS, dtype=jnp.int32)
    fwd = jax.jit(functools.partial(elmo_embedding_forward, bos_eos=(True, True)))
    out = fwd(chars, params)
    out = jax.block_until_ready(out)
    assert out.shape == (B, S + 2, N_OUT), out.shape
    assert bool(jnp.all(jnp.isfinite(out)))
    print("KERNEL_OK")
</pallas_src>

<mosaic_0001>
module attributes {stable_mosaic.version = 11 : i64} {
  func.func @_elmo_kernel(%arg0: memref<20x128xf32, #tpu.memory_space<vmem>>, %arg1: memref<128x256xf32, #tpu.memory_space<vmem>>, %arg2: memref<1x256xf32, #tpu.memory_space<vmem>>, %arg3: memref<32x64xf32, #tpu.memory_space<vmem>>, %arg4: memref<1x64xf32, #tpu.memory_space<vmem>>, %arg5: memref<32x64xf32, #tpu.memory_space<vmem>>, %arg6: memref<1x64xf32, #tpu.memory_space<vmem>>, %arg7: memref<32x16xf32, #tpu.memory_space<vmem>>, %arg8: memref<1x16xf32, #tpu.memory_space<vmem>>, %arg9: memref<16x256xf32, #tpu.memory_space<vmem>>, %arg10: memref<1x256xf32, #tpu.memory_space<vmem>>, %arg11: memref<64x512xf32, #tpu.memory_space<vmem>>, %arg12: memref<64x32xf32, #tpu.memory_space<vmem>>, %arg13: memref<32x256xf32, #tpu.memory_space<vmem>>, %arg14: memref<1x256xf32, #tpu.memory_space<vmem>>, %arg15: memref<64x32xf32, #tpu.memory_space<vmem>>, %arg16: memref<3xf32, #tpu.memory_space<smem>>, %arg17: memref<32x32xf32, #tpu.memory_space<vmem>>, %arg18: memref<20x32xf32, #tpu.memory_space<vmem>>, %arg19: memref<20x32xf32, #tpu.memory_space<vmem>>, %arg20: memref<20x32xf32, #tpu.memory_space<vmem>>) attributes {dimension_semantics = [], scalar_prefetch = 0 : i64, scratch_operands = 2 : i64, tpu.core_type = #tpu.core_type<tc>} {
    %c0 = arith.constant 0 : index
    %c0_0 = arith.constant 0 : index
    %0 = vector.load %arg0[%c0, %c0_0] : memref<20x128xf32, #tpu.memory_space<vmem>>, vector<20x128xf32>
    %c0_1 = arith.constant 0 : index
    %c0_2 = arith.constant 0 : index
    %1 = vector.load %arg1[%c0_1, %c0_2] : memref<128x256xf32, #tpu.memory_space<vmem>>, vector<128x256xf32>
    %cst = arith.constant dense<0.000000e+00> : vector<20x256xf32>
    %2 = tpu.matmul %0, %1, %cst {dimension_numbers = #tpu.dot_dimension_numbers<[1], [0], [0], [1], [0, 0, 1, 1], [], []>} : vector<20x128xf32>, vector<128x256xf32>, vector<20x256xf32> -> vector<20x256xf32>
    %c0_3 = arith.constant 0 : index
    %c0_4 = arith.constant 0 : index
    %3 = vector.load %arg2[%c0_3, %c0_4] : memref<1x256xf32, #tpu.memory_space<vmem>>, vector<1x256xf32>
    %4 = vector.broadcast %3 : vector<1x256xf32> to vector<20x256xf32>
    %5 = arith.addf %2, %4 : vector<20x256xf32>
    %6 = vector.extract_strided_slice %5 {offsets = [0, 0], sizes = [20, 32], strides = [1, 1]} : vector<20x256xf32> to vector<20x32xf32>
    %7 = vector.extract_strided_slice %5 {offsets = [0, 32], sizes = [20, 32], strides = [1, 1]} : vector<20x256xf32> to vector<20x32xf32>
    %8 = arith.maximumf %6, %7 : vector<20x32xf32>
    %9 = vector.extract_strided_slice %5 {offsets = [0, 64], sizes = [20, 32], strides = [1, 1]} : vector<20x256xf32> to vector<20x32xf32>
    %10 = arith.maximumf %8, %9 : vector<20x32xf32>
    %11 = vector.extract_strided_slice %5 {offsets = [0, 96], sizes = [20, 32], strides = [1, 1]} : vector<20x256xf32> to vector<20x32xf32>
    %12 = arith.maximumf %10, %11 : vector<20x32xf32>
    %13 = vector.extract_strided_slice %5 {offsets = [0, 128], sizes = [20, 32], strides = [1, 1]} : vector<20x256xf32> to vector<20x32xf32>
    %14 = arith.maximumf %12, %13 : vector<20x32xf32>
    %15 = vector.extract_strided_slice %5 {offsets = [0, 160], sizes = [20, 32], strides = [1, 1]} : vector<20x256xf32> to vector<20x32xf32>
    %16 = arith.maximumf %14, %15 : vector<20x32xf32>
    %17 = vector.extract_strided_slice %5 {offsets = [0, 192], sizes = [20, 32], strides = [1, 1]} : vector<20x256xf32> to vector<20x32xf32>
    %18 = arith.maximumf %16, %17 : vector<20x32xf32>
    %19 = vector.extract_strided_slice %5 {offsets = [0, 224], sizes = [20, 32], strides = [1, 1]} : vector<20x256xf32> to vector<20x32xf32>
    %20 = arith.maximumf %18, %19 : vector<20x32xf32>
    %cst_5 = arith.constant 0.000000e+00 : f32
    %21 = vector.broadcast %cst_5 : f32 to vector<20x32xf32>
    %22 = arith.maximumf %20, %21 : vector<20x32xf32>
    %c0_6 = arith.constant 0 : index
    %c0_7 = arith.constant 0 : index
    %23 = vector.load %arg3[%c0_6, %c0_7] : memref<32x64xf32, #tpu.memory_space<vmem>>, vector<32x64xf32>
    %cst_8 = arith.constant dense<0.000000e+00> : vector<20x64xf32>
    %24 = tpu.matmul %22, %23, %cst_8 {dimension_numbers = #tpu.dot_dimension_numbers<[1], [0], [0], [1], [0, 0, 1, 1], [], []>} : vector<20x32xf32>, vector<32x64xf32>, vector<20x64xf32> -> vector<20x64xf32>
    %c0_9 = arith.constant 0 : index
    %c0_10 = arith.constant 0 : index
    %25 = vector.load %arg4[%c0_9, %c0_10] : memref<1x64xf32, #tpu.memory_space<vmem>>, vector<1x64xf32>
    %26 = vector.broadcast %25 : vector<1x64xf32> to vector<20x64xf32>
    %27 = arith.addf %24, %26 : vector<20x64xf32>
    %28 = vector.extract_strided_slice %27 {offsets = [0, 0], sizes = [20, 32], strides = [1, 1]} : vector<20x64xf32> to vector<20x32xf32>
    %cst_11 = arith.constant 0.000000e+00 : f32
    %29 = vector.broadcast %cst_11 : f32 to vector<20x32xf32>
    %30 = arith.maximumf %28, %29 : vector<20x32xf32>
    %31 = vector.extract_strided_slice %27 {offsets = [0, 32], sizes = [20, 32], strides = [1, 1]} : vector<20x64xf32> to vector<20x32xf32>
    %32 = arith.negf %31 : vector<20x32xf32>
    %33 = math.exp %32 : vector<20x32xf32>
    %cst_12 = arith.constant 1.000000e+00 : f32
    %34 = vector.broadcast %cst_12 : f32 to vector<20x32xf32>
    %35 = arith.addf %34, %33 : vector<20x32xf32>
    %36 = arith.divf %34, %35 : vector<20x32xf32>
    %37 = arith.mulf %36, %22 : vector<20x32xf32>
    %cst_13 = arith.constant 1.000000e+00 : f32
    %38 = vector.broadcast %cst_13 : f32 to vector<20x32xf32>
    %39 = arith.subf %38, %36 : vector<20x32xf32>
    %40 = arith.mulf %39, %30 : vector<20x32xf32>
    %41 = arith.addf %37, %40 : vector<20x32xf32>
    %c0_14 = arith.constant 0 : index
    %c0_15 = arith.constant 0 : index
    %42 = vector.load %arg5[%c0_14, %c0_15] : memref<32x64xf32, #tpu.memory_space<vmem>>, vector<32x64xf32>
    %cst_16 = arith.constant dense<0.000000e+00> : vector<20x64xf32>
    %43 = tpu.matmul %41, %42, %cst_16 {dimension_numbers = #tpu.dot_dimension_numbers<[1], [0], [0], [1], [0, 0, 1, 1], [], []>} : vector<20x32xf32>, vector<32x64xf32>, vector<20x64xf32> -> vector<20x64xf32>
    %c0_17 = arith.constant 0 : index
    %c0_18 = arith.constant 0 : index
    %44 = vector.load %arg6[%c0_17, %c0_18] : memref<1x64xf32, #tpu.memory_space<vmem>>, vector<1x64xf32>
    %45 = vector.broadcast %44 : vector<1x64xf32> to vector<20x64xf32>
    %46 = arith.addf %43, %45 : vector<20x64xf32>
    %47 = vector.extract_strided_slice %46 {offsets = [0, 0], sizes = [20, 32], strides = [1, 1]} : vector<20x64xf32> to vector<20x32xf32>
    %cst_19 = arith.constant 0.000000e+00 : f32
    %48 = vector.broadcast %cst_19 : f32 to vector<20x32xf32>
    %49 = arith.maximumf %47, %48 : vector<20x32xf32>
    %50 = vector.extract_strided_slice %46 {offsets = [0, 32], sizes = [20, 32], strides = [1, 1]} : vector<20x64xf32> to vector<20x32xf32>
    %51 = arith.negf %50 : vector<20x32xf32>
    %52 = math.exp %51 : vector<20x32xf32>
    %cst_20 = arith.constant 1.000000e+00 : f32
    %53 = vector.broadcast %cst_20 : f32 to vector<20x32xf32>
    %54 = arith.addf %53, %52 : vector<20x32xf32>
    %55 = arith.divf %53, %54 : vector<20x32xf32>
    %56 = arith.mulf %55, %41 : vector<20x32xf32>
    %cst_21 = arith.constant 1.000000e+00 : f32
    %57 = vector.broadcast %cst_21 : f32 to vector<20x32xf32>
    %58 = arith.subf %57, %55 : vector<20x32xf32>
    %59 = arith.mulf %58, %49 : vector<20x32xf32>
    %60 = arith.addf %56, %59 : vector<20x32xf32>
    %c0_22 = arith.constant 0 : index
    %c0_23 = arith.constant 0 : index
    %61 = vector.load %arg7[%c0_22, %c0_23] : memref<32x16xf32, #tpu.memory_space<vmem>>, vector<32x16xf32>
    %cst_24 = arith.constant dense<0.000000e+00> : vector<20x16xf32>
    %62 = tpu.matmul %60, %61, %cst_24 {dimension_numbers = #tpu.dot_dimension_numbers<[1], [0], [0], [1], [0, 0, 1, 1], [], []>} : vector<20x32xf32>, vector<32x16xf32>, vector<20x16xf32> -> vector<20x16xf32>
    %c0_25 = arith.constant 0 : index
    %c0_26 = arith.constant 0 : index
    %63 = vector.load %arg8[%c0_25, %c0_26] : memref<1x16xf32, #tpu.memory_space<vmem>>, vector<1x16xf32>
    %64 = vector.broadcast %63 : vector<1x16xf32> to vector<20x16xf32>
    %65 = arith.addf %62, %64 : vector<20x16xf32>
    %c0_27 = arith.constant 0 : index
    %c0_28 = arith.constant 0 : index
    %66 = vector.load %arg9[%c0_27, %c0_28] : memref<16x256xf32, #tpu.memory_space<vmem>>, vector<16x256xf32>
    %cst_29 = arith.constant dense<0.000000e+00> : vector<20x256xf32>
    %67 = tpu.matmul %65, %66, %cst_29 {dimension_numbers = #tpu.dot_dimension_numbers<[1], [0], [0], [1], [0, 0, 1, 1], [], []>} : vector<20x16xf32>, vector<16x256xf32>, vector<20x256xf32> -> vector<20x256xf32>
    %c0_30 = arith.constant 0 : index
    %c0_31 = arith.constant 0 : index
    %68 = vector.load %arg10[%c0_30, %c0_31] : memref<1x256xf32, #tpu.memory_space<vmem>>, vector<1x256xf32>
    %69 = vector.broadcast %68 : vector<1x256xf32> to vector<20x256xf32>
    %70 = arith.addf %67, %69 : vector<20x256xf32>
    %cst_32 = arith.constant 0.000000e+00 : f32
    %71 = vector.broadcast %cst_32 : f32 to vector<2x16xf32>
    %cst_33 = arith.constant 0.000000e+00 : f32
    %72 = vector.broadcast %cst_33 : f32 to vector<2x32xf32>
    %73 = tpu.concatenate %71, %71, %71, %71 in 1 : vector<2x16xf32>, vector<2x16xf32>, vector<2x16xf32>, vector<2x16xf32> -> vector<2x64xf32>
    %c0_34 = arith.constant 0 : index
    %c0_35 = arith.constant 0 : index
    %74 = vector.load %arg11[%c0_34, %c0_35] : memref<64x512xf32, #tpu.memory_space<vmem>>, vector<64x512xf32>
    %cst_36 = arith.constant dense<0.000000e+00> : vector<2x512xf32>
    %75 = tpu.matmul %73, %74, %cst_36 {dimension_numbers = #tpu.dot_dimension_numbers<[1], [0], [0], [1], [0, 0, 1, 1], [], []>} : vector<2x64xf32>, vector<64x512xf32>, vector<2x512xf32> -> vector<2x512xf32>
    %76 = vector.extract_strided_slice %70 {offsets = [0, 0], sizes = [2, 128], strides = [1, 1]} : vector<20x256xf32> to vector<2x128xf32>
    %77 = vector.extract_strided_slice %75 {offsets = [0, 0], sizes = [2, 128], strides = [1, 1]} : vector<2x512xf32> to vector<2x128xf32>
    %78 = arith.addf %76, %77 : vector<2x128xf32>
    %79 = arith.negf %78 : vector<2x128xf32>
    %80 = math.exp %79 : vector<2x128xf32>
    %cst_37 = arith.constant 1.000000e+00 : f32
    %81 = vector.broadcast %cst_37 : f32 to vector<2x128xf32>
    %82 = arith.addf %81, %80 : vector<2x128xf32>
    %83 = arith.divf %81, %82 : vector<2x128xf32>
    %84 = vector.extract_strided_slice %83 {offsets = [0, 0], sizes = [2, 32], strides = [1, 1]} : vector<2x128xf32> to vector<2x32xf32>
    %85 = vector.extract_strided_slice %83 {offsets = [0, 32], sizes = [2, 32], strides = [1, 1]} : vector<2x128xf32> to vector<2x32xf32>
    %86 = vector.extract_strided_slice %83 {offsets = [0, 96], sizes = [2, 32], strides = [1, 1]} : vector<2x128xf32> to vector<2x32xf32>
    %87 = vector.extract_strided_slice %78 {offsets = [0, 64], sizes = [2, 32], strides = [1, 1]} : vector<2x128xf32> to vector<2x32xf32>
    %88 = math.tanh %87 : vector<2x32xf32>
    %89 = arith.mulf %84, %88 : vector<2x32xf32>
    %90 = arith.mulf %85, %72 : vector<2x32xf32>
    %91 = arith.addf %89, %90 : vector<2x32xf32>
    %cst_38 = arith.constant -3.000000e+00 : f32
    %cst_39 = arith.constant 3.000000e+00 : f32
    %92 = vector.broadcast %cst_38 : f32 to vector<2x32xf32>
    %93 = arith.maximumf %92, %91 : vector<2x32xf32>
    %94 = vector.broadcast %cst_39 : f32 to vector<2x32xf32>
    %95 = arith.minimumf %94, %93 : vector<2x32xf32>
    %96 = math.tanh %95 : vector<2x32xf32>
    %97 = arith.mulf %86, %96 : vector<2x32xf32>
    %98 = vector.extract_strided_slice %70 {offsets = [18, 128], sizes = [2, 128], strides = [1, 1]} : vector<20x256xf32> to vector<2x128xf32>
    %99 = vector.extract_strided_slice %75 {offsets = [0, 128], sizes = [2, 128], strides = [1, 1]} : vector<2x512xf32> to vector<2x128xf32>
    %100 = arith.addf %98, %99 : vector<2x128xf32>
    %101 = arith.negf %100 : vector<2x128xf32>
    %102 = math.exp %101 : vector<2x128xf32>
    %cst_40 = arith.constant 1.000000e+00 : f32
    %103 = vector.broadcast %cst_40 : f32 to vector<2x128xf32>
    %104 = arith.addf %103, %102 : vector<2x128xf32>
    %105 = arith.divf %103, %104 : vector<2x128xf32>
    %106 = vector.extract_strided_slice %105 {offsets = [0, 0], sizes = [2, 32], strides = [1, 1]} : vector<2x128xf32> to vector<2x32xf32>
    %107 = vector.extract_strided_slice %105 {offsets = [0, 32], sizes = [2, 32], strides = [1, 1]} : vector<2x128xf32> to vector<2x32xf32>
    %108 = vector.extract_strided_slice %105 {offsets = [0, 96], sizes = [2, 32], strides = [1, 1]} : vector<2x128xf32> to vector<2x32xf32>
    %109 = vector.extract_strided_slice %100 {offsets = [0, 64], sizes = [2, 32], strides = [1, 1]} : vector<2x128xf32> to vector<2x32xf32>
    %110 = math.tanh %109 : vector<2x32xf32>
    %111 = arith.mulf %106, %110 : vector<2x32xf32>
    %112 = arith.mulf %107, %72 : vector<2x32xf32>
    %113 = arith.addf %111, %112 : vector<2x32xf32>
    %cst_41 = arith.constant -3.000000e+00 : f32
    %cst_42 = arith.constant 3.000000e+00 : f32
    %114 = vector.broadcast %cst_41 : f32 to vector<2x32xf32>
    %115 = arith.maximumf %114, %113 : vector<2x32xf32>
    %116 = vector.broadcast %cst_42 : f32 to vector<2x32xf32>
    %117 = arith.minimumf %116, %115 : vector<2x32xf32>
    %118 = math.tanh %117 : vector<2x32xf32>
    %119 = arith.mulf %108, %118 : vector<2x32xf32>
    %120 = tpu.concatenate %97, %119 in 1 : vector<2x32xf32>, vector<2x32xf32> -> vector<2x64xf32>
    %c0_43 = arith.constant 0 : index
    %c0_44 = arith.constant 0 : index
    %121 = vector.load %arg12[%c0_43, %c0_44] : memref<64x32xf32, #tpu.memory_space<vmem>>, vector<64x32xf32>
    %cst_45 = arith.constant dense<0.000000e+00> : vector<2x32xf32>
    %122 = tpu.matmul %120, %121, %cst_45 {dimension_numbers = #tpu.dot_dimension_numbers<[1], [0], [0], [1], [0, 0, 1, 1], [], []>} : vector<2x64xf32>, vector<64x32xf32>, vector<2x32xf32> -> vector<2x32xf32>
    %cst_46 = arith.constant -3.000000e+00 : f32
    %cst_47 = arith.constant 3.000000e+00 : f32
    %123 = vector.broadcast %cst_46 : f32 to vector<2x32xf32>
    %124 = arith.maximumf %123, %122 : vector<2x32xf32>
    %125 = vector.broadcast %cst_47 : f32 to vector<2x32xf32>
    %126 = arith.minimumf %125, %124 : vector<2x32xf32>
    %127 = vector.extract_strided_slice %126 {offsets = [0, 0], sizes = [2, 16], strides = [1, 1]} : vector<2x32xf32> to vector<2x16xf32>
    %128 = vector.extract_strided_slice %126 {offsets = [0, 16], sizes = [2, 16], strides = [1, 1]} : vector<2x32xf32> to vector<2x16xf32>
    %c0_48 = arith.constant 0 : index
    %c0_49 = arith.constant 0 : index
    %129 = vector.load %arg13[%c0_48, %c0_49] : memref<32x256xf32, #tpu.memory_space<vmem>>, vector<32x256xf32>
    %cst_50 = arith.constant dense<0.000000e+00> : vector<2x256xf32>
    %130 = tpu.matmul %126, %129, %cst_50 {dimension_numbers = #tpu.dot_dimension_numbers<[1], [0], [0], [1], [0, 0, 1, 1], [], []>} : vector<2x32xf32>, vector<32x256xf32>, vector<2x256xf32> -> vector<2x256xf32>
    %c0_51 = arith.constant 0 : index
    %c0_52 = arith.constant 0 : index
    %131 = vector.load %arg14[%c0_51, %c0_52] : memref<1x256xf32, #tpu.memory_space<vmem>>, vector<1x256xf32>
    %132 = vector.broadcast %131 : vector<1x256xf32> to vector<2x256xf32>
    %133 = arith.addf %130, %132 : vector<2x256xf32>
    %134 = vector.extract_strided_slice %133 {offsets = [0, 0], sizes = [2, 128], strides = [1, 1]} : vector<2x256xf32> to vector<2x128xf32>
    %135 = vector.extract_strided_slice %75 {offsets = [0, 256], sizes = [2, 128], strides = [1, 1]} : vector<2x512xf32> to vector<2x128xf32>
    %136 = arith.addf %134, %135 : vector<2x128xf32>
    %137 = arith.negf %136 : vector<2x128xf32>
    %138 = math.exp %137 : vector<2x128xf32>
    %cst_53 = arith.constant 1.000000e+00 : f32
    %139 = vector.broadcast %cst_53 : f32 to vector<2x128xf32>
    %140 = arith.addf %139, %138 : vector<2x128xf32>
    %141 = arith.divf %139, %140 : vector<2x128xf32>
    %142 = vector.extract_strided_slice %141 {offsets = [0, 0], sizes = [2, 32], strides = [1, 1]} : vector<2x128xf32> to vector<2x32xf32>
    %143 = vector.extract_strided_slice %141 {offsets = [0, 32], sizes = [2, 32], strides = [1, 1]} : vector<2x128xf32> to vector<2x32xf32>
    %144 = vector.extract_strided_slice %141 {offsets = [0, 96], sizes = [2, 32], strides = [1, 1]} : vector<2x128xf32> to vector<2x32xf32>
    %145 = vector.extract_strided_slice %136 {offsets = [0, 64], sizes = [2, 32], strides = [1, 1]} : vector<2x128xf32> to vector<2x32xf32>
    %146 = math.tanh %145 : vector<2x32xf32>
    %147 = arith.mulf %142, %146 : vector<2x32xf32>
    %148 = arith.mulf %143, %72 : vector<2x32xf32>
    %149 = arith.addf %147, %148 : vector<2x32xf32>
    %cst_54 = arith.constant -3.000000e+00 : f32
    %cst_55 = arith.constant 3.000000e+00 : f32
    %150 = vector.broadcast %cst_54 : f32 to vector<2x32xf32>
    %151 = arith.maximumf %150, %149 : vector<2x32xf32>
    %152 = vector.broadcast %cst_55 : f32 to vector<2x32xf32>
    %153 = arith.minimumf %152, %151 : vector<2x32xf32>
    %154 = math.tanh %153 : vector<2x32xf32>
    %155 = arith.mulf %144, %154 : vector<2x32xf32>
    %156 = vector.extract_strided_slice %133 {offsets = [0, 128], sizes = [2, 128], strides = [1, 1]} : vector<2x256xf32> to vector<2x128xf32>
    %157 = vector.extract_strided_slice %75 {offsets = [0, 384], sizes = [2, 128], strides = [1, 1]} : vector<2x512xf32> to vector<2x128xf32>
    %158 = arith.addf %156, %157 : vector<2x128xf32>
    %159 = arith.negf %158 : vector<2x128xf32>
    %160 = math.exp %159 : vector<2x128xf32>
    %cst_56 = arith.constant 1.000000e+00 : f32
    %161 = vector.broadcast %cst_56 : f32 to vector<2x128xf32>
    %162 = arith.addf %161, %160 : vector<2x128xf32>
    %163 = arith.divf %161, %162 : vector<2x128xf32>
    %164 = vector.extract_strided_slice %163 {offsets = [0, 0], sizes = [2, 32], strides = [1, 1]} : vector<2x128xf32> to vector<2x32xf32>
    %165 = vector.extract_strided_slice %163 {offsets = [0, 32], sizes = [2, 32], strides = [1, 1]} : vector<2x128xf32> to vector<2x32xf32>
    %166 = vector.extract_strided_slice %163 {offsets = [0, 96], sizes = [2, 32], strides = [1, 1]} : vector<2x128xf32> to vector<2x32xf32>
    %167 = vector.extract_strided_slice %158 {offsets = [0, 64], sizes = [2, 32], strides = [1, 1]} : vector<2x128xf32> to vector<2x32xf32>
    %168 = math.tanh %167 : vector<2x32xf32>
    %169 = arith.mulf %164, %168 : vector<2x32xf32>
    %170 = arith.mulf %165, %72 : vector<2x32xf32>
    %171 = arith.addf %169, %170 : vector<2x32xf32>
    %cst_57 = arith.constant -3.000000e+00 : f32
    %cst_58 = arith.constant 3.000000e+00 : f32
    %172 = vector.broadcast %cst_57 : f32 to vector<2x32xf32>
    %173 = arith.maximumf %172, %171 : vector<2x32xf32>
    %174 = vector.broadcast %cst_58 : f32 to vector<2x32xf32>
    %175 = arith.minimumf %174, %173 : vector<2x32xf32>
    %176 = math.tanh %175 : vector<2x32xf32>
    %177 = arith.mulf %166, %176 : vector<2x32xf32>
    %178 = tpu.concatenate %155, %177 in 1 : vector<2x32xf32>, vector<2x32xf32> -> vector<2x64xf32>
    %c0_59 = arith.constant 0 : index
    %c0_60 = arith.constant 0 : index
    %179 = vector.load %arg15[%c0_59, %c0_60] : memref<64x32xf32, #tpu.memory_space<vmem>>, vector<64x32xf32>
    %cst_61 = arith.constant dense<0.000000e+00> : vector<2x32xf32>
    %180 = tpu.matmul %178, %179, %cst_61 {dimension_numbers = #tpu.dot_dimension_numbers<[1], [0], [0], [1], [0, 0, 1, 1], [], []>} : vector<2x64xf32>, vector<64x32xf32>, vector<2x32xf32> -> vector<2x32xf32>
    %cst_62 = arith.constant -3.000000e+00 : f32
    %cst_63 = arith.constant 3.000000e+00 : f32
    %181 = vector.broadcast %cst_62 : f32 to vector<2x32xf32>
    %182 = arith.maximumf %181, %180 : vector<2x32xf32>
    %183 = vector.broadcast %cst_63 : f32 to vector<2x32xf32>
    %184 = arith.minimumf %183, %182 : vector<2x32xf32>
    %185 = vector.extract_strided_slice %184 {offsets = [0, 0], sizes = [2, 16], strides = [1, 1]} : vector<2x32xf32> to vector<2x16xf32>
    %186 = vector.extract_strided_slice %184 {offsets = [0, 16], sizes = [2, 16], strides = [1, 1]} : vector<2x32xf32> to vector<2x16xf32>
    %c0_64 = arith.constant 0 : index
    %c0_65 = arith.constant 0 : index
    %187 = vector.load %arg19[%c0_64, %c0_65] : memref<20x32xf32, #tpu.memory_space<vmem>>, vector<2x16xf32>
    tpu.vector_store %arg19[%c0_64, %c0_65], %127 {strides = array<i32>} : memref<20x32xf32, #tpu.memory_space<vmem>>, vector<2x16xf32>,
    %c18 = arith.constant 18 : index
    %c16 = arith.constant 16 : index
    %188 = vector.load %arg19[%c18, %c16] : memref<20x32xf32, #tpu.memory_space<vmem>>, vector<2x16xf32>
    tpu.vector_store %arg19[%c18, %c16], %128 {strides = array<i32>} : memref<20x32xf32, #tpu.memory_space<vmem>>, vector<2x16xf32>,
    %189 = arith.addf %185, %127 : vector<2x16xf32>
    %c0_66 = arith.constant 0 : index
    %c0_67 = arith.constant 0 : index
    %190 = vector.load %arg20[%c0_66, %c0_67] : memref<20x32xf32, #tpu.memory_space<vmem>>, vector<2x16xf32>
    tpu.vector_store %arg20[%c0_66, %c0_67], %189 {strides = array<i32>} : memref<20x32xf32, #tpu.memory_space<vmem>>, vector<2x16xf32>,
    %191 = arith.addf %186, %128 : vector<2x16xf32>
    %c18_68 = arith.constant 18 : index
    %c16_69 = arith.constant 16 : index
    %192 = vector.load %arg20[%c18_68, %c16_69] : memref<20x32xf32, #tpu.memory_space<vmem>>, vector<2x16xf32>
    tpu.vector_store %arg20[%c18_68, %c16_69], %191 {strides = array<i32>} : memref<20x32xf32, #tpu.memory_space<vmem>>, vector<2x16xf32>,
    %193 = tpu.concatenate %127, %128, %185, %186 in 1 : vector<2x16xf32>, vector<2x16xf32>, vector<2x16xf32>, vector<2x16xf32> -> vector<2x64xf32>
    %c0_70 = arith.constant 0 : index
    %c0_71 = arith.constant 0 : index
    %194 = vector.load %arg11[%c0_70, %c0_71] : memref<64x512xf32, #tpu.memory_space<vmem>>, vector<64x512xf32>
    %cst_72 = arith.constant dense<0.000000e+00> : vector<2x512xf32>
    %195 = tpu.matmul %193, %194, %cst_72 {dimension_numbers = #tpu.dot_dimension_numbers<[1], [0], [0], [1], [0, 0, 1, 1], [], []>} : vector<2x64xf32>, vector<64x512xf32>, vector<2x512xf32> -> vector<2x512xf32>
    %196 = vector.extract_strided_slice %70 {offsets = [2, 0], sizes = [2, 128], strides = [1, 1]} : vector<20x256xf32> to vector<2x128xf32>
    %197 = vector.extract_strided_slice %195 {offsets = [0, 0], sizes = [2, 128], strides = [1, 1]} : vector<2x512xf32> to vector<2x128xf32>
    %198 = arith.addf %196, %197 : vector<2x128xf32>
    %199 = arith.negf %198 : vector<2x128xf32>
    %200 = math.exp %199 : vector<2x128xf32>
    %cst_73 = arith.constant 1.000000e+00 : f32
    %201 = vector.broadcast %cst_73 : f32 to vector<2x128xf32>
    %202 = arith.addf %201, %200 : vector<2x128xf32>
    %203 = arith.divf %201, %202 : vector<2x128xf32>
    %204 = vector.extract_strided_slice %203 {offsets = [0, 0], sizes = [2, 32], strides = [1, 1]} : vector<2x128xf32> to vector<2x32xf32>
    %205 = vector.extract_strided_slice %203 {offsets = [0, 32], sizes = [2, 32], strides = [1, 1]} : vector<2x128xf32> to vector<2x32xf32>
    %206 = vector.extract_strided_slice %203 {offsets = [0, 96], sizes = [2, 32], strides = [1, 1]} : vector<2x128xf32> to vector<2x32xf32>
    %207 = vector.extract_strided_slice %198 {offsets = [0, 64], sizes = [2, 32], strides = [1, 1]} : vector<2x128xf32> to vector<2x32xf32>
    %208 = math.tanh %207 : vector<2x32xf32>
    %209 = arith.mulf %204, %208 : vector<2x32xf32>
    %210 = arith.mulf %205, %95 : vector<2x32xf32>
    %211 = arith.addf %209, %210 : vector<2x32xf32>
    %cst_74 = arith.constant -3.000000e+00 : f32
    %cst_75 = arith.constant 3.000000e+00 : f32
    %212 = vector.broadcast %cst_74 : f32 to vector<2x32xf32>
    %213 = arith.maximumf %212, %211 : vector<2x32xf32>
    %214 = vector.broadcast %cst_75 : f32 to vector<2x32xf32>
    %215 = arith.minimumf %214, %213 : vector<2x32xf32>
    %216 = math.tanh %215 : vector<2x32xf32>
    %217 = arith.mulf %206, %216 : vector<2x32xf32>
    %218 = vector.extract_strided_slice %70 {offsets = [16, 128], sizes = [2, 128], strides = [1, 1]} : vector<20x256xf32> to vector<2x128xf32>
    %219 = vector.extract_strided_slice %195 {offsets = [0, 128], sizes = [2, 128], strides = [1, 1]} : vector<2x512xf32> to vector<2x128xf32>
    %220 = arith.addf %218, %219 : vector<2x128xf32>
    %221 = arith.negf %220 : vector<2x128xf32>
    %222 = math.exp %221 : vector<2x128xf32>
    %cst_76 = arith.constant 1.000000e+00 : f32
    %223 = vector.broadcast %cst_76 : f32 to vector<2x128xf32>
    %224 = arith.addf %223, %222 : vector<2x128xf32>
    %225 = arith.divf %223, %224 : vector<2x128xf32>
    %226 = vector.extract_strided_slice %225 {offsets = [0, 0], sizes = [2, 32], strides = [1, 1]} : vector<2x128xf32> to vector<2x32xf32>
    %227 = vector.extract_strided_slice %225 {offsets = [0, 32], sizes = [2, 32], strides = [1, 1]} : vector<2x128xf32> to vector<2x32xf32>
    %228 = vector.extract_strided_slice %225 {offsets = [0, 96], sizes = [2, 32], strides = [1, 1]} : vector<2x128xf32> to vector<2x32xf32>
    %229 = vector.extract_strided_slice %220 {offsets = [0, 64], sizes = [2, 32], strides = [1, 1]} : vector<2x128xf32> to vector<2x32xf32>
    %230 = math.tanh %229 : vector<2x32xf32>
    %231 = arith.mulf %226, %230 : vector<2x32xf32>
    %232 = arith.mulf %227, %117 : vector<2x32xf32>
    %233 = arith.addf %231, %232 : vector<2x32xf32>
    %cst_77 = arith.constant -3.000000e+00 : f32
    %cst_78 = arith.constant 3.000000e+00 : f32
    %234 = vector.broadcast %cst_77 : f32 to vector<2x32xf32>
    %235 = arith.maximumf %234, %233 : vector<2x32xf32>
    %236 = vector.broadcast %cst_78 : f32 to vector<2x32xf32>
    %237 = arith.minimumf %236, %235 : vector<2x32xf32>
    %238 = math.tanh %237 : vector<2x32xf32>
    %239 = arith.mulf %228, %238 : vector<2x32xf32>
    %240 = tpu.concatenate %217, %239 in 1 : vector<2x32xf32>, vector<2x32xf32> -> vector<2x64xf32>
    %c0_79 = arith.constant 0 : index
    %c0_80 = arith.constant 0 : index
    %241 = vector.load %arg12[%c0_79, %c0_80] : memref<64x32xf32, #tpu.memory_space<vmem>>, vector<64x32xf32>
    %cst_81 = arith.constant dense<0.000000e+00> : vector<2x32xf32>
    %242 = tpu.matmul %240, %241, %cst_81 {dimension_numbers = #tpu.dot_dimension_numbers<[1], [0], [0], [1], [0, 0, 1, 1], [], []>} : vector<2x64xf32>, vector<64x32xf32>, vector<2x32xf32> -> vector<2x32xf32>
    %cst_82 = arith.constant -3.000000e+00 : f32
    %cst_83 = arith.constant 3.000000e+00 : f32
    %243 = vector.broadcast %cst_82 : f32 to vector<2x32xf32>
    %244 = arith.maximumf %243, %242 : vector<2x32xf32>
    %245 = vector.broadcast %cst_83 : f32 to vector<2x32xf32>
    %246 = arith.minimumf %245, %244 : vector<2x32xf32>
    %247 = vector.extract_strided_slice %246 {offsets = [0, 0], sizes = [2, 16], strides = [1, 1]} : vector<2x32xf32> to vector<2x16xf32>
    %248 = vector.extract_strided_slice %246 {offsets = [0, 16], sizes = [2, 16], strides = [1, 1]} : vector<2x32xf32> to vector<2x16xf32>
    %c0_84 = arith.constant 0 : index
    %c0_85 = arith.constant 0 : index
    %249 = vector.load %arg13[%c0_84, %c0_85] : memref<32x256xf32, #tpu.memory_space<vmem>>, vector<32x256xf32>
    %cst_86 = arith.constant dense<0.000000e+00> : vector<2x256xf32>
    %250 = tpu.matmul %246, %249, %cst_86 {dimension_numbers = #tpu.dot_dimension_numbers<[1], [0], [0], [1], [0, 0, 1, 1], [], []>} : vector<2x32xf32>, vector<32x256xf32>, vector<2x256xf32> -> vector<2x256xf32>
    %c0_87 = arith.constant 0 : index
    %c0_88 = arith.constant 0 : index
    %251 = vector.load %arg14[%c0_87, %c0_88] : memref<1x256xf32, #tpu.memory_space<vmem>>, vector<1x256xf32>
    %252 = vector.broadcast %251 : vector<1x256xf32> to vector<2x256xf32>
    %253 = arith.addf %250, %252 : vector<2x256xf32>
    %254 = vector.extract_strided_slice %253 {offsets = [0, 0], sizes = [2, 128], strides = [1, 1]} : vector<2x256xf32> to vector<2x128xf32>
    %255 = vector.extract_strided_slice %195 {offsets = [0, 256], sizes = [2, 128], strides = [1, 1]} : vector<2x512xf32> to vector<2x128xf32>
    %256 = arith.addf %254, %255 : vector<2x128xf32>
    %257 = arith.negf %256 : vector<2x128xf32>
    %258 = math.exp %257 : vector<2x128xf32>
    %cst_89 = arith.constant 1.000000e+00 : f32
    %259 = vector.broadcast %cst_89 : f32 to vector<2x128xf32>
    %260 = arith.addf %259, %258 : vector<2x128xf32>
    %261 = arith.divf %259, %260 : vector<2x128xf32>
    %262 = vector.extract_strided_slice %261 {offsets = [0, 0], sizes = [2, 32], strides = [1, 1]} : vector<2x128xf32> to vector<2x32xf32>
    %263 = vector.extract_strided_slice %261 {offsets = [0, 32], sizes = [2, 32], strides = [1, 1]} : vector<2x128xf32> to vector<2x32xf32>
    %264 = vector.extract_strided_slice %261 {offsets = [0, 96], sizes = [2, 32], strides = [1, 1]} : vector<2x128xf32> to vector<2x32xf32>
    %265 = vector.extract_strided_slice %256 {offsets = [0, 64], sizes = [2, 32], strides = [1, 1]} : vector<2x128xf32> to vector<2x32xf32>
    %266 = math.tanh %265 : vector<2x32xf32>
    %267 = arith.mulf %262, %266 : vector<2x32xf32>
    %268 = arith.mulf %263, %153 : vector<2x32xf32>
    %269 = arith.addf %267, %268 : vector<2x32xf32>
    %cst_90 = arith.constant -3.000000e+00 : f32
    %cst_91 = arith.constant 3.000000e+00 : f32
    %270 = vector.broadcast %cst_90 : f32 to vector<2x32xf32>
    %271 = arith.maximumf %270, %269 : vector<2x32xf32>
    %272 = vector.broadcast %cst_91 : f32 to vector<2x32xf32>
    %273 = arith.minimumf %272, %271 : vector<2x32xf32>
    %274 = math.tanh %273 : vector<2x32xf32>
    %275 = arith.mulf %264, %274 : vector<2x32xf32>
    %276 = vector.extract_strided_slice %253 {offsets = [0, 128], sizes = [2, 128], strides = [1, 1]} : vector<2x256xf32> to vector<2x128xf32>
    %277 = vector.extract_strided_slice %195 {offsets = [0, 384], sizes = [2, 128], strides = [1, 1]} : vector<2x512xf32> to vector<2x128xf32>
    %278 = arith.addf %276, %277 : vector<2x128xf32>
    %279 = arith.negf %278 : vector<2x128xf32>
    %280 = math.exp %279 : vector<2x128xf32>
    %cst_92 = arith.constant 1.000000e+00 : f32
    %281 = vector.broadcast %cst_92 : f32 to vector<2x128xf32>
    %282 = arith.addf %281, %280 : vector<2x128xf32>
    %283 = arith.divf %281, %282 : vector<2x128xf32>
    %284 = vector.extract_strided_slice %283 {offsets = [0, 0], sizes = [2, 32], strides = [1, 1]} : vector<2x128xf32> to vector<2x32xf32>
    %285 = vector.extract_strided_slice %283 {offsets = [0, 32], sizes = [2, 32], strides = [1, 1]} : vector<2x128xf32> to vector<2x32xf32>
    %286 = vector.extract_strided_slice %283 {offsets = [0, 96], sizes = [2, 32], strides = [1, 1]} : vector<2x128xf32> to vector<2x32xf32>
    %287 = vector.extract_strided_slice %278 {offsets = [0, 64], sizes = [2, 32], strides = [1, 1]} : vector<2x128xf32> to vector<2x32xf32>
    %288 = math.tanh %287 : vector<2x32xf32>
    %289 = arith.mulf %284, %288 : vector<2x32xf32>
    %290 = arith.mulf %285, %175 : vector<2x32xf32>
    %291 = arith.addf %289, %290 : vector<2x32xf32>
    %cst_93 = arith.constant -3.000000e+00 : f32
    %cst_94 = arith.constant 3.000000e+00 : f32
    %292 = vector.broadcast %cst_93 : f32 to vector<2x32xf32>
    %293 = arith.maximumf %292, %291 : vector<2x32xf32>
    %294 = vector.broadcast %cst_94 : f32 to vector<2x32xf32>
    %295 = arith.minimumf %294, %293 : vector<2x32xf32>
    %296 = math.tanh %295 : vector<2x32xf32>
    %297 = arith.mulf %286, %296 : vector<2x32xf32>
    %298 = tpu.concatenate %275, %297 in 1 : vector<2x32xf32>, vector<2x32xf32> -> vector<2x64xf32>
    %c0_95 = arith.constant 0 : index
    %c0_96 = arith.constant 0 : index
    %299 = vector.load %arg15[%c0_95, %c0_96] : memref<64x32xf32, #tpu.memory_space<vmem>>, vector<64x32xf32>
    %cst_97 = arith.constant dense<0.000000e+00> : vector<2x32xf32>
    %300 = tpu.matmul %298, %299, %cst_97 {dimension_numbers = #tpu.dot_dimension_numbers<[1], [0], [0], [1], [0, 0, 1, 1], [], []>} : vector<2x64xf32>, vector<64x32xf32>, vector<2x32xf32> -> vector<2x32xf32>
    %cst_98 = arith.constant -3.000000e+00 : f32
    %cst_99 = arith.constant 3.000000e+00 : f32
    %301 = vector.broadcast %cst_98 : f32 to vector<2x32xf32>
    %302 = arith.maximumf %301, %300 : vector<2x32xf32>
    %303 = vector.broadcast %cst_99 : f32 to vector<2x32xf32>
    %304 = arith.minimumf %303, %302 : vector<2x32xf32>
    %305 = vector.extract_strided_slice %304 {offsets = [0, 0], sizes = [2, 16], strides = [1, 1]} : vector<2x32xf32> to vector<2x16xf32>
    %306 = vector.extract_strided_slice %304 {offsets = [0, 16], sizes = [2, 16], strides = [1, 1]} : vector<2x32xf32> to vector<2x16xf32>
    %c2 = arith.constant 2 : index
    %c0_100 = arith.constant 0 : index
    %307 = vector.load %arg19[%c2, %c0_100] : memref<20x32xf32, #tpu.memory_space<vmem>>, vector<2x16xf32>
    tpu.vector_store %arg19[%c2, %c0_100], %247 {strides = array<i32>} : memref<20x32xf32, #tpu.memory_space<vmem>>, vector<2x16xf32>,
    %c16_101 = arith.constant 16 : index
    %c16_102 = arith.constant 16 : index
    %308 = vector.load %arg19[%c16_101, %c16_102] : memref<20x32xf32, #tpu.memory_space<vmem>>, vector<2x16xf32>
    tpu.vector_store %arg19[%c16_101, %c16_102], %248 {strides = array<i32>} : memref<20x32xf32, #tpu.memory_space<vmem>>, vector<2x16xf32>,
    %309 = arith.addf %305, %247 : vector<2x16xf32>
    %c2_103 = arith.constant 2 : index
    %c0_104 = arith.constant 0 : index
    %310 = vector.load %arg20[%c2_103, %c0_104] : memref<20x32xf32, #tpu.memory_space<vmem>>, vector<2x16xf32>
    tpu.vector_store %arg20[%c2_103, %c0_104], %309 {strides = array<i32>} : memref<20x32xf32, #tpu.memory_space<vmem>>, vector<2x16xf32>,
    %311 = arith.addf %306, %248 : vector<2x16xf32>
    %c16_105 = arith.constant 16 : index
    %c16_106 = arith.constant 16 : index
    %312 = vector.load %arg20[%c16_105, %c16_106] : memref<20x32xf32, #tpu.memory_space<vmem>>, vector<2x16xf32>
    tpu.vector_store %arg20[%c16_105, %c16_106], %311 {strides = array<i32>} : memref<20x32xf32, #tpu.memory_space<vmem>>, vector<2x16xf32>,
    %313 = tpu.concatenate %247, %248, %305, %306 in 1 : vector<2x16xf32>, vector<2x16xf32>, vector<2x16xf32>, vector<2x16xf32> -> vector<2x64xf32>
    %c0_107 = arith.constant 0 : index
    %c0_108 = arith.constant 0 : index
    %314 = vector.load %arg11[%c0_107, %c0_108] : memref<64x512xf32, #tpu.memory_space<vmem>>, vector<64x512xf32>
    %cst_109 = arith.constant dense<0.000000e+00> : vector<2x512xf32>
    %315 = tpu.matmul %313, %314, %cst_109 {dimension_numbers = #tpu.dot_dimension_numbers<[1], [0], [0], [1], [0, 0, 1, 1], [], []>} : vector<2x64xf32>, vector<64x512xf32>, vector<2x512xf32> -> vector<2x512xf32>
    %316 = vector.extract_strided_slice %70 {offsets = [4, 0], sizes = [2, 128], strides = [1, 1]} : vector<20x256xf32> to vector<2x128xf32>
    %317 = vector.extract_strided_slice %315 {offsets = [0, 0], sizes = [2, 128], strides = [1, 1]} : vector<2x512xf32> to vector<2x128xf32>
    %318 = arith.addf %316, %317 : vector<2x128xf32>
    %319 = arith.negf %318 : vector<2x128xf32>
    %320 = math.exp %319 : vector<2x128xf32>
    %cst_110 = arith.constant 1.000000e+00 : f32
    %321 = vector.broadcast %cst_110 : f32 to vector<2x128xf32>
    %322 = arith.addf %321, %320 : vector<2x128xf32>
    %323 = arith.divf %321, %322 : vector<2x128xf32>
    %324 = vector.extract_strided_slice %323 {offsets = [0, 0], sizes = [2, 32], strides = [1, 1]} : vector<2x128xf32> to vector<2x32xf32>
    %325 = vector.extract_strided_slice %323 {offsets = [0, 32], sizes = [2, 32], strides = [1, 1]} : vector<2x128xf32> to vector<2x32xf32>
    %326 = vector.extract_strided_slice %323 {offsets = [0, 96], sizes = [2, 32], strides = [1, 1]} : vector<2x128xf32> to vector<2x32xf32>
    %327 = vector.extract_strided_slice %318 {offsets = [0, 64], sizes = [2, 32], strides = [1, 1]} : vector<2x128xf32> to vector<2x32xf32>
    %328 = math.tanh %327 : vector<2x32xf32>
    %329 = arith.mulf %324, %328 : vector<2x32xf32>
    %330 = arith.mulf %325, %215 : vector<2x32xf32>
    %331 = arith.addf %329, %330 : vector<2x32xf32>
    %cst_111 = arith.constant -3.000000e+00 : f32
    %cst_112 = arith.constant 3.000000e+00 : f32
    %332 = vector.broadcast %cst_111 : f32 to vector<2x32xf32>
    %333 = arith.maximumf %332, %331 : vector<2x32xf32>
    %334 = vector.broadcast %cst_112 : f32 to vector<2x32xf32>
    %335 = arith.minimumf %334, %333 : vector<2x32xf32>
    %336 = math.tanh %335 : vector<2x32xf32>
    %337 = arith.mulf %326, %336 : vector<2x32xf32>
    %338 = vector.extract_strided_slice %70 {offsets = [14, 128], sizes = [2, 128], strides = [1, 1]} : vector<20x256xf32> to vector<2x128xf32>
    %339 = vector.extract_strided_slice %315 {offsets = [0, 128], sizes = [2, 128], strides = [1, 1]} : vector<2x512xf32> to vector<2x128xf32>
    %340 = arith.addf %338, %339 : vector<2x128xf32>
    %341 = arith.negf %340 : vector<2x128xf32>
    %342 = math.exp %341 : vector<2x128xf32>
    %cst_113 = arith.constant 1.000000e+00 : f32
    %343 = vector.broadcast %cst_113 : f32 to vector<2x128xf32>
    %344 = arith.addf %343, %342 : vector<2x128xf32>
    %345 = arith.divf %343, %344 : vector<2x128xf32>
    %346 = vector.extract_strided_slice %345 {offsets = [0, 0], sizes = [2, 32], strides = [1, 1]} : vector<2x128xf32> to vector<2x32xf32>
    %347 = vector.extract_strided_slice %345 {offsets = [0, 32], sizes = [2, 32], strides = [1, 1]} : vector<2x128xf32> to vector<2x32xf32>
    %348 = vector.extract_strided_slice %345 {offsets = [0, 96], sizes = [2, 32], strides = [1, 1]} : vector<2x128xf32> to vector<2x32xf32>
    %349 = vector.extract_strided_slice %340 {offsets = [0, 64], sizes = [2, 32], strides = [1, 1]} : vector<2x128xf32> to vector<2x32xf32>
    %350 = math.tanh %349 : vector<2x32xf32>
    %351 = arith.mulf %346, %350 : vector<2x32xf32>
    %352 = arith.mulf %347, %237 : vector<2x32xf32>
    %353 = arith.addf %351, %352 : vector<2x32xf32>
    %cst_114 = arith.constant -3.000000e+00 : f32
    %cst_115 = arith.constant 3.000000e+00 : f32
    %354 = vector.broadcast %cst_114 : f32 to vector<2x32xf32>
    %355 = arith.maximumf %354, %353 : vector<2x32xf32>
    %356 = vector.broadcast %cst_115 : f32 to vector<2x32xf32>
    %357 = arith.minimumf %356, %355 : vector<2x32xf32>
    %358 = math.tanh %357 : vector<2x32xf32>
    %359 = arith.mulf %348, %358 : vector<2x32xf32>
    %360 = tpu.concatenate %337, %359 in 1 : vector<2x32xf32>, vector<2x32xf32> -> vector<2x64xf32>
    %c0_116 = arith.constant 0 : index
    %c0_117 = arith.constant 0 : index
    %361 = vector.load %arg12[%c0_116, %c0_117] : memref<64x32xf32, #tpu.memory_space<vmem>>, vector<64x32xf32>
    %cst_118 = arith.constant dense<0.000000e+00> : vector<2x32xf32>
    %362 = tpu.matmul %360, %361, %cst_118 {dimension_numbers = #tpu.dot_dimension_numbers<[1], [0], [0], [1], [0, 0, 1, 1], [], []>} : vector<2x64xf32>, vector<64x32xf32>, vector<2x32xf32> -> vector<2x32xf32>
    %cst_119 = arith.constant -3.000000e+00 : f32
    %cst_120 = arith.constant 3.000000e+00 : f32
    %363 = vector.broadcast %cst_119 : f32 to vector<2x32xf32>
    %364 = arith.maximumf %363, %362 : vector<2x32xf32>
    %365 = vector.broadcast %cst_120 : f32 to vector<2x32xf32>
    %366 = arith.minimumf %365, %364 : vector<2x32xf32>
    %367 = vector.extract_strided_slice %366 {offsets = [0, 0], sizes = [2, 16], strides = [1, 1]} : vector<2x32xf32> to vector<2x16xf32>
    %368 = vector.extract_strided_slice %366 {offsets = [0, 16], sizes = [2, 16], strides = [1, 1]} : vector<2x32xf32> to vector<2x16xf32>
    %c0_121 = arith.constant 0 : index
    %c0_122 = arith.constant 0 : index
    %369 = vector.load %arg13[%c0_121, %c0_122] : memref<32x256xf32, #tpu.memory_space<vmem>>, vector<32x256xf32>
    %cst_123 = arith.constant dense<0.000000e+00> : vector<2x256xf32>
    %370 = tpu.matmul %366, %369, %cst_123 {dimension_numbers = #tpu.dot_dimension_numbers<[1], [0], [0], [1], [0, 0, 1, 1], [], []>} : vector<2x32xf32>, vector<32x256xf32>, vector<2x256xf32> -> vector<2x256xf32>
    %c0_124 = arith.constant 0 : index
    %c0_125 = arith.constant 0 : index
    %371 = vector.load %arg14[%c0_124, %c0_125] : memref<1x256xf32, #tpu.memory_space<vmem>>, vector<1x256xf32>
    %372 = vector.broadcast %371 : vector<1x256xf32> to vector<2x256xf32>
    %373 = arith.addf %370, %372 : vector<2x256xf32>
    %374 = vector.extract_strided_slice %373 {offsets = [0, 0], sizes = [2, 128], strides = [1, 1]} : vector<2x256xf32> to vector<2x128xf32>
    %375 = vector.extract_strided_slice %315 {offsets = [0, 256], sizes = [2, 128], strides = [1, 1]} : vector<2x512xf32> to vector<2x128xf32>
    %376 = arith.addf %374, %375 : vector<2x128xf32>
    %377 = arith.negf %376 : vector<2x128xf32>
    %378 = math.exp %377 : vector<2x128xf32>
    %cst_126 = arith.constant 1.000000e+00 : f32
    %379 = vector.broadcast %cst_126 : f32 to vector<2x128xf32>
    %380 = arith.addf %379, %378 : vector<2x128xf32>
    %381 = arith.divf %379, %380 : vector<2x128xf32>
    %382 = vector.extract_strided_slice %381 {offsets = [0, 0], sizes = [2, 32], strides = [1, 1]} : vector<2x128xf32> to vector<2x32xf32>
    %383 = vector.extract_strided_slice %381 {offsets = [0, 32], sizes = [2, 32], strides = [1, 1]} : vector<2x128xf32> to vector<2x32xf32>
    %384 = vector.extract_strided_slice %381 {offsets = [0, 96], sizes = [2, 32], strides = [1, 1]} : vector<2x128xf32> to vector<2x32xf32>
    %385 = vector.extract_strided_slice %376 {offsets = [0, 64], sizes = [2, 32], strides = [1, 1]} : vector<2x128xf32> to vector<2x32xf32>
    %386 = math.tanh %385 : vector<2x32xf32>
    %387 = arith.mulf %382, %386 : vector<2x32xf32>
    %388 = arith.mulf %383, %273 : vector<2x32xf32>
    %389 = arith.addf %387, %388 : vector<2x32xf32>
    %cst_127 = arith.constant -3.000000e+00 : f32
    %cst_128 = arith.constant 3.000000e+00 : f32
    %390 = vector.broadcast %cst_127 : f32 to vector<2x32xf32>
    %391 = arith.maximumf %390, %389 : vector<2x32xf32>
    %392 = vector.broadcast %cst_128 : f32 to vector<2x32xf32>
    %393 = arith.minimumf %392, %391 : vector<2x32xf32>
    %394 = math.tanh %393 : vector<2x32xf32>
    %395 = arith.mulf %384, %394 : vector<2x32xf32>
    %396 = vector.extract_strided_slice %373 {offsets = [0, 128], sizes = [2, 128], strides = [1, 1]} : vector<2x256xf32> to vector<2x128xf32>
    %397 = vector.extract_strided_slice %315 {offsets = [0, 384], sizes = [2, 128], strides = [1, 1]} : vector<2x512xf32> to vector<2x128xf32>
    %398 = arith.addf %396, %397 : vector<2x128xf32>
    %399 = arith.negf %398 : vector<2x128xf32>
    %400 = math.exp %399 : vector<2x128xf32>
    %cst_129 = arith.constant 1.000000e+00 : f32
    %401 = vector.broadcast %cst_129 : f32 to vector<2x128xf32>
    %402 = arith.addf %401, %400 : vector<2x128xf32>
    %403 = arith.divf %401, %402 : vector<2x128xf32>
    %404 = vector.extract_strided_slice %403 {offsets = [0, 0], sizes = [2, 32], strides = [1, 1]} : vector<2x128xf32> to vector<2x32xf32>
    %405 = vector.extract_strided_slice %403 {offsets = [0, 32], sizes = [2, 32], strides = [1, 1]} : vector<2x128xf32> to vector<2x32xf32>
    %406 = vector.extract_strided_slice %403 {offsets = [0, 96], sizes = [2, 32], strides = [1, 1]} : vector<2x128xf32> to vector<2x32xf32>
    %407 = vector.extract_strided_slice %398 {offsets = [0, 64], sizes = [2, 32], strides = [1, 1]} : vector<2x128xf32> to vector<2x32xf32>
    %408 = math.tanh %407 : vector<2x32xf32>
    %409 = arith.mulf %404, %408 : vector<2x32xf32>
    %410 = arith.mulf %405, %295 : vector<2x32xf32>
    %411 = arith.addf %409, %410 : vector<2x32xf32>
    %cst_130 = arith.constant -3.000000e+00 : f32
    %cst_131 = arith.constant 3.000000e+00 : f32
    %412 = vector.broadcast %cst_130 : f32 to vector<2x32xf32>
    %413 = arith.maximumf %412, %411 : vector<2x32xf32>
    %414 = vector.broadcast %cst_131 : f32 to vector<2x32xf32>
    %415 = arith.minimumf %414, %413 : vector<2x32xf32>
    %416 = math.tanh %415 : vector<2x32xf32>
    %417 = arith.mulf %406, %416 : vector<2x32xf32>
    %418 = tpu.concatenate %395, %417 in 1 : vector<2x32xf32>, vector<2x32xf32> -> vector<2x64xf32>
    %c0_132 = arith.constant 0 : index
    %c0_133 = arith.constant 0 : index
    %419 = vector.load %arg15[%c0_132, %c0_133] : memref<64x32xf32, #tpu.memory_space<vmem>>, vector<64x32xf32>
    %cst_134 = arith.constant dense<0.000000e+00> : vector<2x32xf32>
    %420 = tpu.matmul %418, %419, %cst_134 {dimension_numbers = #tpu.dot_dimension_numbers<[1], [0], [0], [1], [0, 0, 1, 1], [], []>} : vector<2x64xf32>, vector<64x32xf32>, vector<2x32xf32> -> vector<2x32xf32>
    %cst_135 = arith.constant -3.000000e+00 : f32
    %cst_136 = arith.constant 3.000000e+00 : f32
    %421 = vector.broadcast %cst_135 : f32 to vector<2x32xf32>
    %422 = arith.maximumf %421, %420 : vector<2x32xf32>
    %423 = vector.broadcast %cst_136 : f32 to vector<2x32xf32>
    %424 = arith.minimumf %423, %422 : vector<2x32xf32>
    %425 = vector.extract_strided_slice %424 {offsets = [0, 0], sizes = [2, 16], strides = [1, 1]} : vector<2x32xf32> to vector<2x16xf32>
    %426 = vector.extract_strided_slice %424 {offsets = [0, 16], sizes = [2, 16], strides = [1, 1]} : vector<2x32xf32> to vector<2x16xf32>
    %c4 = arith.constant 4 : index
    %c0_137 = arith.constant 0 : index
    %427 = vector.load %arg19[%c4, %c0_137] : memref<20x32xf32, #tpu.memory_space<vmem>>, vector<2x16xf32>
    tpu.vector_store %arg19[%c4, %c0_137], %367 {strides = array<i32>} : memref<20x32xf32, #tpu.memory_space<vmem>>, vector<2x16xf32>,
    %c14 = arith.constant 14 : index
    %c16_138 = arith.constant 16 : index
    %428 = vector.load %arg19[%c14, %c16_138] : memref<20x32xf32, #tpu.memory_space<vmem>>, vector<2x16xf32>
    tpu.vector_store %arg19[%c14, %c16_138], %368 {strides = array<i32>} : memref<20x32xf32, #tpu.memory_space<vmem>>, vector<2x16xf32>,
    %429 = arith.addf %425, %367 : vector<2x16xf32>
    %c4_139 = arith.constant 4 : index
    %c0_140 = arith.constant 0 : index
    %430 = vector.load %arg20[%c4_139, %c0_140] : memref<20x32xf32, #tpu.memory_space<vmem>>, vector<2x16xf32>
    tpu.vector_store %arg20[%c4_139, %c0_140], %429 {strides = array<i32>} : memref<20x32xf32, #tpu.memory_space<vmem>>, vector<2x16xf32>,
    %431 = arith.addf %426, %368 : vector<2x16xf32>
    %c14_141 = arith.constant 14 : index
    %c16_142 = arith.constant 16 : index
    %432 = vector.load %arg20[%c14_141, %c16_142] : memref<20x32xf32, #tpu.memory_space<vmem>>, vector<2x16xf32>
    tpu.vector_store %arg20[%c14_141, %c16_142], %431 {strides = array<i32>} : memref<20x32xf32, #tpu.memory_space<vmem>>, vector<2x16xf32>,
    %433 = tpu.concatenate %367, %368, %425, %426 in 1 : vector<2x16xf32>, vector<2x16xf32>, vector<2x16xf32>, vector<2x16xf32> -> vector<2x64xf32>
    %c0_143 = arith.constant 0 : index
    %c0_144 = arith.constant 0 : index
    %434 = vector.load %arg11[%c0_143, %c0_144] : memref<64x512xf32, #tpu.memory_space<vmem>>, vector<64x512xf32>
    %cst_145 = arith.constant dense<0.000000e+00> : vector<2x512xf32>
    %435 = tpu.matmul %433, %434, %cst_145 {dimension_numbers = #tpu.dot_dimension_numbers<[1], [0], [0], [1], [0, 0, 1, 1], [], []>} : vector<2x64xf32>, vector<64x512xf32>, vector<2x512xf32> -> vector<2x512xf32>
    %436 = vector.extract_strided_slice %70 {offsets = [6, 0], sizes = [2, 128], strides = [1, 1]} : vector<20x256xf32> to vector<2x128xf32>
    %437 = vector.extract_strided_slice %435 {offsets = [0, 0], sizes = [2, 128], strides = [1, 1]} : vector<2x512xf32> to vector<2x128xf32>
    %438 = arith.addf %436, %437 : vector<2x128xf32>
    %439 = arith.negf %438 : vector<2x128xf32>
    %440 = math.exp %439 : vector<2x128xf32>
    %cst_146 = arith.constant 1.000000e+00 : f32
    %441 = vector.broadcast %cst_146 : f32 to vector<2x128xf32>
    %442 = arith.addf %441, %440 : vector<2x128xf32>
    %443 = arith.divf %441, %442 : vector<2x128xf32>
    %444 = vector.extract_strided_slice %443 {offsets = [0, 0], sizes = [2, 32], strides = [1, 1]} : vector<2x128xf32> to vector<2x32xf32>
    %445 = vector.extract_strided_slice %443 {offsets = [0, 32], sizes = [2, 32], strides = [1, 1]} : vector<2x128xf32> to vector<2x32xf32>
    %446 = vector.extract_strided_slice %443 {offsets = [0, 96], sizes = [2, 32], strides = [1, 1]} : vector<2x128xf32> to vector<2x32xf32>
    %447 = vector.extract_strided_slice %438 {offsets = [0, 64], sizes = [2, 32], strides = [1, 1]} : vector<2x128xf32> to vector<2x32xf32>
    %448 = math.tanh %447 : vector<2x32xf32>
    %449 = arith.mulf %444, %448 : vector<2x32xf32>
    %450 = arith.mulf %445, %335 : vector<2x32xf32>
    %451 = arith.addf %449, %450 : vector<2x32xf32>
    %cst_147 = arith.constant -3.000000e+00 : f32
    %cst_148 = arith.constant 3.000000e+00 : f32
    %452 = vector.broadcast %cst_147 : f32 to vector<2x32xf32>
    %453 = arith.maximumf %452, %451 : vector<2x32xf32>
    %454 = vector.broadcast %cst_148 : f32 to vector<2x32xf32>
    %455 = arith.minimumf %454, %453 : vector<2x32xf32>
    %456 = math.tanh %455 : vector<2x32xf32>
    %457 = arith.mulf %446, %456 : vector<2x32xf32>
    %458 = vector.extract_strided_slice %70 {offsets = [12, 128], sizes = [2, 128], strides = [1, 1]} : vector<20x256xf32> to vector<2x128xf32>
    %459 = vector.extract_strided_slice %435 {offsets = [0, 128], sizes = [2, 128], strides = [1, 1]} : vector<2x512xf32> to vector<2x128xf32>
    %460 = arith.addf %458, %459 : vector<2x128xf32>
    %461 = arith.negf %460 : vector<2x128xf32>
    %462 = math.exp %461 : vector<2x128xf32>
    %cst_149 = arith.constant 1.000000e+00 : f32
    %463 = vector.broadcast %cst_149 : f32 to vector<2x128xf32>
    %464 = arith.addf %463, %462 : vector<2x128xf32>
    %465 = arith.divf %463, %464 : vector<2x128xf32>
    %466 = vector.extract_strided_slice %465 {offsets = [0, 0], sizes = [2, 32], strides = [1, 1]} : vector<2x128xf32> to vector<2x32xf32>
    %467 = vector.extract_strided_slice %465 {offsets = [0, 32], sizes = [2, 32], strides = [1, 1]} : vector<2x128xf32> to vector<2x32xf32>
    %468 = vector.extract_strided_slice %465 {offsets = [0, 96], sizes = [2, 32], strides = [1, 1]} : vector<2x128xf32> to vector<2x32xf32>
    %469 = vector.extract_strided_slice %460 {offsets = [0, 64], sizes = [2, 32], strides = [1, 1]} : vector<2x128xf32> to vector<2x32xf32>
    %470 = math.tanh %469 : vector<2x32xf32>
    %471 = arith.mulf %466, %470 : vector<2x32xf32>
    %472 = arith.mulf %467, %357 : vector<2x32xf32>
    %473 = arith.addf %471, %472 : vector<2x32xf32>
    %cst_150 = arith.constant -3.000000e+00 : f32
    %cst_151 = arith.constant 3.000000e+00 : f32
    %474 = vector.broadcast %cst_150 : f32 to vector<2x32xf32>
    %475 = arith.maximumf %474, %473 : vector<2x32xf32>
    %476 = vector.broadcast %cst_151 : f32 to vector<2x32xf32>
    %477 = arith.minimumf %476, %475 : vector<2x32xf32>
    %478 = math.tanh %477 : vector<2x32xf32>
    %479 = arith.mulf %468, %478 : vector<2x32xf32>
    %480 = tpu.concatenate %457, %479 in 1 : vector<2x32xf32>, vector<2x32xf32> -> vector<2x64xf32>
    %c0_152 = arith.constant 0 : index
    %c0_153 = arith.constant 0 : index
    %481 = vector.load %arg12[%c0_152, %c0_153] : memref<64x32xf32, #tpu.memory_space<vmem>>, vector<64x32xf32>
    %cst_154 = arith.constant dense<0.000000e+00> : vector<2x32xf32>
    %482 = tpu.matmul %480, %481, %cst_154 {dimension_numbers = #tpu.dot_dimension_numbers<[1], [0], [0], [1], [0, 0, 1, 1], [], []>} : vector<2x64xf32>, vector<64x32xf32>, vector<2x32xf32> -> vector<2x32xf32>
    %cst_155 = arith.constant -3.000000e+00 : f32
    %cst_156 = arith.constant 3.000000e+00 : f32
    %483 = vector.broadcast %cst_155 : f32 to vector<2x32xf32>
    %484 = arith.maximumf %483, %482 : vector<2x32xf32>
    %485 = vector.broadcast %cst_156 : f32 to vector<2x32xf32>
    %486 = arith.minimumf %485, %484 : vector<2x32xf32>
    %487 = vector.extract_strided_slice %486 {offsets = [0, 0], sizes = [2, 16], strides = [1, 1]} : vector<2x32xf32> to vector<2x16xf32>
    %488 = vector.extract_strided_slice %486 {offsets = [0, 16], sizes = [2, 16], strides = [1, 1]} : vector<2x32xf32> to vector<2x16xf32>
    %c0_157 = arith.constant 0 : index
    %c0_158 = arith.constant 0 : index
    %489 = vector.load %arg13[%c0_157, %c0_158] : memref<32x256xf32, #tpu.memory_space<vmem>>, vector<32x256xf32>
    %cst_159 = arith.constant dense<0.000000e+00> : vector<2x256xf32>
    %490 = tpu.matmul %486, %489, %cst_159 {dimension_numbers = #tpu.dot_dimension_numbers<[1], [0], [0], [1], [0, 0, 1, 1], [], []>} : vector<2x32xf32>, vector<32x256xf32>, vector<2x256xf32> -> vector<2x256xf32>
    %c0_160 = arith.constant 0 : index
    %c0_161 = arith.constant 0 : index
    %491 = vector.load %arg14[%c0_160, %c0_161] : memref<1x256xf32, #tpu.memory_space<vmem>>, vector<1x256xf32>
    %492 = vector.broadcast %491 : vector<1x256xf32> to vector<2x256xf32>
    %493 = arith.addf %490, %492 : vector<2x256xf32>
    %494 = vector.extract_strided_slice %493 {offsets = [0, 0], sizes = [2, 128], strides = [1, 1]} : vector<2x256xf32> to vector<2x128xf32>
    %495 = vector.extract_strided_slice %435 {offsets = [0, 256], sizes = [2, 128], strides = [1, 1]} : vector<2x512xf32> to vector<2x128xf32>
    %496 = arith.addf %494, %495 : vector<2x128xf32>
    %497 = arith.negf %496 : vector<2x128xf32>
    %498 = math.exp %497 : vector<2x128xf32>
    %cst_162 = arith.constant 1.000000e+00 : f32
    %499 = vector.broadcast %cst_162 : f32 to vector<2x128xf32>
    %500 = arith.addf %499, %498 : vector<2x128xf32>
    %501 = arith.divf %499, %500 : vector<2x128xf32>
    %502 = vector.extract_strided_slice %501 {offsets = [0, 0], sizes = [2, 32], strides = [1, 1]} : vector<2x128xf32> to vector<2x32xf32>
    %503 = vector.extract_strided_slice %501 {offsets = [0, 32], sizes = [2, 32], strides = [1, 1]} : vector<2x128xf32> to vector<2x32xf32>
    %504 = vector.extract_strided_slice %501 {offsets = [0, 96], sizes = [2, 32], strides = [1, 1]} : vector<2x128xf32> to vector<2x32xf32>
    %505 = vector.extract_strided_slice %496 {offsets = [0, 64], sizes = [2, 32], strides = [1, 1]} : vector<2x128xf32> to vector<2x32xf32>
    %506 = math.tanh %505 : vector<2x32xf32>
    %507 = arith.mulf %502, %506 : vector<2x32xf32>
    %508 = arith.mulf %503, %393 : vector<2x32xf32>
    %509 = arith.addf %507, %508 : vector<2x32xf32>
    %cst_163 = arith.constant -3.000000e+00 : f32
    %cst_164 = arith.constant 3.000000e+00 : f32
    %510 = vector.broadcast %cst_163 : f32 to vector<2x32xf32>
    %511 = arith.maximumf %510, %509 : vector<2x32xf32>
    %512 = vector.broadcast %cst_164 : f32 to vector<2x32xf32>
    %513 = arith.minimumf %512, %511 : vector<2x32xf32>
    %514 = math.tanh %513 : vector<2x32xf32>
    %515 = arith.mulf %504, %514 : vector<2x32xf32>
    %516 = vector.extract_strided_slice %493 {offsets = [0, 128], sizes = [2, 128], strides = [1, 1]} : vector<2x256xf32> to vector<2x128xf32>
    %517 = vector.extract_strided_slice %435 {offsets = [0, 384], sizes = [2, 128], strides = [1, 1]} : vector<2x512xf32> to vector<2x128xf32>
    %518 = arith.addf %516, %517 : vector<2x128xf32>
    %519 = arith.negf %518 : vector<2x128xf32>
    %520 = math.exp %519 : vector<2x128xf32>
    %cst_165 = arith.constant 1.000000e+00 : f32
    %521 = vector.broadcast %cst_165 : f32 to vector<2x128xf32>
    %522 = arith.addf %521, %520 : vector<2x128xf32>
    %523 = arith.divf %521, %522 : vector<2x128xf32>
    %524 = vector.extract_strided_slice %523 {offsets = [0, 0], sizes = [2, 32], strides = [1, 1]} : vector<2x128xf32> to vector<2x32xf32>
    %525 = vector.extract_strided_slice %523 {offsets = [0, 32], sizes = [2, 32], strides = [1, 1]} : vector<2x128xf32> to vector<2x32xf32>
    %526 = vector.extract_strided_slice %523 {offsets = [0, 96], sizes = [2, 32], strides = [1, 1]} : vector<2x128xf32> to vector<2x32xf32>
    %527 = vector.extract_strided_slice %518 {offsets = [0, 64], sizes = [2, 32], strides = [1, 1]} : vector<2x128xf32> to vector<2x32xf32>
    %528 = math.tanh %527 : vector<2x32xf32>
    %529 = arith.mulf %524, %528 : vector<2x32xf32>
    %530 = arith.mulf %525, %415 : vector<2x32xf32>
    %531 = arith.addf %529, %530 : vector<2x32xf32>
    %cst_166 = arith.constant -3.000000e+00 : f32
    %cst_167 = arith.constant 3.000000e+00 : f32
    %532 = vector.broadcast %cst_166 : f32 to vector<2x32xf32>
    %533 = arith.maximumf %532, %531 : vector<2x32xf32>
    %534 = vector.broadcast %cst_167 : f32 to vector<2x32xf32>
    %535 = arith.minimumf %534, %533 : vector<2x32xf32>
    %536 = math.tanh %535 : vector<2x32xf32>
    %537 = arith.mulf %526, %536 : vector<2x32xf32>
    %538 = tpu.concatenate %515, %537 in 1 : vector<2x32xf32>, vector<2x32xf32> -> vector<2x64xf32>
    %c0_168 = arith.constant 0 : index
    %c0_169 = arith.constant 0 : index
    %539 = vector.load %arg15[%c0_168, %c0_169] : memref<64x32xf32, #tpu.memory_space<vmem>>, vector<64x32xf32>
    %cst_170 = arith.constant dense<0.000000e+00> : vector<2x32xf32>
    %540 = tpu.matmul %538, %539, %cst_170 {dimension_numbers = #tpu.dot_dimension_numbers<[1], [0], [0], [1], [0, 0, 1, 1], [], []>} : vector<2x64xf32>, vector<64x32xf32>, vector<2x32xf32> -> vector<2x32xf32>
    %cst_171 = arith.constant -3.000000e+00 : f32
    %cst_172 = arith.constant 3.000000e+00 : f32
    %541 = vector.broadcast %cst_171 : f32 to vector<2x32xf32>
    %542 = arith.maximumf %541, %540 : vector<2x32xf32>
    %543 = vector.broadcast %cst_172 : f32 to vector<2x32xf32>
    %544 = arith.minimumf %543, %542 : vector<2x32xf32>
    %545 = vector.extract_strided_slice %544 {offsets = [0, 0], sizes = [2, 16], strides = [1, 1]} : vector<2x32xf32> to vector<2x16xf32>
    %546 = vector.extract_strided_slice %544 {offsets = [0, 16], sizes = [2, 16], strides = [1, 1]} : vector<2x32xf32> to vector<2x16xf32>
    %c6 = arith.constant 6 : index
    %c0_173 = arith.constant 0 : index
    %547 = vector.load %arg19[%c6, %c0_173] : memref<20x32xf32, #tpu.memory_space<vmem>>, vector<2x16xf32>
    tpu.vector_store %arg19[%c6, %c0_173], %487 {strides = array<i32>} : memref<20x32xf32, #tpu.memory_space<vmem>>, vector<2x16xf32>,
    %c12 = arith.constant 12 : index
    %c16_174 = arith.constant 16 : index
    %548 = vector.load %arg19[%c12, %c16_174] : memref<20x32xf32, #tpu.memory_space<vmem>>, vector<2x16xf32>
    tpu.vector_store %arg19[%c12, %c16_174], %488 {strides = array<i32>} : memref<20x32xf32, #tpu.memory_space<vmem>>, vector<2x16xf32>,
    %549 = arith.addf %545, %487 : vector<2x16xf32>
    %c6_175 = arith.constant 6 : index
    %c0_176 = arith.constant 0 : index
    %550 = vector.load %arg20[%c6_175, %c0_176] : memref<20x32xf32, #tpu.memory_space<vmem>>, vector<2x16xf32>
    tpu.vector_store %arg20[%c6_175, %c0_176], %549 {strides = array<i32>} : memref<20x32xf32, #tpu.memory_space<vmem>>, vector<2x16xf32>,
    %551 = arith.addf %546, %488 : vector<2x16xf32>
    %c12_177 = arith.constant 12 : index
    %c16_178 = arith.constant 16 : index
    %552 = vector.load %arg20[%c12_177, %c16_178] : memref<20x32xf32, #tpu.memory_space<vmem>>, vector<2x16xf32>
    tpu.vector_store %arg20[%c12_177, %c16_178], %551 {strides = array<i32>} : memref<20x32xf32, #tpu.memory_space<vmem>>, vector<2x16xf32>,
    %553 = tpu.concatenate %487, %488, %545, %546 in 1 : vector<2x16xf32>, vector<2x16xf32>, vector<2x16xf32>, vector<2x16xf32> -> vector<2x64xf32>
    %c0_179 = arith.constant 0 : index
    %c0_180 = arith.constant 0 : index
    %554 = vector.load %arg11[%c0_179, %c0_180] : memref<64x512xf32, #tpu.memory_space<vmem>>, vector<64x512xf32>
    %cst_181 = arith.constant dense<0.000000e+00> : vector<2x512xf32>
    %555 = tpu.matmul %553, %554, %cst_181 {dimension_numbers = #tpu.dot_dimension_numbers<[1], [0], [0], [1], [0, 0, 1, 1], [], []>} : vector<2x64xf32>, vector<64x512xf32>, vector<2x512xf32> -> vector<2x512xf32>
    %556 = vector.extract_strided_slice %70 {offsets = [8, 0], sizes = [2, 128], strides = [1, 1]} : vector<20x256xf32> to vector<2x128xf32>
    %557 = vector.extract_strided_slice %555 {offsets = [0, 0], sizes = [2, 128], strides = [1, 1]} : vector<2x512xf32> to vector<2x128xf32>
    %558 = arith.addf %556, %557 : vector<2x128xf32>
    %559 = arith.negf %558 : vector<2x128xf32>
    %560 = math.exp %559 : vector<2x128xf32>
    %cst_182 = arith.constant 1.000000e+00 : f32
    %561 = vector.broadcast %cst_182 : f32 to vector<2x128xf32>
    %562 = arith.addf %561, %560 : vector<2x128xf32>
    %563 = arith.divf %561, %562 : vector<2x128xf32>
    %564 = vector.extract_strided_slice %563 {offsets = [0, 0], sizes = [2, 32], strides = [1, 1]} : vector<2x128xf32> to vector<2x32xf32>
    %565 = vector.extract_strided_slice %563 {offsets = [0, 32], sizes = [2, 32], strides = [1, 1]} : vector<2x128xf32> to vector<2x32xf32>
    %566 = vector.extract_strided_slice %563 {offsets = [0, 96], sizes = [2, 32], strides = [1, 1]} : vector<2x128xf32> to vector<2x32xf32>
    %567 = vector.extract_strided_slice %558 {offsets = [0, 64], sizes = [2, 32], strides = [1, 1]} : vector<2x128xf32> to vector<2x32xf32>
    %568 = math.tanh %567 : vector<2x32xf32>
    %569 = arith.mulf %564, %568 : vector<2x32xf32>
    %570 = arith.mulf %565, %455 : vector<2x32xf32>
    %571 = arith.addf %569, %570 : vector<2x32xf32>
    %cst_183 = arith.constant -3.000000e+00 : f32
    %cst_184 = arith.constant 3.000000e+00 : f32
    %572 = vector.broadcast %cst_183 : f32 to vector<2x32xf32>
    %573 = arith.maximumf %572, %571 : vector<2x32xf32>
    %574 = vector.broadcast %cst_184 : f32 to vector<2x32xf32>
    %575 = arith.minimumf %574, %573 : vector<2x32xf32>
    %576 = math.tanh %575 : vector<2x32xf32>
    %577 = arith.mulf %566, %576 : vector<2x32xf32>
    %578 = vector.extract_strided_slice %70 {offsets = [10, 128], sizes = [2, 128], strides = [1, 1]} : vector<20x256xf32> to vector<2x128xf32>
    %579 = vector.extract_strided_slice %555 {offsets = [0, 128], sizes = [2, 128], strides = [1, 1]} : vector<2x512xf32> to vector<2x128xf32>
    %580 = arith.addf %578, %579 : vector<2x128xf32>
    %581 = arith.negf %580 : vector<2x128xf32>
    %582 = math.exp %581 : vector<2x128xf32>
    %cst_185 = arith.constant 1.000000e+00 : f32
    %583 = vector.broadcast %cst_185 : f32 to vector<2x128xf32>
    %584 = arith.addf %583, %582 : vector<2x128xf32>
    %585 = arith.divf %583, %584 : vector<2x128xf32>
    %586 = vector.extract_strided_slice %585 {offsets = [0, 0], sizes = [2, 32], strides = [1, 1]} : vector<2x128xf32> to vector<2x32xf32>
    %587 = vector.extract_strided_slice %585 {offsets = [0, 32], sizes = [2, 32], strides = [1, 1]} : vector<2x128xf32> to vector<2x32xf32>
    %588 = vector.extract_strided_slice %585 {offsets = [0, 96], sizes = [2, 32], strides = [1, 1]} : vector<2x128xf32> to vector<2x32xf32>
    %589 = vector.extract_strided_slice %580 {offsets = [0, 64], sizes = [2, 32], strides = [1, 1]} : vector<2x128xf32> to vector<2x32xf32>
    %590 = math.tanh %589 : vector<2x32xf32>
    %591 = arith.mulf %586, %590 : vector<2x32xf32>
    %592 = arith.mulf %587, %477 : vector<2x32xf32>
    %593 = arith.addf %591, %592 : vector<2x32xf32>
    %cst_186 = arith.constant -3.000000e+00 : f32
    %cst_187 = arith.constant 3.000000e+00 : f32
    %594 = vector.broadcast %cst_186 : f32 to vector<2x32xf32>
    %595 = arith.maximumf %594, %593 : vector<2x32xf32>
    %596 = vector.broadcast %cst_187 : f32 to vector<2x32xf32>
    %597 = arith.minimumf %596, %595 : vector<2x32xf32>
    %598 = math.tanh %597 : vector<2x32xf32>
    %599 = arith.mulf %588, %598 : vector<2x32xf32>
    %600 = tpu.concatenate %577, %599 in 1 : vector<2x32xf32>, vector<2x32xf32> -> vector<2x64xf32>
    %c0_188 = arith.constant 0 : index
    %c0_189 = arith.constant 0 : index
    %601 = vector.load %arg12[%c0_188, %c0_189] : memref<64x32xf32, #tpu.memory_space<vmem>>, vector<64x32xf32>
    %cst_190 = arith.constant dense<0.000000e+00> : vector<2x32xf32>
    %602 = tpu.matmul %600, %601, %cst_190 {dimension_numbers = #tpu.dot_dimension_numbers<[1], [0], [0], [1], [0, 0, 1, 1], [], []>} : vector<2x64xf32>, vector<64x32xf32>, vector<2x32xf32> -> vector<2x32xf32>
    %cst_191 = arith.constant -3.000000e+00 : f32
    %cst_192 = arith.constant 3.000000e+00 : f32
    %603 = vector.broadcast %cst_191 : f32 to vector<2x32xf32>
    %604 = arith.maximumf %603, %602 : vector<2x32xf32>
    %605 = vector.broadcast %cst_192 : f32 to vector<2x32xf32>
    %606 = arith.minimumf %605, %604 : vector<2x32xf32>
    %607 = vector.extract_strided_slice %606 {offsets = [0, 0], sizes = [2, 16], strides = [1, 1]} : vector<2x32xf32> to vector<2x16xf32>
    %608 = vector.extract_strided_slice %606 {offsets = [0, 16], sizes = [2, 16], strides = [1, 1]} : vector<2x32xf32> to vector<2x16xf32>
    %c0_193 = arith.constant 0 : index
    %c0_194 = arith.constant 0 : index
    %609 = vector.load %arg13[%c0_193, %c0_194] : memref<32x256xf32, #tpu.memory_space<vmem>>, vector<32x256xf32>
    %cst_195 = arith.constant dense<0.000000e+00> : vector<2x256xf32>
    %610 = tpu.matmul %606, %609, %cst_195 {dimension_numbers = #tpu.dot_dimension_numbers<[1], [0], [0], [1], [0, 0, 1, 1], [], []>} : vector<2x32xf32>, vector<32x256xf32>, vector<2x256xf32> -> vector<2x256xf32>
    %c0_196 = arith.constant 0 : index
    %c0_197 = arith.constant 0 : index
    %611 = vector.load %arg14[%c0_196, %c0_197] : memref<1x256xf32, #tpu.memory_space<vmem>>, vector<1x256xf32>
    %612 = vector.broadcast %611 : vector<1x256xf32> to vector<2x256xf32>
    %613 = arith.addf %610, %612 : vector<2x256xf32>
    %614 = vector.extract_strided_slice %613 {offsets = [0, 0], sizes = [2, 128], strides = [1, 1]} : vector<2x256xf32> to vector<2x128xf32>
    %615 = vector.extract_strided_slice %555 {offsets = [0, 256], sizes = [2, 128], strides = [1, 1]} : vector<2x512xf32> to vector<2x128xf32>
    %616 = arith.addf %614, %615 : vector<2x128xf32>
    %617 = arith.negf %616 : vector<2x128xf32>
    %618 = math.exp %617 : vector<2x128xf32>
    %cst_198 = arith.constant 1.000000e+00 : f32
    %619 = vector.broadcast %cst_198 : f32 to vector<2x128xf32>
    %620 = arith.addf %619, %618 : vector<2x128xf32>
    %621 = arith.divf %619, %620 : vector<2x128xf32>
    %622 = vector.extract_strided_slice %621 {offsets = [0, 0], sizes = [2, 32], strides = [1, 1]} : vector<2x128xf32> to vector<2x32xf32>
    %623 = vector.extract_strided_slice %621 {offsets = [0, 32], sizes = [2, 32], strides = [1, 1]} : vector<2x128xf32> to vector<2x32xf32>
    %624 = vector.extract_strided_slice %621 {offsets = [0, 96], sizes = [2, 32], strides = [1, 1]} : vector<2x128xf32> to vector<2x32xf32>
    %625 = vector.extract_strided_slice %616 {offsets = [0, 64], sizes = [2, 32], strides = [1, 1]} : vector<2x128xf32> to vector<2x32xf32>
    %626 = math.tanh %625 : vector<2x32xf32>
    %627 = arith.mulf %622, %626 : vector<2x32xf32>
    %628 = arith.mulf %623, %513 : vector<2x32xf32>
    %629 = arith.addf %627, %628 : vector<2x32xf32>
    %cst_199 = arith.constant -3.000000e+00 : f32
    %cst_200 = arith.constant 3.000000e+00 : f32
    %630 = vector.broadcast %cst_199 : f32 to vector<2x32xf32>
    %631 = arith.maximumf %630, %629 : vector<2x32xf32>
    %632 = vector.broadcast %cst_200 : f32 to vector<2x32xf32>
    %633 = arith.minimumf %632, %631 : vector<2x32xf32>
    %634 = math.tanh %633 : vector<2x32xf32>
    %635 = arith.mulf %624, %634 : vector<2x32xf32>
    %636 = vector.extract_strided_slice %613 {offsets = [0, 128], sizes = [2, 128], strides = [1, 1]} : vector<2x256xf32> to vector<2x128xf32>
    %637 = vector.extract_strided_slice %555 {offsets = [0, 384], sizes = [2, 128], strides = [1, 1]} : vector<2x512xf32> to vector<2x128xf32>
    %638 = arith.addf %636, %637 : vector<2x128xf32>
    %639 = arith.negf %638 : vector<2x128xf32>
    %640 = math.exp %639 : vector<2x128xf32>
    %cst_201 = arith.constant 1.000000e+00 : f32
    %641 = vector.broadcast %cst_201 : f32 to vector<2x128xf32>
    %642 = arith.addf %641, %640 : vector<2x128xf32>
    %643 = arith.divf %641, %642 : vector<2x128xf32>
    %644 = vector.extract_strided_slice %643 {offsets = [0, 0], sizes = [2, 32], strides = [1, 1]} : vector<2x128xf32> to vector<2x32xf32>
    %645 = vector.extract_strided_slice %643 {offsets = [0, 32], sizes = [2, 32], strides = [1, 1]} : vector<2x128xf32> to vector<2x32xf32>
    %646 = vector.extract_strided_slice %643 {offsets = [0, 96], sizes = [2, 32], strides = [1, 1]} : vector<2x128xf32> to vector<2x32xf32>
    %647 = vector.extract_strided_slice %638 {offsets = [0, 64], sizes = [2, 32], strides = [1, 1]} : vector<2x128xf32> to vector<2x32xf32>
    %648 = math.tanh %647 : vector<2x32xf32>
    %649 = arith.mulf %644, %648 : vector<2x32xf32>
    %650 = arith.mulf %645, %535 : vector<2x32xf32>
    %651 = arith.addf %649, %650 : vector<2x32xf32>
    %cst_202 = arith.constant -3.000000e+00 : f32
    %cst_203 = arith.constant 3.000000e+00 : f32
    %652 = vector.broadcast %cst_202 : f32 to vector<2x32xf32>
    %653 = arith.maximumf %652, %651 : vector<2x32xf32>
    %654 = vector.broadcast %cst_203 : f32 to vector<2x32xf32>
    %655 = arith.minimumf %654, %653 : vector<2x32xf32>
    %656 = math.tanh %655 : vector<2x32xf32>
    %657 = arith.mulf %646, %656 : vector<2x32xf32>
    %658 = tpu.concatenate %635, %657 in 1 : vector<2x32xf32>, vector<2x32xf32> -> vector<2x64xf32>
    %c0_204 = arith.constant 0 : index
    %c0_205 = arith.constant 0 : index
    %659 = vector.load %arg15[%c0_204, %c0_205] : memref<64x32xf32, #tpu.memory_space<vmem>>, vector<64x32xf32>
    %cst_206 = arith.constant dense<0.000000e+00> : vector<2x32xf32>
    %660 = tpu.matmul %658, %659, %cst_206 {dimension_numbers = #tpu.dot_dimension_numbers<[1], [0], [0], [1], [0, 0, 1, 1], [], []>} : vector<2x64xf32>, vector<64x32xf32>, vector<2x32xf32> -> vector<2x32xf32>
    %cst_207 = arith.constant -3.000000e+00 : f32
    %cst_208 = arith.constant 3.000000e+00 : f32
    %661 = vector.broadcast %cst_207 : f32 to vector<2x32xf32>
    %662 = arith.maximumf %661, %660 : vector<2x32xf32>
    %663 = vector.broadcast %cst_208 : f32 to vector<2x32xf32>
    %664 = arith.minimumf %663, %662 : vector<2x32xf32>
    %665 = vector.extract_strided_slice %664 {offsets = [0, 0], sizes = [2, 16], strides = [1, 1]} : vector<2x32xf32> to vector<2x16xf32>
    %666 = vector.extract_strided_slice %664 {offsets = [0, 16], sizes = [2, 16], strides = [1, 1]} : vector<2x32xf32> to vector<2x16xf32>
    %c8 = arith.constant 8 : index
    %c0_209 = arith.constant 0 : index
    %667 = vector.load %arg19[%c8, %c0_209] : memref<20x32xf32, #tpu.memory_space<vmem>>, vector<2x16xf32>
    tpu.vector_store %arg19[%c8, %c0_209], %607 {strides = array<i32>} : memref<20x32xf32, #tpu.memory_space<vmem>>, vector<2x16xf32>,
    %c10 = arith.constant 10 : index
    %c16_210 = arith.constant 16 : index
    %668 = vector.load %arg19[%c10, %c16_210] : memref<20x32xf32, #tpu.memory_space<vmem>>, vector<2x16xf32>
    tpu.vector_store %arg19[%c10, %c16_210], %608 {strides = array<i32>} : memref<20x32xf32, #tpu.memory_space<vmem>>, vector<2x16xf32>,
    %669 = arith.addf %665, %607 : vector<2x16xf32>
    %c8_211 = arith.constant 8 : index
    %c0_212 = arith.constant 0 : index
    %670 = vector.load %arg20[%c8_211, %c0_212] : memref<20x32xf32, #tpu.memory_space<vmem>>, vector<2x16xf32>
    tpu.vector_store %arg20[%c8_211, %c0_212], %669 {strides = array<i32>} : memref<20x32xf32, #tpu.memory_space<vmem>>, vector<2x16xf32>,
    %671 = arith.addf %666, %608 : vector<2x16xf32>
    %c10_213 = arith.constant 10 : index
    %c16_214 = arith.constant 16 : index
    %672 = vector.load %arg20[%c10_213, %c16_214] : memref<20x32xf32, #tpu.memory_space<vmem>>, vector<2x16xf32>
    tpu.vector_store %arg20[%c10_213, %c16_214], %671 {strides = array<i32>} : memref<20x32xf32, #tpu.memory_space<vmem>>, vector<2x16xf32>,
    %673 = tpu.concatenate %607, %608, %665, %666 in 1 : vector<2x16xf32>, vector<2x16xf32>, vector<2x16xf32>, vector<2x16xf32> -> vector<2x64xf32>
    %c0_215 = arith.constant 0 : index
    %c0_216 = arith.constant 0 : index
    %674 = vector.load %arg11[%c0_215, %c0_216] : memref<64x512xf32, #tpu.memory_space<vmem>>, vector<64x512xf32>
    %cst_217 = arith.constant dense<0.000000e+00> : vector<2x512xf32>
    %675 = tpu.matmul %673, %674, %cst_217 {dimension_numbers = #tpu.dot_dimension_numbers<[1], [0], [0], [1], [0, 0, 1, 1], [], []>} : vector<2x64xf32>, vector<64x512xf32>, vector<2x512xf32> -> vector<2x512xf32>
    %676 = vector.extract_strided_slice %70 {offsets = [10, 0], sizes = [2, 128], strides = [1, 1]} : vector<20x256xf32> to vector<2x128xf32>
    %677 = vector.extract_strided_slice %675 {offsets = [0, 0], sizes = [2, 128], strides = [1, 1]} : vector<2x512xf32> to vector<2x128xf32>
    %678 = arith.addf %676, %677 : vector<2x128xf32>
    %679 = arith.negf %678 : vector<2x128xf32>
    %680 = math.exp %679 : vector<2x128xf32>
    %cst_218 = arith.constant 1.000000e+00 : f32
    %681 = vector.broadcast %cst_218 : f32 to vector<2x128xf32>
    %682 = arith.addf %681, %680 : vector<2x128xf32>
    %683 = arith.divf %681, %682 : vector<2x128xf32>
    %684 = vector.extract_strided_slice %683 {offsets = [0, 0], sizes = [2, 32], strides = [1, 1]} : vector<2x128xf32> to vector<2x32xf32>
    %685 = vector.extract_strided_slice %683 {offsets = [0, 32], sizes = [2, 32], strides = [1, 1]} : vector<2x128xf32> to vector<2x32xf32>
    %686 = vector.extract_strided_slice %683 {offsets = [0, 96], sizes = [2, 32], strides = [1, 1]} : vector<2x128xf32> to vector<2x32xf32>
    %687 = vector.extract_strided_slice %678 {offsets = [0, 64], sizes = [2, 32], strides = [1, 1]} : vector<2x128xf32> to vector<2x32xf32>
    %688 = math.tanh %687 : vector<2x32xf32>
    %689 = arith.mulf %684, %688 : vector<2x32xf32>
    %690 = arith.mulf %685, %575 : vector<2x32xf32>
    %691 = arith.addf %689, %690 : vector<2x32xf32>
    %cst_219 = arith.constant -3.000000e+00 : f32
    %cst_220 = arith.constant 3.000000e+00 : f32
    %692 = vector.broadcast %cst_219 : f32 to vector<2x32xf32>
    %693 = arith.maximumf %692, %691 : vector<2x32xf32>
    %694 = vector.broadcast %cst_220 : f32 to vector<2x32xf32>
    %695 = arith.minimumf %694, %693 : vector<2x32xf32>
    %696 = math.tanh %695 : vector<2x32xf32>
    %697 = arith.mulf %686, %696 : vector<2x32xf32>
    %698 = vector.extract_strided_slice %70 {offsets = [8, 128], sizes = [2, 128], strides = [1, 1]} : vector<20x256xf32> to vector<2x128xf32>
    %699 = vector.extract_strided_slice %675 {offsets = [0, 128], sizes = [2, 128], strides = [1, 1]} : vector<2x512xf32> to vector<2x128xf32>
    %700 = arith.addf %698, %699 : vector<2x128xf32>
    %701 = arith.negf %700 : vector<2x128xf32>
    %702 = math.exp %701 : vector<2x128xf32>
    %cst_221 = arith.constant 1.000000e+00 : f32
    %703 = vector.broadcast %cst_221 : f32 to vector<2x128xf32>
    %704 = arith.addf %703, %702 : vector<2x128xf32>
    %705 = arith.divf %703, %704 : vector<2x128xf32>
    %706 = vector.extract_strided_slice %705 {offsets = [0, 0], sizes = [2, 32], strides = [1, 1]} : vector<2x128xf32> to vector<2x32xf32>
    %707 = vector.extract_strided_slice %705 {offsets = [0, 32], sizes = [2, 32], strides = [1, 1]} : vector<2x128xf32> to vector<2x32xf32>
    %708 = vector.extract_strided_slice %705 {offsets = [0, 96], sizes = [2, 32], strides = [1, 1]} : vector<2x128xf32> to vector<2x32xf32>
    %709 = vector.extract_strided_slice %700 {offsets = [0, 64], sizes = [2, 32], strides = [1, 1]} : vector<2x128xf32> to vector<2x32xf32>
    %710 = math.tanh %709 : vector<2x32xf32>
    %711 = arith.mulf %706, %710 : vector<2x32xf32>
    %712 = arith.mulf %707, %597 : vector<2x32xf32>
    %713 = arith.addf %711, %712 : vector<2x32xf32>
    %cst_222 = arith.constant -3.000000e+00 : f32
    %cst_223 = arith.constant 3.000000e+00 : f32
    %714 = vector.broadcast %cst_222 : f32 to vector<2x32xf32>
    %715 = arith.maximumf %714, %713 : vector<2x32xf32>
    %716 = vector.broadcast %cst_223 : f32 to vector<2x32xf32>
    %717 = arith.minimumf %716, %715 : vector<2x32xf32>
    %718 = math.tanh %717 : vector<2x32xf32>
    %719 = arith.mulf %708, %718 : vector<2x32xf32>
    %720 = tpu.concatenate %697, %719 in 1 : vector<2x32xf32>, vector<2x32xf32> -> vector<2x64xf32>
    %c0_224 = arith.constant 0 : index
    %c0_225 = arith.constant 0 : index
    %721 = vector.load %arg12[%c0_224, %c0_225] : memref<64x32xf32, #tpu.memory_space<vmem>>, vector<64x32xf32>
    %cst_226 = arith.constant dense<0.000000e+00> : vector<2x32xf32>
    %722 = tpu.matmul %720, %721, %cst_226 {dimension_numbers = #tpu.dot_dimension_numbers<[1], [0], [0], [1], [0, 0, 1, 1], [], []>} : vector<2x64xf32>, vector<64x32xf32>, vector<2x32xf32> -> vector<2x32xf32>
    %cst_227 = arith.constant -3.000000e+00 : f32
    %cst_228 = arith.constant 3.000000e+00 : f32
    %723 = vector.broadcast %cst_227 : f32 to vector<2x32xf32>
    %724 = arith.maximumf %723, %722 : vector<2x32xf32>
    %725 = vector.broadcast %cst_228 : f32 to vector<2x32xf32>
    %726 = arith.minimumf %725, %724 : vector<2x32xf32>
    %727 = vector.extract_strided_slice %726 {offsets = [0, 0], sizes = [2, 16], strides = [1, 1]} : vector<2x32xf32> to vector<2x16xf32>
    %728 = vector.extract_strided_slice %726 {offsets = [0, 16], sizes = [2, 16], strides = [1, 1]} : vector<2x32xf32> to vector<2x16xf32>
    %c0_229 = arith.constant 0 : index
    %c0_230 = arith.constant 0 : index
    %729 = vector.load %arg13[%c0_229, %c0_230] : memref<32x256xf32, #tpu.memory_space<vmem>>, vector<32x256xf32>
    %cst_231 = arith.constant dense<0.000000e+00> : vector<2x256xf32>
    %730 = tpu.matmul %726, %729, %cst_231 {dimension_numbers = #tpu.dot_dimension_numbers<[1], [0], [0], [1], [0, 0, 1, 1], [], []>} : vector<2x32xf32>, vector<32x256xf32>, vector<2x256xf32> -> vector<2x256xf32>
    %c0_232 = arith.constant 0 : index
    %c0_233 = arith.constant 0 : index
    %731 = vector.load %arg14[%c0_232, %c0_233] : memref<1x256xf32, #tpu.memory_space<vmem>>, vector<1x256xf32>
    %732 = vector.broadcast %731 : vector<1x256xf32> to vector<2x256xf32>
    %733 = arith.addf %730, %732 : vector<2x256xf32>
    %734 = vector.extract_strided_slice %733 {offsets = [0, 0], sizes = [2, 128], strides = [1, 1]} : vector<2x256xf32> to vector<2x128xf32>
    %735 = vector.extract_strided_slice %675 {offsets = [0, 256], sizes = [2, 128], strides = [1, 1]} : vector<2x512xf32> to vector<2x128xf32>
    %736 = arith.addf %734, %735 : vector<2x128xf32>
    %737 = arith.negf %736 : vector<2x128xf32>
    %738 = math.exp %737 : vector<2x128xf32>
    %cst_234 = arith.constant 1.000000e+00 : f32
    %739 = vector.broadcast %cst_234 : f32 to vector<2x128xf32>
    %740 = arith.addf %739, %738 : vector<2x128xf32>
    %741 = arith.divf %739, %740 : vector<2x128xf32>
    %742 = vector.extract_strided_slice %741 {offsets = [0, 0], sizes = [2, 32], strides = [1, 1]} : vector<2x128xf32> to vector<2x32xf32>
    %743 = vector.extract_strided_slice %741 {offsets = [0, 32], sizes = [2, 32], strides = [1, 1]} : vector<2x128xf32> to vector<2x32xf32>
    %744 = vector.extract_strided_slice %741 {offsets = [0, 96], sizes = [2, 32], strides = [1, 1]} : vector<2x128xf32> to vector<2x32xf32>
    %745 = vector.extract_strided_slice %736 {offsets = [0, 64], sizes = [2, 32], strides = [1, 1]} : vector<2x128xf32> to vector<2x32xf32>
    %746 = math.tanh %745 : vector<2x32xf32>
    %747 = arith.mulf %742, %746 : vector<2x32xf32>
    %748 = arith.mulf %743, %633 : vector<2x32xf32>
    %749 = arith.addf %747, %748 : vector<2x32xf32>
    %cst_235 = arith.constant -3.000000e+00 : f32
    %cst_236 = arith.constant 3.000000e+00 : f32
    %750 = vector.broadcast %cst_235 : f32 to vector<2x32xf32>
    %751 = arith.maximumf %750, %749 : vector<2x32xf32>
    %752 = vector.broadcast %cst_236 : f32 to vector<2x32xf32>
    %753 = arith.minimumf %752, %751 : vector<2x32xf32>
    %754 = math.tanh %753 : vector<2x32xf32>
    %755 = arith.mulf %744, %754 : vector<2x32xf32>
    %756 = vector.extract_strided_slice %733 {offsets = [0, 128], sizes = [2, 128], strides = [1, 1]} : vector<2x256xf32> to vector<2x128xf32>
    %757 = vector.extract_strided_slice %675 {offsets = [0, 384], sizes = [2, 128], strides = [1, 1]} : vector<2x512xf32> to vector<2x128xf32>
    %758 = arith.addf %756, %757 : vector<2x128xf32>
    %759 = arith.negf %758 : vector<2x128xf32>
    %760 = math.exp %759 : vector<2x128xf32>
    %cst_237 = arith.constant 1.000000e+00 : f32
    %761 = vector.broadcast %cst_237 : f32 to vector<2x128xf32>
    %762 = arith.addf %761, %760 : vector<2x128xf32>
    %763 = arith.divf %761, %762 : vector<2x128xf32>
    %764 = vector.extract_strided_slice %763 {offsets = [0, 0], sizes = [2, 32], strides = [1, 1]} : vector<2x128xf32> to vector<2x32xf32>
    %765 = vector.extract_strided_slice %763 {offsets = [0, 32], sizes = [2, 32], strides = [1, 1]} : vector<2x128xf32> to vector<2x32xf32>
    %766 = vector.extract_strided_slice %763 {offsets = [0, 96], sizes = [2, 32], strides = [1, 1]} : vector<2x128xf32> to vector<2x32xf32>
    %767 = vector.extract_strided_slice %758 {offsets = [0, 64], sizes = [2, 32], strides = [1, 1]} : vector<2x128xf32> to vector<2x32xf32>
    %768 = math.tanh %767 : vector<2x32xf32>
    %769 = arith.mulf %764, %768 : vector<2x32xf32>
    %770 = arith.mulf %765, %655 : vector<2x32xf32>
    %771 = arith.addf %769, %770 : vector<2x32xf32>
    %cst_238 = arith.constant -3.000000e+00 : f32
    %cst_239 = arith.constant 3.000000e+00 : f32
    %772 = vector.broadcast %cst_238 : f32 to vector<2x32xf32>
    %773 = arith.maximumf %772, %771 : vector<2x32xf32>
    %774 = vector.broadcast %cst_239 : f32 to vector<2x32xf32>
    %775 = arith.minimumf %774, %773 : vector<2x32xf32>
    %776 = math.tanh %775 : vector<2x32xf32>
    %777 = arith.mulf %766, %776 : vector<2x32xf32>
    %778 = tpu.concatenate %755, %777 in 1 : vector<2x32xf32>, vector<2x32xf32> -> vector<2x64xf32>
    %c0_240 = arith.constant 0 : index
    %c0_241 = arith.constant 0 : index
    %779 = vector.load %arg15[%c0_240, %c0_241] : memref<64x32xf32, #tpu.memory_space<vmem>>, vector<64x32xf32>
    %cst_242 = arith.constant dense<0.000000e+00> : vector<2x32xf32>
    %780 = tpu.matmul %778, %779, %cst_242 {dimension_numbers = #tpu.dot_dimension_numbers<[1], [0], [0], [1], [0, 0, 1, 1], [], []>} : vector<2x64xf32>, vector<64x32xf32>, vector<2x32xf32> -> vector<2x32xf32>
    %cst_243 = arith.constant -3.000000e+00 : f32
    %cst_244 = arith.constant 3.000000e+00 : f32
    %781 = vector.broadcast %cst_243 : f32 to vector<2x32xf32>
    %782 = arith.maximumf %781, %780 : vector<2x32xf32>
    %783 = vector.broadcast %cst_244 : f32 to vector<2x32xf32>
    %784 = arith.minimumf %783, %782 : vector<2x32xf32>
    %785 = vector.extract_strided_slice %784 {offsets = [0, 0], sizes = [2, 16], strides = [1, 1]} : vector<2x32xf32> to vector<2x16xf32>
    %786 = vector.extract_strided_slice %784 {offsets = [0, 16], sizes = [2, 16], strides = [1, 1]} : vector<2x32xf32> to vector<2x16xf32>
    %c10_245 = arith.constant 10 : index
    %c0_246 = arith.constant 0 : index
    %787 = vector.load %arg19[%c10_245, %c0_246] : memref<20x32xf32, #tpu.memory_space<vmem>>, vector<2x16xf32>
    tpu.vector_store %arg19[%c10_245, %c0_246], %727 {strides = array<i32>} : memref<20x32xf32, #tpu.memory_space<vmem>>, vector<2x16xf32>,
    %c8_247 = arith.constant 8 : index
    %c16_248 = arith.constant 16 : index
    %788 = vector.load %arg19[%c8_247, %c16_248] : memref<20x32xf32, #tpu.memory_space<vmem>>, vector<2x16xf32>
    tpu.vector_store %arg19[%c8_247, %c16_248], %728 {strides = array<i32>} : memref<20x32xf32, #tpu.memory_space<vmem>>, vector<2x16xf32>,
    %789 = arith.addf %785, %727 : vector<2x16xf32>
    %c10_249 = arith.constant 10 : index
    %c0_250 = arith.constant 0 : index
    %790 = vector.load %arg20[%c10_249, %c0_250] : memref<20x32xf32, #tpu.memory_space<vmem>>, vector<2x16xf32>
    tpu.vector_store %arg20[%c10_249, %c0_250], %789 {strides = array<i32>} : memref<20x32xf32, #tpu.memory_space<vmem>>, vector<2x16xf32>,
    %791 = arith.addf %786, %728 : vector<2x16xf32>
    %c8_251 = arith.constant 8 : index
    %c16_252 = arith.constant 16 : index
    %792 = vector.load %arg20[%c8_251, %c16_252] : memref<20x32xf32, #tpu.memory_space<vmem>>, vector<2x16xf32>
    tpu.vector_store %arg20[%c8_251, %c16_252], %791 {strides = array<i32>} : memref<20x32xf32, #tpu.memory_space<vmem>>, vector<2x16xf32>,
    %793 = tpu.concatenate %727, %728, %785, %786 in 1 : vector<2x16xf32>, vector<2x16xf32>, vector<2x16xf32>, vector<2x16xf32> -> vector<2x64xf32>
    %c0_253 = arith.constant 0 : index
    %c0_254 = arith.constant 0 : index
    %794 = vector.load %arg11[%c0_253, %c0_254] : memref<64x512xf32, #tpu.memory_space<vmem>>, vector<64x512xf32>
    %cst_255 = arith.constant dense<0.000000e+00> : vector<2x512xf32>
    %795 = tpu.matmul %793, %794, %cst_255 {dimension_numbers = #tpu.dot_dimension_numbers<[1], [0], [0], [1], [0, 0, 1, 1], [], []>} : vector<2x64xf32>, vector<64x512xf32>, vector<2x512xf32> -> vector<2x512xf32>
    %796 = vector.extract_strided_slice %70 {offsets = [12, 0], sizes = [2, 128], strides = [1, 1]} : vector<20x256xf32> to vector<2x128xf32>
    %797 = vector.extract_strided_slice %795 {offsets = [0, 0], sizes = [2, 128], strides = [1, 1]} : vector<2x512xf32> to vector<2x128xf32>
    %798 = arith.addf %796, %797 : vector<2x128xf32>
    %799 = arith.negf %798 : vector<2x128xf32>
    %800 = math.exp %799 : vector<2x128xf32>
    %cst_256 = arith.constant 1.000000e+00 : f32
    %801 = vector.broadcast %cst_256 : f32 to vector<2x128xf32>
    %802 = arith.addf %801, %800 : vector<2x128xf32>
    %803 = arith.divf %801, %802 : vector<2x128xf32>
    %804 = vector.extract_strided_slice %803 {offsets = [0, 0], sizes = [2, 32], strides = [1, 1]} : vector<2x128xf32> to vector<2x32xf32>
    %805 = vector.extract_strided_slice %803 {offsets = [0, 32], sizes = [2, 32], strides = [1, 1]} : vector<2x128xf32> to vector<2x32xf32>
    %806 = vector.extract_strided_slice %803 {offsets = [0, 96], sizes = [2, 32], strides = [1, 1]} : vector<2x128xf32> to vector<2x32xf32>
    %807 = vector.extract_strided_slice %798 {offsets = [0, 64], sizes = [2, 32], strides = [1, 1]} : vector<2x128xf32> to vector<2x32xf32>
    %808 = math.tanh %807 : vector<2x32xf32>
    %809 = arith.mulf %804, %808 : vector<2x32xf32>
    %810 = arith.mulf %805, %695 : vector<2x32xf32>
    %811 = arith.addf %809, %810 : vector<2x32xf32>
    %cst_257 = arith.constant -3.000000e+00 : f32
    %cst_258 = arith.constant 3.000000e+00 : f32
    %812 = vector.broadcast %cst_257 : f32 to vector<2x32xf32>
    %813 = arith.maximumf %812, %811 : vector<2x32xf32>
    %814 = vector.broadcast %cst_258 : f32 to vector<2x32xf32>
    %815 = arith.minimumf %814, %813 : vector<2x32xf32>
    %816 = math.tanh %815 : vector<2x32xf32>
    %817 = arith.mulf %806, %816 : vector<2x32xf32>
    %818 = vector.extract_strided_slice %70 {offsets = [6, 128], sizes = [2, 128], strides = [1, 1]} : vector<20x256xf32> to vector<2x128xf32>
    %819 = vector.extract_strided_slice %795 {offsets = [0, 128], sizes = [2, 128], strides = [1, 1]} : vector<2x512xf32> to vector<2x128xf32>
    %820 = arith.addf %818, %819 : vector<2x128xf32>
    %821 = arith.negf %820 : vector<2x128xf32>
    %822 = math.exp %821 : vector<2x128xf32>
    %cst_259 = arith.constant 1.000000e+00 : f32
    %823 = vector.broadcast %cst_259 : f32 to vector<2x128xf32>
    %824 = arith.addf %823, %822 : vector<2x128xf32>
    %825 = arith.divf %823, %824 : vector<2x128xf32>
    %826 = vector.extract_strided_slice %825 {offsets = [0, 0], sizes = [2, 32], strides = [1, 1]} : vector<2x128xf32> to vector<2x32xf32>
    %827 = vector.extract_strided_slice %825 {offsets = [0, 32], sizes = [2, 32], strides = [1, 1]} : vector<2x128xf32> to vector<2x32xf32>
    %828 = vector.extract_strided_slice %825 {offsets = [0, 96], sizes = [2, 32], strides = [1, 1]} : vector<2x128xf32> to vector<2x32xf32>
    %829 = vector.extract_strided_slice %820 {offsets = [0, 64], sizes = [2, 32], strides = [1, 1]} : vector<2x128xf32> to vector<2x32xf32>
    %830 = math.tanh %829 : vector<2x32xf32>
    %831 = arith.mulf %826, %830 : vector<2x32xf32>
    %832 = arith.mulf %827, %717 : vector<2x32xf32>
    %833 = arith.addf %831, %832 : vector<2x32xf32>
    %cst_260 = arith.constant -3.000000e+00 : f32
    %cst_261 = arith.constant 3.000000e+00 : f32
    %834 = vector.broadcast %cst_260 : f32 to vector<2x32xf32>
    %835 = arith.maximumf %834, %833 : vector<2x32xf32>
    %836 = vector.broadcast %cst_261 : f32 to vector<2x32xf32>
    %837 = arith.minimumf %836, %835 : vector<2x32xf32>
    %838 = math.tanh %837 : vector<2x32xf32>
    %839 = arith.mulf %828, %838 : vector<2x32xf32>
    %840 = tpu.concatenate %817, %839 in 1 : vector<2x32xf32>, vector<2x32xf32> -> vector<2x64xf32>
    %c0_262 = arith.constant 0 : index
    %c0_263 = arith.constant 0 : index
    %841 = vector.load %arg12[%c0_262, %c0_263] : memref<64x32xf32, #tpu.memory_space<vmem>>, vector<64x32xf32>
    %cst_264 = arith.constant dense<0.000000e+00> : vector<2x32xf32>
    %842 = tpu.matmul %840, %841, %cst_264 {dimension_numbers = #tpu.dot_dimension_numbers<[1], [0], [0], [1], [0, 0, 1, 1], [], []>} : vector<2x64xf32>, vector<64x32xf32>, vector<2x32xf32> -> vector<2x32xf32>
    %cst_265 = arith.constant -3.000000e+00 : f32
    %cst_266 = arith.constant 3.000000e+00 : f32
    %843 = vector.broadcast %cst_265 : f32 to vector<2x32xf32>
    %844 = arith.maximumf %843, %842 : vector<2x32xf32>
    %845 = vector.broadcast %cst_266 : f32 to vector<2x32xf32>
    %846 = arith.minimumf %845, %844 : vector<2x32xf32>
    %847 = vector.extract_strided_slice %846 {offsets = [0, 0], sizes = [2, 16], strides = [1, 1]} : vector<2x32xf32> to vector<2x16xf32>
    %848 = vector.extract_strided_slice %846 {offsets = [0, 16], sizes = [2, 16], strides = [1, 1]} : vector<2x32xf32> to vector<2x16xf32>
    %c0_267 = arith.constant 0 : index
    %c0_268 = arith.constant 0 : index
    %849 = vector.load %arg13[%c0_267, %c0_268] : memref<32x256xf32, #tpu.memory_space<vmem>>, vector<32x256xf32>
    %cst_269 = arith.constant dense<0.000000e+00> : vector<2x256xf32>
    %850 = tpu.matmul %846, %849, %cst_269 {dimension_numbers = #tpu.dot_dimension_numbers<[1], [0], [0], [1], [0, 0, 1, 1], [], []>} : vector<2x32xf32>, vector<32x256xf32>, vector<2x256xf32> -> vector<2x256xf32>
    %c0_270 = arith.constant 0 : index
    %c0_271 = arith.constant 0 : index
    %851 = vector.load %arg14[%c0_270, %c0_271] : memref<1x256xf32, #tpu.memory_space<vmem>>, vector<1x256xf32>
    %852 = vector.broadcast %851 : vector<1x256xf32> to vector<2x256xf32>
    %853 = arith.addf %850, %852 : vector<2x256xf32>
    %854 = vector.extract_strided_slice %853 {offsets = [0, 0], sizes = [2, 128], strides = [1, 1]} : vector<2x256xf32> to vector<2x128xf32>
    %855 = vector.extract_strided_slice %795 {offsets = [0, 256], sizes = [2, 128], strides = [1, 1]} : vector<2x512xf32> to vector<2x128xf32>
    %856 = arith.addf %854, %855 : vector<2x128xf32>
    %857 = arith.negf %856 : vector<2x128xf32>
    %858 = math.exp %857 : vector<2x128xf32>
    %cst_272 = arith.constant 1.000000e+00 : f32
    %859 = vector.broadcast %cst_272 : f32 to vector<2x128xf32>
    %860 = arith.addf %859, %858 : vector<2x128xf32>
    %861 = arith.divf %859, %860 : vector<2x128xf32>
    %862 = vector.extract_strided_slice %861 {offsets = [0, 0], sizes = [2, 32], strides = [1, 1]} : vector<2x128xf32> to vector<2x32xf32>
    %863 = vector.extract_strided_slice %861 {offsets = [0, 32], sizes = [2, 32], strides = [1, 1]} : vector<2x128xf32> to vector<2x32xf32>
    %864 = vector.extract_strided_slice %861 {offsets = [0, 96], sizes = [2, 32], strides = [1, 1]} : vector<2x128xf32> to vector<2x32xf32>
    %865 = vector.extract_strided_slice %856 {offsets = [0, 64], sizes = [2, 32], strides = [1, 1]} : vector<2x128xf32> to vector<2x32xf32>
    %866 = math.tanh %865 : vector<2x32xf32>
    %867 = arith.mulf %862, %866 : vector<2x32xf32>
    %868 = arith.mulf %863, %753 : vector<2x32xf32>
    %869 = arith.addf %867, %868 : vector<2x32xf32>
    %cst_273 = arith.constant -3.000000e+00 : f32
    %cst_274 = arith.constant 3.000000e+00 : f32
    %870 = vector.broadcast %cst_273 : f32 to vector<2x32xf32>
    %871 = arith.maximumf %870, %869 : vector<2x32xf32>
    %872 = vector.broadcast %cst_274 : f32 to vector<2x32xf32>
    %873 = arith.minimumf %872, %871 : vector<2x32xf32>
    %874 = math.tanh %873 : vector<2x32xf32>
    %875 = arith.mulf %864, %874 : vector<2x32xf32>
    %876 = vector.extract_strided_slice %853 {offsets = [0, 128], sizes = [2, 128], strides = [1, 1]} : vector<2x256xf32> to vector<2x128xf32>
    %877 = vector.extract_strided_slice %795 {offsets = [0, 384], sizes = [2, 128], strides = [1, 1]} : vector<2x512xf32> to vector<2x128xf32>
    %878 = arith.addf %876, %877 : vector<2x128xf32>
    %879 = arith.negf %878 : vector<2x128xf32>
    %880 = math.exp %879 : vector<2x128xf32>
    %cst_275 = arith.constant 1.000000e+00 : f32
    %881 = vector.broadcast %cst_275 : f32 to vector<2x128xf32>
    %882 = arith.addf %881, %880 : vector<2x128xf32>
    %883 = arith.divf %881, %882 : vector<2x128xf32>
    %884 = vector.extract_strided_slice %883 {offsets = [0, 0], sizes = [2, 32], strides = [1, 1]} : vector<2x128xf32> to vector<2x32xf32>
    %885 = vector.extract_strided_slice %883 {offsets = [0, 32], sizes = [2, 32], strides = [1, 1]} : vector<2x128xf32> to vector<2x32xf32>
    %886 = vector.extract_strided_slice %883 {offsets = [0, 96], sizes = [2, 32], strides = [1, 1]} : vector<2x128xf32> to vector<2x32xf32>
    %887 = vector.extract_strided_slice %878 {offsets = [0, 64], sizes = [2, 32], strides = [1, 1]} : vector<2x128xf32> to vector<2x32xf32>
    %888 = math.tanh %887 : vector<2x32xf32>
    %889 = arith.mulf %884, %888 : vector<2x32xf32>
    %890 = arith.mulf %885, %775 : vector<2x32xf32>
    %891 = arith.addf %889, %890 : vector<2x32xf32>
    %cst_276 = arith.constant -3.000000e+00 : f32
    %cst_277 = arith.constant 3.000000e+00 : f32
    %892 = vector.broadcast %cst_276 : f32 to vector<2x32xf32>
    %893 = arith.maximumf %892, %891 : vector<2x32xf32>
    %894 = vector.broadcast %cst_277 : f32 to vector<2x32xf32>
    %895 = arith.minimumf %894, %893 : vector<2x32xf32>
    %896 = math.tanh %895 : vector<2x32xf32>
    %897 = arith.mulf %886, %896 : vector<2x32xf32>
    %898 = tpu.concatenate %875, %897 in 1 : vector<2x32xf32>, vector<2x32xf32> -> vector<2x64xf32>
    %c0_278 = arith.constant 0 : index
    %c0_279 = arith.constant 0 : index
    %899 = vector.load %arg15[%c0_278, %c0_279] : memref<64x32xf32, #tpu.memory_space<vmem>>, vector<64x32xf32>
    %cst_280 = arith.constant dense<0.000000e+00> : vector<2x32xf32>
    %900 = tpu.matmul %898, %899, %cst_280 {dimension_numbers = #tpu.dot_dimension_numbers<[1], [0], [0], [1], [0, 0, 1, 1], [], []>} : vector<2x64xf32>, vector<64x32xf32>, vector<2x32xf32> -> vector<2x32xf32>
    %cst_281 = arith.constant -3.000000e+00 : f32
    %cst_282 = arith.constant 3.000000e+00 : f32
    %901 = vector.broadcast %cst_281 : f32 to vector<2x32xf32>
    %902 = arith.maximumf %901, %900 : vector<2x32xf32>
    %903 = vector.broadcast %cst_282 : f32 to vector<2x32xf32>
    %904 = arith.minimumf %903, %902 : vector<2x32xf32>
    %905 = vector.extract_strided_slice %904 {offsets = [0, 0], sizes = [2, 16], strides = [1, 1]} : vector<2x32xf32> to vector<2x16xf32>
    %906 = vector.extract_strided_slice %904 {offsets = [0, 16], sizes = [2, 16], strides = [1, 1]} : vector<2x32xf32> to vector<2x16xf32>
    %c12_283 = arith.constant 12 : index
    %c0_284 = arith.constant 0 : index
    %907 = vector.load %arg19[%c12_283, %c0_284] : memref<20x32xf32, #tpu.memory_space<vmem>>, vector<2x16xf32>
    tpu.vector_store %arg19[%c12_283, %c0_284], %847 {strides = array<i32>} : memref<20x32xf32, #tpu.memory_space<vmem>>, vector<2x16xf32>,
    %c6_285 = arith.constant 6 : index
    %c16_286 = arith.constant 16 : index
    %908 = vector.load %arg19[%c6_285, %c16_286] : memref<20x32xf32, #tpu.memory_space<vmem>>, vector<2x16xf32>
    tpu.vector_store %arg19[%c6_285, %c16_286], %848 {strides = array<i32>} : memref<20x32xf32, #tpu.memory_space<vmem>>, vector<2x16xf32>,
    %909 = arith.addf %905, %847 : vector<2x16xf32>
    %c12_287 = arith.constant 12 : index
    %c0_288 = arith.constant 0 : index
    %910 = vector.load %arg20[%c12_287, %c0_288] : memref<20x32xf32, #tpu.memory_space<vmem>>, vector<2x16xf32>
    tpu.vector_store %arg20[%c12_287, %c0_288], %909 {strides = array<i32>} : memref<20x32xf32, #tpu.memory_space<vmem>>, vector<2x16xf32>,
    %911 = arith.addf %906, %848 : vector<2x16xf32>
    %c6_289 = arith.constant 6 : index
    %c16_290 = arith.constant 16 : index
    %912 = vector.load %arg20[%c6_289, %c16_290] : memref<20x32xf32, #tpu.memory_space<vmem>>, vector<2x16xf32>
    tpu.vector_store %arg20[%c6_289, %c16_290], %911 {strides = array<i32>} : memref<20x32xf32, #tpu.memory_space<vmem>>, vector<2x16xf32>,
    %913 = tpu.concatenate %847, %848, %905, %906 in 1 : vector<2x16xf32>, vector<2x16xf32>, vector<2x16xf32>, vector<2x16xf32> -> vector<2x64xf32>
    %c0_291 = arith.constant 0 : index
    %c0_292 = arith.constant 0 : index
    %914 = vector.load %arg11[%c0_291, %c0_292] : memref<64x512xf32, #tpu.memory_space<vmem>>, vector<64x512xf32>
    %cst_293 = arith.constant dense<0.000000e+00> : vector<2x512xf32>
    %915 = tpu.matmul %913, %914, %cst_293 {dimension_numbers = #tpu.dot_dimension_numbers<[1], [0], [0], [1], [0, 0, 1, 1], [], []>} : vector<2x64xf32>, vector<64x512xf32>, vector<2x512xf32> -> vector<2x512xf32>
    %916 = vector.extract_strided_slice %70 {offsets = [14, 0], sizes = [2, 128], strides = [1, 1]} : vector<20x256xf32> to vector<2x128xf32>
    %917 = vector.extract_strided_slice %915 {offsets = [0, 0], sizes = [2, 128], strides = [1, 1]} : vector<2x512xf32> to vector<2x128xf32>
    %918 = arith.addf %916, %917 : vector<2x128xf32>
    %919 = arith.negf %918 : vector<2x128xf32>
    %920 = math.exp %919 : vector<2x128xf32>
    %cst_294 = arith.constant 1.000000e+00 : f32
    %921 = vector.broadcast %cst_294 : f32 to vector<2x128xf32>
    %922 = arith.addf %921, %920 : vector<2x128xf32>
    %923 = arith.divf %921, %922 : vector<2x128xf32>
    %924 = vector.extract_strided_slice %923 {offsets = [0, 0], sizes = [2, 32], strides = [1, 1]} : vector<2x128xf32> to vector<2x32xf32>
    %925 = vector.extract_strided_slice %923 {offsets = [0, 32], sizes = [2, 32], strides = [1, 1]} : vector<2x128xf32> to vector<2x32xf32>
    %926 = vector.extract_strided_slice %923 {offsets = [0, 96], sizes = [2, 32], strides = [1, 1]} : vector<2x128xf32> to vector<2x32xf32>
    %927 = vector.extract_strided_slice %918 {offsets = [0, 64], sizes = [2, 32], strides = [1, 1]} : vector<2x128xf32> to vector<2x32xf32>
    %928 = math.tanh %927 : vector<2x32xf32>
    %929 = arith.mulf %924, %928 : vector<2x32xf32>
    %930 = arith.mulf %925, %815 : vector<2x32xf32>
    %931 = arith.addf %929, %930 : vector<2x32xf32>
    %cst_295 = arith.constant -3.000000e+00 : f32
    %cst_296 = arith.constant 3.000000e+00 : f32
    %932 = vector.broadcast %cst_295 : f32 to vector<2x32xf32>
    %933 = arith.maximumf %932, %931 : vector<2x32xf32>
    %934 = vector.broadcast %cst_296 : f32 to vector<2x32xf32>
    %935 = arith.minimumf %934, %933 : vector<2x32xf32>
    %936 = math.tanh %935 : vector<2x32xf32>
    %937 = arith.mulf %926, %936 : vector<2x32xf32>
    %938 = vector.extract_strided_slice %70 {offsets = [4, 128], sizes = [2, 128], strides = [1, 1]} : vector<20x256xf32> to vector<2x128xf32>
    %939 = vector.extract_strided_slice %915 {offsets = [0, 128], sizes = [2, 128], strides = [1, 1]} : vector<2x512xf32> to vector<2x128xf32>
    %940 = arith.addf %938, %939 : vector<2x128xf32>
    %941 = arith.negf %940 : vector<2x128xf32>
    %942 = math.exp %941 : vector<2x128xf32>
    %cst_297 = arith.constant 1.000000e+00 : f32
    %943 = vector.broadcast %cst_297 : f32 to vector<2x128xf32>
    %944 = arith.addf %943, %942 : vector<2x128xf32>
    %945 = arith.divf %943, %944 : vector<2x128xf32>
    %946 = vector.extract_strided_slice %945 {offsets = [0, 0], sizes = [2, 32], strides = [1, 1]} : vector<2x128xf32> to vector<2x32xf32>
    %947 = vector.extract_strided_slice %945 {offsets = [0, 32], sizes = [2, 32], strides = [1, 1]} : vector<2x128xf32> to vector<2x32xf32>
    %948 = vector.extract_strided_slice %945 {offsets = [0, 96], sizes = [2, 32], strides = [1, 1]} : vector<2x128xf32> to vector<2x32xf32>
    %949 = vector.extract_strided_slice %940 {offsets = [0, 64], sizes = [2, 32], strides = [1, 1]} : vector<2x128xf32> to vector<2x32xf32>
    %950 = math.tanh %949 : vector<2x32xf32>
    %951 = arith.mulf %946, %950 : vector<2x32xf32>
    %952 = arith.mulf %947, %837 : vector<2x32xf32>
    %953 = arith.addf %951, %952 : vector<2x32xf32>
    %cst_298 = arith.constant -3.000000e+00 : f32
    %cst_299 = arith.constant 3.000000e+00 : f32
    %954 = vector.broadcast %cst_298 : f32 to vector<2x32xf32>
    %955 = arith.maximumf %954, %953 : vector<2x32xf32>
    %956 = vector.broadcast %cst_299 : f32 to vector<2x32xf32>
    %957 = arith.minimumf %956, %955 : vector<2x32xf32>
    %958 = math.tanh %957 : vector<2x32xf32>
    %959 = arith.mulf %948, %958 : vector<2x32xf32>
    %960 = tpu.concatenate %937, %959 in 1 : vector<2x32xf32>, vector<2x32xf32> -> vector<2x64xf32>
    %c0_300 = arith.constant 0 : index
    %c0_301 = arith.constant 0 : index
    %961 = vector.load %arg12[%c0_300, %c0_301] : memref<64x32xf32, #tpu.memory_space<vmem>>, vector<64x32xf32>
    %cst_302 = arith.constant dense<0.000000e+00> : vector<2x32xf32>
    %962 = tpu.matmul %960, %961, %cst_302 {dimension_numbers = #tpu.dot_dimension_numbers<[1], [0], [0], [1], [0, 0, 1, 1], [], []>} : vector<2x64xf32>, vector<64x32xf32>, vector<2x32xf32> -> vector<2x32xf32>
    %cst_303 = arith.constant -3.000000e+00 : f32
    %cst_304 = arith.constant 3.000000e+00 : f32
    %963 = vector.broadcast %cst_303 : f32 to vector<2x32xf32>
    %964 = arith.maximumf %963, %962 : vector<2x32xf32>
    %965 = vector.broadcast %cst_304 : f32 to vector<2x32xf32>
    %966 = arith.minimumf %965, %964 : vector<2x32xf32>
    %967 = vector.extract_strided_slice %966 {offsets = [0, 0], sizes = [2, 16], strides = [1, 1]} : vector<2x32xf32> to vector<2x16xf32>
    %968 = vector.extract_strided_slice %966 {offsets = [0, 16], sizes = [2, 16], strides = [1, 1]} : vector<2x32xf32> to vector<2x16xf32>
    %c0_305 = arith.constant 0 : index
    %c0_306 = arith.constant 0 : index
    %969 = vector.load %arg13[%c0_305, %c0_306] : memref<32x256xf32, #tpu.memory_space<vmem>>, vector<32x256xf32>
    %cst_307 = arith.constant dense<0.000000e+00> : vector<2x256xf32>
    %970 = tpu.matmul %966, %969, %cst_307 {dimension_numbers = #tpu.dot_dimension_numbers<[1], [0], [0], [1], [0, 0, 1, 1], [], []>} : vector<2x32xf32>, vector<32x256xf32>, vector<2x256xf32> -> vector<2x256xf32>
    %c0_308 = arith.constant 0 : index
    %c0_309 = arith.constant 0 : index
    %971 = vector.load %arg14[%c0_308, %c0_309] : memref<1x256xf32, #tpu.memory_space<vmem>>, vector<1x256xf32>
    %972 = vector.broadcast %971 : vector<1x256xf32> to vector<2x256xf32>
    %973 = arith.addf %970, %972 : vector<2x256xf32>
    %974 = vector.extract_strided_slice %973 {offsets = [0, 0], sizes = [2, 128], strides = [1, 1]} : vector<2x256xf32> to vector<2x128xf32>
    %975 = vector.extract_strided_slice %915 {offsets = [0, 256], sizes = [2, 128], strides = [1, 1]} : vector<2x512xf32> to vector<2x128xf32>
    %976 = arith.addf %974, %975 : vector<2x128xf32>
    %977 = arith.negf %976 : vector<2x128xf32>
    %978 = math.exp %977 : vector<2x128xf32>
    %cst_310 = arith.constant 1.000000e+00 : f32
    %979 = vector.broadcast %cst_310 : f32 to vector<2x128xf32>
    %980 = arith.addf %979, %978 : vector<2x128xf32>
    %981 = arith.divf %979, %980 : vector<2x128xf32>
    %982 = vector.extract_strided_slice %981 {offsets = [0, 0], sizes = [2, 32], strides = [1, 1]} : vector<2x128xf32> to vector<2x32xf32>
    %983 = vector.extract_strided_slice %981 {offsets = [0, 32], sizes = [2, 32], strides = [1, 1]} : vector<2x128xf32> to vector<2x32xf32>
    %984 = vector.extract_strided_slice %981 {offsets = [0, 96], sizes = [2, 32], strides = [1, 1]} : vector<2x128xf32> to vector<2x32xf32>
    %985 = vector.extract_strided_slice %976 {offsets = [0, 64], sizes = [2, 32], strides = [1, 1]} : vector<2x128xf32> to vector<2x32xf32>
    %986 = math.tanh %985 : vector<2x32xf32>
    %987 = arith.mulf %982, %986 : vector<2x32xf32>
    %988 = arith.mulf %983, %873 : vector<2x32xf32>
    %989 = arith.addf %987, %988 : vector<2x32xf32>
    %cst_311 = arith.constant -3.000000e+00 : f32
    %cst_312 = arith.constant 3.000000e+00 : f32
    %990 = vector.broadcast %cst_311 : f32 to vector<2x32xf32>
    %991 = arith.maximumf %990, %989 : vector<2x32xf32>
    %992 = vector.broadcast %cst_312 : f32 to vector<2x32xf32>
    %993 = arith.minimumf %992, %991 : vector<2x32xf32>
    %994 = math.tanh %993 : vector<2x32xf32>
    %995 = arith.mulf %984, %994 : vector<2x32xf32>
    %996 = vector.extract_strided_slice %973 {offsets = [0, 128], sizes = [2, 128], strides = [1, 1]} : vector<2x256xf32> to vector<2x128xf32>
    %997 = vector.extract_strided_slice %915 {offsets = [0, 384], sizes = [2, 128], strides = [1, 1]} : vector<2x512xf32> to vector<2x128xf32>
    %998 = arith.addf %996, %997 : vector<2x128xf32>
    %999 = arith.negf %998 : vector<2x128xf32>
    %1000 = math.exp %999 : vector<2x128xf32>
    %cst_313 = arith.constant 1.000000e+00 : f32
    %1001 = vector.broadcast %cst_313 : f32 to vector<2x128xf32>
    %1002 = arith.addf %1001, %1000 : vector<2x128xf32>
    %1003 = arith.divf %1001, %1002 : vector<2x128xf32>
    %1004 = vector.extract_strided_slice %1003 {offsets = [0, 0], sizes = [2, 32], strides = [1, 1]} : vector<2x128xf32> to vector<2x32xf32>
    %1005 = vector.extract_strided_slice %1003 {offsets = [0, 32], sizes = [2, 32], strides = [1, 1]} : vector<2x128xf32> to vector<2x32xf32>
    %1006 = vector.extract_strided_slice %1003 {offsets = [0, 96], sizes = [2, 32], strides = [1, 1]} : vector<2x128xf32> to vector<2x32xf32>
    %1007 = vector.extract_strided_slice %998 {offsets = [0, 64], sizes = [2, 32], strides = [1, 1]} : vector<2x128xf32> to vector<2x32xf32>
    %1008 = math.tanh %1007 : vector<2x32xf32>
    %1009 = arith.mulf %1004, %1008 : vector<2x32xf32>
    %1010 = arith.mulf %1005, %895 : vector<2x32xf32>
    %1011 = arith.addf %1009, %1010 : vector<2x32xf32>
    %cst_314 = arith.constant -3.000000e+00 : f32
    %cst_315 = arith.constant 3.000000e+00 : f32
    %1012 = vector.broadcast %cst_314 : f32 to vector<2x32xf32>
    %1013 = arith.maximumf %1012, %1011 : vector<2x32xf32>
    %1014 = vector.broadcast %cst_315 : f32 to vector<2x32xf32>
    %1015 = arith.minimumf %1014, %1013 : vector<2x32xf32>
    %1016 = math.tanh %1015 : vector<2x32xf32>
    %1017 = arith.mulf %1006, %1016 : vector<2x32xf32>
    %1018 = tpu.concatenate %995, %1017 in 1 : vector<2x32xf32>, vector<2x32xf32> -> vector<2x64xf32>
    %c0_316 = arith.constant 0 : index
    %c0_317 = arith.constant 0 : index
    %1019 = vector.load %arg15[%c0_316, %c0_317] : memref<64x32xf32, #tpu.memory_space<vmem>>, vector<64x32xf32>
    %cst_318 = arith.constant dense<0.000000e+00> : vector<2x32xf32>
    %1020 = tpu.matmul %1018, %1019, %cst_318 {dimension_numbers = #tpu.dot_dimension_numbers<[1], [0], [0], [1], [0, 0, 1, 1], [], []>} : vector<2x64xf32>, vector<64x32xf32>, vector<2x32xf32> -> vector<2x32xf32>
    %cst_319 = arith.constant -3.000000e+00 : f32
    %cst_320 = arith.constant 3.000000e+00 : f32
    %1021 = vector.broadcast %cst_319 : f32 to vector<2x32xf32>
    %1022 = arith.maximumf %1021, %1020 : vector<2x32xf32>
    %1023 = vector.broadcast %cst_320 : f32 to vector<2x32xf32>
    %1024 = arith.minimumf %1023, %1022 : vector<2x32xf32>
    %1025 = vector.extract_strided_slice %1024 {offsets = [0, 0], sizes = [2, 16], strides = [1, 1]} : vector<2x32xf32> to vector<2x16xf32>
    %1026 = vector.extract_strided_slice %1024 {offsets = [0, 16], sizes = [2, 16], strides = [1, 1]} : vector<2x32xf32> to vector<2x16xf32>
    %c14_321 = arith.constant 14 : index
    %c0_322 = arith.constant 0 : index
    %1027 = vector.load %arg19[%c14_321, %c0_322] : memref<20x32xf32, #tpu.memory_space<vmem>>, vector<2x16xf32>
    tpu.vector_store %arg19[%c14_321, %c0_322], %967 {strides = array<i32>} : memref<20x32xf32, #tpu.memory_space<vmem>>, vector<2x16xf32>,
    %c4_323 = arith.constant 4 : index
    %c16_324 = arith.constant 16 : index
    %1028 = vector.load %arg19[%c4_323, %c16_324] : memref<20x32xf32, #tpu.memory_space<vmem>>, vector<2x16xf32>
    tpu.vector_store %arg19[%c4_323, %c16_324], %968 {strides = array<i32>} : memref<20x32xf32, #tpu.memory_space<vmem>>, vector<2x16xf32>,
    %1029 = arith.addf %1025, %967 : vector<2x16xf32>
    %c14_325 = arith.constant 14 : index
    %c0_326 = arith.constant 0 : index
    %1030 = vector.load %arg20[%c14_325, %c0_326] : memref<20x32xf32, #tpu.memory_space<vmem>>, vector<2x16xf32>
    tpu.vector_store %arg20[%c14_325, %c0_326], %1029 {strides = array<i32>} : memref<20x32xf32, #tpu.memory_space<vmem>>, vector<2x16xf32>,
    %1031 = arith.addf %1026, %968 : vector<2x16xf32>
    %c4_327 = arith.constant 4 : index
    %c16_328 = arith.constant 16 : index
    %1032 = vector.load %arg20[%c4_327, %c16_328] : memref<20x32xf32, #tpu.memory_space<vmem>>, vector<2x16xf32>
    tpu.vector_store %arg20[%c4_327, %c16_328], %1031 {strides = array<i32>} : memref<20x32xf32, #tpu.memory_space<vmem>>, vector<2x16xf32>,
    %1033 = tpu.concatenate %967, %968, %1025, %1026 in 1 : vector<2x16xf32>, vector<2x16xf32>, vector<2x16xf32>, vector<2x16xf32> -> vector<2x64xf32>
    %c0_329 = arith.constant 0 : index
    %c0_330 = arith.constant 0 : index
    %1034 = vector.load %arg11[%c0_329, %c0_330] : memref<64x512xf32, #tpu.memory_space<vmem>>, vector<64x512xf32>
    %cst_331 = arith.constant dense<0.000000e+00> : vector<2x512xf32>
    %1035 = tpu.matmul %1033, %1034, %cst_331 {dimension_numbers = #tpu.dot_dimension_numbers<[1], [0], [0], [1], [0, 0, 1, 1], [], []>} : vector<2x64xf32>, vector<64x512xf32>, vector<2x512xf32> -> vector<2x512xf32>
    %1036 = vector.extract_strided_slice %70 {offsets = [16, 0], sizes = [2, 128], strides = [1, 1]} : vector<20x256xf32> to vector<2x128xf32>
    %1037 = vector.extract_strided_slice %1035 {offsets = [0, 0], sizes = [2, 128], strides = [1, 1]} : vector<2x512xf32> to vector<2x128xf32>
    %1038 = arith.addf %1036, %1037 : vector<2x128xf32>
    %1039 = arith.negf %1038 : vector<2x128xf32>
    %1040 = math.exp %1039 : vector<2x128xf32>
    %cst_332 = arith.constant 1.000000e+00 : f32
    %1041 = vector.broadcast %cst_332 : f32 to vector<2x128xf32>
    %1042 = arith.addf %1041, %1040 : vector<2x128xf32>
    %1043 = arith.divf %1041, %1042 : vector<2x128xf32>
    %1044 = vector.extract_strided_slice %1043 {offsets = [0, 0], sizes = [2, 32], strides = [1, 1]} : vector<2x128xf32> to vector<2x32xf32>
    %1045 = vector.extract_strided_slice %1043 {offsets = [0, 32], sizes = [2, 32], strides = [1, 1]} : vector<2x128xf32> to vector<2x32xf32>
    %1046 = vector.extract_strided_slice %1043 {offsets = [0, 96], sizes = [2, 32], strides = [1, 1]} : vector<2x128xf32> to vector<2x32xf32>
    %1047 = vector.extract_strided_slice %1038 {offsets = [0, 64], sizes = [2, 32], strides = [1, 1]} : vector<2x128xf32> to vector<2x32xf32>
    %1048 = math.tanh %1047 : vector<2x32xf32>
    %1049 = arith.mulf %1044, %1048 : vector<2x32xf32>
    %1050 = arith.mulf %1045, %935 : vector<2x32xf32>
    %1051 = arith.addf %1049, %1050 : vector<2x32xf32>
    %cst_333 = arith.constant -3.000000e+00 : f32
    %cst_334 = arith.constant 3.000000e+00 : f32
    %1052 = vector.broadcast %cst_333 : f32 to vector<2x32xf32>
    %1053 = arith.maximumf %1052, %1051 : vector<2x32xf32>
    %1054 = vector.broadcast %cst_334 : f32 to vector<2x32xf32>
    %1055 = arith.minimumf %1054, %1053 : vector<2x32xf32>
    %1056 = math.tanh %1055 : vector<2x32xf32>
    %1057 = arith.mulf %1046, %1056 : vector<2x32xf32>
    %1058 = vector.extract_strided_slice %70 {offsets = [2, 128], sizes = [2, 128], strides = [1, 1]} : vector<20x256xf32> to vector<2x128xf32>
    %1059 = vector.extract_strided_slice %1035 {offsets = [0, 128], sizes = [2, 128], strides = [1, 1]} : vector<2x512xf32> to vector<2x128xf32>
    %1060 = arith.addf %1058, %1059 : vector<2x128xf32>
    %1061 = arith.negf %1060 : vector<2x128xf32>
    %1062 = math.exp %1061 : vector<2x128xf32>
    %cst_335 = arith.constant 1.000000e+00 : f32
    %1063 = vector.broadcast %cst_335 : f32 to vector<2x128xf32>
    %1064 = arith.addf %1063, %1062 : vector<2x128xf32>
    %1065 = arith.divf %1063, %1064 : vector<2x128xf32>
    %1066 = vector.extract_strided_slice %1065 {offsets = [0, 0], sizes = [2, 32], strides = [1, 1]} : vector<2x128xf32> to vector<2x32xf32>
    %1067 = vector.extract_strided_slice %1065 {offsets = [0, 32], sizes = [2, 32], strides = [1, 1]} : vector<2x128xf32> to vector<2x32xf32>
    %1068 = vector.extract_strided_slice %1065 {offsets = [0, 96], sizes = [2, 32], strides = [1, 1]} : vector<2x128xf32> to vector<2x32xf32>
    %1069 = vector.extract_strided_slice %1060 {offsets = [0, 64], sizes = [2, 32], strides = [1, 1]} : vector<2x128xf32> to vector<2x32xf32>
    %1070 = math.tanh %1069 : vector<2x32xf32>
    %1071 = arith.mulf %1066, %1070 : vector<2x32xf32>
    %1072 = arith.mulf %1067, %957 : vector<2x32xf32>
    %1073 = arith.addf %1071, %1072 : vector<2x32xf32>
    %cst_336 = arith.constant -3.000000e+00 : f32
    %cst_337 = arith.constant 3.000000e+00 : f32
    %1074 = vector.broadcast %cst_336 : f32 to vector<2x32xf32>
    %1075 = arith.maximumf %1074, %1073 : vector<2x32xf32>
    %1076 = vector.broadcast %cst_337 : f32 to vector<2x32xf32>
    %1077 = arith.minimumf %1076, %1075 : vector<2x32xf32>
    %1078 = math.tanh %1077 : vector<2x32xf32>
    %1079 = arith.mulf %1068, %1078 : vector<2x32xf32>
    %1080 = tpu.concatenate %1057, %1079 in 1 : vector<2x32xf32>, vector<2x32xf32> -> vector<2x64xf32>
    %c0_338 = arith.constant 0 : index
    %c0_339 = arith.constant 0 : index
    %1081 = vector.load %arg12[%c0_338, %c0_339] : memref<64x32xf32, #tpu.memory_space<vmem>>, vector<64x32xf32>
    %cst_340 = arith.constant dense<0.000000e+00> : vector<2x32xf32>
    %1082 = tpu.matmul %1080, %1081, %cst_340 {dimension_numbers = #tpu.dot_dimension_numbers<[1], [0], [0], [1], [0, 0, 1, 1], [], []>} : vector<2x64xf32>, vector<64x32xf32>, vector<2x32xf32> -> vector<2x32xf32>
    %cst_341 = arith.constant -3.000000e+00 : f32
    %cst_342 = arith.constant 3.000000e+00 : f32
    %1083 = vector.broadcast %cst_341 : f32 to vector<2x32xf32>
    %1084 = arith.maximumf %1083, %1082 : vector<2x32xf32>
    %1085 = vector.broadcast %cst_342 : f32 to vector<2x32xf32>
    %1086 = arith.minimumf %1085, %1084 : vector<2x32xf32>
    %1087 = vector.extract_strided_slice %1086 {offsets = [0, 0], sizes = [2, 16], strides = [1, 1]} : vector<2x32xf32> to vector<2x16xf32>
    %1088 = vector.extract_strided_slice %1086 {offsets = [0, 16], sizes = [2, 16], strides = [1, 1]} : vector<2x32xf32> to vector<2x16xf32>
    %c0_343 = arith.constant 0 : index
    %c0_344 = arith.constant 0 : index
    %1089 = vector.load %arg13[%c0_343, %c0_344] : memref<32x256xf32, #tpu.memory_space<vmem>>, vector<32x256xf32>
    %cst_345 = arith.constant dense<0.000000e+00> : vector<2x256xf32>
    %1090 = tpu.matmul %1086, %1089, %cst_345 {dimension_numbers = #tpu.dot_dimension_numbers<[1], [0], [0], [1], [0, 0, 1, 1], [], []>} : vector<2x32xf32>, vector<32x256xf32>, vector<2x256xf32> -> vector<2x256xf32>
    %c0_346 = arith.constant 0 : index
    %c0_347 = arith.constant 0 : index
    %1091 = vector.load %arg14[%c0_346, %c0_347] : memref<1x256xf32, #tpu.memory_space<vmem>>, vector<1x256xf32>
    %1092 = vector.broadcast %1091 : vector<1x256xf32> to vector<2x256xf32>
    %1093 = arith.addf %1090, %1092 : vector<2x256xf32>
    %1094 = vector.extract_strided_slice %1093 {offsets = [0, 0], sizes = [2, 128], strides = [1, 1]} : vector<2x256xf32> to vector<2x128xf32>
    %1095 = vector.extract_strided_slice %1035 {offsets = [0, 256], sizes = [2, 128], strides = [1, 1]} : vector<2x512xf32> to vector<2x128xf32>
    %1096 = arith.addf %1094, %1095 : vector<2x128xf32>
    %1097 = arith.negf %1096 : vector<2x128xf32>
    %1098 = math.exp %1097 : vector<2x128xf32>
    %cst_348 = arith.constant 1.000000e+00 : f32
    %1099 = vector.broadcast %cst_348 : f32 to vector<2x128xf32>
    %1100 = arith.addf %1099, %1098 : vector<2x128xf32>
    %1101 = arith.divf %1099, %1100 : vector<2x128xf32>
    %1102 = vector.extract_strided_slice %1101 {offsets = [0, 0], sizes = [2, 32], strides = [1, 1]} : vector<2x128xf32> to vector<2x32xf32>
    %1103 = vector.extract_strided_slice %1101 {offsets = [0, 32], sizes = [2, 32], strides = [1, 1]} : vector<2x128xf32> to vector<2x32xf32>
    %1104 = vector.extract_strided_slice %1101 {offsets = [0, 96], sizes = [2, 32], strides = [1, 1]} : vector<2x128xf32> to vector<2x32xf32>
    %1105 = vector.extract_strided_slice %1096 {offsets = [0, 64], sizes = [2, 32], strides = [1, 1]} : vector<2x128xf32> to vector<2x32xf32>
    %1106 = math.tanh %1105 : vector<2x32xf32>
    %1107 = arith.mulf %1102, %1106 : vector<2x32xf32>
    %1108 = arith.mulf %1103, %993 : vector<2x32xf32>
    %1109 = arith.addf %1107, %1108 : vector<2x32xf32>
    %cst_349 = arith.constant -3.000000e+00 : f32
    %cst_350 = arith.constant 3.000000e+00 : f32
    %1110 = vector.broadcast %cst_349 : f32 to vector<2x32xf32>
    %1111 = arith.maximumf %1110, %1109 : vector<2x32xf32>
    %1112 = vector.broadcast %cst_350 : f32 to vector<2x32xf32>
    %1113 = arith.minimumf %1112, %1111 : vector<2x32xf32>
    %1114 = math.tanh %1113 : vector<2x32xf32>
    %1115 = arith.mulf %1104, %1114 : vector<2x32xf32>
    %1116 = vector.extract_strided_slice %1093 {offsets = [0, 128], sizes = [2, 128], strides = [1, 1]} : vector<2x256xf32> to vector<2x128xf32>
    %1117 = vector.extract_strided_slice %1035 {offsets = [0, 384], sizes = [2, 128], strides = [1, 1]} : vector<2x512xf32> to vector<2x128xf32>
    %1118 = arith.addf %1116, %1117 : vector<2x128xf32>
    %1119 = arith.negf %1118 : vector<2x128xf32>
    %1120 = math.exp %1119 : vector<2x128xf32>
    %cst_351 = arith.constant 1.000000e+00 : f32
    %1121 = vector.broadcast %cst_351 : f32 to vector<2x128xf32>
    %1122 = arith.addf %1121, %1120 : vector<2x128xf32>
    %1123 = arith.divf %1121, %1122 : vector<2x128xf32>
    %1124 = vector.extract_strided_slice %1123 {offsets = [0, 0], sizes = [2, 32], strides = [1, 1]} : vector<2x128xf32> to vector<2x32xf32>
    %1125 = vector.extract_strided_slice %1123 {offsets = [0, 32], sizes = [2, 32], strides = [1, 1]} : vector<2x128xf32> to vector<2x32xf32>
    %1126 = vector.extract_strided_slice %1123 {offsets = [0, 96], sizes = [2, 32], strides = [1, 1]} : vector<2x128xf32> to vector<2x32xf32>
    %1127 = vector.extract_strided_slice %1118 {offsets = [0, 64], sizes = [2, 32], strides = [1, 1]} : vector<2x128xf32> to vector<2x32xf32>
    %1128 = math.tanh %1127 : vector<2x32xf32>
    %1129 = arith.mulf %1124, %1128 : vector<2x32xf32>
    %1130 = arith.mulf %1125, %1015 : vector<2x32xf32>
    %1131 = arith.addf %1129, %1130 : vector<2x32xf32>
    %cst_352 = arith.constant -3.000000e+00 : f32
    %cst_353 = arith.constant 3.000000e+00 : f32
    %1132 = vector.broadcast %cst_352 : f32 to vector<2x32xf32>
    %1133 = arith.maximumf %1132, %1131 : vector<2x32xf32>
    %1134 = vector.broadcast %cst_353 : f32 to vector<2x32xf32>
    %1135 = arith.minimumf %1134, %1133 : vector<2x32xf32>
    %1136 = math.tanh %1135 : vector<2x32xf32>
    %1137 = arith.mulf %1126, %1136 : vector<2x32xf32>
    %1138 = tpu.concatenate %1115, %1137 in 1 : vector<2x32xf32>, vector<2x32xf32> -> vector<2x64xf32>
    %c0_354 = arith.constant 0 : index
    %c0_355 = arith.constant 0 : index
    %1139 = vector.load %arg15[%c0_354, %c0_355] : memref<64x32xf32, #tpu.memory_space<vmem>>, vector<64x32xf32>
    %cst_356 = arith.constant dense<0.000000e+00> : vector<2x32xf32>
    %1140 = tpu.matmul %1138, %1139, %cst_356 {dimension_numbers = #tpu.dot_dimension_numbers<[1], [0], [0], [1], [0, 0, 1, 1], [], []>} : vector<2x64xf32>, vector<64x32xf32>, vector<2x32xf32> -> vector<2x32xf32>
    %cst_357 = arith.constant -3.000000e+00 : f32
    %cst_358 = arith.constant 3.000000e+00 : f32
    %1141 = vector.broadcast %cst_357 : f32 to vector<2x32xf32>
    %1142 = arith.maximumf %1141, %1140 : vector<2x32xf32>
    %1143 = vector.broadcast %cst_358 : f32 to vector<2x32xf32>
    %1144 = arith.minimumf %1143, %1142 : vector<2x32xf32>
    %1145 = vector.extract_strided_slice %1144 {offsets = [0, 0], sizes = [2, 16], strides = [1, 1]} : vector<2x32xf32> to vector<2x16xf32>
    %1146 = vector.extract_strided_slice %1144 {offsets = [0, 16], sizes = [2, 16], strides = [1, 1]} : vector<2x32xf32> to vector<2x16xf32>
    %c16_359 = arith.constant 16 : index
    %c0_360 = arith.constant 0 : index
    %1147 = vector.load %arg19[%c16_359, %c0_360] : memref<20x32xf32, #tpu.memory_space<vmem>>, vector<2x16xf32>
    tpu.vector_store %arg19[%c16_359, %c0_360], %1087 {strides = array<i32>} : memref<20x32xf32, #tpu.memory_space<vmem>>, vector<2x16xf32>,
    %c2_361 = arith.constant 2 : index
    %c16_362 = arith.constant 16 : index
    %1148 = vector.load %arg19[%c2_361, %c16_362] : memref<20x32xf32, #tpu.memory_space<vmem>>, vector<2x16xf32>
    tpu.vector_store %arg19[%c2_361, %c16_362], %1088 {strides = array<i32>} : memref<20x32xf32, #tpu.memory_space<vmem>>, vector<2x16xf32>,
    %1149 = arith.addf %1145, %1087 : vector<2x16xf32>
    %c16_363 = arith.constant 16 : index
    %c0_364 = arith.constant 0 : index
    %1150 = vector.load %arg20[%c16_363, %c0_364] : memref<20x32xf32, #tpu.memory_space<vmem>>, vector<2x16xf32>
    tpu.vector_store %arg20[%c16_363, %c0_364], %1149 {strides = array<i32>} : memref<20x32xf32, #tpu.memory_space<vmem>>, vector<2x16xf32>,
    %1151 = arith.addf %1146, %1088 : vector<2x16xf32>
    %c2_365 = arith.constant 2 : index
    %c16_366 = arith.constant 16 : index
    %1152 = vector.load %arg20[%c2_365, %c16_366] : memref<20x32xf32, #tpu.memory_space<vmem>>, vector<2x16xf32>
    tpu.vector_store %arg20[%c2_365, %c16_366], %1151 {strides = array<i32>} : memref<20x32xf32, #tpu.memory_space<vmem>>, vector<2x16xf32>,
    %1153 = tpu.concatenate %1087, %1088, %1145, %1146 in 1 : vector<2x16xf32>, vector<2x16xf32>, vector<2x16xf32>, vector<2x16xf32> -> vector<2x64xf32>
    %c0_367 = arith.constant 0 : index
    %c0_368 = arith.constant 0 : index
    %1154 = vector.load %arg11[%c0_367, %c0_368] : memref<64x512xf32, #tpu.memory_space<vmem>>, vector<64x512xf32>
    %cst_369 = arith.constant dense<0.000000e+00> : vector<2x512xf32>
    %1155 = tpu.matmul %1153, %1154, %cst_369 {dimension_numbers = #tpu.dot_dimension_numbers<[1], [0], [0], [1], [0, 0, 1, 1], [], []>} : vector<2x64xf32>, vector<64x512xf32>, vector<2x512xf32> -> vector<2x512xf32>
    %1156 = vector.extract_strided_slice %70 {offsets = [18, 0], sizes = [2, 128], strides = [1, 1]} : vector<20x256xf32> to vector<2x128xf32>
    %1157 = vector.extract_strided_slice %1155 {offsets = [0, 0], sizes = [2, 128], strides = [1, 1]} : vector<2x512xf32> to vector<2x128xf32>
    %1158 = arith.addf %1156, %1157 : vector<2x128xf32>
    %1159 = arith.negf %1158 : vector<2x128xf32>
    %1160 = math.exp %1159 : vector<2x128xf32>
    %cst_370 = arith.constant 1.000000e+00 : f32
    %1161 = vector.broadcast %cst_370 : f32 to vector<2x128xf32>
    %1162 = arith.addf %1161, %1160 : vector<2x128xf32>
    %1163 = arith.divf %1161, %1162 : vector<2x128xf32>
    %1164 = vector.extract_strided_slice %1163 {offsets = [0, 0], sizes = [2, 32], strides = [1, 1]} : vector<2x128xf32> to vector<2x32xf32>
    %1165 = vector.extract_strided_slice %1163 {offsets = [0, 32], sizes = [2, 32], strides = [1, 1]} : vector<2x128xf32> to vector<2x32xf32>
    %1166 = vector.extract_strided_slice %1163 {offsets = [0, 96], sizes = [2, 32], strides = [1, 1]} : vector<2x128xf32> to vector<2x32xf32>
    %1167 = vector.extract_strided_slice %1158 {offsets = [0, 64], sizes = [2, 32], strides = [1, 1]} : vector<2x128xf32> to vector<2x32xf32>
    %1168 = math.tanh %1167 : vector<2x32xf32>
    %1169 = arith.mulf %1164, %1168 : vector<2x32xf32>
    %1170 = arith.mulf %1165, %1055 : vector<2x32xf32>
    %1171 = arith.addf %1169, %1170 : vector<2x32xf32>
    %cst_371 = arith.constant -3.000000e+00 : f32
    %cst_372 = arith.constant 3.000000e+00 : f32
    %1172 = vector.broadcast %cst_371 : f32 to vector<2x32xf32>
    %1173 = arith.maximumf %1172, %1171 : vector<2x32xf32>
    %1174 = vector.broadcast %cst_372 : f32 to vector<2x32xf32>
    %1175 = arith.minimumf %1174, %1173 : vector<2x32xf32>
    %1176 = math.tanh %1175 : vector<2x32xf32>
    %1177 = arith.mulf %1166, %1176 : vector<2x32xf32>
    %1178 = vector.extract_strided_slice %70 {offsets = [0, 128], sizes = [2, 128], strides = [1, 1]} : vector<20x256xf32> to vector<2x128xf32>
    %1179 = vector.extract_strided_slice %1155 {offsets = [0, 128], sizes = [2, 128], strides = [1, 1]} : vector<2x512xf32> to vector<2x128xf32>
    %1180 = arith.addf %1178, %1179 : vector<2x128xf32>
    %1181 = arith.negf %1180 : vector<2x128xf32>
    %1182 = math.exp %1181 : vector<2x128xf32>
    %cst_373 = arith.constant 1.000000e+00 : f32
    %1183 = vector.broadcast %cst_373 : f32 to vector<2x128xf32>
    %1184 = arith.addf %1183, %1182 : vector<2x128xf32>
    %1185 = arith.divf %1183, %1184 : vector<2x128xf32>
    %1186 = vector.extract_strided_slice %1185 {offsets = [0, 0], sizes = [2, 32], strides = [1, 1]} : vector<2x128xf32> to vector<2x32xf32>
    %1187 = vector.extract_strided_slice %1185 {offsets = [0, 32], sizes = [2, 32], strides = [1, 1]} : vector<2x128xf32> to vector<2x32xf32>
    %1188 = vector.extract_strided_slice %1185 {offsets = [0, 96], sizes = [2, 32], strides = [1, 1]} : vector<2x128xf32> to vector<2x32xf32>
    %1189 = vector.extract_strided_slice %1180 {offsets = [0, 64], sizes = [2, 32], strides = [1, 1]} : vector<2x128xf32> to vector<2x32xf32>
    %1190 = math.tanh %1189 : vector<2x32xf32>
    %1191 = arith.mulf %1186, %1190 : vector<2x32xf32>
    %1192 = arith.mulf %1187, %1077 : vector<2x32xf32>
    %1193 = arith.addf %1191, %1192 : vector<2x32xf32>
    %cst_374 = arith.constant -3.000000e+00 : f32
    %cst_375 = arith.constant 3.000000e+00 : f32
    %1194 = vector.broadcast %cst_374 : f32 to vector<2x32xf32>
    %1195 = arith.maximumf %1194, %1193 : vector<2x32xf32>
    %1196 = vector.broadcast %cst_375 : f32 to vector<2x32xf32>
    %1197 = arith.minimumf %1196, %1195 : vector<2x32xf32>
    %1198 = math.tanh %1197 : vector<2x32xf32>
    %1199 = arith.mulf %1188, %1198 : vector<2x32xf32>
    %1200 = tpu.concatenate %1177, %1199 in 1 : vector<2x32xf32>, vector<2x32xf32> -> vector<2x64xf32>
    %c0_376 = arith.constant 0 : index
    %c0_377 = arith.constant 0 : index
    %1201 = vector.load %arg12[%c0_376, %c0_377] : memref<64x32xf32, #tpu.memory_space<vmem>>, vector<64x32xf32>
    %cst_378 = arith.constant dense<0.000000e+00> : vector<2x32xf32>
    %1202 = tpu.matmul %1200, %1201, %cst_378 {dimension_numbers = #tpu.dot_dimension_numbers<[1], [0], [0], [1], [0, 0, 1, 1], [], []>} : vector<2x64xf32>, vector<64x32xf32>, vector<2x32xf32> -> vector<2x32xf32>
    %cst_379 = arith.constant -3.000000e+00 : f32
    %cst_380 = arith.constant 3.000000e+00 : f32
    %1203 = vector.broadcast %cst_379 : f32 to vector<2x32xf32>
    %1204 = arith.maximumf %1203, %1202 : vector<2x32xf32>
    %1205 = vector.broadcast %cst_380 : f32 to vector<2x32xf32>
    %1206 = arith.minimumf %1205, %1204 : vector<2x32xf32>
    %1207 = vector.extract_strided_slice %1206 {offsets = [0, 0], sizes = [2, 16], strides = [1, 1]} : vector<2x32xf32> to vector<2x16xf32>
    %1208 = vector.extract_strided_slice %1206 {offsets = [0, 16], sizes = [2, 16], strides = [1, 1]} : vector<2x32xf32> to vector<2x16xf32>
    %c0_381 = arith.constant 0 : index
    %c0_382 = arith.constant 0 : index
    %1209 = vector.load %arg13[%c0_381, %c0_382] : memref<32x256xf32, #tpu.memory_space<vmem>>, vector<32x256xf32>
    %cst_383 = arith.constant dense<0.000000e+00> : vector<2x256xf32>
    %1210 = tpu.matmul %1206, %1209, %cst_383 {dimension_numbers = #tpu.dot_dimension_numbers<[1], [0], [0], [1], [0, 0, 1, 1], [], []>} : vector<2x32xf32>, vector<32x256xf32>, vector<2x256xf32> -> vector<2x256xf32>
    %c0_384 = arith.constant 0 : index
    %c0_385 = arith.constant 0 : index
    %1211 = vector.load %arg14[%c0_384, %c0_385] : memref<1x256xf32, #tpu.memory_space<vmem>>, vector<1x256xf32>
    %1212 = vector.broadcast %1211 : vector<1x256xf32> to vector<2x256xf32>
    %1213 = arith.addf %1210, %1212 : vector<2x256xf32>
    %1214 = vector.extract_strided_slice %1213 {offsets = [0, 0], sizes = [2, 128], strides = [1, 1]} : vector<2x256xf32> to vector<2x128xf32>
    %1215 = vector.extract_strided_slice %1155 {offsets = [0, 256], sizes = [2, 128], strides = [1, 1]} : vector<2x512xf32> to vector<2x128xf32>
    %1216 = arith.addf %1214, %1215 : vector<2x128xf32>
    %1217 = arith.negf %1216 : vector<2x128xf32>
    %1218 = math.exp %1217 : vector<2x128xf32>
    %cst_386 = arith.constant 1.000000e+00 : f32
    %1219 = vector.broadcast %cst_386 : f32 to vector<2x128xf32>
    %1220 = arith.addf %1219, %1218 : vector<2x128xf32>
    %1221 = arith.divf %1219, %1220 : vector<2x128xf32>
    %1222 = vector.extract_strided_slice %1221 {offsets = [0, 0], sizes = [2, 32], strides = [1, 1]} : vector<2x128xf32> to vector<2x32xf32>
    %1223 = vector.extract_strided_slice %1221 {offsets = [0, 32], sizes = [2, 32], strides = [1, 1]} : vector<2x128xf32> to vector<2x32xf32>
    %1224 = vector.extract_strided_slice %1221 {offsets = [0, 96], sizes = [2, 32], strides = [1, 1]} : vector<2x128xf32> to vector<2x32xf32>
    %1225 = vector.extract_strided_slice %1216 {offsets = [0, 64], sizes = [2, 32], strides = [1, 1]} : vector<2x128xf32> to vector<2x32xf32>
    %1226 = math.tanh %1225 : vector<2x32xf32>
    %1227 = arith.mulf %1222, %1226 : vector<2x32xf32>
    %1228 = arith.mulf %1223, %1113 : vector<2x32xf32>
    %1229 = arith.addf %1227, %1228 : vector<2x32xf32>
    %cst_387 = arith.constant -3.000000e+00 : f32
    %cst_388 = arith.constant 3.000000e+00 : f32
    %1230 = vector.broadcast %cst_387 : f32 to vector<2x32xf32>
    %1231 = arith.maximumf %1230, %1229 : vector<2x32xf32>
    %1232 = vector.broadcast %cst_388 : f32 to vector<2x32xf32>
    %1233 = arith.minimumf %1232, %1231 : vector<2x32xf32>
    %1234 = math.tanh %1233 : vector<2x32xf32>
    %1235 = arith.mulf %1224, %1234 : vector<2x32xf32>
    %1236 = vector.extract_strided_slice %1213 {offsets = [0, 128], sizes = [2, 128], strides = [1, 1]} : vector<2x256xf32> to vector<2x128xf32>
    %1237 = vector.extract_strided_slice %1155 {offsets = [0, 384], sizes = [2, 128], strides = [1, 1]} : vector<2x512xf32> to vector<2x128xf32>
    %1238 = arith.addf %1236, %1237 : vector<2x128xf32>
    %1239 = arith.negf %1238 : vector<2x128xf32>
    %1240 = math.exp %1239 : vector<2x128xf32>
    %cst_389 = arith.constant 1.000000e+00 : f32
    %1241 = vector.broadcast %cst_389 : f32 to vector<2x128xf32>
    %1242 = arith.addf %1241, %1240 : vector<2x128xf32>
    %1243 = arith.divf %1241, %1242 : vector<2x128xf32>
    %1244 = vector.extract_strided_slice %1243 {offsets = [0, 0], sizes = [2, 32], strides = [1, 1]} : vector<2x128xf32> to vector<2x32xf32>
    %1245 = vector.extract_strided_slice %1243 {offsets = [0, 32], sizes = [2, 32], strides = [1, 1]} : vector<2x128xf32> to vector<2x32xf32>
    %1246 = vector.extract_strided_slice %1243 {offsets = [0, 96], sizes = [2, 32], strides = [1, 1]} : vector<2x128xf32> to vector<2x32xf32>
    %1247 = vector.extract_strided_slice %1238 {offsets = [0, 64], sizes = [2, 32], strides = [1, 1]} : vector<2x128xf32> to vector<2x32xf32>
    %1248 = math.tanh %1247 : vector<2x32xf32>
    %1249 = arith.mulf %1244, %1248 : vector<2x32xf32>
    %1250 = arith.mulf %1245, %1135 : vector<2x32xf32>
    %1251 = arith.addf %1249, %1250 : vector<2x32xf32>
    %cst_390 = arith.constant -3.000000e+00 : f32
    %cst_391 = arith.constant 3.000000e+00 : f32
    %1252 = vector.broadcast %cst_390 : f32 to vector<2x32xf32>
    %1253 = arith.maximumf %1252, %1251 : vector<2x32xf32>
    %1254 = vector.broadcast %cst_391 : f32 to vector<2x32xf32>
    %1255 = arith.minimumf %1254, %1253 : vector<2x32xf32>
    %1256 = math.tanh %1255 : vector<2x32xf32>
    %1257 = arith.mulf %1246, %1256 : vector<2x32xf32>
    %1258 = tpu.concatenate %1235, %1257 in 1 : vector<2x32xf32>, vector<2x32xf32> -> vector<2x64xf32>
    %c0_392 = arith.constant 0 : index
    %c0_393 = arith.constant 0 : index
    %1259 = vector.load %arg15[%c0_392, %c0_393] : memref<64x32xf32, #tpu.memory_space<vmem>>, vector<64x32xf32>
    %cst_394 = arith.constant dense<0.000000e+00> : vector<2x32xf32>
    %1260 = tpu.matmul %1258, %1259, %cst_394 {dimension_numbers = #tpu.dot_dimension_numbers<[1], [0], [0], [1], [0, 0, 1, 1], [], []>} : vector<2x64xf32>, vector<64x32xf32>, vector<2x32xf32> -> vector<2x32xf32>
    %cst_395 = arith.constant -3.000000e+00 : f32
    %cst_396 = arith.constant 3.000000e+00 : f32
    %1261 = vector.broadcast %cst_395 : f32 to vector<2x32xf32>
    %1262 = arith.maximumf %1261, %1260 : vector<2x32xf32>
    %1263 = vector.broadcast %cst_396 : f32 to vector<2x32xf32>
    %1264 = arith.minimumf %1263, %1262 : vector<2x32xf32>
    %1265 = vector.extract_strided_slice %1264 {offsets = [0, 0], sizes = [2, 16], strides = [1, 1]} : vector<2x32xf32> to vector<2x16xf32>
    %1266 = vector.extract_strided_slice %1264 {offsets = [0, 16], sizes = [2, 16], strides = [1, 1]} : vector<2x32xf32> to vector<2x16xf32>
    %c18_397 = arith.constant 18 : index
    %c0_398 = arith.constant 0 : index
    %1267 = vector.load %arg19[%c18_397, %c0_398] : memref<20x32xf32, #tpu.memory_space<vmem>>, vector<2x16xf32>
    tpu.vector_store %arg19[%c18_397, %c0_398], %1207 {strides = array<i32>} : memref<20x32xf32, #tpu.memory_space<vmem>>, vector<2x16xf32>,
    %c0_399 = arith.constant 0 : index
    %c16_400 = arith.constant 16 : index
    %1268 = vector.load %arg19[%c0_399, %c16_400] : memref<20x32xf32, #tpu.memory_space<vmem>>, vector<2x16xf32>
    tpu.vector_store %arg19[%c0_399, %c16_400], %1208 {strides = array<i32>} : memref<20x32xf32, #tpu.memory_space<vmem>>, vector<2x16xf32>,
    %1269 = arith.addf %1265, %1207 : vector<2x16xf32>
    %c18_401 = arith.constant 18 : index
    %c0_402 = arith.constant 0 : index
    %1270 = vector.load %arg20[%c18_401, %c0_402] : memref<20x32xf32, #tpu.memory_space<vmem>>, vector<2x16xf32>
    tpu.vector_store %arg20[%c18_401, %c0_402], %1269 {strides = array<i32>} : memref<20x32xf32, #tpu.memory_space<vmem>>, vector<2x16xf32>,
    %1271 = arith.addf %1266, %1208 : vector<2x16xf32>
    %c0_403 = arith.constant 0 : index
    %c16_404 = arith.constant 16 : index
    %1272 = vector.load %arg20[%c0_403, %c16_404] : memref<20x32xf32, #tpu.memory_space<vmem>>, vector<2x16xf32>
    tpu.vector_store %arg20[%c0_403, %c16_404], %1271 {strides = array<i32>} : memref<20x32xf32, #tpu.memory_space<vmem>>, vector<2x16xf32>,
    %1273 = tpu.concatenate %65, %65 in 1 : vector<20x16xf32>, vector<20x16xf32> -> vector<20x32xf32>
    %c0_405 = arith.constant 0 : index
    %1274 = memref.load %arg16[%c0_405] : memref<3xf32, #tpu.memory_space<smem>>
    %1275 = vector.broadcast %1274 : f32 to vector<20x32xf32>
    %1276 = arith.mulf %1275, %1273 : vector<20x32xf32>
    %c1 = arith.constant 1 : index
    %1277 = memref.load %arg16[%c1] : memref<3xf32, #tpu.memory_space<smem>>
    %c0_406 = arith.constant 0 : index
    %c0_407 = arith.constant 0 : index
    %1278 = vector.load %arg19[%c0_406, %c0_407] : memref<20x32xf32, #tpu.memory_space<vmem>>, vector<20x32xf32>
    %1279 = vector.broadcast %1277 : f32 to vector<20x32xf32>
    %1280 = arith.mulf %1279, %1278 : vector<20x32xf32>
    %1281 = arith.addf %1276, %1280 : vector<20x32xf32>
    %c2_408 = arith.constant 2 : index
    %1282 = memref.load %arg16[%c2_408] : memref<3xf32, #tpu.memory_space<smem>>
    %c0_409 = arith.constant 0 : index
    %c0_410 = arith.constant 0 : index
    %1283 = vector.load %arg20[%c0_409, %c0_410] : memref<20x32xf32, #tpu.memory_space<vmem>>, vector<20x32xf32>
    %1284 = vector.broadcast %1282 : f32 to vector<20x32xf32>
    %1285 = arith.mulf %1284, %1283 : vector<20x32xf32>
    %1286 = arith.addf %1281, %1285 : vector<20x32xf32>
    %c0_411 = arith.constant 0 : index
    %c0_412 = arith.constant 0 : index
    %1287 = vector.load %arg17[%c0_411, %c0_412] : memref<32x32xf32, #tpu.memory_space<vmem>>, vector<32x32xf32>
    %cst_413 = arith.constant dense<0.000000e+00> : vector<20x32xf32>
    %1288 = tpu.matmul %1286, %1287, %cst_413 {dimension_numbers = #tpu.dot_dimension_numbers<[1], [0], [0], [1], [0, 0, 1, 1], [], []>} : vector<20x32xf32>, vector<32x32xf32>, vector<20x32xf32> -> vector<20x32xf32>
    %c0_414 = arith.constant 0 : index
    %c0_415 = arith.constant 0 : index
    %1289 = vector.load %arg18[%c0_414, %c0_415] : memref<20x32xf32, #tpu.memory_space<vmem>>, vector<20x32xf32>
    tpu.vector_store %arg18[%c0_414, %c0_415], %1288 {strides = array<i32>} : memref<20x32xf32, #tpu.memory_space<vmem>>, vector<20x32xf32>,
    return
  }
}

</mosaic_0001>

<bundles_post_ra>
// kernel: elmo_embedding_forward.1
= control target key start
LH: loop header
LB: loop body
LE: loop exit
PB: predicated region body
PF: predicated region fallthrough
CT: control target
= control target key end

     0   :  { %s8362_s0 = inlined_call_operand.vmem [shape: f32[20,128], index: 0, kind: input, shape index: {}]   ;;  %s8363_s1 = inlined_call_operand.vmem [shape: f32[128,256], index: 1, kind: input, shape index: {}]   ;;  %s8364_s2 = inlined_call_operand.vmem [shape: f32[1,256], index: 2, kind: input, shape index: {}]   ;;  %s8365_s3 = inlined_call_operand.vmem [shape: f32[32,64], index: 3, kind: input, shape index: {}]   ;;  %s8366_s4 = inlined_call_operand.vmem [shape: f32[1,64], index: 4, kind: input, shape index: {}]   ;;  %s8367_s5 = inlined_call_operand.vmem [shape: f32[32,64], index: 5, kind: input, shape index: {}]   ;;  %s8368_s6 = inlined_call_operand.vmem [shape: f32[1,64], index: 6, kind: input, shape index: {}]   ;;  %s8369_s7 = inlined_call_operand.vmem [shape: f32[32,16], index: 7, kind: input, shape index: {}]   ;;  %s8370_s8 = inlined_call_operand.vmem [shape: f32[1,16], index: 8, kind: input, shape index: {}]   ;;  %s8371_s9 = inlined_call_operand.vmem [shape: f32[16,256], index: 9, kind: input, shape index: {}]   ;;  %s8372_s10 = inlined_call_operand.vmem [shape: f32[1,256], index: 10, kind: input, shape index: {}]   ;;  %s8373_s11 = inlined_call_operand.vmem [shape: f32[64,512], index: 11, kind: input, shape index: {}]   ;;  %s8374_s12 = inlined_call_operand.vmem [shape: f32[64,32], index: 12, kind: input, shape index: {}]   ;;  %s8375_s13 = inlined_call_operand.vmem [shape: f32[32,256], index: 13, kind: input, shape index: {}]   ;;  %s8376_s14 = inlined_call_operand.vmem [shape: f32[1,256], index: 14, kind: input, shape index: {}]   ;;  %s8377_s15 = inlined_call_operand.vmem [shape: f32[64,32], index: 15, kind: input, shape index: {}]   ;;  %s8378_s16 = inlined_call_operand.vmem [shape: f32[3], index: 16, kind: input, shape index: {}]   ;;  %s8379_s17 = inlined_call_operand.vmem [shape: f32[32,32], index: 17, kind: input, shape index: {}]   ;;  %s8380_s18 = inlined_call_operand.vmem [shape: f32[20,32], index: 18, kind: output, shape index: {}]  }
   0x1   :  { %8383 = sst [smem:[#allocation7_spill]] %s8362_s0 }
   0x2   :  { %8384 = sst [smem:[#allocation8_spill]] %s8363_s1 }
   0x3   :  { %8385 = sst [smem:[#allocation9_spill]] %s8364_s2 }
   0x4   :  { %23 = vsyncpa [#allocation5], 0  ;;  %s61_s29 = sshll.u32 %s8378_s16, 4  ;;  %s5789_s30 = smov [#allocation4]   ;;  %s62_s29 = int_to_ptr.vmem [resolvable:$true] %s61_s29 }
   0x5   :  { %64 = dma.vmem_to_smem %s62_s29, 16, %s5789_s30, [#allocation5]  }
   0x6   :  { %5787 = dma.done.wait [#allocation5], 16  }
   0x7   :  { %5788 = vsyncadd [#allocation5], 4294967280 }
   0x8   :  { %71 = sfence }
   0x9   :  { %s8386_s1 = sld [smem:[#allocation8_spill]]  ;;  %s5790_s29 = smov 96   ;;  %v252_v50 = vld [vmem:[%s8365_s3 + $0x18] sm:$0xff]  ;;  %v251_v51 = vld [vmem:[%s8365_s3 + $0x10] sm:$0xff]  ;;  %v250_v53 = vld [vmem:[%s8365_s3 + $0x8] sm:$0xff]  ;;  %vm257_vm0 = vcmask 261120  }
   0xa   :  { %s8387_s16 = sld [smem:[#allocation7_spill]]  ;;  %s5791_s30 = smov 32   ;;  %279 = vmatpush.msra.mxu2 %v252_v50  ;;  %5418 = vmatpush.msra.mxu3 %v252_v50  ;;  %v249_v54 = vld [vmem:[%s8365_s3] sm:$0xff] }
   0xb   :  { %s8388_s28 = sld [smem:[#allocation9_spill]]  ;;  %s5792_s0 = smov 64  }
   0xc   :  { %280 = vmatpush.msra.mxu2 %v251_v51  ;;  %5419 = vmatpush.msra.mxu3 %v251_v51  ;;  %s5413_s20 = sld [smem:[#allocation4 + $0x1]] }
   0xe   :  { %281 = vmatpush.msra.mxu2 %v250_v53  ;;  %5420 = vmatpush.msra.mxu3 %v250_v53 }
   0xf   :  { %v105_v0 = vld [vmem:[%s8386_s1 + $0xf0] sm:$0xff]  ;;  %v106_v1 = vld [vmem:[%s8386_s1 + $0xf8] sm:$0xff]  ;;  %v103_v2 = vld [vmem:[%s8386_s1 + $0xe0] sm:$0xff] }
  0x10   :  { %113 = vmatpush.msra.mxu0 %v105_v0  ;;  %139 = vmatpush.msra.mxu1 %v106_v1  ;;  %v104_v3 = vld [vmem:[%s8386_s1 + $0xe8] sm:$0xff]  ;;  %v101_v4 = vld [vmem:[%s8386_s1 + $0xd0] sm:$0xff]  ;;  %v102_v5 = vld [vmem:[%s8386_s1 + $0xd8] sm:$0xff] }
  0x11   :  { %v99_v6 = vld [vmem:[%s8386_s1 + $0xc0] sm:$0xff]  ;;  %v100_v7 = vld [vmem:[%s8386_s1 + $0xc8] sm:$0xff]  ;;  %v97_v8 = vld [vmem:[%s8386_s1 + $0xb0] sm:$0xff]  ;;  %282 = vmatpush.msra.mxu2 %v249_v54  ;;  %5421 = vmatpush.msra.mxu3 %v249_v54 }
  0x12   :  { %114 = vmatpush.msra.mxu0 %v103_v2  ;;  %140 = vmatpush.msra.mxu1 %v104_v3  ;;  %v98_v9 = vld [vmem:[%s8386_s1 + $0xb8] sm:$0xff]  ;;  %v95_v10 = vld [vmem:[%s8386_s1 + $0xa0] sm:$0xff]  ;;  %v96_v11 = vld [vmem:[%s8386_s1 + $0xa8] sm:$0xff] }
  0x13   :  { %v93_v12 = vld [vmem:[%s8386_s1 + $0x90] sm:$0xff]  ;;  %v94_v13 = vld [vmem:[%s8386_s1 + $0x98] sm:$0xff]  ;;  %v91_v14 = vld [vmem:[%s8386_s1 + $0x80] sm:$0xff] }
  0x14   :  { %115 = vmatpush.msra.mxu0 %v101_v4  ;;  %141 = vmatpush.msra.mxu1 %v102_v5  ;;  %v92_v15 = vld [vmem:[%s8386_s1 + $0x88] sm:$0xff]  ;;  %v89_v16 = vld [vmem:[%s8386_s1 + $0x70] sm:$0xff]  ;;  %v90_v17 = vld [vmem:[%s8386_s1 + $0x78] sm:$0xff] }
  0x15   :  { %v87_v18 = vld [vmem:[%s8386_s1 + $0x60] sm:$0xff]  ;;  %v88_v19 = vld [vmem:[%s8386_s1 + $0x68] sm:$0xff]  ;;  %v85_v20 = vld [vmem:[%s8386_s1 + $0x50] sm:$0xff] }
  0x16   :  { %116 = vmatpush.msra.mxu0 %v99_v6  ;;  %142 = vmatpush.msra.mxu1 %v100_v7  ;;  %v86_v21 = vld [vmem:[%s8386_s1 + $0x58] sm:$0xff]  ;;  %v83_v22 = vld [vmem:[%s8386_s1 + $0x40] sm:$0xff]  ;;  %v84_v23 = vld [vmem:[%s8386_s1 + $0x48] sm:$0xff] }
  0x17   :  { %v81_v24 = vld [vmem:[%s8386_s1 + $0x30] sm:$0xff]  ;;  %v82_v25 = vld [vmem:[%s8386_s1 + $0x38] sm:$0xff]  ;;  %v79_v26 = vld [vmem:[%s8386_s1 + $0x20] sm:$0xff] }
  0x18   :  { %117 = vmatpush.msra.mxu0 %v97_v8  ;;  %143 = vmatpush.msra.mxu1 %v98_v9  ;;  %v80_v27 = vld [vmem:[%s8386_s1 + $0x28] sm:$0xff]  ;;  %v77_v28 = vld [vmem:[%s8386_s1 + $0x10] sm:$0xff]  ;;  %v78_v29 = vld [vmem:[%s8386_s1 + $0x18] sm:$0xff] }
  0x19   :  { %v75_v30 = vld [vmem:[%s8386_s1] sm:$0xff]  ;;  %v76_v31 = vld [vmem:[%s8386_s1 + $0x8] sm:$0xff]  ;;  %v74_v34 = vld [vmem:[%s8387_s16 + $0x10] sm:$0xf] }
  0x1a   :  { %118 = vmatpush.msra.mxu0 %v95_v10  ;;  %144 = vmatpush.msra.mxu1 %v96_v11  ;;  %v72_v32 = vld [vmem:[%s8387_s16] sm:$0xff]  ;;  %v73_v33 = vld [vmem:[%s8387_s16 + $0x8] sm:$0xff] }
  0x1b   :  { %v107_v35 = vld [vmem:[%s8388_s28] sm:$0x3] }
  0x1c   :  { %119 = vmatpush.msra.mxu0 %v93_v12  ;;  %145 = vmatpush.msra.mxu1 %v94_v13  ;;  %v109_v36 = vperm.slane %v107_v35, 0  ;;  %v110_v37 = vperm.slane %v107_v35, 1 }
  0x1e   :  { %120 = vmatpush.msra.mxu0 %v91_v14  ;;  %146 = vmatpush.msra.mxu1 %v92_v15 }
  0x20   :  { %121 = vmatpush.msra.mxu0 %v89_v16  ;;  %147 = vmatpush.msra.mxu1 %v90_v17 }
  0x22   :  { %122 = vmatpush.msra.mxu0 %v87_v18  ;;  %148 = vmatpush.msra.mxu1 %v88_v19 }
  0x24   :  { %123 = vmatpush.msra.mxu0 %v85_v20  ;;  %149 = vmatpush.msra.mxu1 %v86_v21 }
  0x26   :  { %124 = vmatpush.msra.mxu0 %v83_v22  ;;  %150 = vmatpush.msra.mxu1 %v84_v23 }
  0x28   :  { %125 = vmatpush.msra.mxu0 %v81_v24  ;;  %151 = vmatpush.msra.mxu1 %v82_v25 }
  0x2a   :  { %126 = vmatpush.msra.mxu0 %v79_v26  ;;  %152 = vmatpush.msra.mxu1 %v80_v27 }
  0x2c   :  { %127 = vmatpush.msra.mxu0 %v77_v28  ;;  %153 = vmatpush.msra.mxu1 %v78_v29 }
  0x2e   :  { %128 = vmatpush.msra.mxu0 %v75_v30  ;;  %154 = vmatpush.msra.mxu1 %v76_v31 }
  0x2f   :  { %129 = vmatmul.f32.vlgmr.msra.gmra.mxu0 %v72_v32  ;;  %155 = vmatmul.f32.vlgmr.msra.gmra.mxu1 %v72_v32  ;;  %v5428_v32 = vld [vmem:[%s8366_s4] ss:$0 sm:$0xff] }
  0x37   :  { %132 = vmatmul.f32.gmra.mxu0 %v73_v33  ;;  %158 = vmatmul.f32.gmra.mxu1 %v73_v33 }
  0x3f   :  { %135 = vmatmul.f32.gmra.mxu0 %v74_v34  ;;  %161 = vmatmul.f32.gmra.mxu1 %v74_v34 }
  0xac   :  { %v130_v38 = vpop.f32.mrf.mxu0  ;;  %v156_v39 = vpop.f32.mrf.mxu1 }
  0xad   :  { %v131_v40 = vadd.f32 %v130_v38, %v109_v36  ;;  %v157_v41 = vadd.f32 %v156_v39, %v110_v37 }
  0xaf   :  { %210 = vrot.lane.b32.xlu2 %v157_v41, %s5790_s29  ;;  %192 = vrot.lane.b32.xlu1 %v131_v40, %s5791_s30 }
  0xb0   :  { %168 = vrot.lane.b32.xlu0 %v131_v40, %s5790_s29 }
  0xb4   :  { %v133_v42 = vpop.f32.mrf.mxu0  ;;  %v159_v45 = vpop.f32.mrf.mxu1 }
  0xb5   :  { %v134_v43 = vadd.f32 %v133_v42, %v109_v36  ;;  %v160_v47 = vadd.f32 %v159_v45, %v110_v37 }
  0xb7   :  { %234 = vrot.lane.b32.xlu2 %v157_v41, %s5791_s30  ;;  %170 = vrot.lane.b32.xlu1 %v134_v43, %s5790_s29 }
  0xb8   :  { %180 = vrot.lane.b32.xlu0 %v131_v40, %s5792_s0 }
  0xbc   :  { %v136_v44 = vpop.f32.mrf.mxu0  ;;  %v162_v48 = vpop.f32.mrf.mxu1 }
  0xbd   :  { %v6010_v46 = vadd.f32 %v136_v44, %v109_v36  ;;  %v163_v49 = vadd.f32 %v162_v48, %v110_v37 }
  0xbf   :  { %182 = vrot.lane.b32.xlu2 %v134_v43, %s5792_s0  ;;  %194 = vrot.lane.b32.xlu1 %v134_v43, %s5791_s30 }
  0xc0   :  { %222 = vrot.lane.b32.xlu0 %v157_v41, %s5792_s0 }
  0xc7   :  { %184 = vrot.lane.b32.xlu2 %v6010_v46, %s5792_s0  ;;  %212 = vrot.lane.b32.xlu1 %v160_v47, %s5790_s29 }
  0xc8   :  { %224 = vrot.lane.b32.xlu0 %v160_v47, %s5792_s0 }
  0xcf   :  { %236 = vrot.lane.b32.xlu2 %v160_v47, %s5791_s30  ;;  %196 = vrot.lane.b32.xlu1 %v6010_v46, %s5791_s30 }
  0xd0   :  { %172 = vrot.lane.b32.xlu0 %v6010_v46, %s5790_s29 }
  0xd7   :  { %226 = vrot.lane.b32.xlu1 %v163_v49, %s5792_s0  ;;  %238 = vrot.lane.b32.xlu2 %v163_v49, %s5791_s30 }
  0xd8   :  { %214 = vrot.lane.b32.xlu0 %v163_v49, %s5790_s29 }
 0x109   :  { %v211_v52 = vpop.permute.xlu2 %210 }
 0x111   :  { %v235_v55 = vpop.permute.xlu2 %234 }
 0x119   :  { %v183_v58 = vpop.permute.xlu2 %182 }
 0x121   :  { %v193_v56 = vpop.permute.xlu1 %192  ;;  %v185_v6 = vpop.permute.xlu2 %184 }
 0x122   :  { %v169_v57 = vpop.permute.xlu0 %168 }
 0x123   :  { %v177_v59 = vmax.f32 %v131_v40, %v169_v57 }
 0x129   :  { %v171_v60 = vpop.permute.xlu1 %170  ;;  %v237_v16 = vpop.permute.xlu2 %236 }
 0x12a   :  { %v181_v61 = vpop.permute.xlu0 %180  ;;  %v178_v0 = vmax.f32 %v134_v43, %v171_v60 }
 0x12b   :  { %v189_v62 = vmax.f32 %v177_v59, %v181_v61 }
 0x12c   :  { %v190_v4 = vmax.f32 %v178_v0, %v183_v58 }
 0x12d   :  { %v201_v63 = vmax.f32 %v189_v62, %v193_v56 }
 0x12f   :  { %v204_v1 = vmax.f32 %v201_v63, %v157_v41 }
 0x131   :  { %v195_v2 = vpop.permute.xlu1 %194  ;;  %v219_v3 = vmax.f32 %v204_v1, %v211_v52  ;;  %v239_v28 = vpop.permute.xlu2 %238 }
 0x132   :  { %v223_v5 = vpop.permute.xlu0 %222  ;;  %v202_v8 = vmax.f32 %v190_v4, %v195_v2 }
 0x133   :  { %v231_v7 = vmax.f32 %v219_v3, %v223_v5 }
 0x134   :  { %v205_v11 = vmax.f32 %v202_v8, %v160_v47 }
 0x135   :  { %v243_v9 = vmax.f32 %v231_v7, %v235_v55 }
 0x137   :  { %v246_v10 = vmax.f32 %v243_v9, 0.0 }
 0x139   :  { %353 = vrot.lane.b32.xlu0 %v246_v10, %s5791_s30  ;;  %5216 = vmatmul.msk.f32.vlgmr.msra.gmra.mxu2 %vm257_vm0, %v246_v10  ;;  %v213_v12 = vpop.permute.xlu1 %212 }
 0x13a   :  { %v220_v13 = vmax.f32 %v205_v11, %v213_v12  ;;  %v225_v14 = vpop.permute.xlu0 %224 }
 0x13c   :  { %v232_v15 = vmax.f32 %v220_v13, %v225_v14 }
 0x13e   :  { %v244_v17 = vmax.f32 %v232_v15, %v237_v16 }
 0x140   :  { %v247_v18 = vmax.f32 %v244_v17, 0.0 }
 0x141   :  { %v197_v19 = vpop.permute.xlu1 %196 }
 0x142   :  { %v173_v20 = vpop.permute.xlu0 %172  ;;  %355 = vrot.lane.b32.xlu2 %v247_v18, %s5791_s30  ;;  %5217 = vmatmul.msk.f32.vlgmr.msra.gmra.mxu3 %vm257_vm0, %v247_v18 }
 0x143   :  { %v179_v21 = vmax.f32 %v6010_v46, %v173_v20 }
 0x145   :  { %v191_v22 = vmax.f32 %v179_v21, %v185_v6 }
 0x147   :  { %v203_v23 = vmax.f32 %v191_v22, %v197_v19 }
 0x149   :  { %v206_v24 = vmax.f32 %v203_v23, %v163_v49  ;;  %v227_v26 = vpop.permute.xlu1 %226 }
 0x14a   :  { %v215_v25 = vpop.permute.xlu0 %214 }
 0x14b   :  { %v221_v27 = vmax.f32 %v206_v24, %v215_v25 }
 0x14d   :  { %v233_v29 = vmax.f32 %v221_v27, %v227_v26 }
 0x14f   :  { %v245_v30 = vmax.f32 %v233_v29, %v239_v28 }
 0x151   :  { %v248_v31 = vmax.f32 %v245_v30, 0.0 }
 0x153   :  { %5218 = vmatmul.msk.f32.gmra.mxu3 %vm257_vm0, %v248_v31 }
 0x19c   :  { %v356_v6 = vpop.permute.xlu2 %355 }
 0x1ab   :  { %v354_v12 = vpop.permute.xlu0 %353 }
 0x1bc   :  { %v284_v33 = vpop.f32.mrf.mxu2 }
 0x1bd   :  { %v285_v34 = vadd.f32 %v5428_v32, %v284_v33 }
 0x1bf   :  { %v293_v35 = vmax.f32 %v285_v34, 0.0  ;;  %v5219_v42 = vmul.f32 -1.442695, %v285_v34 }
 0x1c1   :  { %371 = vrot.lane.b32.xlu1 %v293_v35, %s5791_s30  ;;  %5431 = vpow2.f32 %v5219_v42  ;;  %v389_v35 = vld [vmem:[%s8367_s5 + $0x18] sm:$0xff]  ;;  %v5429_v42 = vld [vmem:[%s8368_s6] ss:$0 sm:$0xff] }
 0x1c2   :  { %421 = vmatpush.msrb.mxu3 %v389_v35 }
 0x1c5   :  { %v287_v36 = vpop.f32.mrf.mxu3 }
 0x1c6   :  { %v288_v37 = vadd.f32 %v5428_v32, %v287_v36  ;;  %v388_v36 = vld [vmem:[%s8367_s5 + $0x10] sm:$0xff] }
 0x1c7   :  { %v5432_v45 = vpop.eup %5431  ;;  %422 = vmatpush.msrb.mxu3 %v388_v36 }
 0x1c8   :  { %v294_v38 = vmax.f32 %v288_v37, 0.0  ;;  %v5220_v44 = vmul.f32 -1.442695, %v288_v37  ;;  %v305_v46 = vadd.f32 1.0, %v5432_v45  ;;  %v387_v37 = vld [vmem:[%s8367_s5 + $0x8] sm:$0xff] }
 0x1c9   :  { %357 = vrot.lane.b32.xlu1 %v248_v31, %s5791_s30  ;;  %423 = vmatpush.msrb.mxu3 %v387_v37 }
 0x1ca   :  { %373 = vrot.lane.b32.xlu0 %v294_v38, %s5791_s30  ;;  %v319_v61 = vand.u32 2147483648, %v305_v46  ;;  %vm313_vm2 = vweird.f32 %v305_v46  ;;  %v317_v63 = vand.u32 2147483647, %v305_v46  ;;  %v386_v38 = vld [vmem:[%s8367_s5] sm:$0xff] }
 0x1cb   :  { %424 = vmatpush.msrb.mxu3 %v386_v38 }
 0x1cc   :  { %v320_v2 = vor.u32 1.1754944e-38, %v319_v61  ;;  %vm318_vm4 = vcmp.eq.f32.partialorder %v317_v63, 8.507059e+37 }
 0x1d6   :  { %v290_v39 = vpop.f32.mrf.mxu3 }
 0x1d7   :  { %v291_v40 = vadd.f32 %v5428_v32, %v290_v39 }
 0x1d9   :  { %v295_v41 = vmax.f32 %v291_v40, 0.0  ;;  %v5221_v43 = vmul.f32 -1.442695, %v291_v40 }
 0x1db   :  { %375 = vrot.lane.b32.xlu2 %v295_v41, %s5791_s30  ;;  %5433 = vpow2.f32 %v5221_v43 }
 0x1dc   :  { %5435 = vpow2.f32 %v5220_v44 }
 0x1dd   :  { %5437 = vrcp.f32 %v305_v46 }
 0x1e1   :  { %v5434_v47 = vpop.eup %5433 }
 0x1e2   :  { %v5436_v48 = vpop.eup %5435  ;;  %v307_v49 = vadd.f32 1.0, %v5434_v47 }
 0x1e3   :  { %v306_v50 = vadd.f32 1.0, %v5436_v48  ;;  %v5438_v51 = vpop.eup %5437 }
 0x1e4   :  { %5439 = vrcp.f32 %v307_v49  ;;  %v309_v52 = vmul.f32 %v5438_v51, %v305_v46  ;;  %vm314_vm1 = vweird.f32 %v5438_v51  ;;  %v349_v7 = vand.u32 2147483648, %v307_v49 }
 0x1e5   :  { %5441 = vrcp.f32 %v306_v50  ;;  %vm315_vm3 = vmor %vm313_vm2, %vm314_vm1  ;;  %vm343_vm7 = vweird.f32 %v307_v49  ;;  %v347_v10 = vand.u32 2147483647, %v307_v49  ;;  %v334_v11 = vand.u32 2147483648, %v306_v50 }
 0x1e6   :  { %v310_v53 = vsub.f32 1.0, %v309_v52  ;;  %vm328_vm9 = vweird.f32 %v306_v50  ;;  %v332_v14 = vand.u32 2147483647, %v306_v50  ;;  %v350_v18 = vor.u32 1.1754944e-38, %v349_v7 }
 0x1e7   :  { %vm348_vm11 = vcmp.eq.f32.partialorder %v347_v10, 8.507059e+37  ;;  %v335_v21 = vor.u32 1.1754944e-38, %v334_v11 }
 0x1e8   :  { %v311_v56 = vmul.f32 %v5438_v51, %v310_v53  ;;  %vm333_vm12 = vcmp.eq.f32.partialorder %v332_v14, 8.507059e+37 }
 0x1ea   :  { %v5440_v54 = vpop.eup %5439  ;;  %v312_v59 = vadd.f32 %v5438_v51, %v311_v56 }
 0x1eb   :  { %v5442_v55 = vpop.eup %5441  ;;  %v339_v57 = vmul.f32 %v5440_v54, %v307_v49  ;;  %vm344_vm5 = vweird.f32 %v5440_v54 }
 0x1ec   :  { %v324_v58 = vmul.f32 %v5442_v55, %v306_v50  ;;  %v316_v0 = vsel %vm315_vm3, %v5438_v51, %v312_v59  ;;  %vm329_vm6 = vweird.f32 %v5442_v55  ;;  %vm345_vm8 = vmor %vm343_vm7, %vm344_vm5 }
 0x1ed   :  { %v340_v60 = vsub.f32 1.0, %v339_v57  ;;  %v321_v4 = vsel %vm318_vm4, %v320_v2, %v316_v0  ;;  %vm330_vm10 = vmor %vm328_vm9, %vm329_vm6 }
 0x1ee   :  { %v325_v62 = vsub.f32 1.0, %v324_v58  ;;  %v365_v9 = vsub.f32 1.0, %v321_v4  ;;  %v362_v15 = vmul.f32 %v354_v12, %v321_v4 }
 0x1ef   :  { %v341_v1 = vmul.f32 %v5440_v54, %v340_v60 }
 0x1f0   :  { %v326_v3 = vmul.f32 %v5442_v55, %v325_v62 }
 0x1f1   :  { %v342_v5 = vadd.f32 %v5440_v54, %v341_v1 }
 0x1f2   :  { %v327_v8 = vadd.f32 %v5442_v55, %v326_v3 }
 0x1f3   :  { %v346_v17 = vsel %vm345_vm8, %v5440_v54, %v342_v5 }
 0x1f4   :  { %v331_v19 = vsel %vm330_vm10, %v5442_v55, %v327_v8  ;;  %v351_v22 = vsel %vm348_vm11, %v350_v18, %v346_v17  ;;  %vm578_vm10 = vcmask 130048  }
 0x1f5   :  { %v336_v23 = vsel %vm333_vm12, %v335_v21, %v331_v19  ;;  %v367_v25 = vsub.f32 1.0, %v351_v22 }
 0x1f6   :  { %v366_v27 = vsub.f32 1.0, %v336_v23  ;;  %v363_v31 = vmul.f32 %v356_v6, %v336_v23 }
 0x233   :  { %v372_v13 = vpop.permute.xlu1 %371 }
 0x234   :  { %v380_v16 = vmul.f32 %v372_v13, %v365_v9 }
 0x235   :  { %v376_v24 = vpop.permute.xlu2 %375 }
 0x236   :  { %v6049_v20 = vadd.f32 %v380_v16, %v362_v15  ;;  %v382_v28 = vmul.f32 %v376_v24, %v367_v25 }
 0x238   :  { %397 = vrot.lane.b32.xlu0 %v6049_v20, %s5790_s29 }
 0x23b   :  { %v358_v26 = vpop.permute.xlu1 %357 }
 0x23c   :  { %v364_v29 = vmul.f32 %v358_v26, %v351_v22  ;;  %v374_v30 = vpop.permute.xlu0 %373 }
 0x23d   :  { %v381_v32 = vmul.f32 %v374_v30, %v366_v27 }
 0x23e   :  { %v6053_v33 = vadd.f32 %v382_v28, %v364_v29 }
 0x23f   :  { %v6055_v34 = vadd.f32 %v381_v32, %v363_v31 }
 0x240   :  { %401 = vrot.lane.b32.xlu2 %v6053_v33, %s5790_s29 }
 0x241   :  { %399 = vrot.lane.b32.xlu1 %v6055_v34, %s5790_s29 }
 0x29a   :  { %v402_v41 = vpop.permute.xlu2 %401 }
 0x2aa   :  { %v398_v39 = vpop.permute.xlu0 %397 }
 0x2ab   :  { %5222 = vmatmul.msk.f32.vlgmr.msrb.gmra.mxu3 %vm257_vm0, %v398_v39 }
 0x2b3   :  { %v400_v40 = vpop.permute.xlu1 %399 }
 0x2b4   :  { %5223 = vmatmul.msk.f32.gmra.mxu3 %vm257_vm0, %v400_v40 }
 0x2bc   :  { %5224 = vmatmul.msk.f32.gmra.mxu3 %vm257_vm0, %v402_v41 }
 0x32e   :  { %v426_v43 = vpop.f32.mrf.mxu3 }
 0x32f   :  { %v427_v44 = vadd.f32 %v5429_v42, %v426_v43 }
 0x331   :  { %v435_v45 = vmax.f32 %v427_v44, 0.0  ;;  %v5225_v53 = vmul.f32 -1.442695, %v427_v44  ;;  %v521_v44 = vld [vmem:[%s8369_s7 + $0x10] sm:$0xff] }
 0x333   :  { %504 = vrot.lane.b32.xlu0 %v435_v45, %s5791_s30  ;;  %v520_v45 = vld [vmem:[%s8369_s7 + $0x8] sm:$0xff] }
 0x337   :  { %v429_v46 = vpop.f32.mrf.mxu3 }
 0x338   :  { %v430_v47 = vadd.f32 %v5429_v42, %v429_v46  ;;  %v571_v46 = vld [vmem:[%s8371_s9 + $0x18] sm:$0xff] }
 0x339   :  { %628 = vmatpush.msrb.mxu0 %v571_v46 }
 0x33a   :  { %v436_v48 = vmax.f32 %v430_v47, 0.0  ;;  %v5226_v56 = vmul.f32 -1.442695, %v430_v47  ;;  %v6106_v47 = vld [vmem:[%s8373_s11 + $0xe8] sm:$0xff] }
 0x33c   :  { %506 = vrot.lane.b32.xlu1 %v436_v48, %s5791_s30  ;;  %v569_v48 = vld [vmem:[%s8371_s9 + $0x8] sm:$0xff] }
 0x33d   :  { %629 = vmatpush.msrb.mxu0 %v569_v48 }
 0x33f   :  { %v432_v49 = vpop.f32.mrf.mxu3 }
 0x340   :  { %v433_v50 = vadd.f32 %v5429_v42, %v432_v49  ;;  %v6115_v49 = vld [vmem:[%s8373_s11 + $0xc8] sm:$0xff] }
 0x342   :  { %v437_v51 = vmax.f32 %v433_v50, 0.0  ;;  %v5227_v52 = vmul.f32 -1.442695, %v433_v50  ;;  %v570_v50 = vld [vmem:[%s8371_s9 + $0x10] sm:$0xff] }
 0x343   :  { %602 = vmatpush.msra.mxu3 %v570_v50 }
 0x344   :  { %508 = vrot.lane.b32.xlu2 %v437_v51, %s5791_s30  ;;  %5443 = vpow2.f32 %v5227_v52  ;;  %v6123_v51 = vld [vmem:[%s8373_s11 + $0xe0] sm:$0xff]  ;;  %v6129_v52 = vld [vmem:[%s8373_s11 + $0xa8] sm:$0xff] }
 0x345   :  { %5445 = vpow2.f32 %v5225_v53  ;;  %684 = vmatpush.msrb.mxu1 %v6123_v51  ;;  %v6134_v53 = vld [vmem:[%s8373_s11 + $0xc0] sm:$0xff] }
 0x347   :  { %685 = vmatpush.msrb.mxu1 %v6134_v53 }
 0x34a   :  { %v5444_v54 = vpop.eup %5443 }
 0x34b   :  { %v449_v55 = vadd.f32 1.0, %v5444_v54  ;;  %v5446_v57 = vpop.eup %5445 }
 0x34c   :  { %v447_v58 = vadd.f32 1.0, %v5446_v57  ;;  %v6145_v57 = vld [vmem:[%s8373_s11 + $0xa0] sm:$0xff] }
 0x34d   :  { %5447 = vrcp.f32 %v449_v55  ;;  %v491_v6 = vand.u32 2147483648, %v449_v55  ;;  %vm485_vm14 = vweird.f32 %v449_v55  ;;  %v489_v7 = vand.u32 2147483647, %v449_v55  ;;  %686 = vmatpush.msrb.mxu1 %v6145_v57 }
 0x34e   :  { %5449 = vpow2.f32 %v5226_v56  ;;  %v461_v14 = vand.u32 2147483648, %v447_v58  ;;  %vm455_vm3 = vweird.f32 %v447_v58  ;;  %v459_v16 = vand.u32 2147483647, %v447_v58 }
 0x34f   :  { %5451 = vrcp.f32 %v447_v58  ;;  %v492_v11 = vor.u32 1.1754944e-38, %v491_v6  ;;  %vm490_vm1 = vcmp.eq.f32.partialorder %v489_v7, 8.507059e+37  ;;  %v5430_v6 = vld [vmem:[%s8370_s8] ss:$0 sm:$0xff]  ;;  %s5141_s8 = sld [smem:[#allocation4]] }
 0x350   :  { %v462_v23 = vor.u32 1.1754944e-38, %v461_v14  ;;  %vm460_vm5 = vcmp.eq.f32.partialorder %v459_v16, 8.507059e+37 }
 0x353   :  { %v5448_v59 = vpop.eup %5447 }
 0x354   :  { %v5450_v60 = vpop.eup %5449  ;;  %v481_v61 = vmul.f32 %v5448_v59, %v449_v55  ;;  %vm486_vm13 = vweird.f32 %v5448_v59 }
 0x355   :  { %v448_v62 = vadd.f32 1.0, %v5450_v60  ;;  %v5452_v63 = vpop.eup %5451  ;;  %vm487_vm15 = vmor %vm485_vm14, %vm486_vm13  ;;  %v6159_v60 = vld [vmem:[%s8373_s11 + $0x80] sm:$0xff] }
 0x356   :  { %v482_v0 = vsub.f32 1.0, %v481_v61  ;;  %v451_v1 = vmul.f32 %v5452_v63, %v447_v58  ;;  %vm456_vm2 = vweird.f32 %v5452_v63  ;;  %v6151_v58 = vld [vmem:[%s8373_s11 + $0x88] sm:$0xff]  ;;  %687 = vmatpush.msrb.mxu1 %v6159_v60 }
 0x357   :  { %5453 = vrcp.f32 %v448_v62  ;;  %vm457_vm4 = vmor %vm455_vm3, %vm456_vm2  ;;  %v476_v29 = vand.u32 2147483648, %v448_v62  ;;  %vm470_vm7 = vweird.f32 %v448_v62  ;;  %v474_v31 = vand.u32 2147483647, %v448_v62  ;;  %v6166_v61 = vld [vmem:[%s8373_s11 + $0x68] sm:$0xff] }
 0x358   :  { %v483_v2 = vmul.f32 %v5448_v59, %v482_v0  ;;  %v452_v3 = vsub.f32 1.0, %v451_v1  ;;  %v6182_v0 = vld [vmem:[%s8373_s11 + $0x48] sm:$0xff] }
 0x359   :  { %v477_v37 = vor.u32 1.1754944e-38, %v476_v29  ;;  %vm475_vm9 = vcmp.eq.f32.partialorder %v474_v31, 8.507059e+37  ;;  %v6188_v1 = vld [vmem:[%s8373_s11 + $0x28] sm:$0xff] }
 0x35a   :  { %v484_v4 = vadd.f32 %v5448_v59, %v483_v2  ;;  %v453_v8 = vmul.f32 %v5452_v63, %v452_v3  ;;  %v6194_v2 = vld [vmem:[%s8373_s11 + $0x20] sm:$0xff] }
 0x35b   :  { %v6202_v3 = vld [vmem:[%s8373_s11] sm:$0xff] }
 0x35c   :  { %v488_v9 = vsel %vm487_vm15, %v5448_v59, %v484_v4  ;;  %v454_v13 = vadd.f32 %v5452_v63, %v453_v8  ;;  %v568_v59 = vld [vmem:[%s8371_s9] sm:$0xff]  ;;  %v6207_v4 = vld [vmem:[%s8373_s11 + $0x8] sm:$0xff] }
 0x35d   :  { %v5454_v5 = vpop.eup %5453  ;;  %v493_v12 = vsel %vm490_vm1, %v492_v11, %v488_v9  ;;  %603 = vmatpush.msra.mxu3 %v568_v59 }
 0x35e   :  { %v466_v10 = vmul.f32 %v5454_v5, %v448_v62  ;;  %v500_v17 = vsub.f32 1.0, %v493_v12  ;;  %v458_v19 = vsel %vm457_vm4, %v5452_v63, %v454_v13  ;;  %v497_v21 = vmul.f32 %v493_v12, %v6053_v33  ;;  %v6171_v62 = vld [vmem:[%s8373_s11 + $0x60] sm:$0xff] }
 0x35f   :  { %v463_v26 = vsel %vm460_vm5, %v462_v23, %v458_v19  ;;  %vm471_vm6 = vweird.f32 %v5454_v5  ;;  %v6177_v63 = vld [vmem:[%s8373_s11 + $0x40] sm:$0xff]  ;;  %688 = vmatpush.msrb.mxu1 %v6171_v62  ;;  %vm672_vm4 = vcmask 523264   ;;  %vm1061_vm5 = vcmask 123904  }
 0x360   :  { %v467_v15 = vsub.f32 1.0, %v466_v10  ;;  %v498_v28 = vsub.f32 1.0, %v463_v26  ;;  %v495_v32 = vmul.f32 %v463_v26, %v6049_v20  ;;  %vm472_vm8 = vmor %vm470_vm7, %vm471_vm6  ;;  %v522_v20 = vld [vmem:[%s8369_s7 + $0x18] sm:$0xff]  ;;  %v572_v13 = vld [vmem:[%s8372_s10] sm:$0x3]  ;;  %vm1063_vm6 = vcmask 255104  }
 0x361   :  { %554 = vmatpush.msrb.mxu2 %v522_v20  ;;  %689 = vmatpush.msrb.mxu1 %v6177_v63  ;;  %v575_v14 = vperm.slane %v572_v13, 1  ;;  %s5414_s10 = sld [smem:[#allocation4 + $0x2]] }
 0x362   :  { %v468_v24 = vmul.f32 %v5454_v5, %v467_v15 }
 0x363   :  { %555 = vmatpush.msrb.mxu2 %v521_v44  ;;  %690 = vmatpush.msrb.mxu1 %v6194_v2 }
 0x364   :  { %v469_v27 = vadd.f32 %v5454_v5, %v468_v24 }
 0x365   :  { %556 = vmatpush.msrb.mxu2 %v520_v45  ;;  %691 = vmatpush.msrb.mxu1 %v6202_v3 }
 0x366   :  { %v473_v33 = vsel %vm472_vm8, %v5454_v5, %v469_v27  ;;  %v5793_v5 = vmov 0.0  }
 0x367   :  { %v478_v38 = vsel %vm475_vm9, %v477_v37, %v473_v33  ;;  %692 = vmatmul.f32.vlgmr.msrb.gmra.mxu1 %v5793_v5 }
 0x368   :  { %v499_v39 = vsub.f32 1.0, %v478_v38  ;;  %v496_v41 = vmul.f32 %v478_v38, %v6055_v34  ;;  %v519_v34 = vld [vmem:[%s8369_s7] sm:$0xff] }
 0x369   :  { %557 = vmatpush.msrb.mxu2 %v519_v34 }
 0x36b   :  { %704 = vmatpush.msra.mxu2 %v6106_v47 }
 0x36d   :  { %705 = vmatpush.msra.mxu2 %v6115_v49 }
 0x36f   :  { %706 = vmatpush.msra.mxu2 %v6129_v52 }
 0x371   :  { %707 = vmatpush.msra.mxu2 %v6151_v58 }
 0x373   :  { %708 = vmatpush.msra.mxu2 %v6166_v61 }
 0x375   :  { %709 = vmatpush.msra.mxu2 %v6182_v0 }
 0x377   :  { %710 = vmatpush.msra.mxu2 %v6188_v1 }
 0x379   :  { %711 = vmatpush.msra.mxu2 %v6207_v4 }
 0x39e   :  { %v509_v18 = vpop.permute.xlu2 %508 }
 0x39f   :  { %v515_v22 = vmul.f32 %v509_v18, %v500_v17  ;;  %v6239_v17 = vperm.slane %v572_v13, 0 }
 0x3a1   :  { %v518_v25 = vadd.f32 %v515_v22, %v497_v21 }
 0x3a3   :  { %534 = vrot.lane.b32.xlu2 %v518_v25, %s5790_s29 }
 0x3a5   :  { %v505_v30 = vpop.permute.xlu0 %504 }
 0x3a6   :  { %v513_v35 = vmul.f32 %v505_v30, %v498_v28 }
 0x3a8   :  { %v516_v36 = vadd.f32 %v513_v35, %v495_v32 }
 0x3aa   :  { %530 = vrot.lane.b32.xlu0 %v516_v36, %s5790_s29 }
 0x3ae   :  { %v507_v40 = vpop.permute.xlu1 %506 }
 0x3af   :  { %v514_v42 = vmul.f32 %v507_v40, %v499_v39 }
 0x3b1   :  { %v517_v43 = vadd.f32 %v514_v42, %v496_v41 }
 0x3b3   :  { %532 = vrot.lane.b32.xlu1 %v517_v43, %s5790_s29 }
 0x3e4   :  { %v693_v19 = vpop.f32.mrf.mxu1 }
 0x3fd   :  { %v535_v56 = vpop.permute.xlu2 %534 }
 0x41c   :  { %v531_v54 = vpop.permute.xlu0 %530 }
 0x41d   :  { %5228 = vmatmul.msk.f32.vlgmr.msrb.gmra.mxu2 %vm257_vm0, %v531_v54 }
 0x425   :  { %v533_v55 = vpop.permute.xlu1 %532 }
 0x426   :  { %5229 = vmatmul.msk.f32.gmra.mxu2 %vm257_vm0, %v533_v55 }
 0x42e   :  { %5230 = vmatmul.msk.f32.gmra.mxu2 %vm257_vm0, %v535_v56 }
 0x436   :  { %712 = vmatmul.f32.vlgmr.msra.gmra.mxu2 %v5793_v5 }
 0x4a0   :  { %v559_v7 = vpop.f32.mrf.mxu2 }
 0x4a1   :  { %v6216_v8 = vadd.f32 %v5430_v6, %v559_v7 }
 0x4a3   :  { %5231 = vmatmul.msk.f32.vlgmr.msra.gmra.mxu3 %vm578_vm10, %v6216_v8  ;;  %5234 = vmatmul.msk.f32.vlgmr.msrb.gmra.mxu0 %vm578_vm10, %v6216_v8 }
 0x4a9   :  { %v562_v9 = vpop.f32.mrf.mxu2 }
 0x4aa   :  { %v6222_v10 = vadd.f32 %v5430_v6, %v562_v9 }
 0x4ac   :  { %5232 = vmatmul.msk.f32.gmra.mxu3 %vm578_vm10, %v6222_v10  ;;  %5235 = vmatmul.msk.f32.gmra.mxu0 %vm578_vm10, %v6222_v10 }
 0x4b1   :  { %v565_v11 = vpop.f32.mrf.mxu2 }
 0x4b2   :  { %v6228_v12 = vadd.f32 %v5430_v6, %v565_v11 }
 0x4b4   :  { %5233 = vmatmul.msk.f32.gmra.mxu3 %vm578_vm10, %v6228_v12  ;;  %5236 = vmatmul.msk.f32.gmra.mxu0 %vm578_vm10, %v6228_v12 }
 0x4b9   :  { %v713_v26 = vpop.f32.mrf.mxu2 }
 0x4ba   :  { %v797_v29 = vrot.slane %v713_v26, 6 }
 0x520   :  { %v631_v15 = vpop.f32.mrf.mxu0 }
 0x521   :  { %v6237_v16 = vadd.f32 %v631_v15, %v575_v14 }
 0x526   :  { %v605_v18 = vpop.f32.mrf.mxu3 }
 0x527   :  { %v6242_v21 = vadd.f32 %v605_v18, %v6239_v17 }
 0x529   :  { %v756_v22 = vadd.f32 %v693_v19, %v6242_v21  ;;  %v634_v23 = vpop.f32.mrf.mxu0 }
 0x52a   :  { %v6245_v24 = vadd.f32 %v634_v23, %v575_v14 }
 0x52b   :  { %v5237_v25 = vmul.f32 -1.442695, %v756_v22  ;;  %5455 = vtanh.f32 %v756_v22 }
 0x52d   :  { %5457 = vpow2.f32 %v5237_v25 }
 0x52f   :  { %v608_v27 = vpop.f32.mrf.mxu3 }
 0x530   :  { %v6248_v28 = vadd.f32 %v608_v27, %v6239_v17 }
 0x531   :  { %v5456_v30 = vpop.eup %5455  ;;  %v637_v31 = vpop.f32.mrf.mxu0 }
 0x532   :  { %v6250_v32 = vadd.f32 %v637_v31, %v575_v14  ;;  %778 = vrot.lane.b32.xlu1 %v5456_v30, %s5792_s0 }
 0x533   :  { %v5458_v35 = vpop.eup %5457 }
 0x534   :  { %v760_v33 = vadd.f32 1.0, %v5458_v35  ;;  %v799_v36 = vadd.f32 %v797_v29, %v6250_v32 }
 0x536   :  { %5459 = vrcp.f32 %v760_v33  ;;  %v5239_v37 = vmul.f32 -1.442695, %v799_v36  ;;  %v772_v20 = vand.u32 2147483648, %v760_v33  ;;  %v770_v45 = vand.u32 2147483647, %v760_v33 }
 0x537   :  { %5461 = vtanh.f32 %v799_v36  ;;  %vm766_vm12 = vweird.f32 %v760_v33 }
 0x538   :  { %5463 = vpow2.f32 %v5239_v37  ;;  %v773_v46 = vor.u32 1.1754944e-38, %v772_v20  ;;  %vm771_vm14 = vcmp.eq.f32.partialorder %v770_v45, 8.507059e+37  ;;  %v6285_v20 = vld [vmem:[%s8374_s12 + $0x28] sm:$0xff]  ;;  %v6297_v45 = vld [vmem:[%s8374_s12 + $0x18] sm:$0xff] }
 0x53c   :  { %v5460_v38 = vpop.eup %5459 }
 0x53d   :  { %v5462_v39 = vpop.eup %5461  ;;  %v762_v40 = vmul.f32 %v5460_v38, %v760_v33  ;;  %vm767_vm11 = vweird.f32 %v5460_v38 }
 0x53e   :  { %v5464_v41 = vpop.eup %5463  ;;  %821 = vrot.lane.b32.xlu0 %v5462_v39, %s5792_s0  ;;  %vm768_vm13 = vmor %vm766_vm12, %vm767_vm11 }
 0x53f   :  { %v803_v42 = vadd.f32 1.0, %v5464_v41  ;;  %v763_v43 = vsub.f32 1.0, %v762_v40 }
 0x541   :  { %5465 = vrcp.f32 %v803_v42  ;;  %v764_v44 = vmul.f32 %v5460_v38, %v763_v43  ;;  %v815_v6 = vand.u32 2147483648, %v803_v42  ;;  %v813_v9 = vand.u32 2147483647, %v803_v42  ;;  %v6279_v43 = vld [vmem:[%s8374_s12 + $0x30] sm:$0xff] }
 0x542   :  { %vm809_vm1 = vweird.f32 %v803_v42 }
 0x543   :  { %v765_v34 = vadd.f32 %v5460_v38, %v764_v44  ;;  %v816_v13 = vor.u32 1.1754944e-38, %v815_v6  ;;  %vm814_vm3 = vcmp.eq.f32.partialorder %v813_v9, 8.507059e+37  ;;  %v6291_v44 = vld [vmem:[%s8374_s12 + $0x20] sm:$0xff]  ;;  %v889_v9 = vld [vmem:[%s8375_s13 + $0x38] sm:$0xff] }
 0x545   :  { %v769_v48 = vsel %vm768_vm13, %v5460_v38, %v765_v34  ;;  %v6303_v34 = vld [vmem:[%s8374_s12 + $0x10] sm:$0xff] }
 0x546   :  { %v774_v50 = vsel %vm771_vm14, %v773_v46, %v769_v48  ;;  %v6309_v46 = vld [vmem:[%s8374_s12 + $0x8] sm:$0xff]  ;;  %v6316_v48 = vld [vmem:[%s8374_s12] sm:$0xff] }
 0x547   :  { %v5466_v54 = vpop.eup %5465  ;;  %v782_v55 = vmul.f32 0.0, %v774_v50 }
 0x548   :  { %v805_v56 = vmul.f32 %v5466_v54, %v803_v42  ;;  %vm810_vm15 = vweird.f32 %v5466_v54  ;;  %v6274_v42 = vld [vmem:[%s8374_s12 + $0x38] sm:$0xff] }
 0x549   :  { %784 = vrot.lane.b32.xlu0 %v782_v55, %s5790_s29  ;;  %vm811_vm2 = vmor %vm809_vm1, %vm810_vm15  ;;  %868 = vmatpush.msrb.mxu2 %v6274_v42  ;;  %v6334_v55 = vld [vmem:[%s8373_s11 + $0xb0] sm:$0xff]  ;;  %vm1073_vm1 = vcmask 392192  }
 0x54a   :  { %v806_v59 = vsub.f32 1.0, %v805_v56  ;;  %v6341_v56 = vld [vmem:[%s8373_s11 + $0x90] sm:$0xff] }
 0x54b   :  { %869 = vmatpush.msrb.mxu2 %v6279_v43 }
 0x54c   :  { %v807_v7 = vmul.f32 %v5466_v54, %v806_v59  ;;  %v884_v59 = vld [vmem:[%s8375_s13 + $0x10] sm:$0xff] }
 0x54d   :  { %870 = vmatpush.msrb.mxu2 %v6285_v20 }
 0x54e   :  { %v808_v11 = vadd.f32 %v5466_v54, %v807_v7 }
 0x54f   :  { %871 = vmatpush.msrb.mxu2 %v6291_v44 }
 0x550   :  { %v812_v14 = vsel %vm811_vm2, %v5466_v54, %v808_v11  ;;  %v6327_v54 = vld [vmem:[%s8373_s11 + $0xd0] sm:$0xff]  ;;  %v6396_v11 = vld [vmem:[%s8373_s11 + $0xf8] sm:$0xff] }
 0x551   :  { %v817_v15 = vsel %vm814_vm3, %v816_v13, %v812_v14  ;;  %872 = vmatpush.msrb.mxu2 %v6297_v45  ;;  %v887_v13 = vld [vmem:[%s8375_s13 + $0x28] sm:$0xff]  ;;  %744 = vmatpush.msra.mxu1 %v6396_v11  ;;  %v6405_v14 = vld [vmem:[%s8373_s11 + $0xd8] sm:$0xff] }
 0x552   :  { %v825_v18 = vmul.f32 0.0, %v817_v15 }
 0x553   :  { %873 = vmatpush.msrb.mxu2 %v6303_v34  ;;  %745 = vmatpush.msra.mxu1 %v6405_v14 }
 0x554   :  { %827 = vrot.lane.b32.xlu2 %v825_v18, %s5790_s29  ;;  %v6413_v18 = vld [vmem:[%s8373_s11 + $0xb8] sm:$0xff] }
 0x555   :  { %874 = vmatpush.msrb.mxu2 %v6309_v46  ;;  %746 = vmatpush.msra.mxu1 %v6413_v18 }
 0x557   :  { %875 = vmatpush.msrb.mxu2 %v6316_v48 }
 0x559   :  { %1138 = vmatpush.msra.mxu2 %v6106_v47  ;;  %v6348_v47 = vld [vmem:[%s8373_s11 + $0x70] sm:$0xff] }
 0x55b   :  { %1139 = vmatpush.msra.mxu2 %v6115_v49  ;;  %v6355_v49 = vld [vmem:[%s8373_s11 + $0x50] sm:$0xff] }
 0x55d   :  { %1140 = vmatpush.msra.mxu2 %v6129_v52  ;;  %v6362_v52 = vld [vmem:[%s8373_s11 + $0x30] sm:$0xff] }
 0x55f   :  { %1141 = vmatpush.msra.mxu2 %v6151_v58  ;;  %v6369_v58 = vld [vmem:[%s8373_s11 + $0x10] sm:$0xff] }
 0x561   :  { %1142 = vmatpush.msra.mxu2 %v6166_v61  ;;  %v888_v61 = vld [vmem:[%s8375_s13 + $0x30] sm:$0xff] }
 0x563   :  { %1143 = vmatpush.msra.mxu2 %v6182_v0  ;;  %v886_v0 = vld [vmem:[%s8375_s13 + $0x20] sm:$0xff] }
 0x565   :  { %1144 = vmatpush.msra.mxu2 %v6188_v1 }
 0x567   :  { %1145 = vmatpush.msra.mxu2 %v6207_v4  ;;  %v882_v4 = vld [vmem:[%s8375_s13] sm:$0xff] }
 0x5a4   :  { %v779_v27 = vpop.permute.xlu1 %778 }
 0x5a5   :  { %v781_v29 = vmul.f32 %v779_v27, %v774_v50  ;;  %v6434_v27 = vld [vmem:[%s8373_s11 + $0x58] sm:$0xff] }
 0x5ae   :  { %v828_v23 = vpop.permute.xlu2 %827 }
 0x5b0   :  { %v822_v19 = vpop.permute.xlu0 %821 }
 0x5b1   :  { %v824_v22 = vmul.f32 %v822_v19, %v817_v15  ;;  %v883_v19 = vld [vmem:[%s8375_s13 + $0x8] sm:$0xff] }
 0x5b3   :  { %v6257_v25 = vadd.f32 %v828_v23, %v824_v22  ;;  %v6422_v22 = vld [vmem:[%s8373_s11 + $0x98] sm:$0xff] }
 0x5b4   :  { %747 = vmatpush.msra.mxu1 %v6422_v22  ;;  %v6429_v23 = vld [vmem:[%s8373_s11 + $0x78] sm:$0xff] }
 0x5b5   :  { %v5240_v26 = vclamps-f32 %v6257_v25, 3.0  ;;  %v1028_v25 = vld [vmem:[%s8377_s15] sm:$0xff] }
 0x5b6   :  { %748 = vmatpush.msra.mxu1 %v6429_v23 }
 0x5b7   :  { %5467 = vtanh.f32 %v5240_v26 }
 0x5b8   :  { %749 = vmatpush.msra.mxu1 %v6434_v27 }
 0x5bb   :  { %v785_v30 = vpop.permute.xlu0 %784 }
 0x5bc   :  { %v6262_v31 = vadd.f32 %v785_v30, %v781_v29  ;;  %v6440_v29 = vld [vmem:[%s8373_s11 + $0x38] sm:$0xff] }
 0x5bd   :  { %v5468_v35 = vpop.eup %5467  ;;  %v6446_v30 = vld [vmem:[%s8373_s11 + $0x18] sm:$0xff]  ;;  %750 = vmatpush.msra.mxu1 %v6440_v29 }
 0x5be   :  { %v5238_v33 = vclamps-f32 %v6262_v31, 3.0  ;;  %835 = vrot.lane.b32.xlu1 %v5468_v35, %s5790_s29  ;;  %v1030_v31 = vld [vmem:[%s8377_s15 + $0x10] sm:$0xff] }
 0x5bf   :  { %751 = vmatpush.msra.mxu1 %v6446_v30 }
 0x5c0   :  { %5469 = vtanh.f32 %v5238_v33  ;;  %752 = vmatmul.f32.vlgmr.msra.gmra.mxu1 %v5793_v5 }
 0x5c1   :  { %1118 = vmatpush.msrb.mxu1 %v6123_v51  ;;  %v6485_v51 = vpop.f32.mrf.mxu3 }
 0x5c3   :  { %1119 = vmatpush.msrb.mxu1 %v6134_v53 }
 0x5c5   :  { %1120 = vmatpush.msrb.mxu1 %v6145_v57  ;;  %v890_v57 = vld [vmem:[%s8376_s14] sm:$0x3] }
 0x5c6   :  { %v5470_v36 = vpop.eup %5469 }
 0x5c7   :  { %792 = vrot.lane.b32.xlu2 %v5470_v36, %s5790_s29  ;;  %1121 = vmatpush.msrb.mxu1 %v6159_v60  ;;  %v892_v60 = vperm.slane %v890_v57, 0 }
 0x5c9   :  { %1122 = vmatpush.msrb.mxu1 %v6171_v62 }
 0x5cb   :  { %1123 = vmatpush.msrb.mxu1 %v6177_v63 }
 0x5cd   :  { %1124 = vmatpush.msrb.mxu1 %v6194_v2 }
 0x5cf   :  { %1125 = vmatpush.msrb.mxu1 %v6202_v3 }
 0x5d1   :  { %1313 = vmatpush.msra.mxu1 %v6274_v42 }
 0x5d3   :  { %1314 = vmatpush.msra.mxu1 %v6279_v43 }
 0x5d5   :  { %1315 = vmatpush.msra.mxu1 %v6285_v20 }
 0x5d7   :  { %1316 = vmatpush.msra.mxu1 %v6291_v44 }
 0x5d9   :  { %1317 = vmatpush.msra.mxu1 %v6297_v45 }
 0x5db   :  { %1318 = vmatpush.msra.mxu1 %v6303_v34 }
 0x5dd   :  { %1319 = vmatpush.msra.mxu1 %v6309_v46 }
 0x5df   :  { %1320 = vmatpush.msra.mxu1 %v6316_v48 }
 0x621   :  { %v793_v37 = vpop.permute.xlu2 %792 }
 0x622   :  { %v795_v38 = vmul.f32 %v793_v37, %v774_v50  ;;  %v6322_v50 = vld [vmem:[%s8373_s11 + $0xf0] sm:$0xff] }
 0x623   :  { %724 = vmatpush.msrb.mxu3 %v6322_v50 }
 0x624   :  { %840 = vrot.lane.b32.xlu0 %v795_v38, %s5791_s30 }
 0x625   :  { %725 = vmatpush.msrb.mxu3 %v6327_v54 }
 0x627   :  { %726 = vmatpush.msrb.mxu3 %v6334_v55 }
 0x629   :  { %727 = vmatpush.msrb.mxu3 %v6341_v56 }
 0x62b   :  { %728 = vmatpush.msrb.mxu3 %v6348_v47 }
 0x62d   :  { %729 = vmatpush.msrb.mxu3 %v6355_v49 }
 0x62f   :  { %730 = vmatpush.msrb.mxu3 %v6362_v52 }
 0x630   :  { %v836_v39 = vpop.permute.xlu1 %835 }
 0x631   :  { %v838_v40 = vmul.f32 %v836_v39, %v817_v15  ;;  %731 = vmatpush.msrb.mxu3 %v6369_v58  ;;  %v885_v15 = vld [vmem:[%s8375_s13 + $0x18] sm:$0xff] }
 0x632   :  { %732 = vmatmul.f32.vlgmr.msrb.gmra.mxu3 %v5793_v5  ;;  %v893_v5 = vperm.slane %v890_v57, 1 }
 0x633   :  { %v844_v41 = vrot.slane %v838_v40, 2  ;;  %911 = vmatpush.msra.mxu3 %v888_v61 }
 0x635   :  { %845 = vrot.lane.b32.xlu1 %v844_v41, %s5792_s0  ;;  %912 = vmatpush.msra.mxu3 %v886_v0 }
 0x637   :  { %913 = vmatpush.msra.mxu3 %v884_v59 }
 0x639   :  { %914 = vmatpush.msra.mxu3 %v882_v4 }
 0x63b   :  { %931 = vmatpush.msrb.mxu3 %v889_v9 }
 0x63d   :  { %932 = vmatpush.msrb.mxu3 %v887_v13  ;;  %v753_v38 = vpop.f32.mrf.mxu1 }
 0x63f   :  { %933 = vmatpush.msrb.mxu3 %v885_v15 }
 0x641   :  { %934 = vmatpush.msrb.mxu3 %v883_v19 }
 0x696   :  { %v841_v1 = vpop.permute.xlu0 %840 }
 0x6a7   :  { %v846_v6 = vpop.permute.xlu1 %845 }
 0x6a8   :  { %v848_v7 = vsel %vm257_vm0, %v841_v1, %v846_v6 }
 0x6a9   :  { %5241 = vmatmul.msk.f32.vlgmr.msrb.gmra.mxu2 %vm672_vm4, %v848_v7 }
 0x6aa   :  { %1356 = vmatpush.msrb.mxu2 %v888_v61 }
 0x6ac   :  { %1357 = vmatpush.msrb.mxu2 %v886_v0 }
 0x6ae   :  { %1358 = vmatpush.msrb.mxu2 %v884_v59 }
 0x6b0   :  { %1359 = vmatpush.msrb.mxu2 %v882_v4 }
 0x6b5   :  { %v733_v53 = vpop.f32.mrf.mxu3 }
 0x72c   :  { %v877_v35 = vpop.f32.mrf.mxu2 }
 0x72d   :  { %v6458_v36 = vclamps-f32 %v877_v35, 3.0 }
 0x72f   :  { %5243 = vmatmul.msk.f32.vlgmr.msra.gmra.mxu3 %vm257_vm0, %v6458_v36  ;;  %1062 = vst.msk [vmem:[#allocation2] sm:$0x3] %vm1061_vm5, %v6458_v36 }
 0x730   :  { %1064 = vst.msk [vmem:[#allocation2 + $0x12] sm:$0x3] %vm1063_vm6, %v6458_v36  ;;  %1158 = vmatpush.msra.mxu3 %v6322_v50 }
 0x732   :  { %1159 = vmatpush.msra.mxu3 %v6327_v54 }
 0x734   :  { %1160 = vmatpush.msra.mxu3 %v6334_v55 }
 0x736   :  { %1161 = vmatpush.msra.mxu3 %v6341_v56 }
 0x737   :  { %5244 = vmatmul.msk.f32.vlgmr.msrb.gmra.mxu3 %vm257_vm0, %v6458_v36 }
 0x738   :  { %1162 = vmatpush.msra.mxu3 %v6348_v47 }
 0x73a   :  { %1163 = vmatpush.msra.mxu3 %v6355_v49 }
 0x73c   :  { %1164 = vmatpush.msra.mxu3 %v6362_v52 }
 0x73e   :  { %1165 = vmatpush.msra.mxu3 %v6369_v58 }
 0x740   :  { %1376 = vmatpush.msrb.mxu3 %v889_v9 }
 0x742   :  { %1377 = vmatpush.msrb.mxu3 %v887_v13 }
 0x744   :  { %1378 = vmatpush.msrb.mxu3 %v885_v15 }
 0x746   :  { %1379 = vmatpush.msrb.mxu3 %v883_v19 }
 0x7b2   :  { %v916_v62 = vpop.f32.mrf.mxu3 }
 0x7b3   :  { %v917_v63 = vadd.f32 %v916_v62, %v892_v60 }
 0x7b5   :  { %v939_v2 = vadd.f32 %v917_v63, %v733_v53 }
 0x7b7   :  { %v5245_v3 = vmul.f32 -1.442695, %v939_v2  ;;  %5471 = vtanh.f32 %v939_v2 }
 0x7b9   :  { %5473 = vpow2.f32 %v5245_v3 }
 0x7ba   :  { %v936_v37 = vpop.f32.mrf.mxu3 }
 0x7bb   :  { %v937_v39 = vadd.f32 %v936_v37, %v893_v5 }
 0x7bd   :  { %v5472_v40 = vpop.eup %5471  ;;  %v979_v41 = vadd.f32 %v937_v39, %v753_v38 }
 0x7be   :  { %961 = vrot.lane.b32.xlu2 %v5472_v40, %s5792_s0 }
 0x7bf   :  { %v5474_v42 = vpop.eup %5473  ;;  %v5247_v43 = vmul.f32 -1.442695, %v979_v41  ;;  %5475 = vtanh.f32 %v979_v41 }
 0x7c0   :  { %v943_v20 = vadd.f32 1.0, %v5474_v42 }
 0x7c1   :  { %5477 = vpow2.f32 %v5247_v43 }
 0x7c2   :  { %5479 = vrcp.f32 %v943_v20  ;;  %v955_v0 = vand.u32 2147483648, %v943_v20  ;;  %v953_v1 = vand.u32 2147483647, %v943_v20  ;;  %vm949_vm8 = vweird.f32 %v943_v20 }
 0x7c4   :  { %v956_v4 = vor.u32 1.1754944e-38, %v955_v0  ;;  %vm954_vm11 = vcmp.eq.f32.partialorder %v953_v1, 8.507059e+37  ;;  %v1033_v0 = vld [vmem:[%s8377_s15 + $0x28] sm:$0xff] }
 0x7c5   :  { %v5476_v44 = vpop.eup %5475 }
 0x7c6   :  { %1001 = vrot.lane.b32.xlu0 %v5476_v44, %s5792_s0 }
 0x7c7   :  { %v5478_v45 = vpop.eup %5477 }
 0x7c8   :  { %v5480_v34 = vpop.eup %5479  ;;  %v983_v46 = vadd.f32 1.0, %v5478_v45 }
 0x7c9   :  { %v945_v48 = vmul.f32 %v5480_v34, %v943_v20  ;;  %vm950_vm7 = vweird.f32 %v5480_v34 }
 0x7ca   :  { %5481 = vrcp.f32 %v983_v46  ;;  %vm951_vm9 = vmor %vm949_vm8, %vm950_vm7  ;;  %v995_v53 = vand.u32 2147483648, %v983_v46  ;;  %v993_v60 = vand.u32 2147483647, %v983_v46  ;;  %vm989_vm13 = vweird.f32 %v983_v46 }
 0x7cb   :  { %v946_v61 = vsub.f32 1.0, %v945_v48  ;;  %v1035_v48 = vld [vmem:[%s8377_s15 + $0x38] sm:$0xff] }
 0x7cc   :  { %v996_v63 = vor.u32 1.1754944e-38, %v995_v53  ;;  %vm994_vm15 = vcmp.eq.f32.partialorder %v993_v60, 8.507059e+37  ;;  %1047 = vmatpush.msra.mxu0 %v1035_v48 }
 0x7cd   :  { %v947_v59 = vmul.f32 %v5480_v34, %v946_v61  ;;  %v1034_v61 = vld [vmem:[%s8377_s15 + $0x30] sm:$0xff] }
 0x7ce   :  { %1048 = vmatpush.msra.mxu0 %v1034_v61 }
 0x7cf   :  { %v948_v6 = vadd.f32 %v5480_v34, %v947_v59  ;;  %v1032_v59 = vld [vmem:[%s8377_s15 + $0x20] sm:$0xff] }
 0x7d0   :  { %v5482_v7 = vpop.eup %5481  ;;  %1049 = vmatpush.msra.mxu0 %v1033_v0 }
 0x7d1   :  { %v985_v9 = vmul.f32 %v5482_v7, %v983_v46  ;;  %v952_v13 = vsel %vm951_vm9, %v5480_v34, %v948_v6  ;;  %vm990_vm12 = vweird.f32 %v5482_v7 }
 0x7d2   :  { %v957_v15 = vsel %vm954_vm11, %v956_v4, %v952_v13  ;;  %vm991_vm14 = vmor %vm989_vm13, %vm990_vm12  ;;  %1050 = vmatpush.msra.mxu0 %v1032_v59  ;;  %v1265_v13 = vrot.slane %v5240_v26, 2 }
 0x7d3   :  { %v965_v19 = vmul.f32 0.0, %v957_v15  ;;  %v986_v35 = vsub.f32 1.0, %v985_v9 }
 0x7d5   :  { %967 = vrot.lane.b32.xlu1 %v965_v19, %s5790_s29  ;;  %v987_v57 = vmul.f32 %v5482_v7, %v986_v35  ;;  %v1031_v19 = vld [vmem:[%s8377_s15 + $0x18] sm:$0xff] }
 0x7d6   :  { %1051 = vmatpush.msra.mxu0 %v1031_v19 }
 0x7d7   :  { %v988_v62 = vadd.f32 %v5482_v7, %v987_v57 }
 0x7d8   :  { %1052 = vmatpush.msra.mxu0 %v1030_v31 }
 0x7d9   :  { %v992_v2 = vsel %vm991_vm14, %v5482_v7, %v988_v62  ;;  %v1220_v7 = vrot.slane %v5238_v33, 6  ;;  %v1029_v33 = vld [vmem:[%s8377_s15 + $0x8] sm:$0xff] }
 0x7da   :  { %v997_v3 = vsel %vm994_vm15, %v996_v63, %v992_v2  ;;  %1053 = vmatpush.msra.mxu0 %v1029_v33 }
 0x7db   :  { %v1005_v5 = vmul.f32 0.0, %v997_v3 }
 0x7dc   :  { %1054 = vmatpush.msra.mxu0 %v1028_v25 }
 0x7dd   :  { %1007 = vrot.lane.b32.xlu2 %v1005_v5, %s5790_s29 }
 0x7de   :  { %1178 = vmatpush.msrb.mxu0 %v6396_v11 }
 0x7e0   :  { %1179 = vmatpush.msrb.mxu0 %v6405_v14 }
 0x7e2   :  { %1180 = vmatpush.msrb.mxu0 %v6413_v18 }
 0x7e4   :  { %1181 = vmatpush.msrb.mxu0 %v6422_v22 }
 0x7e6   :  { %1182 = vmatpush.msrb.mxu0 %v6429_v23 }
 0x7e8   :  { %1183 = vmatpush.msrb.mxu0 %v6434_v27 }
 0x7ea   :  { %1184 = vmatpush.msrb.mxu0 %v6440_v29 }
 0x7ec   :  { %1185 = vmatpush.msrb.mxu0 %v6446_v30 }
 0x818   :  { %v962_v37 = vpop.permute.xlu2 %961 }
 0x819   :  { %v964_v20 = vmul.f32 %v962_v37, %v957_v15 }
 0x837   :  { %v1008_v40 = vpop.permute.xlu2 %1007 }
 0x838   :  { %v1002_v38 = vpop.permute.xlu0 %1001 }
 0x839   :  { %v1004_v39 = vmul.f32 %v1002_v38, %v997_v3 }
 0x83b   :  { %v6494_v41 = vadd.f32 %v1008_v40, %v1004_v39 }
 0x83d   :  { %v5248_v42 = vclamps-f32 %v6494_v41, 3.0 }
 0x83f   :  { %5483 = vtanh.f32 %v5248_v42 }
 0x845   :  { %v5484_v43 = vpop.eup %5483 }
 0x846   :  { %1015 = vrot.lane.b32.xlu1 %v5484_v43, %s5790_s29 }
 0x847   :  { %v968_v44 = vpop.permute.xlu1 %967 }
 0x848   :  { %v6500_v45 = vadd.f32 %v968_v44, %v964_v20 }
 0x84a   :  { %v5246_v34 = vclamps-f32 %v6500_v45, 3.0 }
 0x84c   :  { %5485 = vtanh.f32 %v5246_v34 }
 0x852   :  { %v5486_v46 = vpop.eup %5485 }
 0x853   :  { %975 = vrot.lane.b32.xlu0 %v5486_v46, %s5790_s29 }
 0x8b8   :  { %v1016_v1 = vpop.permute.xlu1 %1015 }
 0x8b9   :  { %v1018_v6 = vmul.f32 %v1016_v1, %v997_v3 }
 0x8bb   :  { %1024 = vrot.lane.b32.xlu0 %v1018_v6, %s5792_s0 }
 0x8c3   :  { %1221 = vrot.lane.b32.xlu0 %v1220_v7, %s5791_s30 }
 0x8c5   :  { %v976_v4 = vpop.permute.xlu0 %975 }
 0x8c6   :  { %v978_v9 = vmul.f32 %v976_v4, %v957_v15 }
 0x8c8   :  { %1020 = vrot.lane.b32.xlu2 %v978_v9, %s5791_s30 }
 0x8d0   :  { %1266 = vrot.lane.b32.xlu2 %v1265_v13, %s5791_s30 }
 0x922   :  { %v1021_v26 = vpop.permute.xlu2 %1020 }
 0x92a   :  { %v1267_v7 = vpop.permute.xlu2 %1266 }
 0x92d   :  { %v1025_v15 = vpop.permute.xlu0 %1024 }
 0x92e   :  { %v1027_v35 = vsel %vm257_vm0, %v1021_v26, %v1025_v15 }
 0x92f   :  { %5249 = vmatmul.msk.f32.vlgmr.msra.gmra.mxu0 %vm672_vm4, %v1027_v35 }
 0x930   :  { %1500 = vmatpush.msra.mxu0 %v1035_v48 }
 0x932   :  { %1501 = vmatpush.msra.mxu0 %v1034_v61 }
 0x934   :  { %1502 = vmatpush.msra.mxu0 %v1033_v0 }
 0x935   :  { %v1222_v48 = vpop.permute.xlu0 %1221 }
 0x936   :  { %1503 = vmatpush.msra.mxu0 %v1032_v59 }
 0x938   :  { %1504 = vmatpush.msra.mxu0 %v1031_v19 }
 0x93a   :  { %1505 = vmatpush.msra.mxu0 %v1030_v31 }
 0x93c   :  { %1506 = vmatpush.msra.mxu0 %v1029_v33 }
 0x93e   :  { %1507 = vmatpush.msra.mxu0 %v1028_v25 }
 0x9ac   :  { %v1056_v53 = vpop.f32.mrf.mxu0 }
 0x9ad   :  { %v5250_v57 = vclamps-f32 %v1056_v53, 3.0 }
 0x9af   :  { %v1065_v60 = vadd.f32 %v5250_v57, %v6458_v36  ;;  %1069 = vrot.lane.b32.xlu1 %v5250_v57, %s5791_s30 }
 0x9b1   :  { %1066 = vst.msk [vmem:[#allocation3] sm:$0x3] %vm1061_vm5, %v1065_v60 }
 0x9b2   :  { %1067 = vst.msk [vmem:[#allocation3 + $0x12] sm:$0x3] %vm1063_vm6, %v1065_v60 }
 0xa21   :  { %v1070_v62 = vpop.permute.xlu1 %1069 }
 0xa22   :  { %v1072_v63 = vsel %vm257_vm0, %v6458_v36, %v1070_v62 }
 0xa23   :  { %v1074_v2 = vsel %vm1073_vm1, %v1072_v63, %v1070_v62 }
 0xa24   :  { %5251 = vmatmul.msk.f32.vlgmr.msrb.gmra.mxu1 %vm672_vm4, %v1074_v2  ;;  %5252 = vmatmul.msk.f32.vlgmr.msra.gmra.mxu2 %vm672_vm4, %v1074_v2 }
 0xa25   :  { %5253 = vmatmul.msk.f32.vlgmr.msra.gmra.mxu3 %vm672_vm4, %v1074_v2  ;;  %5254 = vmatmul.msk.f32.vlgmr.msrb.gmra.mxu0 %vm672_vm4, %v1074_v2 }
 0xa26   :  { %1608 = vmatpush.msrb.mxu1 %v6322_v50  ;;  %1628 = vmatpush.msrb.mxu0 %v6396_v11 }
 0xa28   :  { %1609 = vmatpush.msrb.mxu1 %v6327_v54  ;;  %1629 = vmatpush.msrb.mxu0 %v6405_v14 }
 0xa2a   :  { %1610 = vmatpush.msrb.mxu1 %v6334_v55  ;;  %1630 = vmatpush.msrb.mxu0 %v6413_v18 }
 0xa2c   :  { %1611 = vmatpush.msrb.mxu1 %v6341_v56  ;;  %1631 = vmatpush.msrb.mxu0 %v6422_v22 }
 0xa2e   :  { %1612 = vmatpush.msrb.mxu1 %v6348_v47  ;;  %1632 = vmatpush.msrb.mxu0 %v6429_v23 }
 0xa30   :  { %1613 = vmatpush.msrb.mxu1 %v6355_v49  ;;  %1633 = vmatpush.msrb.mxu0 %v6434_v27 }
 0xa32   :  { %1614 = vmatpush.msrb.mxu1 %v6362_v52  ;;  %1634 = vmatpush.msrb.mxu0 %v6440_v29 }
 0xa34   :  { %1615 = vmatpush.msrb.mxu1 %v6369_v58  ;;  %1635 = vmatpush.msrb.mxu0 %v6446_v30 }
 0xaa1   :  { %v1127_v50 = vpop.f32.mrf.mxu1 }
 0xaa2   :  { %v1191_v54 = vrot.slane %v1127_v50, 6 }
 0xaa4   :  { %v1193_v55 = vadd.f32 %v1191_v54, %v6242_v21 }
 0xaa6   :  { %v5255_v56 = vmul.f32 -1.442695, %v1193_v55  ;;  %5487 = vtanh.f32 %v1193_v55 }
 0xaa7   :  { %v1147_v47 = vpop.f32.mrf.mxu2 }
 0xaa8   :  { %5489 = vpow2.f32 %v5255_v56  ;;  %v1238_v49 = vadd.f32 %v1147_v47, %v6250_v32  ;;  %v1167_v41 = vpop.f32.mrf.mxu3 }
 0xaaa   :  { %v5257_v11 = vmul.f32 -1.442695, %v1238_v49  ;;  %5491 = vtanh.f32 %v1238_v49 }
 0xaac   :  { %v5488_v14 = vpop.eup %5487  ;;  %5493 = vpow2.f32 %v5257_v11 }
 0xaad   :  { %1215 = vrot.lane.b32.xlu2 %v5488_v14, %s5792_s0 }
 0xaae   :  { %v5490_v52 = vpop.eup %5489 }
 0xaaf   :  { %v1197_v58 = vadd.f32 1.0, %v5490_v52 }
 0xab0   :  { %v5492_v18 = vpop.eup %5491 }
 0xab1   :  { %5495 = vrcp.f32 %v1197_v58  ;;  %1260 = vrot.lane.b32.xlu1 %v5492_v18, %s5792_s0  ;;  %v1207_v32 = vand.u32 2147483647, %v1197_v58  ;;  %v1209_v3 = vand.u32 2147483648, %v1197_v58  ;;  %vm1203_vm3 = vweird.f32 %v1197_v58 }
 0xab2   :  { %v5494_v22 = vpop.eup %5493 }
 0xab3   :  { %v1242_v23 = vadd.f32 1.0, %v5494_v22  ;;  %vm1208_vm8 = vcmp.eq.f32.partialorder %v1207_v32, 8.507059e+37  ;;  %v1210_v40 = vor.u32 1.1754944e-38, %v1209_v3 }
 0xab5   :  { %5497 = vrcp.f32 %v1242_v23  ;;  %v1254_v43 = vand.u32 2147483648, %v1242_v23  ;;  %v1252_v46 = vand.u32 2147483647, %v1242_v23  ;;  %vm1248_vm11 = vweird.f32 %v1242_v23 }
 0xab7   :  { %v5496_v27 = vpop.eup %5495  ;;  %v1255_v1 = vor.u32 1.1754944e-38, %v1254_v43  ;;  %vm1253_vm13 = vcmp.eq.f32.partialorder %v1252_v46, 8.507059e+37 }
 0xab8   :  { %v1199_v29 = vmul.f32 %v5496_v27, %v1197_v58  ;;  %vm1204_vm2 = vweird.f32 %v5496_v27 }
 0xab9   :  { %vm1205_vm7 = vmor %vm1203_vm3, %vm1204_vm2 }
 0xaba   :  { %v1200_v30 = vsub.f32 1.0, %v1199_v29 }
 0xabb   :  { %v5498_v36 = vpop.eup %5497 }
 0xabc   :  { %v1244_v5 = vmul.f32 %v5498_v36, %v1242_v23  ;;  %v1201_v37 = vmul.f32 %v5496_v27, %v1200_v30  ;;  %vm1249_vm9 = vweird.f32 %v5498_v36 }
 0xabd   :  { %vm1250_vm12 = vmor %vm1248_vm11, %vm1249_vm9 }
 0xabe   :  { %v1202_v38 = vadd.f32 %v5496_v27, %v1201_v37  ;;  %v1245_v39 = vsub.f32 1.0, %v1244_v5 }
 0xac0   :  { %v1206_v20 = vsel %vm1205_vm7, %v5496_v27, %v1202_v38  ;;  %v1246_v44 = vmul.f32 %v5498_v36, %v1245_v39  ;;  %v1187_v27 = vpop.f32.mrf.mxu0 }
 0xac1   :  { %v1211_v61 = vsel %vm1208_vm8, %v1210_v40, %v1206_v20 }
 0xac2   :  { %v1224_v0 = vmul.f32 %v1222_v48, %v1211_v61  ;;  %v1247_v59 = vadd.f32 %v5498_v36, %v1246_v44 }
 0xac4   :  { %1226 = vrot.lane.b32.xlu1 %v1224_v0, %s5790_s29  ;;  %v1251_v6 = vsel %vm1250_vm12, %v5498_v36, %v1247_v59 }
 0xac5   :  { %v1256_v4 = vsel %vm1253_vm13, %v1255_v1, %v1251_v6 }
 0xac6   :  { %v1269_v9 = vmul.f32 %v1267_v7, %v1256_v4 }
 0xac8   :  { %1271 = vrot.lane.b32.xlu0 %v1269_v9, %s5790_s29 }
 0xb07   :  { %v1216_v19 = vpop.permute.xlu2 %1215 }
 0xb08   :  { %v1218_v31 = vmul.f32 %v1216_v19, %v1211_v61 }
 0xb23   :  { %v1261_v13 = vpop.permute.xlu1 %1260 }
 0xb24   :  { %v1263_v26 = vmul.f32 %v1261_v13, %v1256_v4 }
 0xb36   :  { %v1227_v33 = vpop.permute.xlu1 %1226 }
 0xb37   :  { %v6581_v25 = vadd.f32 %v1227_v33, %v1218_v31 }
 0xb39   :  { %v5256_v15 = vclamps-f32 %v6581_v25, 3.0  ;;  %v1553_v25 = vld [vmem:[%s8373_s11 + $0xe0] sm:$0xff] }
 0xb3a   :  { %v1272_v35 = vpop.permute.xlu0 %1271  ;;  %1568 = vmatpush.msra.mxu2 %v1553_v25 }
 0xb3b   :  { %5499 = vtanh.f32 %v5256_v15  ;;  %v6586_v53 = vadd.f32 %v1272_v35, %v1263_v26 }
 0xb3d   :  { %v5258_v57 = vclamps-f32 %v6586_v53, 3.0  ;;  %v1549_v53 = vld [vmem:[%s8373_s11 + $0xc0] sm:$0xff] }
 0xb3e   :  { %1569 = vmatpush.msra.mxu2 %v1549_v53 }
 0xb3f   :  { %5501 = vtanh.f32 %v5258_v57 }
 0xb41   :  { %v5500_v60 = vpop.eup %5499 }
 0xb42   :  { %1234 = vrot.lane.b32.xlu0 %v5500_v60, %s5790_s29 }
 0xb45   :  { %v5502_v62 = vpop.eup %5501 }
 0xb46   :  { %1279 = vrot.lane.b32.xlu2 %v5502_v62, %s5790_s29 }
 0xb4a   :  { %1411 = vrot.lane.b32.xlu0 %v5246_v34, %s5791_s30 }
 0xba0   :  { %v1280_v63 = vpop.permute.xlu2 %1279 }
 0xba1   :  { %v1282_v2 = vmul.f32 %v1280_v63, %v1256_v4 }
 0xba3   :  { %v1288_v50 = vrot.slane %v1282_v2, 6 }
 0xba5   :  { %1289 = vrot.lane.b32.xlu2 %v1288_v50, %s5792_s0 }
 0xbb4   :  { %v1235_v54 = vpop.permute.xlu0 %1234 }
 0xbb5   :  { %v1237_v55 = vmul.f32 %v1235_v54, %v1211_v61 }
 0xbb7   :  { %1284 = vrot.lane.b32.xlu1 %v1237_v55, %s5791_s30 }
 0xbbc   :  { %v1412_v26 = vpop.permute.xlu0 %1411 }
 0xbbf   :  { %1455 = vrot.lane.b32.xlu1 %v5248_v42, %s5791_s30  ;;  %v1335_v42 = vld [vmem:[%s8376_s14] sm:$0x3] }
 0xbc0   :  { %v1337_v14 = vperm.slane %v1335_v42, 0  ;;  %v1338_v52 = vperm.slane %v1335_v42, 1 }
 0xbff   :  { %v1290_v56 = vpop.permute.xlu2 %1289 }
 0xc29   :  { %v1285_v47 = vpop.permute.xlu1 %1284 }
 0xc2a   :  { %v1292_v49 = vsel %vm257_vm0, %v1285_v47, %v1290_v56 }
 0xc2b   :  { %v1302_v11 = vrot.slane %v1292_v49, 2 }
 0xc2d   :  { %5259 = vmatmul.msk.f32.vlgmr.msra.gmra.mxu1 %vm672_vm4, %v1302_v11 }
 0xc31   :  { %v1456_v62 = vpop.permute.xlu1 %1455 }
 0xcaa   :  { %v1322_v45 = vpop.f32.mrf.mxu1 }
 0xcab   :  { %v6603_v34 = vclamps-f32 %v1322_v45, 3.0 }
 0xcad   :  { %1514 = vst.msk [vmem:[#allocation2 + $0x2] sm:$0x3] %vm1061_vm5, %v6603_v34  ;;  %5261 = vmatmul.msk.f32.vlgmr.msrb.gmra.mxu2 %vm257_vm0, %v6603_v34  ;;  %5262 = vmatmul.msk.f32.vlgmr.msrb.gmra.mxu3 %vm257_vm0, %v6603_v34 }
 0xcae   :  { %1515 = vst.msk [vmem:[#allocation2 + $0x10] sm:$0x3] %vm1063_vm6, %v6603_v34 }
 0xd30   :  { %v1361_v58 = vpop.f32.mrf.mxu2  ;;  %v1381_v18 = vpop.f32.mrf.mxu3 }
 0xd31   :  { %v1362_v22 = vadd.f32 %v1361_v58, %v1337_v14  ;;  %v1382_v23 = vadd.f32 %v1381_v18, %v1338_v52 }
 0xd33   :  { %v1384_v29 = vadd.f32 %v1362_v22, %v1167_v41  ;;  %v1428_v30 = vadd.f32 %v1382_v23, %v1187_v27  ;;  %v1670_v23 = vrot.slane %v5256_v15, 6  ;;  %v6648_v15 = vld [vmem:[%s8373_s11 + $0xe8] sm:$0xff] }
 0xd34   :  { %1588 = vmatpush.msra.mxu3 %v6648_v15 }
 0xd35   :  { %v5263_v36 = vmul.f32 -1.442695, %v1384_v29  ;;  %5503 = vtanh.f32 %v1384_v29  ;;  %v5265_v32 = vmul.f32 -1.442695, %v1428_v30 }
 0xd36   :  { %5505 = vtanh.f32 %v1428_v30  ;;  %v1718_v30 = vrot.slane %v5258_v57, 2  ;;  %v6657_v57 = vld [vmem:[%s8373_s11 + $0xc8] sm:$0xff] }
 0xd37   :  { %5507 = vpow2.f32 %v5263_v36  ;;  %1589 = vmatpush.msra.mxu3 %v6657_v57 }
 0xd38   :  { %5509 = vpow2.f32 %v5265_v32 }
 0xd3b   :  { %v5504_v3 = vpop.eup %5503 }
 0xd3c   :  { %v5506_v5 = vpop.eup %5505  ;;  %1406 = vrot.lane.b32.xlu2 %v5504_v3, %s5792_s0 }
 0xd3d   :  { %v5508_v37 = vpop.eup %5507  ;;  %1450 = vrot.lane.b32.xlu0 %v5506_v5, %s5792_s0  ;;  %v1545_v5 = vld [vmem:[%s8373_s11 + $0xa0] sm:$0xff] }
 0xd3e   :  { %v5510_v38 = vpop.eup %5509  ;;  %v1388_v39 = vadd.f32 1.0, %v5508_v37  ;;  %v6665_v37 = vld [vmem:[%s8373_s11 + $0xa8] sm:$0xff]  ;;  %1570 = vmatpush.msra.mxu2 %v1545_v5 }
 0xd3f   :  { %v1432_v40 = vadd.f32 1.0, %v5510_v38  ;;  %v1541_v38 = vld [vmem:[%s8373_s11 + $0x80] sm:$0xff]  ;;  %1590 = vmatpush.msra.mxu3 %v6665_v37 }
 0xd40   :  { %5511 = vrcp.f32 %v1388_v39  ;;  %v1400_v0 = vand.u32 2147483648, %v1388_v39  ;;  %v1398_v6 = vand.u32 2147483647, %v1388_v39  ;;  %vm1394_vm2 = vweird.f32 %v1388_v39  ;;  %1571 = vmatpush.msra.mxu2 %v1541_v38 }
 0xd41   :  { %5513 = vrcp.f32 %v1432_v40  ;;  %v1444_v59 = vand.u32 2147483648, %v1432_v40  ;;  %v1442_v4 = vand.u32 2147483647, %v1432_v40  ;;  %vm1438_vm3 = vweird.f32 %v1432_v40 }
 0xd42   :  { %v1401_v19 = vor.u32 1.1754944e-38, %v1400_v0  ;;  %vm1399_vm9 = vcmp.eq.f32.partialorder %v1398_v6, 8.507059e+37  ;;  %v6715_v6 = vld [vmem:[%s8373_s11 + $0x8] sm:$0xff] }
 0xd43   :  { %v1445_v31 = vor.u32 1.1754944e-38, %v1444_v59  ;;  %vm1443_vm11 = vcmp.eq.f32.partialorder %v1442_v4, 8.507059e+37 }
 0xd46   :  { %v5512_v43 = vpop.eup %5511 }
 0xd47   :  { %v5514_v20 = vpop.eup %5513  ;;  %v1390_v44 = vmul.f32 %v5512_v43, %v1388_v39  ;;  %vm1395_vm14 = vweird.f32 %v5512_v43  ;;  %v6674_v39 = vld [vmem:[%s8373_s11 + $0x88] sm:$0xff] }
 0xd48   :  { %v1434_v46 = vmul.f32 %v5514_v20, %v1432_v40  ;;  %vm1439_vm15 = vweird.f32 %v5514_v20  ;;  %vm1396_vm7 = vmor %vm1394_vm2, %vm1395_vm14  ;;  %v1537_v40 = vld [vmem:[%s8373_s11 + $0x60] sm:$0xff]  ;;  %1591 = vmatpush.msra.mxu3 %v6674_v39 }
 0xd49   :  { %v1391_v48 = vsub.f32 1.0, %v1390_v44  ;;  %vm1440_vm8 = vmor %vm1438_vm3, %vm1439_vm15  ;;  %v6692_v44 = vld [vmem:[%s8373_s11 + $0x48] sm:$0xff]  ;;  %1572 = vmatpush.msra.mxu2 %v1537_v40 }
 0xd4a   :  { %v1435_v61 = vsub.f32 1.0, %v1434_v46  ;;  %v1529_v46 = vld [vmem:[%s8373_s11 + $0x20] sm:$0xff] }
 0xd4b   :  { %v1392_v1 = vmul.f32 %v5512_v43, %v1391_v48  ;;  %v6701_v48 = vld [vmem:[%s8373_s11 + $0x28] sm:$0xff] }
 0xd4c   :  { %v1436_v7 = vmul.f32 %v5514_v20, %v1435_v61 }
 0xd4d   :  { %v1393_v9 = vadd.f32 %v5512_v43, %v1392_v1  ;;  %v1525_v1 = vld [vmem:[%s8373_s11] sm:$0xff] }
 0xd4e   :  { %v1437_v13 = vadd.f32 %v5514_v20, %v1436_v7 }
 0xd4f   :  { %v1397_v33 = vsel %vm1396_vm7, %v5512_v43, %v1393_v9  ;;  %v6683_v43 = vld [vmem:[%s8373_s11 + $0x68] sm:$0xff] }
 0xd50   :  { %v1441_v35 = vsel %vm1440_vm8, %v5514_v20, %v1437_v13  ;;  %v1402_v60 = vsel %vm1399_vm9, %v1401_v19, %v1397_v33  ;;  %v1533_v20 = vld [vmem:[%s8373_s11 + $0x40] sm:$0xff]  ;;  %1592 = vmatpush.msra.mxu3 %v6683_v43 }
 0xd51   :  { %v1446_v63 = vsel %vm1443_vm11, %v1445_v31, %v1441_v35  ;;  %v1414_v2 = vmul.f32 %v1412_v26, %v1402_v60  ;;  %1573 = vmatpush.msra.mxu2 %v1533_v20 }
 0xd52   :  { %v1458_v50 = vmul.f32 %v1456_v62, %v1446_v63  ;;  %1593 = vmatpush.msra.mxu3 %v6692_v44 }
 0xd53   :  { %1416 = vrot.lane.b32.xlu1 %v1414_v2, %s5790_s29  ;;  %1574 = vmatpush.msra.mxu2 %v1529_v46 }
 0xd54   :  { %1460 = vrot.lane.b32.xlu2 %v1458_v50, %s5790_s29  ;;  %1594 = vmatpush.msra.mxu3 %v6701_v48 }
 0xd55   :  { %1575 = vmatpush.msra.mxu2 %v1525_v1 }
 0xd56   :  { %1595 = vmatpush.msra.mxu3 %v6715_v6 }
 0xd96   :  { %v1407_v54 = vpop.permute.xlu2 %1406 }
 0xd97   :  { %v1409_v41 = vmul.f32 %v1407_v54, %v1402_v60 }
 0xdae   :  { %v1461_v47 = vpop.permute.xlu2 %1460 }
 0xdaf   :  { %v1451_v55 = vpop.permute.xlu0 %1450 }
 0xdb0   :  { %v1453_v56 = vmul.f32 %v1451_v55, %v1446_v63 }
 0xdb2   :  { %v6620_v49 = vadd.f32 %v1461_v47, %v1453_v56 }
 0xdb4   :  { %v5266_v11 = vclamps-f32 %v6620_v49, 3.0  ;;  %v1750_v49 = vld [vmem:[%s8374_s12 + $0x20] sm:$0xff] }
 0xdb6   :  { %5515 = vtanh.f32 %v5266_v11 }
 0xdbc   :  { %v5516_v45 = vpop.eup %5515 }
 0xdbd   :  { %1468 = vrot.lane.b32.xlu1 %v5516_v45, %s5790_s29 }
 0xdc5   :  { %v1417_v42 = vpop.permute.xlu1 %1416 }
 0xdc6   :  { %v6626_v14 = vadd.f32 %v1417_v42, %v1409_v41 }
 0xdc8   :  { %v5264_v52 = vclamps-f32 %v6626_v14, 3.0  ;;  %v1752_v14 = vld [vmem:[%s8374_s12 + $0x30] sm:$0xff] }
 0xdca   :  { %5517 = vtanh.f32 %v5264_v52 }
 0xdd0   :  { %v5518_v58 = vpop.eup %5517 }
 0xdd1   :  { %1424 = vrot.lane.b32.xlu0 %v5518_v58, %s5790_s29 }
 0xe2f   :  { %v1469_v18 = vpop.permute.xlu1 %1468 }
 0xe30   :  { %v1471_v22 = vmul.f32 %v1469_v18, %v1446_v63 }
 0xe32   :  { %1477 = vrot.lane.b32.xlu0 %v1471_v22, %s5792_s0 }
 0xe3a   :  { %1671 = vrot.lane.b32.xlu0 %v1670_v23, %s5791_s30 }
 0xe43   :  { %v1425_v27 = vpop.permute.xlu0 %1424 }
 0xe44   :  { %v1427_v29 = vmul.f32 %v1425_v27, %v1402_v60 }
 0xe46   :  { %1473 = vrot.lane.b32.xlu2 %v1427_v29, %s5791_s30 }
 0xe4e   :  { %1719 = vrot.lane.b32.xlu2 %v1718_v30, %s5791_s30 }
 0xea0   :  { %v1474_v36 = vpop.permute.xlu2 %1473 }
 0xea4   :  { %v1478_v32 = vpop.permute.xlu0 %1477 }
 0xea5   :  { %v1480_v3 = vsel %vm257_vm0, %v1474_v36, %v1478_v32 }
 0xea6   :  { %5267 = vmatmul.msk.f32.vlgmr.msra.gmra.mxu0 %vm672_vm4, %v1480_v3 }
 0xea7   :  { %2021 = vmatpush.msra.mxu0 %v1553_v25 }
 0xea9   :  { %2022 = vmatpush.msra.mxu0 %v1549_v53 }
 0xeab   :  { %2023 = vmatpush.msra.mxu0 %v1545_v5 }
 0xeac   :  { %v1672_v5 = vpop.permute.xlu0 %1671 }
 0xead   :  { %2024 = vmatpush.msra.mxu0 %v1541_v38 }
 0xeaf   :  { %2025 = vmatpush.msra.mxu0 %v1537_v40 }
 0xeb1   :  { %2026 = vmatpush.msra.mxu0 %v1533_v20  ;;  %v1720_v20 = vpop.permute.xlu2 %1719 }
 0xeb3   :  { %2027 = vmatpush.msra.mxu0 %v1529_v46 }
 0xeb5   :  { %2028 = vmatpush.msra.mxu0 %v1525_v1 }
 0xf23   :  { %v1509_v61 = vpop.f32.mrf.mxu0 }
 0xf24   :  { %v5268_v0 = vclamps-f32 %v1509_v61, 3.0 }
 0xf26   :  { %v1516_v59 = vadd.f32 %v5268_v0, %v6603_v34  ;;  %1520 = vrot.lane.b32.xlu1 %v5268_v0, %s5791_s30 }
 0xf28   :  { %1517 = vst.msk [vmem:[#allocation3 + $0x2] sm:$0x3] %vm1061_vm5, %v1516_v59 }
 0xf29   :  { %1518 = vst.msk [vmem:[#allocation3 + $0x10] sm:$0x3] %vm1063_vm6, %v1516_v59 }
 0xf98   :  { %v1521_v7 = vpop.permute.xlu1 %1520 }
 0xf99   :  { %v1523_v4 = vsel %vm257_vm0, %v6603_v34, %v1521_v7 }
 0xf9a   :  { %v1524_v9 = vsel %vm1073_vm1, %v1523_v4, %v1521_v7 }
 0xf9b   :  { %5269 = vmatmul.msk.f32.vlgmr.msra.gmra.mxu2 %vm672_vm4, %v1524_v9  ;;  %5270 = vmatmul.msk.f32.vlgmr.msra.gmra.mxu3 %vm672_vm4, %v1524_v9 }
 0xf9c   :  { %5271 = vmatmul.msk.f32.vlgmr.msrb.gmra.mxu1 %vm672_vm4, %v1524_v9  ;;  %5272 = vmatmul.msk.f32.vlgmr.msrb.gmra.mxu0 %vm672_vm4, %v1524_v9 }
0x101e   :  { %v1577_v13 = vpop.f32.mrf.mxu2  ;;  %v1597_v19 = vpop.f32.mrf.mxu3 }
0x101f   :  { %v1641_v31 = vrot.slane %v1577_v13, 4  ;;  %v1689_v33 = vrot.slane %v1597_v19, 2 }
0x1021   :  { %v1643_v26 = vadd.f32 %v1641_v31, %v6242_v21  ;;  %v1691_v35 = vadd.f32 %v1689_v33, %v6245_v24 }
0x1023   :  { %v5273_v60 = vmul.f32 -1.442695, %v1643_v26  ;;  %5519 = vtanh.f32 %v1643_v26  ;;  %v5275_v34 = vmul.f32 -1.442695, %v1691_v35 }
0x1024   :  { %5521 = vtanh.f32 %v1691_v35 }
0x1025   :  { %5523 = vpow2.f32 %v5273_v60 }
0x1026   :  { %5525 = vpow2.f32 %v5275_v34 }
0x1029   :  { %v5520_v62 = vpop.eup %5519 }
0x102a   :  { %v5522_v63 = vpop.eup %5521  ;;  %1665 = vrot.lane.b32.xlu2 %v5520_v62, %s5792_s0 }
0x102b   :  { %v5524_v2 = vpop.eup %5523  ;;  %1713 = vrot.lane.b32.xlu1 %v5522_v63, %s5792_s0 }
0x102c   :  { %v5526_v50 = vpop.eup %5525  ;;  %v1647_v54 = vadd.f32 1.0, %v5524_v2 }
0x102d   :  { %v1695_v55 = vadd.f32 1.0, %v5526_v50 }
0x102e   :  { %5527 = vrcp.f32 %v1647_v54  ;;  %v1659_v18 = vand.u32 2147483648, %v1647_v54  ;;  %v1657_v27 = vand.u32 2147483647, %v1647_v54  ;;  %vm1653_vm14 = vweird.f32 %v1647_v54 }
0x102f   :  { %5529 = vrcp.f32 %v1695_v55  ;;  %v1707_v22 = vand.u32 2147483648, %v1695_v55  ;;  %v1705_v30 = vand.u32 2147483647, %v1695_v55  ;;  %vm1701_vm15 = vweird.f32 %v1695_v55 }
0x1030   :  { %v1660_v3 = vor.u32 1.1754944e-38, %v1659_v18  ;;  %vm1658_vm7 = vcmp.eq.f32.partialorder %v1657_v27, 8.507059e+37  ;;  %v1782_v18 = vld [vmem:[%s8375_s13 + $0x10] sm:$0xff] }
0x1031   :  { %v1708_v25 = vor.u32 1.1754944e-38, %v1707_v22  ;;  %vm1706_vm8 = vcmp.eq.f32.partialorder %v1705_v30, 8.507059e+37  ;;  %v6801_v30 = vld [vmem:[%s8375_s13 + $0x18] sm:$0xff] }
0x1034   :  { %v5528_v56 = vpop.eup %5527 }
0x1035   :  { %v5530_v47 = vpop.eup %5529  ;;  %v1649_v45 = vmul.f32 %v5528_v56, %v1647_v54  ;;  %vm1654_vm12 = vweird.f32 %v5528_v56  ;;  %v1753_v54 = vld [vmem:[%s8374_s12 + $0x38] sm:$0xff] }
0x1036   :  { %v1697_v41 = vmul.f32 %v5530_v47, %v1695_v55  ;;  %vm1702_vm13 = vweird.f32 %v5530_v47  ;;  %vm1655_vm2 = vmor %vm1653_vm14, %vm1654_vm12  ;;  %1766 = vmatpush.msrb.mxu2 %v1753_v54  ;;  %2219 = vmatpush.msrb.mxu0 %v1753_v54  ;;  %v1748_v55 = vld [vmem:[%s8374_s12 + $0x10] sm:$0xff] }
0x1037   :  { %v1650_v42 = vsub.f32 1.0, %v1649_v45  ;;  %vm1703_vm3 = vmor %vm1701_vm15, %vm1702_vm13  ;;  %v1786_v45 = vld [vmem:[%s8375_s13 + $0x30] sm:$0xff] }
0x1038   :  { %v1698_v58 = vsub.f32 1.0, %v1697_v41  ;;  %1767 = vmatpush.msrb.mxu2 %v1752_v14  ;;  %2220 = vmatpush.msrb.mxu0 %v1752_v14  ;;  %v6781_v41 = vld [vmem:[%s8375_s13 + $0x38] sm:$0xff] }
0x1039   :  { %v1651_v23 = vmul.f32 %v5528_v56, %v1650_v42  ;;  %v1784_v42 = vld [vmem:[%s8375_s13 + $0x20] sm:$0xff]  ;;  %1809 = vmatpush.msrb.mxu3 %v1786_v45  ;;  %1829 = vmatpush.msra.mxu1 %v6781_v41 }
0x103a   :  { %v1699_v29 = vmul.f32 %v5530_v47, %v1698_v58  ;;  %v6790_v58 = vld [vmem:[%s8375_s13 + $0x28] sm:$0xff] }
0x103b   :  { %v1652_v36 = vadd.f32 %v5528_v56, %v1651_v23  ;;  %1810 = vmatpush.msrb.mxu3 %v1784_v42  ;;  %1830 = vmatpush.msra.mxu1 %v6790_v58 }
0x103c   :  { %v1700_v32 = vadd.f32 %v5530_v47, %v1699_v29 }
0x103d   :  { %v1656_v53 = vsel %vm1655_vm2, %v5528_v56, %v1652_v36  ;;  %v1747_v56 = vld [vmem:[%s8374_s12 + $0x8] sm:$0xff]  ;;  %1811 = vmatpush.msrb.mxu3 %v1782_v18  ;;  %1831 = vmatpush.msra.mxu1 %v6801_v30  ;;  %v1780_v36 = vld [vmem:[%s8375_s13] sm:$0xff] }
0x103e   :  { %v1704_v38 = vsel %vm1703_vm3, %v5530_v47, %v1700_v32  ;;  %v1661_v40 = vsel %vm1658_vm7, %v1660_v3, %v1656_v53  ;;  %v1746_v47 = vld [vmem:[%s8374_s12] sm:$0xff]  ;;  %v6810_v32 = vld [vmem:[%s8375_s13 + $0x8] sm:$0xff] }
0x103f   :  { %v1709_v46 = vsel %vm1706_vm8, %v1708_v25, %v1704_v38  ;;  %v1674_v61 = vmul.f32 %v1672_v5, %v1661_v40  ;;  %1812 = vmatpush.msrb.mxu3 %v1780_v36  ;;  %1832 = vmatpush.msra.mxu1 %v6810_v32 }
0x1040   :  { %v1722_v0 = vmul.f32 %v1720_v20, %v1709_v46 }
0x1041   :  { %1676 = vrot.lane.b32.xlu1 %v1674_v61, %s5790_s29  ;;  %2041 = vmatpush.msrb.mxu1 %v6648_v15  ;;  %v1617_v15 = vpop.f32.mrf.mxu1 }
0x1042   :  { %1724 = vrot.lane.b32.xlu0 %v1722_v0, %s5790_s29 }
0x1043   :  { %2042 = vmatpush.msrb.mxu1 %v6657_v57  ;;  %v1788_v57 = vld [vmem:[%s8376_s14] sm:$0x3] }
0x1045   :  { %2043 = vmatpush.msrb.mxu1 %v6665_v37  ;;  %v1791_v37 = vperm.slane %v1788_v57, 1 }
0x1047   :  { %2044 = vmatpush.msrb.mxu1 %v6674_v39 }
0x1049   :  { %2045 = vmatpush.msrb.mxu1 %v6683_v43 }
0x104b   :  { %2046 = vmatpush.msrb.mxu1 %v6692_v44  ;;  %v1637_v44 = vpop.f32.mrf.mxu0 }
0x104d   :  { %2047 = vmatpush.msrb.mxu1 %v6701_v48 }
0x104f   :  { %2048 = vmatpush.msrb.mxu1 %v6715_v6  ;;  %v1790_v6 = vperm.slane %v1788_v57, 0 }
0x1084   :  { %v1666_v1 = vpop.permute.xlu2 %1665 }
0x1085   :  { %v1668_v7 = vmul.f32 %v1666_v1, %v1661_v40 }
0x109d   :  { %v1714_v59 = vpop.permute.xlu1 %1713 }
0x109e   :  { %v1716_v4 = vmul.f32 %v1714_v59, %v1709_v46 }
0x10b3   :  { %v1677_v9 = vpop.permute.xlu1 %1676 }
0x10b4   :  { %v6731_v13 = vadd.f32 %v1677_v9, %v1668_v7  ;;  %v1725_v19 = vpop.permute.xlu0 %1724 }
0x10b5   :  { %v6733_v31 = vadd.f32 %v1725_v19, %v1716_v4 }
0x10b6   :  { %v5274_v33 = vclamps-f32 %v6731_v13, 3.0  ;;  %v6886_v13 = vld [vmem:[%s8377_s15 + $0x10] sm:$0xff] }
0x10b7   :  { %v5276_v26 = vclamps-f32 %v6733_v31, 3.0 }
0x10b8   :  { %5531 = vtanh.f32 %v5274_v33 }
0x10b9   :  { %5533 = vtanh.f32 %v5276_v26 }
0x10be   :  { %v5532_v35 = vpop.eup %5531 }
0x10bf   :  { %v5534_v60 = vpop.eup %5533  ;;  %1684 = vrot.lane.b32.xlu0 %v5532_v35, %s5790_s29 }
0x10c0   :  { %1732 = vrot.lane.b32.xlu2 %v5534_v60, %s5790_s29 }
0x10c7   :  { %1864 = vrot.lane.b32.xlu0 %v5264_v52, %s5791_s30  ;;  %v1751_v52 = vld [vmem:[%s8374_s12 + $0x28] sm:$0xff] }
0x10c8   :  { %1768 = vmatpush.msrb.mxu2 %v1751_v52  ;;  %2221 = vmatpush.msrb.mxu0 %v1751_v52 }
0x10ca   :  { %1769 = vmatpush.msrb.mxu2 %v1750_v49  ;;  %2222 = vmatpush.msrb.mxu0 %v1750_v49 }
0x111a   :  { %v1733_v34 = vpop.permute.xlu2 %1732 }
0x111b   :  { %v1735_v62 = vmul.f32 %v1733_v34, %v1709_v46 }
0x111d   :  { %v1741_v63 = vrot.slane %v1735_v62, 2 }
0x111f   :  { %1742 = vrot.lane.b32.xlu2 %v1741_v63, %s5792_s0 }
0x1131   :  { %v1685_v2 = vpop.permute.xlu0 %1684 }
0x1132   :  { %v1687_v50 = vmul.f32 %v1685_v2, %v1661_v40 }
0x1134   :  { %1737 = vrot.lane.b32.xlu1 %v1687_v50, %s5791_s30 }
0x113c   :  { %1908 = vrot.lane.b32.xlu1 %v5266_v11, %s5791_s30  ;;  %v1749_v11 = vld [vmem:[%s8374_s12 + $0x18] sm:$0xff] }
0x113d   :  { %1770 = vmatpush.msrb.mxu2 %v1749_v11  ;;  %2223 = vmatpush.msrb.mxu0 %v1749_v11 }
0x113f   :  { %1771 = vmatpush.msrb.mxu2 %v1748_v55  ;;  %2224 = vmatpush.msrb.mxu0 %v1748_v55 }
0x1141   :  { %1772 = vmatpush.msrb.mxu2 %v1747_v56  ;;  %2225 = vmatpush.msrb.mxu0 %v1747_v56 }
0x1143   :  { %1773 = vmatpush.msrb.mxu2 %v1746_v47  ;;  %2226 = vmatpush.msrb.mxu0 %v1746_v47 }
0x1179   :  { %v1743_v22 = vpop.permute.xlu2 %1742 }
0x11a6   :  { %v1738_v23 = vpop.permute.xlu1 %1737 }
0x11a7   :  { %v1745_v27 = vsel %vm257_vm0, %v1738_v23, %v1743_v22  ;;  %v1865_v22 = vpop.permute.xlu0 %1864 }
0x11a8   :  { %v1755_v29 = vrot.slane %v1745_v27, 4 }
0x11aa   :  { %5277 = vmatmul.msk.f32.vlgmr.msrb.gmra.mxu2 %vm672_vm4, %v1755_v29 }
0x11ae   :  { %v1909_v52 = vpop.permute.xlu1 %1908 }
0x122d   :  { %v1775_v3 = vpop.f32.mrf.mxu2 }
0x122e   :  { %v6821_v25 = vclamps-f32 %v1775_v3, 3.0 }
0x1230   :  { %1967 = vst.msk [vmem:[#allocation2 + $0x4] sm:$0x3] %vm1061_vm5, %v6821_v25  ;;  %5279 = vmatmul.msk.f32.vlgmr.msrb.gmra.mxu3 %vm257_vm0, %v6821_v25  ;;  %5280 = vmatmul.msk.f32.vlgmr.msra.gmra.mxu1 %vm257_vm0, %v6821_v25 }
0x1231   :  { %1968 = vst.msk [vmem:[#allocation2 + $0xe] sm:$0x3] %vm1063_vm6, %v6821_v25  ;;  %2262 = vmatpush.msra.mxu1 %v1786_v45 }
0x1233   :  { %2263 = vmatpush.msra.mxu1 %v1784_v42 }
0x1235   :  { %2264 = vmatpush.msra.mxu1 %v1782_v18 }
0x1237   :  { %2265 = vmatpush.msra.mxu1 %v1780_v36 }
0x12ad   :  { %v1834_v39 = vpop.f32.mrf.mxu1 }
0x12ae   :  { %v1835_v43 = vadd.f32 %v1834_v39, %v1791_v37 }
0x12b0   :  { %v1881_v48 = vadd.f32 %v1835_v43, %v1637_v44 }
0x12b2   :  { %v5283_v53 = vmul.f32 -1.442695, %v1881_v48  ;;  %5535 = vtanh.f32 %v1881_v48 }
0x12b3   :  { %v1814_v5 = vpop.f32.mrf.mxu3 }
0x12b4   :  { %5537 = vpow2.f32 %v5283_v53  ;;  %v1815_v38 = vadd.f32 %v1814_v5, %v1790_v6 }
0x12b6   :  { %v1837_v40 = vadd.f32 %v1815_v38, %v1617_v15 }
0x12b8   :  { %v5536_v20 = vpop.eup %5535  ;;  %v5281_v46 = vmul.f32 -1.442695, %v1837_v40  ;;  %5539 = vtanh.f32 %v1837_v40  ;;  %v6854_v40 = vld [vmem:[%s8377_s15 + $0x38] sm:$0xff] }
0x12b9   :  { %1903 = vrot.lane.b32.xlu0 %v5536_v20, %s5792_s0  ;;  %v6859_v20 = vld [vmem:[%s8377_s15 + $0x30] sm:$0xff]  ;;  %1953 = vmatpush.msra.mxu3 %v6854_v40 }
0x12ba   :  { %v5538_v61 = vpop.eup %5537  ;;  %5541 = vpow2.f32 %v5281_v46  ;;  %v6865_v46 = vld [vmem:[%s8377_s15 + $0x28] sm:$0xff] }
0x12bb   :  { %v1885_v0 = vadd.f32 1.0, %v5538_v61  ;;  %v2123_v61 = vrot.slane %v5274_v33, 6  ;;  %1954 = vmatpush.msra.mxu3 %v6859_v20 }
0x12bd   :  { %5543 = vrcp.f32 %v1885_v0  ;;  %v1897_v35 = vand.u32 2147483648, %v1885_v0  ;;  %v1895_v34 = vand.u32 2147483647, %v1885_v0  ;;  %vm1891_vm11 = vweird.f32 %v1885_v0  ;;  %1955 = vmatpush.msra.mxu3 %v6865_v46 }
0x12be   :  { %v5540_v59 = vpop.eup %5539 }
0x12bf   :  { %1859 = vrot.lane.b32.xlu2 %v5540_v59, %s5792_s0  ;;  %v1898_v50 = vor.u32 1.1754944e-38, %v1897_v35  ;;  %vm1896_vm13 = vcmp.eq.f32.partialorder %v1895_v34, 8.507059e+37  ;;  %v6880_v59 = vld [vmem:[%s8377_s15 + $0x18] sm:$0xff]  ;;  %v2004_v34 = vld [vmem:[%s8373_s11 + $0xd0] sm:$0xff] }
0x12c0   :  { %v5542_v1 = vpop.eup %5541 }
0x12c1   :  { %v1841_v7 = vadd.f32 1.0, %v5542_v1 }
0x12c3   :  { %v5544_v4 = vpop.eup %5543  ;;  %5545 = vrcp.f32 %v1841_v7  ;;  %v1853_v11 = vand.u32 2147483648, %v1841_v7  ;;  %v1851_v47 = vand.u32 2147483647, %v1841_v7  ;;  %vm1847_vm15 = vweird.f32 %v1841_v7 }
0x12c4   :  { %v1887_v9 = vmul.f32 %v5544_v4, %v1885_v0  ;;  %vm1892_vm9 = vweird.f32 %v5544_v4  ;;  %v6873_v0 = vld [vmem:[%s8377_s15 + $0x20] sm:$0xff] }
0x12c5   :  { %vm1893_vm12 = vmor %vm1891_vm11, %vm1892_vm9  ;;  %v1854_v42 = vor.u32 1.1754944e-38, %v1853_v11  ;;  %vm1852_vm3 = vcmp.eq.f32.partialorder %v1851_v47, 8.507059e+37  ;;  %1956 = vmatpush.msra.mxu3 %v6873_v0  ;;  %v6958_v11 = vld [vmem:[%s8373_s11 + $0x58] sm:$0xff] }
0x12c6   :  { %v1888_v19 = vsub.f32 1.0, %v1887_v9  ;;  %v6903_v9 = vld [vmem:[%s8377_s15] sm:$0xff] }
0x12c7   :  { %1957 = vmatpush.msra.mxu3 %v6880_v59 }
0x12c8   :  { %v1889_v60 = vmul.f32 %v5544_v4, %v1888_v19 }
0x12c9   :  { %v5546_v62 = vpop.eup %5545  ;;  %1958 = vmatpush.msra.mxu3 %v6886_v13 }
0x12ca   :  { %v1890_v63 = vadd.f32 %v5544_v4, %v1889_v60  ;;  %v1843_v2 = vmul.f32 %v5546_v62, %v1841_v7  ;;  %vm1848_vm14 = vweird.f32 %v5546_v62  ;;  %v2171_v7 = vrot.slane %v5276_v26, 2  ;;  %v2008_v26 = vld [vmem:[%s8373_s11 + $0xf0] sm:$0xff]  ;;  %v6914_v60 = vld [vmem:[%s8373_s11 + $0xf8] sm:$0xff] }
0x12cb   :  { %vm1849_vm2 = vmor %vm1847_vm15, %vm1848_vm14  ;;  %2061 = vmatpush.msra.mxu2 %v2008_v26 }
0x12cc   :  { %v1894_v54 = vsel %vm1893_vm12, %v5544_v4, %v1890_v63  ;;  %v1844_v14 = vsub.f32 1.0, %v1843_v2  ;;  %v6897_v4 = vld [vmem:[%s8377_s15 + $0x8] sm:$0xff]  ;;  %v2000_v63 = vld [vmem:[%s8373_s11 + $0xb0] sm:$0xff]  ;;  %v6931_v2 = vld [vmem:[%s8373_s11 + $0xb8] sm:$0xff] }
0x12cd   :  { %v1899_v49 = vsel %vm1896_vm13, %v1898_v50, %v1894_v54  ;;  %1959 = vmatpush.msra.mxu3 %v6897_v4  ;;  %2062 = vmatpush.msra.mxu2 %v2004_v34  ;;  %v1996_v50 = vld [vmem:[%s8373_s11 + $0x90] sm:$0xff]  ;;  %v6940_v54 = vld [vmem:[%s8373_s11 + $0x98] sm:$0xff] }
0x12ce   :  { %v1911_v55 = vmul.f32 %v1909_v52, %v1899_v49  ;;  %v1845_v56 = vmul.f32 %v5546_v62, %v1844_v14  ;;  %v1992_v14 = vld [vmem:[%s8373_s11 + $0x70] sm:$0xff]  ;;  %v6949_v52 = vld [vmem:[%s8373_s11 + $0x78] sm:$0xff] }
0x12cf   :  { %1960 = vmatpush.msra.mxu3 %v6903_v9  ;;  %2063 = vmatpush.msra.mxu2 %v2000_v63 }
0x12d0   :  { %1913 = vrot.lane.b32.xlu2 %v1911_v55, %s5790_s29  ;;  %v1846_v45 = vadd.f32 %v5546_v62, %v1845_v56  ;;  %v1984_v55 = vld [vmem:[%s8373_s11 + $0x30] sm:$0xff]  ;;  %v6967_v56 = vld [vmem:[%s8373_s11 + $0x38] sm:$0xff] }
0x12d1   :  { %2081 = vmatpush.msrb.mxu3 %v6914_v60  ;;  %2064 = vmatpush.msra.mxu2 %v1996_v50 }
0x12d2   :  { %v1850_v18 = vsel %vm1849_vm2, %v5546_v62, %v1846_v45  ;;  %v6923_v62 = vld [vmem:[%s8373_s11 + $0xd8] sm:$0xff] }
0x12d3   :  { %v1855_v23 = vsel %vm1852_vm3, %v1854_v42, %v1850_v18  ;;  %2082 = vmatpush.msrb.mxu3 %v6923_v62  ;;  %2065 = vmatpush.msra.mxu2 %v1992_v14  ;;  %v1980_v18 = vld [vmem:[%s8373_s11 + $0x10] sm:$0xff] }
0x12d4   :  { %v1867_v27 = vmul.f32 %v1865_v22, %v1855_v23  ;;  %v6981_v22 = vld [vmem:[%s8373_s11 + $0x18] sm:$0xff] }
0x12d5   :  { %2083 = vmatpush.msrb.mxu3 %v6931_v2 }
0x12d6   :  { %1869 = vrot.lane.b32.xlu1 %v1867_v27, %s5790_s29 }
0x12d7   :  { %2084 = vmatpush.msrb.mxu3 %v6940_v54 }
0x12d9   :  { %2085 = vmatpush.msrb.mxu3 %v6949_v52 }
0x12db   :  { %2086 = vmatpush.msrb.mxu3 %v6958_v11 }
0x12dd   :  { %2087 = vmatpush.msrb.mxu3 %v6967_v56 }
0x12df   :  { %2088 = vmatpush.msrb.mxu3 %v6981_v22 }
0x1319   :  { %v1860_v29 = vpop.permute.xlu2 %1859 }
0x131a   :  { %v1862_v43 = vmul.f32 %v1860_v29, %v1855_v23 }
0x132a   :  { %v1914_v15 = vpop.permute.xlu2 %1913 }
0x132b   :  { %v1904_v36 = vpop.permute.xlu0 %1903 }
0x132c   :  { %v1906_v3 = vmul.f32 %v1904_v36, %v1899_v49 }
0x132e   :  { %v6838_v57 = vadd.f32 %v1914_v15, %v1906_v3 }
0x1330   :  { %v5284_v37 = vclamps-f32 %v6838_v57, 3.0  ;;  %v2241_v57 = vld [vmem:[%s8376_s14] sm:$0x3] }
0x1332   :  { %5547 = vtanh.f32 %v5284_v37 }
0x1338   :  { %v5548_v39 = vpop.eup %5547 }
0x1339   :  { %1921 = vrot.lane.b32.xlu1 %v5548_v39, %s5790_s29 }
0x1348   :  { %v1870_v44 = vpop.permute.xlu1 %1869 }
0x1349   :  { %v6844_v48 = vadd.f32 %v1870_v44, %v1862_v43 }
0x134b   :  { %v5282_v6 = vclamps-f32 %v6844_v48, 3.0 }
0x134d   :  { %5549 = vtanh.f32 %v5282_v6 }
0x1353   :  { %v5550_v53 = vpop.eup %5549 }
0x1354   :  { %1877 = vrot.lane.b32.xlu0 %v5550_v53, %s5790_s29 }
0x13ab   :  { %v1922_v5 = vpop.permute.xlu1 %1921 }
0x13ac   :  { %v1924_v38 = vmul.f32 %v1922_v5, %v1899_v49  ;;  %v1988_v49 = vld [vmem:[%s8373_s11 + $0x50] sm:$0xff] }
0x13ad   :  { %2066 = vmatpush.msra.mxu2 %v1988_v49 }
0x13ae   :  { %1930 = vrot.lane.b32.xlu0 %v1924_v38, %s5792_s0 }
0x13af   :  { %2067 = vmatpush.msra.mxu2 %v1984_v55 }
0x13b1   :  { %2068 = vmatpush.msra.mxu2 %v1980_v18 }
0x13b3   :  { %2282 = vmatpush.msrb.mxu2 %v6781_v41 }
0x13b5   :  { %2283 = vmatpush.msrb.mxu2 %v6790_v58 }
0x13b6   :  { %2124 = vrot.lane.b32.xlu0 %v2123_v61, %s5791_s30 }
0x13b7   :  { %2284 = vmatpush.msrb.mxu2 %v6801_v30 }
0x13b9   :  { %2285 = vmatpush.msrb.mxu2 %v6810_v32 }
0x13c6   :  { %v1878_v33 = vpop.permute.xlu0 %1877 }
0x13c7   :  { %v1880_v1 = vmul.f32 %v1878_v33, %v1855_v23 }
0x13c9   :  { %1926 = vrot.lane.b32.xlu2 %v1880_v1, %s5791_s30 }
0x13d1   :  { %2172 = vrot.lane.b32.xlu2 %v2171_v7, %s5791_s30 }
0x1420   :  { %v1931_v19 = vpop.permute.xlu0 %1930 }
0x1423   :  { %v1927_v35 = vpop.permute.xlu2 %1926 }
0x1424   :  { %v1933_v31 = vsel %vm257_vm0, %v1927_v35, %v1931_v19 }
0x1425   :  { %5285 = vmatmul.msk.f32.vlgmr.msra.gmra.mxu3 %vm672_vm4, %v1933_v31 }
0x14a8   :  { %v1962_v47 = vpop.f32.mrf.mxu3 }
0x14a9   :  { %v5286_v45 = vclamps-f32 %v1962_v47, 3.0 }
0x14ab   :  { %v1969_v42 = vadd.f32 %v5286_v45, %v6821_v25  ;;  %1973 = vrot.lane.b32.xlu1 %v5286_v45, %s5791_s30 }
0x14ad   :  { %1970 = vst.msk [vmem:[#allocation3 + $0x4] sm:$0x3] %vm1061_vm5, %v1969_v42 }
0x14ae   :  { %1971 = vst.msk [vmem:[#allocation3 + $0xe] sm:$0x3] %vm1063_vm6, %v1969_v42 }
0x151d   :  { %v1974_v23 = vpop.permute.xlu1 %1973 }
0x151e   :  { %v1976_v27 = vsel %vm257_vm0, %v6821_v25, %v1974_v23 }
0x151f   :  { %v1977_v29 = vsel %vm1073_vm1, %v1976_v27, %v1974_v23 }
0x1520   :  { %5287 = vmatmul.msk.f32.vlgmr.msra.gmra.mxu0 %vm672_vm4, %v1977_v29  ;;  %5288 = vmatmul.msk.f32.vlgmr.msrb.gmra.mxu1 %vm672_vm4, %v1977_v29 }
0x1521   :  { %5289 = vmatmul.msk.f32.vlgmr.msra.gmra.mxu2 %vm672_vm4, %v1977_v29  ;;  %5290 = vmatmul.msk.f32.vlgmr.msrb.gmra.mxu3 %vm672_vm4, %v1977_v29 }
0x1522   :  { %2406 = vmatpush.msrb.mxu1 %v6854_v40  ;;  %2514 = vmatpush.msra.mxu0 %v2008_v26 }
0x1524   :  { %2407 = vmatpush.msrb.mxu1 %v6859_v20  ;;  %2515 = vmatpush.msra.mxu0 %v2004_v34  ;;  %v2125_v34 = vpop.permute.xlu0 %2124 }
0x1526   :  { %2408 = vmatpush.msrb.mxu1 %v6865_v46  ;;  %2516 = vmatpush.msra.mxu0 %v2000_v63 }
0x1528   :  { %2409 = vmatpush.msrb.mxu1 %v6873_v0  ;;  %2517 = vmatpush.msra.mxu0 %v1996_v50 }
0x152a   :  { %2410 = vmatpush.msrb.mxu1 %v6880_v59  ;;  %2518 = vmatpush.msra.mxu0 %v1992_v14  ;;  %v2173_v14 = vpop.permute.xlu2 %2172 }
0x152c   :  { %2411 = vmatpush.msrb.mxu1 %v6886_v13  ;;  %2519 = vmatpush.msra.mxu0 %v1988_v49 }
0x152e   :  { %2412 = vmatpush.msrb.mxu1 %v6897_v4  ;;  %2520 = vmatpush.msra.mxu0 %v1984_v55 }
0x1530   :  { %2413 = vmatpush.msrb.mxu1 %v6903_v9  ;;  %2521 = vmatpush.msra.mxu0 %v1980_v18 }
0x159d   :  { %v2030_v41 = vpop.f32.mrf.mxu0  ;;  %v2050_v58 = vpop.f32.mrf.mxu1 }
0x159e   :  { %v2094_v30 = vrot.slane %v2030_v41, 2  ;;  %v2142_v32 = vrot.slane %v2050_v58, 4 }
0x15a0   :  { %v2096_v25 = vadd.f32 %v2094_v30, %v6242_v21  ;;  %v2144_v36 = vadd.f32 %v2142_v32, %v6245_v24 }
0x15a2   :  { %v5291_v3 = vmul.f32 -1.442695, %v2096_v25  ;;  %5551 = vtanh.f32 %v2096_v25  ;;  %v5293_v15 = vmul.f32 -1.442695, %v2144_v36 }
0x15a3   :  { %5553 = vtanh.f32 %v2144_v36 }
0x15a4   :  { %5555 = vpow2.f32 %v5291_v3 }
0x15a5   :  { %5557 = vpow2.f32 %v5293_v15 }
0x15a8   :  { %v5552_v39 = vpop.eup %5551 }
0x15a9   :  { %v5554_v43 = vpop.eup %5553  ;;  %2118 = vrot.lane.b32.xlu2 %v5552_v39, %s5792_s0 }
0x15aa   :  { %v5556_v44 = vpop.eup %5555  ;;  %2166 = vrot.lane.b32.xlu1 %v5554_v43, %s5792_s0 }
0x15ab   :  { %v5558_v53 = vpop.eup %5557  ;;  %v2100_v5 = vadd.f32 1.0, %v5556_v44 }
0x15ac   :  { %v2148_v38 = vadd.f32 1.0, %v5558_v53 }
0x15ad   :  { %5559 = vrcp.f32 %v2100_v5  ;;  %v2112_v59 = vand.u32 2147483648, %v2100_v5  ;;  %v2110_v1 = vand.u32 2147483647, %v2100_v5  ;;  %vm2106_vm9 = vweird.f32 %v2100_v5 }
0x15ae   :  { %5561 = vrcp.f32 %v2148_v38  ;;  %v2160_v13 = vand.u32 2147483648, %v2148_v38  ;;  %v2158_v4 = vand.u32 2147483647, %v2148_v38  ;;  %vm2154_vm11 = vweird.f32 %v2148_v38 }
0x15af   :  { %v2113_v35 = vor.u32 1.1754944e-38, %v2112_v59  ;;  %vm2111_vm14 = vcmp.eq.f32.partialorder %v2110_v1, 8.507059e+37 }
0x15b0   :  { %v2161_v31 = vor.u32 1.1754944e-38, %v2160_v13  ;;  %vm2159_vm15 = vcmp.eq.f32.partialorder %v2158_v4, 8.507059e+37 }
0x15b3   :  { %v5560_v21 = vpop.eup %5559 }
0x15b4   :  { %v5562_v40 = vpop.eup %5561  ;;  %v2102_v20 = vmul.f32 %v5560_v21, %v2100_v5  ;;  %vm2107_vm7 = vweird.f32 %v5560_v21 }
0x15b5   :  { %v2150_v46 = vmul.f32 %v5562_v40, %v2148_v38  ;;  %vm2155_vm8 = vweird.f32 %v5562_v40  ;;  %vm2108_vm12 = vmor %vm2106_vm9, %vm2107_vm7 }
0x15b6   :  { %v2103_v61 = vsub.f32 1.0, %v2102_v20  ;;  %vm2156_vm13 = vmor %vm2154_vm11, %vm2155_vm8 }
0x15b7   :  { %v2151_v0 = vsub.f32 1.0, %v2150_v46 }
0x15b8   :  { %v2104_v33 = vmul.f32 %v5560_v21, %v2103_v61 }
0x15b9   :  { %v2152_v7 = vmul.f32 %v5562_v40, %v2151_v0 }
0x15ba   :  { %v2105_v9 = vadd.f32 %v5560_v21, %v2104_v33 }
0x15bb   :  { %v2153_v19 = vadd.f32 %v5562_v40, %v2152_v7 }
0x15bc   :  { %v2109_v26 = vsel %vm2108_vm12, %v5560_v21, %v2105_v9 }
0x15bd   :  { %v2157_v63 = vsel %vm2156_vm13, %v5562_v40, %v2153_v19  ;;  %v2114_v50 = vsel %vm2111_vm14, %v2113_v35, %v2109_v26 }
0x15be   :  { %v2162_v49 = vsel %vm2159_vm15, %v2161_v31, %v2157_v63  ;;  %v2127_v55 = vmul.f32 %v2125_v34, %v2114_v50 }
0x15bf   :  { %v2175_v47 = vmul.f32 %v2173_v14, %v2162_v49 }
0x15c0   :  { %2129 = vrot.lane.b32.xlu1 %v2127_v55, %s5790_s29 }
0x15c1   :  { %2177 = vrot.lane.b32.xlu0 %v2175_v47, %s5790_s29 }
0x1603   :  { %v2119_v42 = vpop.permute.xlu2 %2118 }
0x1604   :  { %v2121_v18 = vmul.f32 %v2119_v42, %v2114_v50 }
0x161c   :  { %v2167_v45 = vpop.permute.xlu1 %2166 }
0x161d   :  { %v2169_v23 = vmul.f32 %v2167_v45, %v2162_v49 }
0x1632   :  { %v2130_v27 = vpop.permute.xlu1 %2129 }
0x1633   :  { %v7009_v29 = vadd.f32 %v2130_v27, %v2121_v18  ;;  %v2178_v41 = vpop.permute.xlu0 %2177 }
0x1634   :  { %v7011_v58 = vadd.f32 %v2178_v41, %v2169_v23 }
0x1635   :  { %v5292_v30 = vclamps-f32 %v7009_v29, 3.0  ;;  %v7081_v29 = vld [vmem:[%s8373_s11 + $0xe0] sm:$0xff] }
0x1636   :  { %v5294_v32 = vclamps-f32 %v7011_v58, 3.0  ;;  %v7089_v58 = vld [vmem:[%s8373_s11 + $0xc0] sm:$0xff]  ;;  %2474 = vmatpush.msra.mxu2 %v7081_v29 }
0x1637   :  { %5563 = vtanh.f32 %v5292_v30 }
0x1638   :  { %5565 = vtanh.f32 %v5294_v32  ;;  %2475 = vmatpush.msra.mxu2 %v7089_v58 }
0x163d   :  { %v5564_v25 = vpop.eup %5563 }
0x163e   :  { %v5566_v36 = vpop.eup %5565  ;;  %2137 = vrot.lane.b32.xlu0 %v5564_v25, %s5790_s29 }
0x163f   :  { %2185 = vrot.lane.b32.xlu2 %v5566_v36, %s5790_s29 }
0x1646   :  { %2317 = vrot.lane.b32.xlu0 %v5282_v6, %s5791_s30 }
0x1699   :  { %v2186_v3 = vpop.permute.xlu2 %2185 }
0x169a   :  { %v2188_v15 = vmul.f32 %v2186_v3, %v2162_v49 }
0x169c   :  { %v2194_v39 = vrot.slane %v2188_v15, 6 }
0x169e   :  { %2195 = vrot.lane.b32.xlu2 %v2194_v39, %s5792_s0 }
0x16b0   :  { %v2138_v43 = vpop.permute.xlu0 %2137 }
0x16b1   :  { %v2140_v44 = vmul.f32 %v2138_v43, %v2114_v50 }
0x16b3   :  { %2190 = vrot.lane.b32.xlu1 %v2140_v44, %s5791_s30 }
0x16b8   :  { %v2318_v55 = vpop.permute.xlu0 %2317 }
0x16bb   :  { %2361 = vrot.lane.b32.xlu1 %v5284_v37, %s5791_s30  ;;  %v2243_v37 = vperm.slane %v2241_v57, 0 }
0x16f8   :  { %v2196_v53 = vpop.permute.xlu2 %2195 }
0x1725   :  { %v2191_v5 = vpop.permute.xlu1 %2190 }
0x1726   :  { %v2198_v38 = vsel %vm257_vm0, %v2191_v5, %v2196_v53 }
0x1727   :  { %v2208_v21 = vrot.slane %v2198_v38, 6 }
0x1729   :  { %5295 = vmatmul.msk.f32.vlgmr.msrb.gmra.mxu0 %vm672_vm4, %v2208_v21 }
0x172d   :  { %v2362_v36 = vpop.permute.xlu1 %2361 }
0x17a6   :  { %v2228_v48 = vpop.f32.mrf.mxu0 }
0x17a7   :  { %v7031_v6 = vclamps-f32 %v2228_v48, 3.0 }
0x17a9   :  { %2420 = vst.msk [vmem:[#allocation2 + $0x6] sm:$0x3] %vm1061_vm5, %v7031_v6  ;;  %5297 = vmatmul.msk.f32.vlgmr.msra.gmra.mxu1 %vm257_vm0, %v7031_v6  ;;  %5298 = vmatmul.msk.f32.vlgmr.msrb.gmra.mxu2 %vm257_vm0, %v7031_v6 }
0x17aa   :  { %2421 = vst.msk [vmem:[#allocation2 + $0xc] sm:$0x3] %vm1063_vm6, %v7031_v6  ;;  %2534 = vmatpush.msra.mxu1 %v6914_v60  ;;  %v2070_v60 = vpop.f32.mrf.mxu2 }
0x17ac   :  { %2535 = vmatpush.msra.mxu1 %v6923_v62 }
0x17ae   :  { %2536 = vmatpush.msra.mxu1 %v6931_v2  ;;  %v2244_v2 = vperm.slane %v2241_v57, 1 }
0x17b0   :  { %2537 = vmatpush.msra.mxu1 %v6940_v54 }
0x17b2   :  { %2538 = vmatpush.msra.mxu1 %v6949_v52 }
0x17b4   :  { %2539 = vmatpush.msra.mxu1 %v6958_v11  ;;  %v2090_v11 = vpop.f32.mrf.mxu3 }
0x17b6   :  { %2540 = vmatpush.msra.mxu1 %v6967_v56 }
0x17b8   :  { %2541 = vmatpush.msra.mxu1 %v6981_v22 }
0x1826   :  { %v2267_v40 = vpop.f32.mrf.mxu1 }
0x1827   :  { %v2268_v62 = vadd.f32 %v2267_v40, %v2243_v37 }
0x1829   :  { %v2290_v20 = vadd.f32 %v2268_v62, %v2070_v60 }
0x182b   :  { %v5299_v46 = vmul.f32 -1.442695, %v2290_v20  ;;  %5567 = vtanh.f32 %v2290_v20 }
0x182c   :  { %v2287_v54 = vpop.f32.mrf.mxu2 }
0x182d   :  { %5569 = vpow2.f32 %v5299_v46  ;;  %v2288_v52 = vadd.f32 %v2287_v54, %v2244_v2  ;;  %v2573_v2 = vrot.slane %v5292_v30, 6  ;;  %v2460_v30 = vld [vmem:[%s8373_s11 + $0xe8] sm:$0xff] }
0x182e   :  { %2494 = vmatpush.msra.mxu3 %v2460_v30 }
0x182f   :  { %v2334_v61 = vadd.f32 %v2288_v52, %v2090_v11  ;;  %v2621_v52 = vrot.slane %v5294_v32, 2  ;;  %v2456_v32 = vld [vmem:[%s8373_s11 + $0xc8] sm:$0xff] }
0x1830   :  { %2495 = vmatpush.msra.mxu3 %v2456_v32 }
0x1831   :  { %v5568_v56 = vpop.eup %5567  ;;  %v5301_v0 = vmul.f32 -1.442695, %v2334_v61  ;;  %5571 = vtanh.f32 %v2334_v61 }
0x1832   :  { %2312 = vrot.lane.b32.xlu2 %v5568_v56, %s5792_s0 }
0x1833   :  { %v5570_v22 = vpop.eup %5569  ;;  %5573 = vpow2.f32 %v5301_v0  ;;  %v7098_v0 = vld [vmem:[%s8373_s11 + $0xa0] sm:$0xff] }
0x1834   :  { %v2294_v59 = vadd.f32 1.0, %v5570_v22  ;;  %v2452_v22 = vld [vmem:[%s8373_s11 + $0xa8] sm:$0xff]  ;;  %2476 = vmatpush.msra.mxu2 %v7098_v0 }
0x1835   :  { %2496 = vmatpush.msra.mxu3 %v2452_v22 }
0x1836   :  { %5575 = vrcp.f32 %v2294_v59  ;;  %v2306_v19 = vand.u32 2147483648, %v2294_v59  ;;  %v2304_v31 = vand.u32 2147483647, %v2294_v59  ;;  %vm2300_vm3 = vweird.f32 %v2294_v59 }
0x1837   :  { %v5572_v13 = vpop.eup %5571 }
0x1838   :  { %2356 = vrot.lane.b32.xlu0 %v5572_v13, %s5792_s0  ;;  %v2307_v50 = vor.u32 1.1754944e-38, %v2306_v19  ;;  %vm2305_vm8 = vcmp.eq.f32.partialorder %v2304_v31, 8.507059e+37  ;;  %v2448_v13 = vld [vmem:[%s8373_s11 + $0x88] sm:$0xff] }
0x1839   :  { %v5574_v33 = vpop.eup %5573  ;;  %2497 = vmatpush.msra.mxu3 %v2448_v13  ;;  %v2436_v19 = vld [vmem:[%s8373_s11 + $0x28] sm:$0xff] }
0x183a   :  { %v2338_v1 = vadd.f32 1.0, %v5574_v33  ;;  %v7116_v33 = vld [vmem:[%s8373_s11 + $0x60] sm:$0xff] }
0x183c   :  { %v5576_v7 = vpop.eup %5575  ;;  %5577 = vrcp.f32 %v2338_v1  ;;  %v2350_v45 = vand.u32 2147483648, %v2338_v1  ;;  %v2348_v23 = vand.u32 2147483647, %v2338_v1  ;;  %vm2344_vm11 = vweird.f32 %v2338_v1 }
0x183d   :  { %v2296_v4 = vmul.f32 %v5576_v7, %v2294_v59  ;;  %vm2301_vm2 = vweird.f32 %v5576_v7  ;;  %v7107_v59 = vld [vmem:[%s8373_s11 + $0x80] sm:$0xff] }
0x183e   :  { %vm2302_vm7 = vmor %vm2300_vm3, %vm2301_vm2  ;;  %v2351_v41 = vor.u32 1.1754944e-38, %v2350_v45  ;;  %vm2349_vm13 = vcmp.eq.f32.partialorder %v2348_v23, 8.507059e+37  ;;  %2477 = vmatpush.msra.mxu2 %v7107_v59 }
0x183f   :  { %v2297_v9 = vsub.f32 1.0, %v2296_v4  ;;  %v2440_v4 = vld [vmem:[%s8373_s11 + $0x48] sm:$0xff] }
0x1840   :  { %2478 = vmatpush.msra.mxu2 %v7116_v33 }
0x1841   :  { %v2298_v35 = vmul.f32 %v5576_v7, %v2297_v9  ;;  %v7134_v9 = vld [vmem:[%s8373_s11 + $0x20] sm:$0xff] }
0x1842   :  { %v5578_v26 = vpop.eup %5577 }
0x1843   :  { %v2299_v34 = vadd.f32 %v5576_v7, %v2298_v35  ;;  %v2340_v63 = vmul.f32 %v5578_v26, %v2338_v1  ;;  %vm2345_vm9 = vweird.f32 %v5578_v26  ;;  %v2444_v1 = vld [vmem:[%s8373_s11 + $0x68] sm:$0xff] }
0x1844   :  { %vm2346_vm12 = vmor %vm2344_vm11, %vm2345_vm9  ;;  %2498 = vmatpush.msra.mxu3 %v2444_v1 }
0x1845   :  { %v2303_v14 = vsel %vm2302_vm7, %v5576_v7, %v2299_v34  ;;  %v2341_v49 = vsub.f32 1.0, %v2340_v63  ;;  %v7125_v7 = vld [vmem:[%s8373_s11 + $0x40] sm:$0xff]  ;;  %v2432_v63 = vld [vmem:[%s8373_s11 + $0x8] sm:$0xff] }
0x1846   :  { %v2308_v47 = vsel %vm2305_vm8, %v2307_v50, %v2303_v14  ;;  %2479 = vmatpush.msra.mxu2 %v7125_v7  ;;  %2499 = vmatpush.msra.mxu3 %v2440_v4  ;;  %v7148_v34 = vld [vmem:[%s8373_s11] sm:$0xff] }
0x1847   :  { %v2320_v42 = vmul.f32 %v2318_v55, %v2308_v47  ;;  %v2342_v18 = vmul.f32 %v5578_v26, %v2341_v49 }
0x1848   :  { %2480 = vmatpush.msra.mxu2 %v7134_v9  ;;  %2500 = vmatpush.msra.mxu3 %v2436_v19 }
0x1849   :  { %2322 = vrot.lane.b32.xlu1 %v2320_v42, %s5790_s29  ;;  %v2343_v27 = vadd.f32 %v5578_v26, %v2342_v18 }
0x184a   :  { %2481 = vmatpush.msra.mxu2 %v7148_v34  ;;  %2501 = vmatpush.msra.mxu3 %v2432_v63 }
0x184b   :  { %v2347_v25 = vsel %vm2346_vm12, %v5578_v26, %v2343_v27 }
0x184c   :  { %v2352_v3 = vsel %vm2349_vm13, %v2351_v41, %v2347_v25 }
0x184d   :  { %v2364_v15 = vmul.f32 %v2362_v36, %v2352_v3 }
0x184f   :  { %2366 = vrot.lane.b32.xlu2 %v2364_v15, %s5790_s29 }
0x188c   :  { %v2313_v39 = vpop.permute.xlu2 %2312 }
0x188d   :  { %v2315_v48 = vmul.f32 %v2313_v39, %v2308_v47 }
0x18a9   :  { %v2367_v53 = vpop.permute.xlu2 %2366 }
0x18aa   :  { %v2357_v43 = vpop.permute.xlu0 %2356 }
0x18ab   :  { %v2359_v44 = vmul.f32 %v2357_v43, %v2352_v3 }
0x18ad   :  { %v7056_v5 = vadd.f32 %v2367_v53, %v2359_v44 }
0x18af   :  { %v5302_v38 = vclamps-f32 %v7056_v5, 3.0  ;;  %v2652_v5 = vld [vmem:[%s8374_s12 + $0x18] sm:$0xff] }
0x18b1   :  { %5579 = vtanh.f32 %v5302_v38 }
0x18b7   :  { %v5580_v21 = vpop.eup %5579 }
0x18b8   :  { %2374 = vrot.lane.b32.xlu1 %v5580_v21, %s5790_s29 }
0x18bb   :  { %v2323_v57 = vpop.permute.xlu1 %2322 }
0x18bc   :  { %v7062_v37 = vadd.f32 %v2323_v57, %v2315_v48 }
0x18be   :  { %v5300_v60 = vclamps-f32 %v7062_v37, 3.0  ;;  %v2655_v37 = vld [vmem:[%s8374_s12 + $0x30] sm:$0xff] }
0x18c0   :  { %5581 = vtanh.f32 %v5300_v60 }
0x18c6   :  { %v5582_v40 = vpop.eup %5581 }
0x18c7   :  { %2330 = vrot.lane.b32.xlu0 %v5582_v40, %s5790_s29 }
0x192a   :  { %v2375_v62 = vpop.permute.xlu1 %2374 }
0x192b   :  { %v2377_v20 = vmul.f32 %v2375_v62, %v2352_v3 }
0x192d   :  { %2383 = vrot.lane.b32.xlu0 %v2377_v20, %s5792_s0 }
0x1935   :  { %2574 = vrot.lane.b32.xlu0 %v2573_v2, %s5791_s30 }
0x1939   :  { %v2331_v46 = vpop.permute.xlu0 %2330 }
0x193a   :  { %v2333_v54 = vmul.f32 %v2331_v46, %v2308_v47 }
0x193c   :  { %2379 = vrot.lane.b32.xlu2 %v2333_v54, %s5791_s30 }
0x1944   :  { %2622 = vrot.lane.b32.xlu2 %v2621_v52, %s5791_s30 }
0x1996   :  { %v2380_v11 = vpop.permute.xlu2 %2379 }
0x199f   :  { %v2384_v61 = vpop.permute.xlu0 %2383 }
0x19a0   :  { %v2386_v56 = vsel %vm257_vm0, %v2380_v11, %v2384_v61 }
0x19a1   :  { %5303 = vmatmul.msk.f32.vlgmr.msrb.gmra.mxu1 %vm672_vm4, %v2386_v56 }
0x19a2   :  { %2943 = vmatpush.msrb.mxu1 %v2460_v30 }
0x19a4   :  { %2944 = vmatpush.msrb.mxu1 %v2456_v32 }
0x19a6   :  { %2945 = vmatpush.msrb.mxu1 %v2452_v22 }
0x19a7   :  { %v2575_v56 = vpop.permute.xlu0 %2574 }
0x19a8   :  { %2946 = vmatpush.msrb.mxu1 %v2448_v13 }
0x19aa   :  { %2947 = vmatpush.msrb.mxu1 %v2444_v1  ;;  %v2623_v1 = vpop.permute.xlu2 %2622 }
0x19ac   :  { %2948 = vmatpush.msrb.mxu1 %v2440_v4 }
0x19ae   :  { %2949 = vmatpush.msrb.mxu1 %v2436_v19 }
0x19b0   :  { %2950 = vmatpush.msrb.mxu1 %v2432_v63 }
0x1a1e   :  { %v2415_v35 = vpop.f32.mrf.mxu1 }
0x1a1f   :  { %v5304_v31 = vclamps-f32 %v2415_v35, 3.0 }
0x1a21   :  { %v2422_v26 = vadd.f32 %v5304_v31, %v7031_v6  ;;  %2426 = vrot.lane.b32.xlu1 %v5304_v31, %s5791_s30 }
0x1a23   :  { %2423 = vst.msk [vmem:[#allocation3 + $0x6] sm:$0x3] %vm1061_vm5, %v2422_v26 }
0x1a24   :  { %2424 = vst.msk [vmem:[#allocation3 + $0xc] sm:$0x3] %vm1063_vm6, %v2422_v26 }
0x1a93   :  { %v2427_v50 = vpop.permute.xlu1 %2426 }
0x1a94   :  { %v2429_v14 = vsel %vm257_vm0, %v7031_v6, %v2427_v50 }
0x1a95   :  { %v2430_v49 = vsel %vm1073_vm1, %v2429_v14, %v2427_v50 }
0x1a96   :  { %5305 = vmatmul.msk.f32.vlgmr.msra.gmra.mxu2 %vm672_vm4, %v2430_v49  ;;  %5306 = vmatmul.msk.f32.vlgmr.msra.gmra.mxu3 %vm672_vm4, %v2430_v49 }
0x1a97   :  { %5307 = vmatmul.msk.f32.vlgmr.msra.gmra.mxu0 %vm672_vm4, %v2430_v49  ;;  %5308 = vmatmul.msk.f32.vlgmr.msra.gmra.mxu1 %vm672_vm4, %v2430_v49 }
0x1b19   :  { %v2483_v55 = vpop.f32.mrf.mxu2  ;;  %v2503_v47 = vpop.f32.mrf.mxu3 }
0x1b1a   :  { %v2546_v45 = vadd.f32 %v2483_v55, %v6248_v28  ;;  %v2592_v42 = vrot.slane %v2503_v47, 6 }
0x1b1c   :  { %v5309_v18 = vmul.f32 -1.442695, %v2546_v45  ;;  %5583 = vtanh.f32 %v2546_v45  ;;  %v2594_v23 = vadd.f32 %v2592_v42, %v6245_v24 }
0x1b1e   :  { %5585 = vpow2.f32 %v5309_v18  ;;  %v5311_v6 = vmul.f32 -1.442695, %v2594_v23 }
0x1b1f   :  { %5587 = vtanh.f32 %v2594_v23 }
0x1b20   :  { %5589 = vpow2.f32 %v5311_v6 }
0x1b22   :  { %v5584_v27 = vpop.eup %5583 }
0x1b23   :  { %2568 = vrot.lane.b32.xlu2 %v5584_v27, %s5792_s0 }
0x1b24   :  { %v5586_v41 = vpop.eup %5585 }
0x1b25   :  { %v5588_v25 = vpop.eup %5587  ;;  %v2550_v36 = vadd.f32 1.0, %v5586_v41 }
0x1b26   :  { %v5590_v3 = vpop.eup %5589  ;;  %2616 = vrot.lane.b32.xlu1 %v5588_v25, %s5792_s0 }
0x1b27   :  { %5591 = vrcp.f32 %v2550_v36  ;;  %v2598_v15 = vadd.f32 1.0, %v5590_v3  ;;  %v2562_v48 = vand.u32 2147483648, %v2550_v36  ;;  %v2560_v40 = vand.u32 2147483647, %v2550_v36  ;;  %v2653_v3 = vld [vmem:[%s8374_s12 + $0x20] sm:$0xff] }
0x1b28   :  { %vm2556_vm15 = vweird.f32 %v2550_v36 }
0x1b29   :  { %5593 = vrcp.f32 %v2598_v15  ;;  %v2610_v20 = vand.u32 2147483648, %v2598_v15  ;;  %v2608_v54 = vand.u32 2147483647, %v2598_v15  ;;  %v2563_v52 = vor.u32 1.1754944e-38, %v2562_v48  ;;  %v2684_v48 = vld [vmem:[%s8375_s13 + $0x10] sm:$0xff] }
0x1b2a   :  { %vm2561_vm7 = vcmp.eq.f32.partialorder %v2560_v40, 8.507059e+37  ;;  %vm2604_vm8 = vweird.f32 %v2598_v15 }
0x1b2b   :  { %v2611_v32 = vor.u32 1.1754944e-38, %v2610_v20  ;;  %vm2609_vm11 = vcmp.eq.f32.partialorder %v2608_v54, 8.507059e+37  ;;  %v7237_v20 = vld [vmem:[%s8375_s13 + $0x18] sm:$0xff] }
0x1b2d   :  { %v5592_v39 = vpop.eup %5591 }
0x1b2e   :  { %v2552_v43 = vmul.f32 %v5592_v39, %v2550_v36  ;;  %vm2557_vm14 = vweird.f32 %v5592_v39  ;;  %v2656_v36 = vld [vmem:[%s8374_s12 + $0x38] sm:$0xff] }
0x1b2f   :  { %v5594_v44 = vpop.eup %5593  ;;  %vm2558_vm3 = vmor %vm2556_vm15, %vm2557_vm14  ;;  %2668 = vmatpush.msrb.mxu2 %v2656_v36 }
0x1b30   :  { %v2553_v53 = vsub.f32 1.0, %v2552_v43  ;;  %v2600_v21 = vmul.f32 %v5594_v44, %v2598_v15  ;;  %vm2605_vm2 = vweird.f32 %v5594_v44  ;;  %v2650_v15 = vld [vmem:[%s8374_s12 + $0x8] sm:$0xff]  ;;  %v2688_v43 = vld [vmem:[%s8375_s13 + $0x30] sm:$0xff] }
0x1b31   :  { %vm2606_vm9 = vmor %vm2604_vm8, %vm2605_vm2  ;;  %2669 = vmatpush.msrb.mxu2 %v2655_v37  ;;  %2711 = vmatpush.msrb.mxu3 %v2688_v43 }
0x1b32   :  { %v2554_v57 = vmul.f32 %v5592_v39, %v2553_v53  ;;  %v2601_v62 = vsub.f32 1.0, %v2600_v21  ;;  %v2686_v53 = vld [vmem:[%s8375_s13 + $0x20] sm:$0xff]  ;;  %v7226_v21 = vld [vmem:[%s8375_s13 + $0x28] sm:$0xff]  ;;  %3161 = vmatpush.msra.mxu1 %v2688_v43 }
0x1b33   :  { %2712 = vmatpush.msrb.mxu3 %v2686_v53 }
0x1b34   :  { %v2555_v2 = vadd.f32 %v5592_v39, %v2554_v57  ;;  %v2602_v46 = vmul.f32 %v5594_v44, %v2601_v62  ;;  %3162 = vmatpush.msra.mxu1 %v2686_v53 }
0x1b35   :  { %2713 = vmatpush.msrb.mxu3 %v2684_v48 }
0x1b36   :  { %v2559_v11 = vsel %vm2558_vm3, %v5592_v39, %v2555_v2  ;;  %v2603_v61 = vadd.f32 %v5594_v44, %v2602_v46  ;;  %v2649_v39 = vld [vmem:[%s8374_s12] sm:$0xff]  ;;  %3163 = vmatpush.msra.mxu1 %v2684_v48  ;;  %v7246_v46 = vld [vmem:[%s8375_s13 + $0x8] sm:$0xff] }
0x1b37   :  { %v2564_v30 = vsel %vm2561_vm7, %v2563_v52, %v2559_v11  ;;  %v2682_v2 = vld [vmem:[%s8375_s13] sm:$0xff] }
0x1b38   :  { %v2577_v22 = vmul.f32 %v2575_v56, %v2564_v30  ;;  %v2607_v13 = vsel %vm2606_vm9, %v5594_v44, %v2603_v61  ;;  %v7217_v44 = vld [vmem:[%s8375_s13 + $0x38] sm:$0xff]  ;;  %2714 = vmatpush.msrb.mxu3 %v2682_v2  ;;  %3164 = vmatpush.msra.mxu1 %v2682_v2 }
0x1b39   :  { %v2612_v4 = vsel %vm2609_vm11, %v2611_v32, %v2607_v13  ;;  %2731 = vmatpush.msrb.mxu0 %v7217_v44 }
0x1b3a   :  { %2579 = vrot.lane.b32.xlu1 %v2577_v22, %s5790_s29  ;;  %v2625_v19 = vmul.f32 %v2623_v1, %v2612_v4 }
0x1b3b   :  { %2732 = vmatpush.msrb.mxu0 %v7226_v21 }
0x1b3c   :  { %2627 = vrot.lane.b32.xlu0 %v2625_v19, %s5790_s29 }
0x1b3d   :  { %2733 = vmatpush.msrb.mxu0 %v7237_v20 }
0x1b3f   :  { %2734 = vmatpush.msrb.mxu0 %v7246_v46 }
0x1b41   :  { %2923 = vmatpush.msra.mxu0 %v7081_v29  ;;  %v2523_v29 = vpop.f32.mrf.mxu0 }
0x1b43   :  { %2924 = vmatpush.msra.mxu0 %v7089_v58  ;;  %v2690_v58 = vld [vmem:[%s8376_s14] sm:$0x3] }
0x1b45   :  { %2925 = vmatpush.msra.mxu0 %v7098_v0  ;;  %v2693_v0 = vperm.slane %v2690_v58, 1 }
0x1b47   :  { %2926 = vmatpush.msra.mxu0 %v7107_v59 }
0x1b49   :  { %2927 = vmatpush.msra.mxu0 %v7116_v33 }
0x1b4b   :  { %2928 = vmatpush.msra.mxu0 %v7125_v7  ;;  %v2543_v7 = vpop.f32.mrf.mxu1 }
0x1b4d   :  { %2929 = vmatpush.msra.mxu0 %v7134_v9 }
0x1b4f   :  { %2930 = vmatpush.msra.mxu0 %v7148_v34  ;;  %v2692_v34 = vperm.slane %v2690_v58, 0 }
0x1b7d   :  { %v2569_v31 = vpop.permute.xlu2 %2568 }
0x1b7e   :  { %v2571_v26 = vmul.f32 %v2569_v31, %v2564_v30 }
0x1b98   :  { %v2617_v35 = vpop.permute.xlu1 %2616 }
0x1b99   :  { %v2619_v50 = vmul.f32 %v2617_v35, %v2612_v4 }
0x1bac   :  { %v2580_v63 = vpop.permute.xlu1 %2579 }
0x1bad   :  { %v7167_v14 = vadd.f32 %v2580_v63, %v2571_v26 }
0x1bae   :  { %v2628_v49 = vpop.permute.xlu0 %2627 }
0x1baf   :  { %v5310_v55 = vclamps-f32 %v7167_v14, 3.0  ;;  %v7170_v47 = vadd.f32 %v2628_v49, %v2619_v50  ;;  %v7322_v14 = vld [vmem:[%s8377_s15 + $0x10] sm:$0xff] }
0x1bb1   :  { %5595 = vtanh.f32 %v5310_v55  ;;  %v5312_v45 = vclamps-f32 %v7170_v47, 3.0 }
0x1bb3   :  { %5597 = vtanh.f32 %v5312_v45 }
0x1bb7   :  { %v5596_v42 = vpop.eup %5595 }
0x1bb8   :  { %2587 = vrot.lane.b32.xlu0 %v5596_v42, %s5790_s29 }
0x1bb9   :  { %v5598_v18 = vpop.eup %5597 }
0x1bba   :  { %2635 = vrot.lane.b32.xlu2 %v5598_v18, %s5790_s29 }
0x1bc0   :  { %2766 = vrot.lane.b32.xlu0 %v5300_v60, %s5791_s30  ;;  %v2654_v60 = vld [vmem:[%s8374_s12 + $0x28] sm:$0xff] }
0x1bc1   :  { %2670 = vmatpush.msrb.mxu2 %v2654_v60 }
0x1bc3   :  { %2671 = vmatpush.msrb.mxu2 %v2653_v3 }
0x1bc5   :  { %2672 = vmatpush.msrb.mxu2 %v2652_v5 }
0x1c14   :  { %v2636_v23 = vpop.permute.xlu2 %2635 }
0x1c15   :  { %v2638_v6 = vmul.f32 %v2636_v23, %v2612_v4 }
0x1c17   :  { %v2644_v27 = vrot.slane %v2638_v6, 2 }
0x1c19   :  { %2645 = vrot.lane.b32.xlu2 %v2644_v27, %s5792_s0 }
0x1c2a   :  { %v2588_v41 = vpop.permute.xlu0 %2587 }
0x1c2b   :  { %v2590_v25 = vmul.f32 %v2588_v41, %v2564_v30 }
0x1c2d   :  { %2640 = vrot.lane.b32.xlu1 %v2590_v25, %s5791_s30 }
0x1c32   :  { %v2767_v53 = vpop.permute.xlu0 %2766 }
0x1c35   :  { %2810 = vrot.lane.b32.xlu1 %v5302_v38, %s5791_s30  ;;  %v2651_v38 = vld [vmem:[%s8374_s12 + $0x10] sm:$0xff] }
0x1c36   :  { %2673 = vmatpush.msrb.mxu2 %v2651_v38 }
0x1c38   :  { %2674 = vmatpush.msrb.mxu2 %v2650_v15 }
0x1c3a   :  { %2675 = vmatpush.msrb.mxu2 %v2649_v39 }
0x1c73   :  { %v2646_v57 = vpop.permute.xlu2 %2645 }
0x1c9f   :  { %v2641_v40 = vpop.permute.xlu1 %2640 }
0x1ca0   :  { %v2648_v62 = vsel %vm257_vm0, %v2641_v40, %v2646_v57 }
0x1ca1   :  { %5313 = vmatmul.msk.f32.vlgmr.msrb.gmra.mxu2 %vm672_vm4, %v2648_v62 }
0x1d24   :  { %v2677_v54 = vpop.f32.mrf.mxu2 }
0x1d25   :  { %v7257_v52 = vclamps-f32 %v2677_v54, 3.0 }
0x1d27   :  { %2869 = vst.msk [vmem:[#allocation2 + $0x8] sm:$0x3] %vm1061_vm5, %v7257_v52  ;;  %5315 = vmatmul.msk.f32.vlgmr.msrb.gmra.mxu3 %vm257_vm0, %v7257_v52  ;;  %5316 = vmatmul.msk.f32.vlgmr.msrb.gmra.mxu0 %vm257_vm0, %v7257_v52 }
0x1d28   :  { %2870 = vst.msk [vmem:[#allocation2 + $0xa] sm:$0x3] %vm1063_vm6, %v7257_v52  ;;  %3118 = vmatpush.msrb.mxu0 %v2656_v36  ;;  %v2811_v36 = vpop.permute.xlu1 %2810 }
0x1d2a   :  { %3119 = vmatpush.msrb.mxu0 %v2655_v37 }
0x1d2c   :  { %3120 = vmatpush.msrb.mxu0 %v2654_v60 }
0x1d2e   :  { %3121 = vmatpush.msrb.mxu0 %v2653_v3 }
0x1d30   :  { %3122 = vmatpush.msrb.mxu0 %v2652_v5 }
0x1d32   :  { %3123 = vmatpush.msrb.mxu0 %v2651_v38 }
0x1d34   :  { %3124 = vmatpush.msrb.mxu0 %v2650_v15 }
0x1d36   :  { %3125 = vmatpush.msrb.mxu0 %v2649_v39 }
0x1da4   :  { %v2736_v59 = vpop.f32.mrf.mxu0 }
0x1da5   :  { %v2737_v33 = vadd.f32 %v2736_v59, %v2693_v0 }
0x1da7   :  { %v2783_v9 = vadd.f32 %v2737_v33, %v2543_v7 }
0x1da9   :  { %v5319_v11 = vmul.f32 -1.442695, %v2783_v9  ;;  %5599 = vtanh.f32 %v2783_v9 }
0x1daa   :  { %v2716_v61 = vpop.f32.mrf.mxu3 }
0x1dab   :  { %5601 = vpow2.f32 %v5319_v11  ;;  %v2717_v56 = vadd.f32 %v2716_v61, %v2692_v34 }
0x1dad   :  { %v2739_v30 = vadd.f32 %v2717_v56, %v2523_v29  ;;  %v7290_v56 = vld [vmem:[%s8377_s15 + $0x38] sm:$0xff] }
0x1dae   :  { %2855 = vmatpush.msra.mxu3 %v7290_v56 }
0x1daf   :  { %v5600_v32 = vpop.eup %5599  ;;  %v5317_v22 = vmul.f32 -1.442695, %v2739_v30  ;;  %5603 = vtanh.f32 %v2739_v30  ;;  %v7295_v30 = vld [vmem:[%s8377_s15 + $0x30] sm:$0xff] }
0x1db0   :  { %2805 = vrot.lane.b32.xlu0 %v5600_v32, %s5792_s0  ;;  %v7301_v32 = vld [vmem:[%s8377_s15 + $0x28] sm:$0xff]  ;;  %2856 = vmatpush.msra.mxu3 %v7295_v30 }
0x1db1   :  { %v5602_v13 = vpop.eup %5601  ;;  %5605 = vpow2.f32 %v5317_v22  ;;  %v3025_v22 = vrot.slane %v5310_v55, 6 }
0x1db2   :  { %v2787_v1 = vadd.f32 1.0, %v5602_v13  ;;  %v7309_v13 = vld [vmem:[%s8377_s15 + $0x20] sm:$0xff]  ;;  %2857 = vmatpush.msra.mxu3 %v7301_v32 }
0x1db4   :  { %5607 = vrcp.f32 %v2787_v1  ;;  %v2799_v50 = vand.u32 2147483648, %v2787_v1  ;;  %v2797_v42 = vand.u32 2147483647, %v2787_v1  ;;  %vm2793_vm13 = vweird.f32 %v2787_v1  ;;  %2858 = vmatpush.msra.mxu3 %v7309_v13 }
0x1db5   :  { %v5604_v4 = vpop.eup %5603 }
0x1db6   :  { %2761 = vrot.lane.b32.xlu2 %v5604_v4, %s5792_s0  ;;  %v2800_v27 = vor.u32 1.1754944e-38, %v2799_v50  ;;  %vm2798_vm15 = vcmp.eq.f32.partialorder %v2797_v42, 8.507059e+37  ;;  %v7350_v50 = vld [vmem:[%s8373_s11 + $0xf8] sm:$0xff] }
0x1db7   :  { %v5606_v19 = vpop.eup %5605  ;;  %v7359_v42 = vld [vmem:[%s8373_s11 + $0xd8] sm:$0xff] }
0x1db8   :  { %v2743_v35 = vadd.f32 1.0, %v5606_v19  ;;  %v3070_v19 = vrot.slane %v5312_v45, 2  ;;  %v2910_v45 = vld [vmem:[%s8373_s11 + $0xf0] sm:$0xff] }
0x1db9   :  { %2963 = vmatpush.msra.mxu2 %v2910_v45 }
0x1dba   :  { %v5608_v31 = vpop.eup %5607  ;;  %5609 = vrcp.f32 %v2743_v35  ;;  %v2755_v60 = vand.u32 2147483648, %v2743_v35  ;;  %v2753_v38 = vand.u32 2147483647, %v2743_v35  ;;  %vm2749_vm3 = vweird.f32 %v2743_v35 }
0x1dbb   :  { %v2789_v26 = vmul.f32 %v5608_v31, %v2787_v1  ;;  %vm2794_vm12 = vweird.f32 %v5608_v31  ;;  %v7316_v1 = vld [vmem:[%s8377_s15 + $0x18] sm:$0xff] }
0x1dbc   :  { %vm2795_vm14 = vmor %vm2793_vm13, %vm2794_vm12  ;;  %v2756_v39 = vor.u32 1.1754944e-38, %v2755_v60  ;;  %vm2754_vm8 = vcmp.eq.f32.partialorder %v2753_v38, 8.507059e+37  ;;  %2859 = vmatpush.msra.mxu3 %v7316_v1  ;;  %v2886_v60 = vld [vmem:[%s8373_s11 + $0x30] sm:$0xff] }
0x1dbd   :  { %v2790_v63 = vsub.f32 1.0, %v2789_v26 }
0x1dbe   :  { %2860 = vmatpush.msra.mxu3 %v7322_v14 }
0x1dbf   :  { %v2791_v49 = vmul.f32 %v5608_v31, %v2790_v63 }
0x1dc0   :  { %v5610_v18 = vpop.eup %5609 }
0x1dc1   :  { %v2792_v23 = vadd.f32 %v5608_v31, %v2791_v49  ;;  %v2745_v6 = vmul.f32 %v5610_v18, %v2743_v35  ;;  %vm2750_vm2 = vweird.f32 %v5610_v18  ;;  %v7333_v35 = vld [vmem:[%s8377_s15 + $0x8] sm:$0xff]  ;;  %v2906_v49 = vld [vmem:[%s8373_s11 + $0xd0] sm:$0xff] }
0x1dc2   :  { %vm2751_vm7 = vmor %vm2749_vm3, %vm2750_vm2  ;;  %2861 = vmatpush.msra.mxu3 %v7333_v35  ;;  %2964 = vmatpush.msra.mxu2 %v2906_v49 }
0x1dc3   :  { %v2796_v41 = vsel %vm2795_vm14, %v5608_v31, %v2792_v23  ;;  %v2746_v25 = vsub.f32 1.0, %v2745_v6  ;;  %v7339_v31 = vld [vmem:[%s8377_s15] sm:$0xff]  ;;  %v7367_v23 = vld [vmem:[%s8373_s11 + $0xb8] sm:$0xff]  ;;  %v2898_v6 = vld [vmem:[%s8373_s11 + $0x90] sm:$0xff] }
0x1dc4   :  { %v2801_v37 = vsel %vm2798_vm15, %v2800_v27, %v2796_v41  ;;  %2862 = vmatpush.msra.mxu3 %v7339_v31  ;;  %v7376_v27 = vld [vmem:[%s8373_s11 + $0x98] sm:$0xff]  ;;  %v2894_v41 = vld [vmem:[%s8373_s11 + $0x70] sm:$0xff] }
0x1dc5   :  { %v2813_v3 = vmul.f32 %v2811_v36, %v2801_v37  ;;  %v2747_v5 = vmul.f32 %v5610_v18, %v2746_v25  ;;  %v7385_v25 = vld [vmem:[%s8373_s11 + $0x78] sm:$0xff]  ;;  %v2890_v36 = vld [vmem:[%s8373_s11 + $0x50] sm:$0xff] }
0x1dc6   :  { %2983 = vmatpush.msrb.mxu3 %v7350_v50 }
0x1dc7   :  { %2815 = vrot.lane.b32.xlu2 %v2813_v3, %s5790_s29  ;;  %v2748_v15 = vadd.f32 %v5610_v18, %v2747_v5  ;;  %v7403_v3 = vld [vmem:[%s8373_s11 + $0x38] sm:$0xff] }
0x1dc8   :  { %2984 = vmatpush.msrb.mxu3 %v7359_v42 }
0x1dc9   :  { %v2752_v43 = vsel %vm2751_vm7, %v5610_v18, %v2748_v15  ;;  %v2902_v18 = vld [vmem:[%s8373_s11 + $0xb0] sm:$0xff] }
0x1dca   :  { %v2757_v48 = vsel %vm2754_vm8, %v2756_v39, %v2752_v43  ;;  %2965 = vmatpush.msra.mxu2 %v2902_v18  ;;  %2985 = vmatpush.msrb.mxu3 %v7367_v23  ;;  %v2882_v39 = vld [vmem:[%s8373_s11 + $0x10] sm:$0xff]  ;;  %v7417_v43 = vld [vmem:[%s8373_s11 + $0x18] sm:$0xff] }
0x1dcb   :  { %v2769_v57 = vmul.f32 %v2767_v53, %v2757_v48 }
0x1dcc   :  { %2966 = vmatpush.msra.mxu2 %v2898_v6  ;;  %2986 = vmatpush.msrb.mxu3 %v7376_v27 }
0x1dcd   :  { %2771 = vrot.lane.b32.xlu1 %v2769_v57, %s5790_s29 }
0x1dce   :  { %2967 = vmatpush.msra.mxu2 %v2894_v41  ;;  %2987 = vmatpush.msrb.mxu3 %v7385_v25 }
0x1dd0   :  { %2968 = vmatpush.msra.mxu2 %v2890_v36 }
0x1dd2   :  { %2969 = vmatpush.msra.mxu2 %v2886_v60 }
0x1dd4   :  { %2970 = vmatpush.msra.mxu2 %v2882_v39 }
0x1dd6   :  { %3181 = vmatpush.msrb.mxu2 %v7217_v44 }
0x1dd8   :  { %3182 = vmatpush.msrb.mxu2 %v7226_v21 }
0x1dda   :  { %3183 = vmatpush.msrb.mxu2 %v7237_v20 }
0x1ddc   :  { %3184 = vmatpush.msrb.mxu2 %v7246_v46 }
0x1e10   :  { %v2762_v40 = vpop.permute.xlu2 %2761 }
0x1e11   :  { %v2764_v59 = vmul.f32 %v2762_v40, %v2757_v48 }
0x1e21   :  { %v2816_v54 = vpop.permute.xlu2 %2815 }
0x1e22   :  { %v2806_v62 = vpop.permute.xlu0 %2805 }
0x1e23   :  { %v2808_v2 = vmul.f32 %v2806_v62, %v2801_v37 }
0x1e25   :  { %v7274_v29 = vadd.f32 %v2816_v54, %v2808_v2 }
0x1e27   :  { %v5320_v58 = vclamps-f32 %v7274_v29, 3.0  ;;  %v3140_v29 = vld [vmem:[%s8376_s14] sm:$0x3] }
0x1e29   :  { %5611 = vtanh.f32 %v5320_v58 }
0x1e2f   :  { %v5612_v0 = vpop.eup %5611 }
0x1e30   :  { %2823 = vrot.lane.b32.xlu1 %v5612_v0, %s5790_s29 }
0x1e3f   :  { %v2772_v33 = vpop.permute.xlu1 %2771 }
0x1e40   :  { %v7280_v7 = vadd.f32 %v2772_v33, %v2764_v59 }
0x1e42   :  { %v5318_v9 = vclamps-f32 %v7280_v7, 3.0 }
0x1e44   :  { %5613 = vtanh.f32 %v5318_v9 }
0x1e4a   :  { %v5614_v34 = vpop.eup %5613 }
0x1e4b   :  { %2779 = vrot.lane.b32.xlu0 %v5614_v34, %s5790_s29 }
0x1ea2   :  { %v2824_v11 = vpop.permute.xlu1 %2823 }
0x1ea3   :  { %v2826_v61 = vmul.f32 %v2824_v11, %v2801_v37  ;;  %v7394_v37 = vld [vmem:[%s8373_s11 + $0x58] sm:$0xff] }
0x1ea4   :  { %2988 = vmatpush.msrb.mxu3 %v7394_v37 }
0x1ea5   :  { %2832 = vrot.lane.b32.xlu0 %v2826_v61, %s5792_s0 }
0x1ea6   :  { %2989 = vmatpush.msrb.mxu3 %v7403_v3 }
0x1ea8   :  { %2990 = vmatpush.msrb.mxu3 %v7417_v43 }
0x1ead   :  { %3026 = vrot.lane.b32.xlu0 %v3025_v22, %s5791_s30 }
0x1ebd   :  { %v2780_v55 = vpop.permute.xlu0 %2779 }
0x1ebe   :  { %v2782_v4 = vmul.f32 %v2780_v55, %v2757_v48 }
0x1ec0   :  { %2828 = vrot.lane.b32.xlu2 %v2782_v4, %s5791_s30 }
0x1ec8   :  { %3071 = vrot.lane.b32.xlu2 %v3070_v19, %s5791_s30 }
0x1f17   :  { %v2833_v26 = vpop.permute.xlu0 %2832 }
0x1f1a   :  { %v2829_v63 = vpop.permute.xlu2 %2828 }
0x1f1b   :  { %v2835_v47 = vsel %vm257_vm0, %v2829_v63, %v2833_v26 }
0x1f1c   :  { %5321 = vmatmul.msk.f32.vlgmr.msra.gmra.mxu3 %vm672_vm4, %v2835_v47 }
0x1f22   :  { %v3072_v47 = vpop.permute.xlu2 %3071 }
0x1f9f   :  { %v2864_v5 = vpop.f32.mrf.mxu3 }
0x1fa0   :  { %v5322_v38 = vclamps-f32 %v2864_v5, 3.0 }
0x1fa2   :  { %v2871_v15 = vadd.f32 %v5322_v38, %v7257_v52  ;;  %2875 = vrot.lane.b32.xlu1 %v5322_v38, %s5791_s30 }
0x1fa4   :  { %2872 = vst.msk [vmem:[#allocation3 + $0x8] sm:$0x3] %vm1061_vm5, %v2871_v15 }
0x1fa5   :  { %2873 = vst.msk [vmem:[#allocation3 + $0xa] sm:$0x3] %vm1063_vm6, %v2871_v15 }
0x2014   :  { %v2876_v53 = vpop.permute.xlu1 %2875 }
0x2015   :  { %v2878_v48 = vsel %vm257_vm0, %v7257_v52, %v2876_v53 }
0x2016   :  { %v2879_v57 = vsel %vm1073_vm1, %v2878_v48, %v2876_v53 }
0x2017   :  { %5323 = vmatmul.msk.f32.vlgmr.msra.gmra.mxu0 %vm672_vm4, %v2879_v57  ;;  %5324 = vmatmul.msk.f32.vlgmr.msrb.gmra.mxu1 %vm672_vm4, %v2879_v57 }
0x2018   :  { %5325 = vmatmul.msk.f32.vlgmr.msra.gmra.mxu2 %vm672_vm4, %v2879_v57  ;;  %5326 = vmatmul.msk.f32.vlgmr.msrb.gmra.mxu3 %vm672_vm4, %v2879_v57 }
0x2019   :  { %3305 = vmatpush.msrb.mxu1 %v7290_v56  ;;  %3413 = vmatpush.msra.mxu0 %v2910_v45 }
0x201b   :  { %3306 = vmatpush.msrb.mxu1 %v7295_v30  ;;  %3414 = vmatpush.msra.mxu0 %v2906_v49 }
0x201d   :  { %3307 = vmatpush.msrb.mxu1 %v7301_v32  ;;  %3415 = vmatpush.msra.mxu0 %v2902_v18  ;;  %v3027_v18 = vpop.permute.xlu0 %3026 }
0x201f   :  { %3308 = vmatpush.msrb.mxu1 %v7309_v13  ;;  %3416 = vmatpush.msra.mxu0 %v2898_v6 }
0x2021   :  { %3309 = vmatpush.msrb.mxu1 %v7316_v1  ;;  %3417 = vmatpush.msra.mxu0 %v2894_v41 }
0x2023   :  { %3310 = vmatpush.msrb.mxu1 %v7322_v14  ;;  %3418 = vmatpush.msra.mxu0 %v2890_v36 }
0x2025   :  { %3311 = vmatpush.msrb.mxu1 %v7333_v35  ;;  %3419 = vmatpush.msra.mxu0 %v2886_v60 }
0x2027   :  { %3312 = vmatpush.msrb.mxu1 %v7339_v31  ;;  %3420 = vmatpush.msra.mxu0 %v2882_v39 }
0x2094   :  { %v2932_v44 = vpop.f32.mrf.mxu0  ;;  %v2952_v21 = vpop.f32.mrf.mxu1 }
0x2095   :  { %v2996_v20 = vrot.slane %v2932_v44, 6  ;;  %v3043_v46 = vadd.f32 %v2952_v21, %v6245_v24 }
0x2097   :  { %v2998_v52 = vadd.f32 %v2996_v20, %v6248_v28  ;;  %v5329_v40 = vmul.f32 -1.442695, %v3043_v46  ;;  %5615 = vtanh.f32 %v3043_v46 }
0x2099   :  { %v5327_v62 = vmul.f32 -1.442695, %v2998_v52  ;;  %5617 = vtanh.f32 %v2998_v52 }
0x209a   :  { %5619 = vpow2.f32 %v5329_v40 }
0x209b   :  { %5621 = vpow2.f32 %v5327_v62 }
0x209d   :  { %v5616_v2 = vpop.eup %5615 }
0x209e   :  { %3065 = vrot.lane.b32.xlu1 %v5616_v2, %s5792_s0 }
0x209f   :  { %v5618_v54 = vpop.eup %5617 }
0x20a0   :  { %v5620_v0 = vpop.eup %5619  ;;  %3020 = vrot.lane.b32.xlu2 %v5618_v54, %s5792_s0 }
0x20a1   :  { %v5622_v59 = vpop.eup %5621  ;;  %v3047_v33 = vadd.f32 1.0, %v5620_v0 }
0x20a2   :  { %v3002_v34 = vadd.f32 1.0, %v5622_v59 }
0x20a3   :  { %5623 = vrcp.f32 %v3047_v33  ;;  %v3059_v32 = vand.u32 2147483648, %v3047_v33  ;;  %v3057_v1 = vand.u32 2147483647, %v3047_v33  ;;  %vm3053_vm12 = vweird.f32 %v3047_v33 }
0x20a4   :  { %5625 = vrcp.f32 %v3002_v34  ;;  %v3014_v14 = vand.u32 2147483648, %v3002_v34  ;;  %v3012_v4 = vand.u32 2147483647, %v3002_v34  ;;  %vm3008_vm14 = vweird.f32 %v3002_v34 }
0x20a5   :  { %v3060_v35 = vor.u32 1.1754944e-38, %v3059_v32  ;;  %vm3058_vm15 = vcmp.eq.f32.partialorder %v3057_v1, 8.507059e+37 }
0x20a6   :  { %v3015_v63 = vor.u32 1.1754944e-38, %v3014_v14  ;;  %vm3013_vm3 = vcmp.eq.f32.partialorder %v3012_v4, 8.507059e+37 }
0x20a9   :  { %v5624_v24 = vpop.eup %5623 }
0x20aa   :  { %v5626_v11 = vpop.eup %5625  ;;  %v3049_v61 = vmul.f32 %v5624_v24, %v3047_v33  ;;  %vm3054_vm9 = vweird.f32 %v5624_v24 }
0x20ab   :  { %v3004_v56 = vmul.f32 %v5626_v11, %v3002_v34  ;;  %vm3009_vm11 = vweird.f32 %v5626_v11  ;;  %vm3055_vm13 = vmor %vm3053_vm12, %vm3054_vm9 }
0x20ac   :  { %v3050_v30 = vsub.f32 1.0, %v3049_v61  ;;  %vm3010_vm2 = vmor %vm3008_vm14, %vm3009_vm11 }
0x20ad   :  { %v3005_v22 = vsub.f32 1.0, %v3004_v56 }
0x20ae   :  { %v3051_v13 = vmul.f32 %v5624_v24, %v3050_v30 }
0x20af   :  { %v3006_v55 = vmul.f32 %v5626_v11, %v3005_v22 }
0x20b0   :  { %v3052_v19 = vadd.f32 %v5624_v24, %v3051_v13 }
0x20b1   :  { %v3007_v31 = vadd.f32 %v5626_v11, %v3006_v55 }
0x20b2   :  { %v3056_v26 = vsel %vm3055_vm13, %v5624_v24, %v3052_v19 }
0x20b3   :  { %v3061_v45 = vsel %vm3058_vm15, %v3060_v35, %v3056_v26  ;;  %v3011_v49 = vsel %vm3010_vm2, %v5626_v11, %v3007_v31 }
0x20b4   :  { %v3074_v6 = vmul.f32 %v3072_v47, %v3061_v45  ;;  %v3016_v41 = vsel %vm3013_vm3, %v3015_v63, %v3011_v49 }
0x20b5   :  { %v3029_v36 = vmul.f32 %v3027_v18, %v3016_v41 }
0x20b6   :  { %3076 = vrot.lane.b32.xlu0 %v3074_v6, %s5790_s29 }
0x20b7   :  { %3031 = vrot.lane.b32.xlu1 %v3029_v36, %s5790_s29 }
0x20fa   :  { %v3021_v5 = vpop.permute.xlu2 %3020 }
0x20fb   :  { %v3023_v15 = vmul.f32 %v3021_v5, %v3016_v41 }
0x2110   :  { %v3066_v60 = vpop.permute.xlu1 %3065 }
0x2111   :  { %v3068_v38 = vmul.f32 %v3066_v60, %v3061_v45 }
0x2128   :  { %v3077_v39 = vpop.permute.xlu0 %3076 }
0x2129   :  { %v7445_v53 = vadd.f32 %v3077_v39, %v3068_v38  ;;  %v3032_v48 = vpop.permute.xlu1 %3031 }
0x212a   :  { %v7447_v57 = vadd.f32 %v3032_v48, %v3023_v15 }
0x212b   :  { %v5330_v44 = vclamps-f32 %v7445_v53, 3.0  ;;  %v7525_v53 = vld [vmem:[%s8373_s11 + $0xc0] sm:$0xff] }
0x212c   :  { %v5328_v21 = vclamps-f32 %v7447_v57, 3.0  ;;  %v7517_v57 = vld [vmem:[%s8373_s11 + $0xe0] sm:$0xff] }
0x212d   :  { %5627 = vtanh.f32 %v5330_v44  ;;  %3373 = vmatpush.msra.mxu2 %v7517_v57 }
0x212e   :  { %5629 = vtanh.f32 %v5328_v21 }
0x212f   :  { %3374 = vmatpush.msra.mxu2 %v7525_v53 }
0x2133   :  { %v5628_v20 = vpop.eup %5627 }
0x2134   :  { %v5630_v46 = vpop.eup %5629  ;;  %3084 = vrot.lane.b32.xlu2 %v5628_v20, %s5790_s29 }
0x2135   :  { %3039 = vrot.lane.b32.xlu0 %v5630_v46, %s5790_s29 }
0x213d   :  { %3216 = vrot.lane.b32.xlu0 %v5318_v9, %s5791_s30 }
0x218e   :  { %v3085_v52 = vpop.permute.xlu2 %3084 }
0x218f   :  { %v3087_v40 = vmul.f32 %v3085_v52, %v3061_v45 }
0x2191   :  { %v3093_v62 = vrot.slane %v3087_v40, 6 }
0x2193   :  { %3094 = vrot.lane.b32.xlu2 %v3093_v62, %s5792_s0 }
0x21a7   :  { %v3040_v2 = vpop.permute.xlu0 %3039 }
0x21a8   :  { %v3042_v54 = vmul.f32 %v3040_v2, %v3016_v41 }
0x21aa   :  { %3089 = vrot.lane.b32.xlu1 %v3042_v54, %s5791_s30 }
0x21af   :  { %v3217_v6 = vpop.permute.xlu0 %3216 }
0x21b2   :  { %3260 = vrot.lane.b32.xlu1 %v5320_v58, %s5791_s30  ;;  %v3142_v58 = vperm.slane %v3140_v29, 0 }
0x21ed   :  { %v3095_v0 = vpop.permute.xlu2 %3094 }
0x221c   :  { %v3090_v59 = vpop.permute.xlu1 %3089 }
0x221d   :  { %v3097_v33 = vsel %vm257_vm0, %v3090_v59, %v3095_v0 }
0x221e   :  { %v3107_v34 = vrot.slane %v3097_v33, 2 }
0x2220   :  { %5331 = vmatmul.msk.f32.vlgmr.msrb.gmra.mxu0 %vm672_vm4, %v3107_v34 }
0x2224   :  { %v3261_v20 = vpop.permute.xlu1 %3260 }
0x229d   :  { %v3127_v7 = vpop.f32.mrf.mxu0 }
0x229e   :  { %v7467_v9 = vclamps-f32 %v3127_v7, 3.0 }
0x22a0   :  { %3319 = vst.msk [vmem:[#allocation2 + $0xa] sm:$0x3] %vm1061_vm5, %v7467_v9  ;;  %5333 = vmatmul.msk.f32.vlgmr.msra.gmra.mxu1 %vm257_vm0, %v7467_v9  ;;  %5334 = vmatmul.msk.f32.vlgmr.msrb.gmra.mxu2 %vm257_vm0, %v7467_v9 }
0x22a1   :  { %3320 = vst.msk [vmem:[#allocation2 + $0x8] sm:$0x3] %vm1063_vm6, %v7467_v9  ;;  %3433 = vmatpush.msra.mxu1 %v7350_v50  ;;  %v2972_v50 = vpop.f32.mrf.mxu2 }
0x22a3   :  { %3434 = vmatpush.msra.mxu1 %v7359_v42 }
0x22a5   :  { %3435 = vmatpush.msra.mxu1 %v7367_v23  ;;  %v3143_v23 = vperm.slane %v3140_v29, 1 }
0x22a7   :  { %3436 = vmatpush.msra.mxu1 %v7376_v27 }
0x22a9   :  { %3437 = vmatpush.msra.mxu1 %v7385_v25 }
0x22ab   :  { %3438 = vmatpush.msra.mxu1 %v7394_v37  ;;  %v2992_v37 = vpop.f32.mrf.mxu3 }
0x22ad   :  { %3439 = vmatpush.msra.mxu1 %v7403_v3 }
0x22af   :  { %3440 = vmatpush.msra.mxu1 %v7417_v43 }
0x231d   :  { %v3166_v24 = vpop.f32.mrf.mxu1 }
0x231e   :  { %v3167_v42 = vadd.f32 %v3166_v24, %v3142_v58 }
0x2320   :  { %v3189_v11 = vadd.f32 %v3167_v42, %v2972_v50 }
0x2322   :  { %v5335_v61 = vmul.f32 -1.442695, %v3189_v11  ;;  %5631 = vtanh.f32 %v3189_v11  ;;  %v3475_v11 = vrot.slane %v5328_v21, 6  ;;  %v3359_v21 = vld [vmem:[%s8373_s11 + $0xe8] sm:$0xff] }
0x2323   :  { %v3186_v27 = vpop.f32.mrf.mxu2  ;;  %3393 = vmatpush.msra.mxu3 %v3359_v21 }
0x2324   :  { %5633 = vpow2.f32 %v5335_v61  ;;  %v3187_v25 = vadd.f32 %v3186_v27, %v3143_v23  ;;  %v3523_v27 = vrot.slane %v5330_v44, 2  ;;  %v3355_v44 = vld [vmem:[%s8373_s11 + $0xc8] sm:$0xff] }
0x2325   :  { %3394 = vmatpush.msra.mxu3 %v3355_v44 }
0x2326   :  { %v3233_v56 = vadd.f32 %v3187_v25, %v2992_v37 }
0x2328   :  { %v5632_v3 = vpop.eup %5631  ;;  %v5337_v30 = vmul.f32 -1.442695, %v3233_v56  ;;  %5635 = vtanh.f32 %v3233_v56 }
0x2329   :  { %3211 = vrot.lane.b32.xlu2 %v5632_v3, %s5792_s0  ;;  %v7534_v3 = vld [vmem:[%s8373_s11 + $0xa0] sm:$0xff] }
0x232a   :  { %v5634_v43 = vpop.eup %5633  ;;  %5637 = vpow2.f32 %v5337_v30  ;;  %v3351_v30 = vld [vmem:[%s8373_s11 + $0xa8] sm:$0xff]  ;;  %3375 = vmatpush.msra.mxu2 %v7534_v3 }
0x232b   :  { %v3193_v32 = vadd.f32 1.0, %v5634_v43  ;;  %v7543_v43 = vld [vmem:[%s8373_s11 + $0x80] sm:$0xff]  ;;  %3395 = vmatpush.msra.mxu3 %v3351_v30 }
0x232c   :  { %3376 = vmatpush.msra.mxu2 %v7543_v43 }
0x232d   :  { %5639 = vrcp.f32 %v3193_v32  ;;  %v3205_v19 = vand.u32 2147483648, %v3193_v32  ;;  %v3203_v31 = vand.u32 2147483647, %v3193_v32  ;;  %vm3199_vm8 = vweird.f32 %v3193_v32 }
0x232e   :  { %v5636_v22 = vpop.eup %5635 }
0x232f   :  { %3255 = vrot.lane.b32.xlu0 %v5636_v22, %s5792_s0  ;;  %v3206_v45 = vor.u32 1.1754944e-38, %v3205_v19  ;;  %vm3204_vm11 = vcmp.eq.f32.partialorder %v3203_v31, 8.507059e+37  ;;  %v7552_v22 = vld [vmem:[%s8373_s11 + $0x60] sm:$0xff] }
0x2330   :  { %v5638_v13 = vpop.eup %5637  ;;  %3377 = vmatpush.msra.mxu2 %v7552_v22 }
0x2331   :  { %v3237_v1 = vadd.f32 1.0, %v5638_v13  ;;  %v3343_v13 = vld [vmem:[%s8373_s11 + $0x68] sm:$0xff] }
0x2333   :  { %v5640_v14 = vpop.eup %5639  ;;  %5641 = vrcp.f32 %v3237_v1  ;;  %v3249_v36 = vand.u32 2147483648, %v3237_v1  ;;  %v3247_v38 = vand.u32 2147483647, %v3237_v1  ;;  %vm3243_vm13 = vweird.f32 %v3237_v1 }
0x2334   :  { %v3195_v55 = vmul.f32 %v5640_v14, %v3193_v32  ;;  %vm3200_vm7 = vweird.f32 %v5640_v14  ;;  %v3347_v32 = vld [vmem:[%s8373_s11 + $0x88] sm:$0xff] }
0x2335   :  { %vm3201_vm9 = vmor %vm3199_vm8, %vm3200_vm7  ;;  %v3250_v39 = vor.u32 1.1754944e-38, %v3249_v36  ;;  %vm3248_vm15 = vcmp.eq.f32.partialorder %v3247_v38, 8.507059e+37  ;;  %3396 = vmatpush.msra.mxu3 %v3347_v32 }
0x2336   :  { %v3196_v4 = vsub.f32 1.0, %v3195_v55  ;;  %v7570_v55 = vld [vmem:[%s8373_s11 + $0x20] sm:$0xff] }
0x2337   :  { %3397 = vmatpush.msra.mxu3 %v3343_v13 }
0x2338   :  { %v3197_v35 = vmul.f32 %v5640_v14, %v3196_v4  ;;  %v3335_v4 = vld [vmem:[%s8373_s11 + $0x28] sm:$0xff] }
0x2339   :  { %v5642_v26 = vpop.eup %5641 }
0x233a   :  { %v3239_v63 = vmul.f32 %v5642_v26, %v3237_v1  ;;  %v3198_v47 = vadd.f32 %v5640_v14, %v3197_v35  ;;  %vm3244_vm12 = vweird.f32 %v5642_v26  ;;  %v7561_v1 = vld [vmem:[%s8373_s11 + $0x40] sm:$0xff] }
0x233b   :  { %vm3245_vm14 = vmor %vm3243_vm13, %vm3244_vm12  ;;  %3378 = vmatpush.msra.mxu2 %v7561_v1 }
0x233c   :  { %v3240_v49 = vsub.f32 1.0, %v3239_v63  ;;  %v3202_v18 = vsel %vm3201_vm9, %v5640_v14, %v3198_v47  ;;  %v3339_v14 = vld [vmem:[%s8373_s11 + $0x48] sm:$0xff] }
0x233d   :  { %v3207_v41 = vsel %vm3204_vm11, %v3206_v45, %v3202_v18  ;;  %3398 = vmatpush.msra.mxu3 %v3339_v14  ;;  %3379 = vmatpush.msra.mxu2 %v7570_v55  ;;  %v3331_v63 = vld [vmem:[%s8373_s11 + $0x8] sm:$0xff] }
0x233e   :  { %v3219_v60 = vmul.f32 %v3217_v6, %v3207_v41  ;;  %v3241_v5 = vmul.f32 %v5642_v26, %v3240_v49 }
0x233f   :  { %3399 = vmatpush.msra.mxu3 %v3335_v4 }
0x2340   :  { %3221 = vrot.lane.b32.xlu1 %v3219_v60, %s5790_s29  ;;  %v3242_v15 = vadd.f32 %v5642_v26, %v3241_v5 }
0x2341   :  { %3400 = vmatpush.msra.mxu3 %v3331_v63 }
0x2342   :  { %v3246_v48 = vsel %vm3245_vm14, %v5642_v26, %v3242_v15  ;;  %v7584_v26 = vld [vmem:[%s8373_s11] sm:$0xff] }
0x2343   :  { %v3251_v46 = vsel %vm3248_vm15, %v3250_v39, %v3246_v48  ;;  %3380 = vmatpush.msra.mxu2 %v7584_v26 }
0x2344   :  { %v3263_v52 = vmul.f32 %v3261_v20, %v3251_v46 }
0x2346   :  { %3265 = vrot.lane.b32.xlu2 %v3263_v52, %s5790_s29 }
0x2383   :  { %v3212_v40 = vpop.permute.xlu2 %3211 }
0x2384   :  { %v3214_v34 = vmul.f32 %v3212_v40, %v3207_v41 }
0x23a0   :  { %v3266_v54 = vpop.permute.xlu2 %3265 }
0x23a1   :  { %v3256_v62 = vpop.permute.xlu0 %3255 }
0x23a2   :  { %v3258_v2 = vmul.f32 %v3256_v62, %v3251_v46 }
0x23a4   :  { %v7492_v0 = vadd.f32 %v3266_v54, %v3258_v2 }
0x23a6   :  { %v5338_v59 = vclamps-f32 %v7492_v0, 3.0  ;;  %v3554_v0 = vld [vmem:[%s8374_s12 + $0x18] sm:$0xff] }
0x23a8   :  { %5643 = vtanh.f32 %v5338_v59 }
0x23ae   :  { %v5644_v33 = vpop.eup %5643 }
0x23af   :  { %3273 = vrot.lane.b32.xlu1 %v5644_v33, %s5790_s29 }
0x23b2   :  { %v3222_v7 = vpop.permute.xlu1 %3221 }
0x23b3   :  { %v7498_v29 = vadd.f32 %v3222_v7, %v3214_v34 }
0x23b5   :  { %v5336_v58 = vclamps-f32 %v7498_v29, 3.0  ;;  %v3557_v29 = vld [vmem:[%s8374_s12 + $0x30] sm:$0xff] }
0x23b7   :  { %5645 = vtanh.f32 %v5336_v58 }
0x23bd   :  { %v5646_v50 = vpop.eup %5645 }
0x23be   :  { %3229 = vrot.lane.b32.xlu0 %v5646_v50, %s5790_s29 }
0x2421   :  { %v3274_v24 = vpop.permute.xlu1 %3273 }
0x2422   :  { %v3276_v42 = vmul.f32 %v3274_v24, %v3251_v46 }
0x2424   :  { %3282 = vrot.lane.b32.xlu0 %v3276_v42, %s5792_s0 }
0x242c   :  { %3476 = vrot.lane.b32.xlu0 %v3475_v11, %s5791_s30 }
0x2430   :  { %v3230_v23 = vpop.permute.xlu0 %3229 }
0x2431   :  { %v3232_v61 = vmul.f32 %v3230_v23, %v3207_v41 }
0x2433   :  { %3278 = vrot.lane.b32.xlu2 %v3232_v61, %s5791_s30 }
0x243b   :  { %3524 = vrot.lane.b32.xlu2 %v3523_v27, %s5791_s30 }
0x248d   :  { %v3279_v25 = vpop.permute.xlu2 %3278 }
0x2496   :  { %v3283_v37 = vpop.permute.xlu0 %3282 }
0x2497   :  { %v3285_v56 = vsel %vm257_vm0, %v3279_v25, %v3283_v37 }
0x2498   :  { %5339 = vmatmul.msk.f32.vlgmr.msrb.gmra.mxu1 %vm672_vm4, %v3285_v56 }
0x2499   :  { %3846 = vmatpush.msrb.mxu1 %v3359_v21 }
0x249b   :  { %3847 = vmatpush.msrb.mxu1 %v3355_v44 }
0x249d   :  { %3848 = vmatpush.msrb.mxu1 %v3351_v30 }
0x249e   :  { %v3477_v21 = vpop.permute.xlu0 %3476 }
0x249f   :  { %3849 = vmatpush.msrb.mxu1 %v3347_v32  ;;  %v3525_v32 = vpop.permute.xlu2 %3524 }
0x24a1   :  { %3850 = vmatpush.msrb.mxu1 %v3343_v13 }
0x24a3   :  { %3851 = vmatpush.msrb.mxu1 %v3339_v14 }
0x24a5   :  { %3852 = vmatpush.msrb.mxu1 %v3335_v4 }
0x24a7   :  { %3853 = vmatpush.msrb.mxu1 %v3331_v63 }
0x2515   :  { %v3314_v19 = vpop.f32.mrf.mxu1 }
0x2516   :  { %v5340_v35 = vclamps-f32 %v3314_v19, 3.0 }
0x2518   :  { %v3321_v31 = vadd.f32 %v5340_v35, %v7467_v9  ;;  %3325 = vrot.lane.b32.xlu1 %v5340_v35, %s5791_s30 }
0x251a   :  { %3322 = vst.msk [vmem:[#allocation3 + $0xa] sm:$0x3] %vm1061_vm5, %v3321_v31 }
0x251b   :  { %3323 = vst.msk [vmem:[#allocation3 + $0x8] sm:$0x3] %vm1063_vm6, %v3321_v31 }
0x258a   :  { %v3326_v47 = vpop.permute.xlu1 %3325 }
0x258b   :  { %v3328_v45 = vsel %vm257_vm0, %v7467_v9, %v3326_v47 }
0x258c   :  { %v3329_v49 = vsel %vm1073_vm1, %v3328_v45, %v3326_v47 }
0x258d   :  { %5341 = vmatmul.msk.f32.vlgmr.msra.gmra.mxu2 %vm672_vm4, %v3329_v49  ;;  %5342 = vmatmul.msk.f32.vlgmr.msra.gmra.mxu3 %vm672_vm4, %v3329_v49 }
0x258e   :  { %5343 = vmatmul.msk.f32.vlgmr.msra.gmra.mxu0 %vm672_vm4, %v3329_v49  ;;  %5344 = vmatmul.msk.f32.vlgmr.msra.gmra.mxu1 %vm672_vm4, %v3329_v49 }
0x2610   :  { %v3382_v18 = vpop.f32.mrf.mxu2  ;;  %v3402_v6 = vpop.f32.mrf.mxu3 }
0x2611   :  { %v3446_v41 = vrot.slane %v3382_v18, 4  ;;  %v3494_v36 = vrot.slane %v3402_v6, 2 }
0x2613   :  { %v3448_v60 = vadd.f32 %v3446_v41, %v6248_v28  ;;  %v3496_v5 = vadd.f32 %v3494_v36, %v6237_v16 }
0x2615   :  { %v5345_v38 = vmul.f32 -1.442695, %v3448_v60  ;;  %5647 = vtanh.f32 %v3448_v60  ;;  %v5347_v9 = vmul.f32 -1.442695, %v3496_v5 }
0x2616   :  { %5649 = vtanh.f32 %v3496_v5 }
0x2617   :  { %5651 = vpow2.f32 %v5345_v38 }
0x2618   :  { %5653 = vpow2.f32 %v5347_v9 }
0x261b   :  { %v5648_v15 = vpop.eup %5647 }
0x261c   :  { %v5650_v39 = vpop.eup %5649  ;;  %3470 = vrot.lane.b32.xlu2 %v5648_v15, %s5792_s0 }
0x261d   :  { %v5652_v48 = vpop.eup %5651  ;;  %3518 = vrot.lane.b32.xlu1 %v5650_v39, %s5792_s0 }
0x261e   :  { %v5654_v20 = vpop.eup %5653  ;;  %v3452_v46 = vadd.f32 1.0, %v5652_v48  ;;  %v3558_v48 = vld [vmem:[%s8374_s12 + $0x38] sm:$0xff] }
0x261f   :  { %v3500_v52 = vadd.f32 1.0, %v5654_v20  ;;  %3571 = vmatpush.msrb.mxu2 %v3558_v48  ;;  %v3555_v20 = vld [vmem:[%s8374_s12 + $0x20] sm:$0xff] }
0x2620   :  { %5655 = vrcp.f32 %v3452_v46  ;;  %v3464_v7 = vand.u32 2147483648, %v3452_v46  ;;  %v3462_v42 = vand.u32 2147483647, %v3452_v46  ;;  %vm3458_vm7 = vweird.f32 %v3452_v46 }
0x2621   :  { %5657 = vrcp.f32 %v3500_v52  ;;  %v3512_v50 = vand.u32 2147483648, %v3500_v52  ;;  %v3510_v23 = vand.u32 2147483647, %v3500_v52  ;;  %vm3506_vm8 = vweird.f32 %v3500_v52  ;;  %3572 = vmatpush.msrb.mxu2 %v3557_v29 }
0x2622   :  { %v3465_v25 = vor.u32 1.1754944e-38, %v3464_v7  ;;  %vm3463_vm12 = vcmp.eq.f32.partialorder %v3462_v42, 8.507059e+37  ;;  %v7673_v42 = vld [vmem:[%s8375_s13 + $0x18] sm:$0xff] }
0x2623   :  { %v3513_v37 = vor.u32 1.1754944e-38, %v3512_v50  ;;  %vm3511_vm13 = vcmp.eq.f32.partialorder %v3510_v23, 8.507059e+37  ;;  %v7682_v23 = vld [vmem:[%s8375_s13 + $0x8] sm:$0xff] }
0x2626   :  { %v5656_v40 = vpop.eup %5655 }
0x2627   :  { %v5658_v62 = vpop.eup %5657  ;;  %v3454_v2 = vmul.f32 %v5656_v40, %v3452_v46  ;;  %vm3459_vm2 = vweird.f32 %v5656_v40  ;;  %v3552_v46 = vld [vmem:[%s8374_s12 + $0x8] sm:$0xff] }
0x2628   :  { %v3502_v54 = vmul.f32 %v5658_v62, %v3500_v52  ;;  %vm3507_vm3 = vweird.f32 %v5658_v62  ;;  %vm3460_vm9 = vmor %vm3458_vm7, %vm3459_vm2  ;;  %v3551_v52 = vld [vmem:[%s8374_s12] sm:$0xff] }
0x2629   :  { %v3455_v33 = vsub.f32 1.0, %v3454_v2  ;;  %vm3508_vm11 = vmor %vm3506_vm8, %vm3507_vm3  ;;  %v3589_v2 = vld [vmem:[%s8375_s13 + $0x20] sm:$0xff] }
0x262a   :  { %v3503_v34 = vsub.f32 1.0, %v3502_v54  ;;  %v7662_v54 = vld [vmem:[%s8375_s13 + $0x28] sm:$0xff] }
0x262b   :  { %v3456_v24 = vmul.f32 %v5656_v40, %v3455_v33  ;;  %v3587_v33 = vld [vmem:[%s8375_s13 + $0x10] sm:$0xff] }
0x262c   :  { %v3504_v11 = vmul.f32 %v5658_v62, %v3503_v34 }
0x262d   :  { %v3457_v61 = vadd.f32 %v5656_v40, %v3456_v24 }
0x262e   :  { %v3505_v27 = vadd.f32 %v5658_v62, %v3504_v11  ;;  %v3585_v11 = vld [vmem:[%s8375_s13] sm:$0xff] }
0x262f   :  { %v3461_v56 = vsel %vm3460_vm9, %v5656_v40, %v3457_v61  ;;  %v3591_v40 = vld [vmem:[%s8375_s13 + $0x30] sm:$0xff] }
0x2630   :  { %v3509_v44 = vsel %vm3508_vm11, %v5658_v62, %v3505_v27  ;;  %v3466_v30 = vsel %vm3463_vm12, %v3465_v25, %v3461_v56  ;;  %v7653_v62 = vld [vmem:[%s8375_s13 + $0x38] sm:$0xff]  ;;  %3614 = vmatpush.msrb.mxu3 %v3591_v40  ;;  %4067 = vmatpush.msra.mxu1 %v3591_v40 }
0x2631   :  { %v3514_v13 = vsel %vm3511_vm13, %v3513_v37, %v3509_v44  ;;  %v3479_v14 = vmul.f32 %v3477_v21, %v3466_v30  ;;  %3634 = vmatpush.msrb.mxu0 %v7653_v62 }
0x2632   :  { %v3527_v4 = vmul.f32 %v3525_v32, %v3514_v13  ;;  %3615 = vmatpush.msrb.mxu3 %v3589_v2  ;;  %4068 = vmatpush.msra.mxu1 %v3589_v2 }
0x2633   :  { %3481 = vrot.lane.b32.xlu1 %v3479_v14, %s5790_s29  ;;  %3635 = vmatpush.msrb.mxu0 %v7662_v54 }
0x2634   :  { %3529 = vrot.lane.b32.xlu0 %v3527_v4, %s5790_s29  ;;  %3616 = vmatpush.msrb.mxu3 %v3587_v33 }
0x2635   :  { %4069 = vmatpush.msra.mxu1 %v3587_v33  ;;  %3636 = vmatpush.msrb.mxu0 %v7673_v42 }
0x2636   :  { %3617 = vmatpush.msrb.mxu3 %v3585_v11 }
0x2637   :  { %3637 = vmatpush.msrb.mxu0 %v7682_v23  ;;  %4070 = vmatpush.msra.mxu1 %v3585_v11 }
0x2639   :  { %3826 = vmatpush.msra.mxu0 %v7517_v57  ;;  %v3422_v57 = vpop.f32.mrf.mxu0 }
0x263b   :  { %3827 = vmatpush.msra.mxu0 %v7525_v53  ;;  %v3593_v53 = vld [vmem:[%s8376_s14] sm:$0x3] }
0x263d   :  { %3828 = vmatpush.msra.mxu0 %v7534_v3  ;;  %v3596_v3 = vperm.slane %v3593_v53, 1 }
0x263f   :  { %3829 = vmatpush.msra.mxu0 %v7543_v43 }
0x2641   :  { %3830 = vmatpush.msra.mxu0 %v7552_v22 }
0x2643   :  { %3831 = vmatpush.msra.mxu0 %v7561_v1  ;;  %v3442_v1 = vpop.f32.mrf.mxu1 }
0x2645   :  { %3832 = vmatpush.msra.mxu0 %v7570_v55 }
0x2647   :  { %3833 = vmatpush.msra.mxu0 %v7584_v26  ;;  %v3595_v26 = vperm.slane %v3593_v53, 0 }
0x2676   :  { %v3471_v35 = vpop.permute.xlu2 %3470 }
0x2677   :  { %v3473_v31 = vmul.f32 %v3471_v35, %v3466_v30 }
0x268f   :  { %v3519_v19 = vpop.permute.xlu1 %3518 }
0x2690   :  { %v3521_v63 = vmul.f32 %v3519_v19, %v3514_v13 }
0x26a5   :  { %v3482_v47 = vpop.permute.xlu1 %3481 }
0x26a6   :  { %v7603_v45 = vadd.f32 %v3482_v47, %v3473_v31  ;;  %v3530_v49 = vpop.permute.xlu0 %3529 }
0x26a7   :  { %v7605_v18 = vadd.f32 %v3530_v49, %v3521_v63 }
0x26a8   :  { %v5346_v6 = vclamps-f32 %v7603_v45, 3.0  ;;  %v7758_v45 = vld [vmem:[%s8377_s15 + $0x10] sm:$0xff] }
0x26a9   :  { %v5348_v41 = vclamps-f32 %v7605_v18, 3.0 }
0x26aa   :  { %5659 = vtanh.f32 %v5346_v6 }
0x26ab   :  { %5661 = vtanh.f32 %v5348_v41 }
0x26b0   :  { %v5660_v36 = vpop.eup %5659 }
0x26b1   :  { %v5662_v60 = vpop.eup %5661  ;;  %3489 = vrot.lane.b32.xlu0 %v5660_v36, %s5790_s29 }
0x26b2   :  { %3537 = vrot.lane.b32.xlu2 %v5662_v60, %s5790_s29 }
0x26b9   :  { %3669 = vrot.lane.b32.xlu0 %v5336_v58, %s5791_s30  ;;  %v3556_v58 = vld [vmem:[%s8374_s12 + $0x28] sm:$0xff] }
0x26ba   :  { %3573 = vmatpush.msrb.mxu2 %v3556_v58 }
0x26bc   :  { %3574 = vmatpush.msrb.mxu2 %v3555_v20 }
0x26be   :  { %3575 = vmatpush.msrb.mxu2 %v3554_v0 }
0x270c   :  { %v3538_v5 = vpop.permute.xlu2 %3537 }
0x270d   :  { %v3540_v38 = vmul.f32 %v3538_v5, %v3514_v13 }
0x270f   :  { %v3546_v9 = vrot.slane %v3540_v38, 2 }
0x2711   :  { %3547 = vrot.lane.b32.xlu2 %v3546_v9, %s5792_s0 }
0x2723   :  { %v3490_v15 = vpop.permute.xlu0 %3489 }
0x2724   :  { %v3492_v39 = vmul.f32 %v3490_v15, %v3466_v30 }
0x2726   :  { %3542 = vrot.lane.b32.xlu1 %v3492_v39, %s5791_s30 }
0x272b   :  { %v3670_v2 = vpop.permute.xlu0 %3669 }
0x272e   :  { %3713 = vrot.lane.b32.xlu1 %v5338_v59, %s5791_s30  ;;  %v3553_v59 = vld [vmem:[%s8374_s12 + $0x10] sm:$0xff] }
0x272f   :  { %3576 = vmatpush.msrb.mxu2 %v3553_v59 }
0x2731   :  { %3577 = vmatpush.msrb.mxu2 %v3552_v46 }
0x2733   :  { %3578 = vmatpush.msrb.mxu2 %v3551_v52 }
0x276b   :  { %v3548_v34 = vpop.permute.xlu2 %3547 }
0x2798   :  { %v3543_v7 = vpop.permute.xlu1 %3542 }
0x2799   :  { %v3550_v50 = vsel %vm257_vm0, %v3543_v7, %v3548_v34 }
0x279a   :  { %v3560_v24 = vrot.slane %v3550_v50, 4 }
0x279c   :  { %5349 = vmatmul.msk.f32.vlgmr.msrb.gmra.mxu2 %vm672_vm4, %v3560_v24 }
0x281f   :  { %v3580_v61 = vpop.f32.mrf.mxu2 }
0x2820   :  { %v7693_v27 = vclamps-f32 %v3580_v61, 3.0 }
0x2822   :  { %3772 = vst.msk [vmem:[#allocation2 + $0xc] sm:$0x3] %vm1061_vm5, %v7693_v27  ;;  %5351 = vmatmul.msk.f32.vlgmr.msrb.gmra.mxu3 %vm257_vm0, %v7693_v27  ;;  %5352 = vmatmul.msk.f32.vlgmr.msrb.gmra.mxu0 %vm257_vm0, %v7693_v27 }
0x2823   :  { %3773 = vst.msk [vmem:[#allocation2 + $0x6] sm:$0x3] %vm1063_vm6, %v7693_v27  ;;  %4024 = vmatpush.msrb.mxu0 %v3558_v48  ;;  %v3714_v48 = vpop.permute.xlu1 %3713 }
0x2825   :  { %4025 = vmatpush.msrb.mxu0 %v3557_v29 }
0x2827   :  { %4026 = vmatpush.msrb.mxu0 %v3556_v58 }
0x2829   :  { %4027 = vmatpush.msrb.mxu0 %v3555_v20 }
0x282b   :  { %4028 = vmatpush.msrb.mxu0 %v3554_v0 }
0x282d   :  { %4029 = vmatpush.msrb.mxu0 %v3553_v59 }
0x282f   :  { %4030 = vmatpush.msrb.mxu0 %v3552_v46 }
0x2831   :  { %4031 = vmatpush.msrb.mxu0 %v3551_v52 }
0x289f   :  { %v3639_v43 = vpop.f32.mrf.mxu0 }
0x28a0   :  { %v3640_v22 = vadd.f32 %v3639_v43, %v3596_v3 }
0x28a2   :  { %v3686_v55 = vadd.f32 %v3640_v22, %v3442_v1 }
0x28a4   :  { %v5355_v25 = vmul.f32 -1.442695, %v3686_v55  ;;  %5663 = vtanh.f32 %v3686_v55 }
0x28a5   :  { %v3619_v37 = vpop.f32.mrf.mxu3 }
0x28a6   :  { %5665 = vpow2.f32 %v5355_v25  ;;  %v3620_v56 = vadd.f32 %v3619_v37, %v3595_v26  ;;  %v7726_v37 = vld [vmem:[%s8377_s15 + $0x38] sm:$0xff] }
0x28a7   :  { %3758 = vmatpush.msra.mxu3 %v7726_v37 }
0x28a8   :  { %v3642_v21 = vadd.f32 %v3620_v56, %v3422_v57  ;;  %v7731_v56 = vld [vmem:[%s8377_s15 + $0x30] sm:$0xff] }
0x28a9   :  { %3759 = vmatpush.msra.mxu3 %v7731_v56 }
0x28aa   :  { %v5664_v44 = vpop.eup %5663  ;;  %v5353_v30 = vmul.f32 -1.442695, %v3642_v21  ;;  %5667 = vtanh.f32 %v3642_v21  ;;  %v7737_v21 = vld [vmem:[%s8377_s15 + $0x28] sm:$0xff] }
0x28ab   :  { %3708 = vrot.lane.b32.xlu0 %v5664_v44, %s5792_s0  ;;  %v3928_v44 = vrot.slane %v5346_v6, 6  ;;  %3760 = vmatpush.msra.mxu3 %v7737_v21 }
0x28ac   :  { %v5666_v32 = vpop.eup %5665  ;;  %5669 = vpow2.f32 %v5353_v30  ;;  %v7745_v30 = vld [vmem:[%s8377_s15 + $0x20] sm:$0xff] }
0x28ad   :  { %v3690_v13 = vadd.f32 1.0, %v5666_v32  ;;  %v7752_v32 = vld [vmem:[%s8377_s15 + $0x18] sm:$0xff]  ;;  %3761 = vmatpush.msra.mxu3 %v7745_v30 }
0x28af   :  { %5671 = vrcp.f32 %v3690_v13  ;;  %v3702_v47 = vand.u32 2147483648, %v3690_v13  ;;  %v3700_v36 = vand.u32 2147483647, %v3690_v13  ;;  %vm3696_vm15 = vweird.f32 %v3690_v13  ;;  %3762 = vmatpush.msra.mxu3 %v7752_v32 }
0x28b0   :  { %v5668_v14 = vpop.eup %5667 }
0x28b1   :  { %3664 = vrot.lane.b32.xlu2 %v5668_v14, %s5792_s0  ;;  %v3703_v9 = vor.u32 1.1754944e-38, %v3702_v47  ;;  %vm3701_vm3 = vcmp.eq.f32.partialorder %v3700_v36, 8.507059e+37  ;;  %3763 = vmatpush.msra.mxu3 %v7758_v45  ;;  %v3976_v14 = vrot.slane %v5348_v41, 2  ;;  %v3813_v41 = vld [vmem:[%s8373_s11 + $0xf0] sm:$0xff] }
0x28b2   :  { %v5670_v4 = vpop.eup %5669  ;;  %v3809_v47 = vld [vmem:[%s8373_s11 + $0xd0] sm:$0xff]  ;;  %3866 = vmatpush.msra.mxu2 %v3813_v41 }
0x28b3   :  { %v3646_v19 = vadd.f32 1.0, %v5670_v4  ;;  %v7769_v4 = vld [vmem:[%s8377_s15 + $0x8] sm:$0xff]  ;;  %v3805_v36 = vld [vmem:[%s8373_s11 + $0xb0] sm:$0xff] }
0x28b4   :  { %3764 = vmatpush.msra.mxu3 %v7769_v4  ;;  %3867 = vmatpush.msra.mxu2 %v3809_v47 }
0x28b5   :  { %v5672_v35 = vpop.eup %5671  ;;  %5673 = vrcp.f32 %v3646_v19  ;;  %v3658_v58 = vand.u32 2147483648, %v3646_v19  ;;  %v3656_v59 = vand.u32 2147483647, %v3646_v19  ;;  %vm3652_vm8 = vweird.f32 %v3646_v19 }
0x28b6   :  { %v3692_v31 = vmul.f32 %v5672_v35, %v3690_v13  ;;  %vm3697_vm14 = vweird.f32 %v5672_v35  ;;  %3868 = vmatpush.msra.mxu2 %v3805_v36 }
0x28b7   :  { %vm3698_vm2 = vmor %vm3696_vm15, %vm3697_vm14  ;;  %v3659_v52 = vor.u32 1.1754944e-38, %v3658_v58  ;;  %vm3657_vm11 = vcmp.eq.f32.partialorder %v3656_v59, 8.507059e+37  ;;  %v7839_v58 = vld [vmem:[%s8373_s11 + $0x38] sm:$0xff] }
0x28b8   :  { %v3693_v63 = vsub.f32 1.0, %v3692_v31 }
0x28ba   :  { %v3694_v49 = vmul.f32 %v5672_v35, %v3693_v63  ;;  %v7786_v63 = vld [vmem:[%s8373_s11 + $0xf8] sm:$0xff] }
0x28bb   :  { %v5674_v60 = vpop.eup %5673 }
0x28bc   :  { %v3648_v5 = vmul.f32 %v5674_v60, %v3646_v19  ;;  %v3695_v38 = vadd.f32 %v5672_v35, %v3694_v49  ;;  %vm3653_vm7 = vweird.f32 %v5674_v60  ;;  %v7775_v19 = vld [vmem:[%s8377_s15] sm:$0xff]  ;;  %v7795_v49 = vld [vmem:[%s8373_s11 + $0xd8] sm:$0xff] }
0x28bd   :  { %vm3654_vm9 = vmor %vm3652_vm8, %vm3653_vm7  ;;  %3765 = vmatpush.msra.mxu3 %v7775_v19 }
0x28be   :  { %v3649_v15 = vsub.f32 1.0, %v3648_v5  ;;  %v3699_v39 = vsel %vm3698_vm2, %v5672_v35, %v3695_v38  ;;  %v3801_v5 = vld [vmem:[%s8373_s11 + $0x90] sm:$0xff]  ;;  %v7812_v38 = vld [vmem:[%s8373_s11 + $0x98] sm:$0xff] }
0x28bf   :  { %v3704_v29 = vsel %vm3701_vm3, %v3703_v9, %v3699_v39  ;;  %3886 = vmatpush.msrb.mxu3 %v7786_v63  ;;  %v3797_v9 = vld [vmem:[%s8373_s11 + $0x70] sm:$0xff]  ;;  %3869 = vmatpush.msra.mxu2 %v3801_v5 }
0x28c0   :  { %v3716_v20 = vmul.f32 %v3714_v48, %v3704_v29  ;;  %v3650_v0 = vmul.f32 %v5674_v60, %v3649_v15  ;;  %v7821_v15 = vld [vmem:[%s8373_s11 + $0x78] sm:$0xff]  ;;  %v3793_v39 = vld [vmem:[%s8373_s11 + $0x50] sm:$0xff] }
0x28c1   :  { %3887 = vmatpush.msrb.mxu3 %v7795_v49  ;;  %v7830_v48 = vld [vmem:[%s8373_s11 + $0x58] sm:$0xff]  ;;  %3870 = vmatpush.msra.mxu2 %v3797_v9 }
0x28c2   :  { %3718 = vrot.lane.b32.xlu2 %v3716_v20, %s5790_s29  ;;  %v3651_v46 = vadd.f32 %v5674_v60, %v3650_v0 }
0x28c3   :  { %3871 = vmatpush.msra.mxu2 %v3793_v39 }
0x28c4   :  { %v3655_v40 = vsel %vm3654_vm9, %v5674_v60, %v3651_v46  ;;  %v7803_v60 = vld [vmem:[%s8373_s11 + $0xb8] sm:$0xff]  ;;  %v3785_v46 = vld [vmem:[%s8373_s11 + $0x10] sm:$0xff] }
0x28c5   :  { %v3660_v33 = vsel %vm3657_vm11, %v3659_v52, %v3655_v40  ;;  %3888 = vmatpush.msrb.mxu3 %v7803_v60  ;;  %v7853_v52 = vld [vmem:[%s8373_s11 + $0x18] sm:$0xff] }
0x28c6   :  { %v3672_v34 = vmul.f32 %v3670_v2, %v3660_v33 }
0x28c7   :  { %3889 = vmatpush.msrb.mxu3 %v7812_v38 }
0x28c8   :  { %3674 = vrot.lane.b32.xlu1 %v3672_v34, %s5790_s29 }
0x28c9   :  { %3890 = vmatpush.msrb.mxu3 %v7821_v15 }
0x28cb   :  { %3891 = vmatpush.msrb.mxu3 %v7830_v48 }
0x28cd   :  { %3892 = vmatpush.msrb.mxu3 %v7839_v58 }
0x28cf   :  { %3893 = vmatpush.msrb.mxu3 %v7853_v52 }
0x290b   :  { %v3665_v7 = vpop.permute.xlu2 %3664 }
0x290c   :  { %v3667_v3 = vmul.f32 %v3665_v7, %v3660_v33 }
0x291c   :  { %v3719_v11 = vpop.permute.xlu2 %3718 }
0x291d   :  { %v3709_v50 = vpop.permute.xlu0 %3708 }
0x291e   :  { %v3711_v24 = vmul.f32 %v3709_v50, %v3704_v29 }
0x2920   :  { %v7710_v61 = vadd.f32 %v3719_v11, %v3711_v24 }
0x2922   :  { %v5356_v57 = vclamps-f32 %v7710_v61, 3.0  ;;  %v4046_v61 = vld [vmem:[%s8376_s14] sm:$0x3] }
0x2924   :  { %5675 = vtanh.f32 %v5356_v57 }
0x292a   :  { %v5676_v53 = vpop.eup %5675 }
0x292b   :  { %3726 = vrot.lane.b32.xlu1 %v5676_v53, %s5790_s29 }
0x293a   :  { %v3675_v43 = vpop.permute.xlu1 %3674 }
0x293b   :  { %v7716_v22 = vadd.f32 %v3675_v43, %v3667_v3 }
0x293d   :  { %v5354_v1 = vclamps-f32 %v7716_v22, 3.0 }
0x293f   :  { %5677 = vtanh.f32 %v5354_v1 }
0x2945   :  { %v5678_v55 = vpop.eup %5677 }
0x2946   :  { %3682 = vrot.lane.b32.xlu0 %v5678_v55, %s5790_s29 }
0x299d   :  { %v3727_v26 = vpop.permute.xlu1 %3726 }
0x299e   :  { %v3729_v25 = vmul.f32 %v3727_v26, %v3704_v29  ;;  %v3789_v29 = vld [vmem:[%s8373_s11 + $0x30] sm:$0xff] }
0x299f   :  { %3872 = vmatpush.msra.mxu2 %v3789_v29 }
0x29a0   :  { %3735 = vrot.lane.b32.xlu0 %v3729_v25, %s5792_s0 }
0x29a1   :  { %3873 = vmatpush.msra.mxu2 %v3785_v46 }
0x29a3   :  { %4087 = vmatpush.msrb.mxu2 %v7653_v62 }
0x29a5   :  { %4088 = vmatpush.msrb.mxu2 %v7662_v54 }
0x29a7   :  { %4089 = vmatpush.msrb.mxu2 %v7673_v42 }
0x29a8   :  { %3929 = vrot.lane.b32.xlu0 %v3928_v44, %s5791_s30 }
0x29a9   :  { %4090 = vmatpush.msrb.mxu2 %v7682_v23 }
0x29b8   :  { %v3683_v6 = vpop.permute.xlu0 %3682 }
0x29b9   :  { %v3685_v13 = vmul.f32 %v3683_v6, %v3660_v33 }
0x29bb   :  { %3731 = vrot.lane.b32.xlu2 %v3685_v13, %s5791_s30 }
0x29c3   :  { %3977 = vrot.lane.b32.xlu2 %v3976_v14, %s5791_s30 }
0x2a12   :  { %v3736_v35 = vpop.permute.xlu0 %3735 }
0x2a15   :  { %v3732_v31 = vpop.permute.xlu2 %3731 }
0x2a16   :  { %v3738_v18 = vsel %vm257_vm0, %v3732_v31, %v3736_v35 }
0x2a17   :  { %5357 = vmatmul.msk.f32.vlgmr.msra.gmra.mxu3 %vm672_vm4, %v3738_v18 }
0x2a1a   :  { %v3930_v18 = vpop.permute.xlu0 %3929 }
0x2a9a   :  { %v3767_v20 = vpop.f32.mrf.mxu3 }
0x2a9b   :  { %v5358_v0 = vclamps-f32 %v3767_v20, 3.0 }
0x2a9d   :  { %v3774_v59 = vadd.f32 %v5358_v0, %v7693_v27  ;;  %3778 = vrot.lane.b32.xlu1 %v5358_v0, %s5791_s30 }
0x2a9f   :  { %3775 = vst.msk [vmem:[#allocation3 + $0xc] sm:$0x3] %vm1061_vm5, %v3774_v59 }
0x2aa0   :  { %3776 = vst.msk [vmem:[#allocation3 + $0x6] sm:$0x3] %vm1063_vm6, %v3774_v59 }
0x2b0f   :  { %v3779_v40 = vpop.permute.xlu1 %3778 }
0x2b10   :  { %v3781_v2 = vsel %vm257_vm0, %v7693_v27, %v3779_v40 }
0x2b11   :  { %v3782_v33 = vsel %vm1073_vm1, %v3781_v2, %v3779_v40 }
0x2b12   :  { %5359 = vmatmul.msk.f32.vlgmr.msra.gmra.mxu0 %vm672_vm4, %v3782_v33  ;;  %5360 = vmatmul.msk.f32.vlgmr.msrb.gmra.mxu1 %vm672_vm4, %v3782_v33 }
0x2b13   :  { %5361 = vmatmul.msk.f32.vlgmr.msra.gmra.mxu2 %vm672_vm4, %v3782_v33  ;;  %5362 = vmatmul.msk.f32.vlgmr.msrb.gmra.mxu3 %vm672_vm4, %v3782_v33 }
0x2b14   :  { %4211 = vmatpush.msrb.mxu1 %v7726_v37  ;;  %4319 = vmatpush.msra.mxu0 %v3813_v41 }
0x2b16   :  { %4212 = vmatpush.msrb.mxu1 %v7731_v56  ;;  %4320 = vmatpush.msra.mxu0 %v3809_v47 }
0x2b18   :  { %4213 = vmatpush.msrb.mxu1 %v7737_v21  ;;  %4321 = vmatpush.msra.mxu0 %v3805_v36  ;;  %v3978_v36 = vpop.permute.xlu2 %3977 }
0x2b1a   :  { %4214 = vmatpush.msrb.mxu1 %v7745_v30  ;;  %4322 = vmatpush.msra.mxu0 %v3801_v5 }
0x2b1c   :  { %4215 = vmatpush.msrb.mxu1 %v7752_v32  ;;  %4323 = vmatpush.msra.mxu0 %v3797_v9 }
0x2b1e   :  { %4216 = vmatpush.msrb.mxu1 %v7758_v45  ;;  %4324 = vmatpush.msra.mxu0 %v3793_v39 }
0x2b20   :  { %4217 = vmatpush.msrb.mxu1 %v7769_v4  ;;  %4325 = vmatpush.msra.mxu0 %v3789_v29 }
0x2b22   :  { %4218 = vmatpush.msrb.mxu1 %v7775_v19  ;;  %4326 = vmatpush.msra.mxu0 %v3785_v46 }
0x2b8f   :  { %v3835_v62 = vpop.f32.mrf.mxu0  ;;  %v3855_v54 = vpop.f32.mrf.mxu1 }
0x2b90   :  { %v3899_v42 = vrot.slane %v3835_v62, 2  ;;  %v3947_v23 = vrot.slane %v3855_v54, 4 }
0x2b92   :  { %v3901_v27 = vadd.f32 %v3899_v42, %v6248_v28  ;;  %v3949_v34 = vadd.f32 %v3947_v23, %v6237_v16 }
0x2b94   :  { %v5363_v7 = vmul.f32 -1.442695, %v3901_v27  ;;  %5679 = vtanh.f32 %v3901_v27  ;;  %v5365_v50 = vmul.f32 -1.442695, %v3949_v34 }
0x2b95   :  { %5681 = vtanh.f32 %v3949_v34 }
0x2b96   :  { %5683 = vpow2.f32 %v5363_v7 }
0x2b97   :  { %5685 = vpow2.f32 %v5365_v50 }
0x2b9a   :  { %v5680_v24 = vpop.eup %5679 }
0x2b9b   :  { %v5682_v11 = vpop.eup %5681  ;;  %3923 = vrot.lane.b32.xlu2 %v5680_v24, %s5792_s0 }
0x2b9c   :  { %v5684_v53 = vpop.eup %5683  ;;  %3971 = vrot.lane.b32.xlu1 %v5682_v11, %s5792_s0 }
0x2b9d   :  { %v5686_v3 = vpop.eup %5685  ;;  %v3905_v43 = vadd.f32 1.0, %v5684_v53 }
0x2b9e   :  { %v3953_v55 = vadd.f32 1.0, %v5686_v3 }
0x2b9f   :  { %5687 = vrcp.f32 %v3905_v43  ;;  %v3917_v44 = vand.u32 2147483648, %v3905_v43  ;;  %v3915_v45 = vand.u32 2147483647, %v3905_v43  ;;  %vm3911_vm14 = vweird.f32 %v3905_v43 }
0x2ba0   :  { %5689 = vrcp.f32 %v3953_v55  ;;  %v3965_v30 = vand.u32 2147483648, %v3953_v55  ;;  %v3963_v13 = vand.u32 2147483647, %v3953_v55  ;;  %vm3959_vm15 = vweird.f32 %v3953_v55 }
0x2ba1   :  { %v3918_v19 = vor.u32 1.1754944e-38, %v3917_v44  ;;  %vm3916_vm7 = vcmp.eq.f32.partialorder %v3915_v45, 8.507059e+37 }
0x2ba2   :  { %v3966_v35 = vor.u32 1.1754944e-38, %v3965_v30  ;;  %vm3964_vm8 = vcmp.eq.f32.partialorder %v3963_v13, 8.507059e+37 }
0x2ba5   :  { %v5688_v28 = vpop.eup %5687 }
0x2ba6   :  { %v5690_v26 = vpop.eup %5689  ;;  %v3907_v25 = vmul.f32 %v5688_v28, %v3905_v43  ;;  %vm3912_vm12 = vweird.f32 %v5688_v28 }
0x2ba7   :  { %v3955_v37 = vmul.f32 %v5690_v26, %v3953_v55  ;;  %vm3960_vm13 = vweird.f32 %v5690_v26  ;;  %vm3913_vm2 = vmor %vm3911_vm14, %vm3912_vm12 }
0x2ba8   :  { %v3908_v56 = vsub.f32 1.0, %v3907_v25  ;;  %vm3961_vm3 = vmor %vm3959_vm15, %vm3960_vm13 }
0x2ba9   :  { %v3956_v21 = vsub.f32 1.0, %v3955_v37 }
0x2baa   :  { %v3909_v32 = vmul.f32 %v5688_v28, %v3908_v56 }
0x2bab   :  { %v3957_v6 = vmul.f32 %v5690_v26, %v3956_v21 }
0x2bac   :  { %v3910_v14 = vadd.f32 %v5688_v28, %v3909_v32 }
0x2bad   :  { %v3958_v4 = vadd.f32 %v5690_v26, %v3957_v6 }
0x2bae   :  { %v3914_v31 = vsel %vm3913_vm2, %v5688_v28, %v3910_v14 }
0x2baf   :  { %v3962_v41 = vsel %vm3961_vm3, %v5690_v26, %v3958_v4  ;;  %v3919_v47 = vsel %vm3916_vm7, %v3918_v19, %v3914_v31 }
0x2bb0   :  { %v3967_v5 = vsel %vm3964_vm8, %v3966_v35, %v3962_v41  ;;  %v3932_v9 = vmul.f32 %v3930_v18, %v3919_v47 }
0x2bb1   :  { %v3980_v39 = vmul.f32 %v3978_v36, %v3967_v5 }
0x2bb2   :  { %3934 = vrot.lane.b32.xlu1 %v3932_v9, %s5790_s29 }
0x2bb3   :  { %3982 = vrot.lane.b32.xlu0 %v3980_v39, %s5790_s29 }
0x2bf5   :  { %v3924_v20 = vpop.permute.xlu2 %3923 }
0x2bf6   :  { %v3926_v0 = vmul.f32 %v3924_v20, %v3919_v47 }
0x2c0e   :  { %v3972_v29 = vpop.permute.xlu1 %3971 }
0x2c0f   :  { %v3974_v59 = vmul.f32 %v3972_v29, %v3967_v5 }
0x2c24   :  { %v3935_v46 = vpop.permute.xlu1 %3934 }
0x2c25   :  { %v7881_v40 = vadd.f32 %v3935_v46, %v3926_v0  ;;  %v3983_v2 = vpop.permute.xlu0 %3982 }
0x2c26   :  { %v7883_v33 = vadd.f32 %v3983_v2, %v3974_v59 }
0x2c27   :  { %v5364_v62 = vclamps-f32 %v7881_v40, 3.0  ;;  %v7953_v40 = vld [vmem:[%s8373_s11 + $0xe0] sm:$0xff] }
0x2c28   :  { %v5366_v54 = vclamps-f32 %v7883_v33, 3.0  ;;  %v7961_v33 = vld [vmem:[%s8373_s11 + $0xc0] sm:$0xff]  ;;  %4279 = vmatpush.msra.mxu2 %v7953_v40 }
0x2c29   :  { %5691 = vtanh.f32 %v5364_v62 }
0x2c2a   :  { %5693 = vtanh.f32 %v5366_v54  ;;  %4280 = vmatpush.msra.mxu2 %v7961_v33 }
0x2c2f   :  { %v5692_v42 = vpop.eup %5691 }
0x2c30   :  { %v5694_v23 = vpop.eup %5693  ;;  %3942 = vrot.lane.b32.xlu0 %v5692_v42, %s5790_s29 }
0x2c31   :  { %3990 = vrot.lane.b32.xlu2 %v5694_v23, %s5790_s29 }
0x2c38   :  { %4122 = vrot.lane.b32.xlu0 %v5354_v1, %s5791_s30 }
0x2c8b   :  { %v3991_v27 = vpop.permute.xlu2 %3990 }
0x2c8c   :  { %v3993_v34 = vmul.f32 %v3991_v27, %v3967_v5 }
0x2c8e   :  { %v3999_v7 = vrot.slane %v3993_v34, 6 }
0x2c90   :  { %4000 = vrot.lane.b32.xlu2 %v3999_v7, %s5792_s0 }
0x2ca2   :  { %v3943_v50 = vpop.permute.xlu0 %3942 }
0x2ca3   :  { %v3945_v24 = vmul.f32 %v3943_v50, %v3919_v47 }
0x2ca5   :  { %3995 = vrot.lane.b32.xlu1 %v3945_v24, %s5791_s30 }
0x2caa   :  { %v4123_v36 = vpop.permute.xlu0 %4122 }
0x2cad   :  { %4166 = vrot.lane.b32.xlu1 %v5356_v57, %s5791_s30  ;;  %v4048_v57 = vperm.slane %v4046_v61, 0 }
0x2cea   :  { %v4001_v11 = vpop.permute.xlu2 %4000 }
0x2d17   :  { %v3996_v53 = vpop.permute.xlu1 %3995 }
0x2d18   :  { %v4003_v3 = vsel %vm257_vm0, %v3996_v53, %v4001_v11 }
0x2d19   :  { %v4013_v43 = vrot.slane %v4003_v3, 6 }
0x2d1b   :  { %5367 = vmatmul.msk.f32.vlgmr.msrb.gmra.mxu0 %vm672_vm4, %v4013_v43 }
0x2d1f   :  { %v4167_v2 = vpop.permute.xlu1 %4166 }
0x2d98   :  { %v4033_v22 = vpop.f32.mrf.mxu0 }
0x2d99   :  { %v7903_v1 = vclamps-f32 %v4033_v22, 3.0 }
0x2d9b   :  { %4225 = vst.msk [vmem:[#allocation2 + $0xe] sm:$0x3] %vm1061_vm5, %v7903_v1  ;;  %5369 = vmatmul.msk.f32.vlgmr.msra.gmra.mxu1 %vm257_vm0, %v7903_v1  ;;  %5370 = vmatmul.msk.f32.vlgmr.msrb.gmra.mxu2 %vm257_vm0, %v7903_v1 }
0x2d9c   :  { %4226 = vst.msk [vmem:[#allocation2 + $0x4] sm:$0x3] %vm1063_vm6, %v7903_v1  ;;  %4339 = vmatpush.msra.mxu1 %v7786_v63  ;;  %v3875_v63 = vpop.f32.mrf.mxu2 }
0x2d9e   :  { %4340 = vmatpush.msra.mxu1 %v7795_v49 }
0x2da0   :  { %4341 = vmatpush.msra.mxu1 %v7803_v60  ;;  %v4049_v60 = vperm.slane %v4046_v61, 1 }
0x2da2   :  { %4342 = vmatpush.msra.mxu1 %v7812_v38 }
0x2da4   :  { %4343 = vmatpush.msra.mxu1 %v7821_v15 }
0x2da6   :  { %4344 = vmatpush.msra.mxu1 %v7830_v48  ;;  %v3895_v48 = vpop.f32.mrf.mxu3 }
0x2da8   :  { %4345 = vmatpush.msra.mxu1 %v7839_v58 }
0x2daa   :  { %4346 = vmatpush.msra.mxu1 %v7853_v52 }
0x2e18   :  { %v4072_v55 = vpop.f32.mrf.mxu1 }
0x2e19   :  { %v4073_v49 = vadd.f32 %v4072_v55, %v4048_v57 }
0x2e1b   :  { %v4095_v28 = vadd.f32 %v4073_v49, %v3875_v63  ;;  %v4378_v49 = vrot.slane %v5364_v62, 6  ;;  %v4265_v62 = vld [vmem:[%s8373_s11 + $0xe8] sm:$0xff] }
0x2e1c   :  { %4299 = vmatpush.msra.mxu3 %v4265_v62 }
0x2e1d   :  { %v5371_v26 = vmul.f32 -1.442695, %v4095_v28  ;;  %5695 = vtanh.f32 %v4095_v28 }
0x2e1e   :  { %v4092_v38 = vpop.f32.mrf.mxu2 }
0x2e1f   :  { %5697 = vpow2.f32 %v5371_v26  ;;  %v4093_v15 = vadd.f32 %v4092_v38, %v4049_v60  ;;  %v4426_v26 = vrot.slane %v5366_v54, 2  ;;  %v4261_v54 = vld [vmem:[%s8373_s11 + $0xc8] sm:$0xff] }
0x2e20   :  { %4300 = vmatpush.msra.mxu3 %v4261_v54 }
0x2e21   :  { %v4139_v25 = vadd.f32 %v4093_v15, %v3895_v48 }
0x2e23   :  { %v5696_v58 = vpop.eup %5695  ;;  %v5373_v37 = vmul.f32 -1.442695, %v4139_v25  ;;  %5699 = vtanh.f32 %v4139_v25  ;;  %v7970_v25 = vld [vmem:[%s8373_s11 + $0xa0] sm:$0xff] }
0x2e24   :  { %4117 = vrot.lane.b32.xlu2 %v5696_v58, %s5792_s0  ;;  %v4257_v58 = vld [vmem:[%s8373_s11 + $0xa8] sm:$0xff]  ;;  %4281 = vmatpush.msra.mxu2 %v7970_v25 }
0x2e25   :  { %v5698_v52 = vpop.eup %5697  ;;  %5701 = vpow2.f32 %v5373_v37  ;;  %v7979_v37 = vld [vmem:[%s8373_s11 + $0x80] sm:$0xff]  ;;  %4301 = vmatpush.msra.mxu3 %v4257_v58 }
0x2e26   :  { %v4099_v56 = vadd.f32 1.0, %v5698_v52  ;;  %v4253_v52 = vld [vmem:[%s8373_s11 + $0x88] sm:$0xff]  ;;  %4282 = vmatpush.msra.mxu2 %v7979_v37 }
0x2e27   :  { %4302 = vmatpush.msra.mxu3 %v4253_v52 }
0x2e28   :  { %5703 = vrcp.f32 %v4099_v56  ;;  %v4111_v13 = vand.u32 2147483648, %v4099_v56  ;;  %v4109_v4 = vand.u32 2147483647, %v4099_v56  ;;  %vm4105_vm11 = vweird.f32 %v4099_v56 }
0x2e29   :  { %v5700_v21 = vpop.eup %5699 }
0x2e2a   :  { %4161 = vrot.lane.b32.xlu0 %v5700_v21, %s5792_s0  ;;  %v4112_v18 = vor.u32 1.1754944e-38, %v4111_v13  ;;  %vm4110_vm13 = vcmp.eq.f32.partialorder %v4109_v4, 8.507059e+37  ;;  %v4249_v21 = vld [vmem:[%s8373_s11 + $0x68] sm:$0xff]  ;;  %v8020_v4 = vld [vmem:[%s8373_s11] sm:$0xff] }
0x2e2b   :  { %v5702_v44 = vpop.eup %5701  ;;  %4303 = vmatpush.msra.mxu3 %v4249_v21 }
0x2e2c   :  { %v4143_v30 = vadd.f32 1.0, %v5702_v44  ;;  %v7997_v44 = vld [vmem:[%s8373_s11 + $0x40] sm:$0xff] }
0x2e2e   :  { %v5704_v32 = vpop.eup %5703  ;;  %5705 = vrcp.f32 %v4143_v30  ;;  %v4155_v9 = vand.u32 2147483648, %v4143_v30  ;;  %v4153_v20 = vand.u32 2147483647, %v4143_v30  ;;  %vm4149_vm15 = vweird.f32 %v4143_v30 }
0x2e2f   :  { %v4101_v45 = vmul.f32 %v5704_v32, %v4099_v56  ;;  %vm4106_vm9 = vweird.f32 %v5704_v32  ;;  %v7988_v56 = vld [vmem:[%s8373_s11 + $0x60] sm:$0xff] }
0x2e30   :  { %vm4107_vm12 = vmor %vm4105_vm11, %vm4106_vm9  ;;  %v4156_v59 = vor.u32 1.1754944e-38, %v4155_v9  ;;  %vm4154_vm3 = vcmp.eq.f32.partialorder %v4153_v20, 8.507059e+37  ;;  %4283 = vmatpush.msra.mxu2 %v7988_v56 }
0x2e31   :  { %v4102_v6 = vsub.f32 1.0, %v4101_v45  ;;  %v4241_v45 = vld [vmem:[%s8373_s11 + $0x28] sm:$0xff] }
0x2e32   :  { %4284 = vmatpush.msra.mxu2 %v7997_v44 }
0x2e33   :  { %v4103_v14 = vmul.f32 %v5704_v32, %v4102_v6 }
0x2e34   :  { %v5706_v19 = vpop.eup %5705 }
0x2e35   :  { %v4145_v35 = vmul.f32 %v5706_v19, %v4143_v30  ;;  %v4104_v31 = vadd.f32 %v5704_v32, %v4103_v14  ;;  %vm4150_vm14 = vweird.f32 %v5706_v19  ;;  %v4245_v30 = vld [vmem:[%s8373_s11 + $0x48] sm:$0xff] }
0x2e36   :  { %vm4151_vm2 = vmor %vm4149_vm15, %vm4150_vm14  ;;  %4304 = vmatpush.msra.mxu3 %v4245_v30 }
0x2e37   :  { %v4146_v41 = vsub.f32 1.0, %v4145_v35  ;;  %v4108_v47 = vsel %vm4107_vm12, %v5704_v32, %v4104_v31  ;;  %v8006_v32 = vld [vmem:[%s8373_s11 + $0x20] sm:$0xff] }
0x2e38   :  { %v4113_v5 = vsel %vm4110_vm13, %v4112_v18, %v4108_v47  ;;  %4285 = vmatpush.msra.mxu2 %v8006_v32  ;;  %4305 = vmatpush.msra.mxu3 %v4241_v45 }
0x2e39   :  { %v4125_v39 = vmul.f32 %v4123_v36, %v4113_v5  ;;  %v4147_v29 = vmul.f32 %v5706_v19, %v4146_v41  ;;  %v8035_v41 = vadd.f32 %v6485_v51, %v6239_v17 }
0x2e3a   :  { %4286 = vmatpush.msra.mxu2 %v8020_v4 }
0x2e3b   :  { %4127 = vrot.lane.b32.xlu1 %v4125_v39, %s5790_s29  ;;  %v4148_v0 = vadd.f32 %v5706_v19, %v4147_v29 }
0x2e3d   :  { %v4152_v46 = vsel %vm4151_vm2, %v5706_v19, %v4148_v0  ;;  %v4237_v19 = vld [vmem:[%s8373_s11 + $0x8] sm:$0xff] }
0x2e3e   :  { %v4157_v42 = vsel %vm4154_vm3, %v4156_v59, %v4152_v46  ;;  %4306 = vmatpush.msra.mxu3 %v4237_v19 }
0x2e3f   :  { %v4169_v23 = vmul.f32 %v4167_v2, %v4157_v42 }
0x2e41   :  { %4171 = vrot.lane.b32.xlu2 %v4169_v23, %s5790_s29 }
0x2e7e   :  { %v4118_v27 = vpop.permute.xlu2 %4117 }
0x2e7f   :  { %v4120_v3 = vmul.f32 %v4118_v27, %v4113_v5 }
0x2e9b   :  { %v4172_v50 = vpop.permute.xlu2 %4171 }
0x2e9c   :  { %v4162_v34 = vpop.permute.xlu0 %4161 }
0x2e9d   :  { %v4164_v7 = vmul.f32 %v4162_v34, %v4157_v42 }
0x2e9f   :  { %v7928_v24 = vadd.f32 %v4172_v50, %v4164_v7 }
0x2ea1   :  { %v5374_v11 = vclamps-f32 %v7928_v24, 3.0  ;;  %v4457_v24 = vld [vmem:[%s8374_s12 + $0x18] sm:$0xff] }
0x2ea3   :  { %5707 = vtanh.f32 %v5374_v11 }
0x2ea9   :  { %v5708_v53 = vpop.eup %5707 }
0x2eaa   :  { %4179 = vrot.lane.b32.xlu1 %v5708_v53, %s5790_s29 }
0x2ead   :  { %v4128_v43 = vpop.permute.xlu1 %4127 }
0x2eae   :  { %v7934_v22 = vadd.f32 %v4128_v43, %v4120_v3 }
0x2eb0   :  { %v5372_v61 = vclamps-f32 %v7934_v22, 3.0  ;;  %v4460_v22 = vld [vmem:[%s8374_s12 + $0x30] sm:$0xff] }
0x2eb2   :  { %5709 = vtanh.f32 %v5372_v61 }
0x2eb8   :  { %v5710_v57 = vpop.eup %5709 }
0x2eb9   :  { %4135 = vrot.lane.b32.xlu0 %v5710_v57, %s5790_s29 }
0x2f1c   :  { %v4180_v63 = vpop.permute.xlu1 %4179 }
0x2f1d   :  { %v4182_v55 = vmul.f32 %v4180_v63, %v4157_v42 }
0x2f1f   :  { %4188 = vrot.lane.b32.xlu0 %v4182_v55, %s5792_s0 }
0x2f27   :  { %4379 = vrot.lane.b32.xlu0 %v4378_v49, %s5791_s30 }
0x2f2b   :  { %v4136_v28 = vpop.permute.xlu0 %4135 }
0x2f2c   :  { %v4138_v60 = vmul.f32 %v4136_v28, %v4113_v5 }
0x2f2e   :  { %4184 = vrot.lane.b32.xlu2 %v4138_v60, %s5791_s30 }
0x2f36   :  { %4427 = vrot.lane.b32.xlu2 %v4426_v26, %s5791_s30 }
0x2f88   :  { %v4185_v38 = vpop.permute.xlu2 %4184 }
0x2f91   :  { %v4189_v15 = vpop.permute.xlu0 %4188 }
0x2f92   :  { %v4191_v48 = vsel %vm257_vm0, %v4185_v38, %v4189_v15 }
0x2f93   :  { %5375 = vmatmul.msk.f32.vlgmr.msrb.gmra.mxu1 %vm672_vm4, %v4191_v48 }
0x2f94   :  { %4748 = vmatpush.msrb.mxu1 %v4265_v62 }
0x2f96   :  { %4749 = vmatpush.msrb.mxu1 %v4261_v54  ;;  %v4428_v54 = vpop.permute.xlu2 %4427 }
0x2f98   :  { %4750 = vmatpush.msrb.mxu1 %v4257_v58 }
0x2f99   :  { %v4380_v26 = vpop.permute.xlu0 %4379 }
0x2f9a   :  { %4751 = vmatpush.msrb.mxu1 %v4253_v52 }
0x2f9c   :  { %4752 = vmatpush.msrb.mxu1 %v4249_v21 }
0x2f9e   :  { %4753 = vmatpush.msrb.mxu1 %v4245_v30 }
0x2fa0   :  { %4754 = vmatpush.msrb.mxu1 %v4241_v45 }
0x2fa2   :  { %4755 = vmatpush.msrb.mxu1 %v4237_v19 }
0x3010   :  { %v4220_v6 = vpop.f32.mrf.mxu1 }
0x3011   :  { %v5376_v13 = vclamps-f32 %v4220_v6, 3.0 }
0x3013   :  { %v4227_v14 = vadd.f32 %v5376_v13, %v7903_v1  ;;  %4231 = vrot.lane.b32.xlu1 %v5376_v13, %s5791_s30 }
0x3015   :  { %4228 = vst.msk [vmem:[#allocation3 + $0xe] sm:$0x3] %vm1061_vm5, %v4227_v14 }
0x3016   :  { %4229 = vst.msk [vmem:[#allocation3 + $0x4] sm:$0x3] %vm1063_vm6, %v4227_v14 }
0x3085   :  { %v4232_v35 = vpop.permute.xlu1 %4231 }
0x3086   :  { %v4234_v31 = vsel %vm257_vm0, %v7903_v1, %v4232_v35 }
0x3087   :  { %v4235_v18 = vsel %vm1073_vm1, %v4234_v31, %v4232_v35 }
0x3088   :  { %5377 = vmatmul.msk.f32.vlgmr.msra.gmra.mxu2 %vm672_vm4, %v4235_v18  ;;  %5378 = vmatmul.msk.f32.vlgmr.msra.gmra.mxu3 %vm672_vm4, %v4235_v18 }
0x3089   :  { %5379 = vmatmul.msk.f32.vlgmr.msra.gmra.mxu0 %vm672_vm4, %v4235_v18  ;;  %5380 = vmatmul.msk.f32.vlgmr.msra.gmra.mxu1 %vm672_vm4, %v4235_v18 }
0x310b   :  { %v4288_v47 = vpop.f32.mrf.mxu2  ;;  %v4308_v36 = vpop.f32.mrf.mxu3 }
0x310c   :  { %v4351_v5 = vadd.f32 %v4288_v47, %v8035_v41  ;;  %v4397_v9 = vrot.slane %v4308_v36, 6 }
0x310e   :  { %v5381_v1 = vmul.f32 -1.442695, %v4351_v5  ;;  %5711 = vtanh.f32 %v4351_v5  ;;  %v4399_v39 = vadd.f32 %v4397_v9, %v6237_v16 }
0x3110   :  { %5713 = vpow2.f32 %v5381_v1  ;;  %v5383_v29 = vmul.f32 -1.442695, %v4399_v39 }
0x3111   :  { %5715 = vtanh.f32 %v4399_v39 }
0x3112   :  { %5717 = vpow2.f32 %v5383_v29 }
0x3114   :  { %v5712_v20 = vpop.eup %5711 }
0x3115   :  { %4373 = vrot.lane.b32.xlu2 %v5712_v20, %s5792_s0  ;;  %v4461_v20 = vld [vmem:[%s8374_s12 + $0x38] sm:$0xff] }
0x3116   :  { %v5714_v0 = vpop.eup %5713  ;;  %4473 = vmatpush.msrb.mxu2 %v4461_v20 }
0x3117   :  { %v5716_v59 = vpop.eup %5715  ;;  %v4355_v17 = vadd.f32 1.0, %v5714_v0  ;;  %v4458_v0 = vld [vmem:[%s8374_s12 + $0x20] sm:$0xff] }
0x3118   :  { %v5718_v51 = vpop.eup %5717  ;;  %4421 = vrot.lane.b32.xlu1 %v5716_v59, %s5792_s0  ;;  %4474 = vmatpush.msrb.mxu2 %v4460_v22  ;;  %v4455_v59 = vld [vmem:[%s8374_s12 + $0x8] sm:$0xff] }
0x3119   :  { %5719 = vrcp.f32 %v4355_v17  ;;  %v4403_v46 = vadd.f32 1.0, %v5718_v51  ;;  %v4367_v7 = vand.u32 2147483648, %v4355_v17  ;;  %v4365_v3 = vand.u32 2147483647, %v4355_v17  ;;  %v4493_v51 = vld [vmem:[%s8375_s13 + $0x30] sm:$0xff] }
0x311a   :  { %vm4361_vm8 = vweird.f32 %v4355_v17  ;;  %4516 = vmatpush.msrb.mxu3 %v4493_v51  ;;  %4966 = vmatpush.msra.mxu1 %v4493_v51 }
0x311b   :  { %5721 = vrcp.f32 %v4403_v46  ;;  %v4415_v43 = vand.u32 2147483648, %v4403_v46  ;;  %v4413_v55 = vand.u32 2147483647, %v4403_v46  ;;  %v4368_v49 = vor.u32 1.1754944e-38, %v4367_v7 }
0x311c   :  { %vm4366_vm12 = vcmp.eq.f32.partialorder %v4365_v3, 8.507059e+37  ;;  %vm4409_vm13 = vweird.f32 %v4403_v46  ;;  %v8122_v3 = vld [vmem:[%s8375_s13 + $0x8] sm:$0xff] }
0x311d   :  { %v4416_v15 = vor.u32 1.1754944e-38, %v4415_v43  ;;  %vm4414_vm15 = vcmp.eq.f32.partialorder %v4413_v55, 8.507059e+37 }
0x311f   :  { %v5720_v2 = vpop.eup %5719 }
0x3120   :  { %v4357_v42 = vmul.f32 %v5720_v2, %v4355_v17  ;;  %vm4362_vm7 = vweird.f32 %v5720_v2  ;;  %v4454_v17 = vld [vmem:[%s8374_s12] sm:$0xff] }
0x3121   :  { %v5722_v23 = vpop.eup %5721  ;;  %vm4363_vm11 = vmor %vm4361_vm8, %vm4362_vm7 }
0x3122   :  { %v4358_v27 = vsub.f32 1.0, %v4357_v42  ;;  %v4405_v34 = vmul.f32 %v5722_v23, %v4403_v46  ;;  %vm4410_vm9 = vweird.f32 %v5722_v23  ;;  %v8093_v46 = vld [vmem:[%s8375_s13 + $0x38] sm:$0xff]  ;;  %v8102_v42 = vld [vmem:[%s8375_s13 + $0x28] sm:$0xff] }
0x3123   :  { %vm4411_vm14 = vmor %vm4409_vm13, %vm4410_vm9  ;;  %4536 = vmatpush.msrb.mxu0 %v8093_v46 }
0x3124   :  { %v4406_v50 = vsub.f32 1.0, %v4405_v34  ;;  %v4359_v53 = vmul.f32 %v5720_v2, %v4358_v27 }
0x3125   :  { %4537 = vmatpush.msrb.mxu0 %v8102_v42 }
0x3126   :  { %v4360_v57 = vadd.f32 %v5720_v2, %v4359_v53  ;;  %v4407_v63 = vmul.f32 %v5722_v23, %v4406_v50  ;;  %v8113_v50 = vld [vmem:[%s8375_s13 + $0x18] sm:$0xff]  ;;  %v4487_v53 = vld [vmem:[%s8375_s13] sm:$0xff] }
0x3127   :  { %4538 = vmatpush.msrb.mxu0 %v8113_v50 }
0x3128   :  { %v4364_v28 = vsel %vm4363_vm11, %v5720_v2, %v4360_v57  ;;  %v4408_v60 = vadd.f32 %v5722_v23, %v4407_v63  ;;  %v4491_v2 = vld [vmem:[%s8375_s13 + $0x20] sm:$0xff] }
0x3129   :  { %v4369_v38 = vsel %vm4366_vm12, %v4368_v49, %v4364_v28  ;;  %4517 = vmatpush.msrb.mxu3 %v4491_v2  ;;  %4967 = vmatpush.msra.mxu1 %v4491_v2 }
0x312a   :  { %v4382_v48 = vmul.f32 %v4380_v26, %v4369_v38  ;;  %v4412_v62 = vsel %vm4411_vm14, %v5722_v23, %v4408_v60  ;;  %v4489_v23 = vld [vmem:[%s8375_s13 + $0x10] sm:$0xff]  ;;  %4539 = vmatpush.msrb.mxu0 %v8122_v3 }
0x312b   :  { %v4417_v58 = vsel %vm4414_vm15, %v4416_v15, %v4412_v62  ;;  %4518 = vmatpush.msrb.mxu3 %v4489_v23  ;;  %4968 = vmatpush.msra.mxu1 %v4489_v23 }
0x312c   :  { %4384 = vrot.lane.b32.xlu1 %v4382_v48, %s5790_s29  ;;  %v4430_v52 = vmul.f32 %v4428_v54, %v4417_v58  ;;  %4728 = vmatpush.msra.mxu0 %v7953_v40  ;;  %v4328_v40 = vpop.f32.mrf.mxu0 }
0x312d   :  { %4519 = vmatpush.msrb.mxu3 %v4487_v53  ;;  %4969 = vmatpush.msra.mxu1 %v4487_v53 }
0x312e   :  { %4432 = vrot.lane.b32.xlu0 %v4430_v52, %s5790_s29  ;;  %4729 = vmatpush.msra.mxu0 %v7961_v33  ;;  %v4495_v33 = vld [vmem:[%s8376_s14] sm:$0x3] }
0x3130   :  { %4730 = vmatpush.msra.mxu0 %v7970_v25  ;;  %v4498_v25 = vperm.slane %v4495_v33, 1 }
0x3132   :  { %4731 = vmatpush.msra.mxu0 %v7979_v37 }
0x3134   :  { %4732 = vmatpush.msra.mxu0 %v7988_v56 }
0x3136   :  { %4733 = vmatpush.msra.mxu0 %v7997_v44  ;;  %v4348_v44 = vpop.f32.mrf.mxu1 }
0x3138   :  { %4734 = vmatpush.msra.mxu0 %v8006_v32 }
0x313a   :  { %4735 = vmatpush.msra.mxu0 %v8020_v4  ;;  %v4497_v4 = vperm.slane %v4495_v33, 0 }
0x316f   :  { %v4374_v30 = vpop.permute.xlu2 %4373 }
0x3170   :  { %v4376_v45 = vmul.f32 %v4374_v30, %v4369_v38 }
0x318a   :  { %v4422_v21 = vpop.permute.xlu1 %4421 }
0x318b   :  { %v4424_v13 = vmul.f32 %v4422_v21, %v4417_v58 }
0x319e   :  { %v4385_v6 = vpop.permute.xlu1 %4384 }
0x319f   :  { %v8043_v14 = vadd.f32 %v4385_v6, %v4376_v45 }
0x31a0   :  { %v4433_v19 = vpop.permute.xlu0 %4432 }
0x31a1   :  { %v5382_v35 = vclamps-f32 %v8043_v14, 3.0  ;;  %v8046_v31 = vadd.f32 %v4433_v19, %v4424_v13  ;;  %v8198_v14 = vld [vmem:[%s8377_s15 + $0x10] sm:$0xff] }
0x31a3   :  { %5723 = vtanh.f32 %v5382_v35  ;;  %v5384_v18 = vclamps-f32 %v8046_v31, 3.0  ;;  %v4715_v31 = vld [vmem:[%s8373_s11 + $0xf0] sm:$0xff] }
0x31a5   :  { %5725 = vtanh.f32 %v5384_v18 }
0x31a9   :  { %v5724_v47 = vpop.eup %5723 }
0x31aa   :  { %4392 = vrot.lane.b32.xlu0 %v5724_v47, %s5790_s29 }
0x31ab   :  { %v5726_v36 = vpop.eup %5725 }
0x31ac   :  { %4440 = vrot.lane.b32.xlu2 %v5726_v36, %s5790_s29 }
0x31b2   :  { %4571 = vrot.lane.b32.xlu0 %v5372_v61, %s5791_s30  ;;  %v4459_v61 = vld [vmem:[%s8374_s12 + $0x28] sm:$0xff] }
0x31b3   :  { %4475 = vmatpush.msrb.mxu2 %v4459_v61 }
0x31b5   :  { %4476 = vmatpush.msrb.mxu2 %v4458_v0 }
0x31b7   :  { %4477 = vmatpush.msrb.mxu2 %v4457_v24 }
0x3206   :  { %v4441_v5 = vpop.permute.xlu2 %4440 }
0x3207   :  { %v4443_v9 = vmul.f32 %v4441_v5, %v4417_v58 }
0x3209   :  { %v4449_v1 = vrot.slane %v4443_v9, 2 }
0x320b   :  { %4450 = vrot.lane.b32.xlu2 %v4449_v1, %s5792_s0 }
0x321c   :  { %v4393_v39 = vpop.permute.xlu0 %4392 }
0x321d   :  { %v4395_v29 = vmul.f32 %v4393_v39, %v4369_v38 }
0x321f   :  { %4445 = vrot.lane.b32.xlu1 %v4395_v29, %s5791_s30 }
0x3227   :  { %4615 = vrot.lane.b32.xlu1 %v5374_v11, %s5791_s30  ;;  %v4456_v11 = vld [vmem:[%s8374_s12 + $0x10] sm:$0xff] }
0x3228   :  { %4478 = vmatpush.msrb.mxu2 %v4456_v11 }
0x322a   :  { %4479 = vmatpush.msrb.mxu2 %v4455_v59 }
0x322c   :  { %4480 = vmatpush.msrb.mxu2 %v4454_v17 }
0x322e   :  { %4768 = vmatpush.msra.mxu2 %v4715_v31 }
0x3265   :  { %v4451_v27 = vpop.permute.xlu2 %4450 }
0x3291   :  { %v4446_v34 = vpop.permute.xlu1 %4445 }
0x3292   :  { %v4453_v7 = vsel %vm257_vm0, %v4446_v34, %v4451_v27 }
0x3293   :  { %5385 = vmatmul.msk.f32.vlgmr.msrb.gmra.mxu2 %vm672_vm4, %v4453_v7 }
0x3299   :  { %v4616_v1 = vpop.permute.xlu1 %4615 }
0x3316   :  { %v4482_v43 = vpop.f32.mrf.mxu2 }
0x3317   :  { %v8133_v57 = vclamps-f32 %v4482_v43, 3.0 }
0x3319   :  { %4674 = vst.msk [vmem:[#allocation2 + $0x10] sm:$0x3] %vm1061_vm5, %v8133_v57  ;;  %5387 = vmatmul.msk.f32.vlgmr.msrb.gmra.mxu3 %vm257_vm0, %v8133_v57  ;;  %5388 = vmatmul.msk.f32.vlgmr.msrb.gmra.mxu0 %vm257_vm0, %v8133_v57 }
0x331a   :  { %4675 = vst.msk [vmem:[#allocation2 + $0x2] sm:$0x3] %vm1063_vm6, %v8133_v57  ;;  %4923 = vmatpush.msrb.mxu0 %v4461_v20 }
0x331c   :  { %4924 = vmatpush.msrb.mxu0 %v4460_v22 }
0x331e   :  { %4925 = vmatpush.msrb.mxu0 %v4459_v61 }
0x3320   :  { %4926 = vmatpush.msrb.mxu0 %v4458_v0 }
0x3322   :  { %4927 = vmatpush.msrb.mxu0 %v4457_v24 }
0x3324   :  { %4928 = vmatpush.msrb.mxu0 %v4456_v11 }
0x3326   :  { %4929 = vmatpush.msrb.mxu0 %v4455_v59  ;;  %v4572_v59 = vpop.permute.xlu0 %4571 }
0x3328   :  { %4930 = vmatpush.msrb.mxu0 %v4454_v17 }
0x3396   :  { %v4541_v37 = vpop.f32.mrf.mxu0 }
0x3397   :  { %v4542_v56 = vadd.f32 %v4541_v37, %v4498_v25 }
0x3399   :  { %v4588_v32 = vadd.f32 %v4542_v56, %v4348_v44 }
0x339b   :  { %v5391_v63 = vmul.f32 -1.442695, %v4588_v32  ;;  %5727 = vtanh.f32 %v4588_v32 }
0x339c   :  { %v4521_v55 = vpop.f32.mrf.mxu3 }
0x339d   :  { %5729 = vpow2.f32 %v5391_v63  ;;  %v4522_v49 = vadd.f32 %v4521_v55, %v4497_v4  ;;  %v8166_v4 = vld [vmem:[%s8377_s15 + $0x38] sm:$0xff]  ;;  %v8171_v63 = vld [vmem:[%s8377_s15 + $0x30] sm:$0xff]  ;;  %v8177_v55 = vld [vmem:[%s8377_s15 + $0x28] sm:$0xff] }
0x339e   :  { %4660 = vmatpush.msra.mxu3 %v8166_v4 }
0x339f   :  { %v4544_v28 = vadd.f32 %v4522_v49, %v4328_v40  ;;  %v4830_v49 = vrot.slane %v5382_v35, 6 }
0x33a0   :  { %4661 = vmatpush.msra.mxu3 %v8171_v63 }
0x33a1   :  { %v5728_v60 = vpop.eup %5727  ;;  %v5389_v26 = vmul.f32 -1.442695, %v4544_v28  ;;  %5731 = vtanh.f32 %v4544_v28  ;;  %v8185_v28 = vld [vmem:[%s8377_s15 + $0x20] sm:$0xff] }
0x33a2   :  { %4610 = vrot.lane.b32.xlu0 %v5728_v60, %s5792_s0  ;;  %4662 = vmatpush.msra.mxu3 %v8177_v55  ;;  %v8192_v60 = vld [vmem:[%s8377_s15 + $0x18] sm:$0xff] }
0x33a3   :  { %v5730_v38 = vpop.eup %5729  ;;  %5733 = vpow2.f32 %v5389_v26 }
0x33a4   :  { %v4592_v15 = vadd.f32 1.0, %v5730_v38  ;;  %4663 = vmatpush.msra.mxu3 %v8185_v28  ;;  %v4875_v38 = vrot.slane %v5384_v18, 2  ;;  %v4716_v18 = vld [vmem:[%s8373_s11 + $0xf8] sm:$0xff] }
0x33a6   :  { %5735 = vrcp.f32 %v4592_v15  ;;  %v4604_v30 = vand.u32 2147483648, %v4592_v15  ;;  %v4602_v6 = vand.u32 2147483647, %v4592_v15  ;;  %vm4598_vm3 = vweird.f32 %v4592_v15  ;;  %4664 = vmatpush.msra.mxu3 %v8192_v60 }
0x33a7   :  { %v5732_v48 = vpop.eup %5731 }
0x33a8   :  { %4566 = vrot.lane.b32.xlu2 %v5732_v48, %s5792_s0  ;;  %v4605_v36 = vor.u32 1.1754944e-38, %v4604_v30  ;;  %vm4603_vm8 = vcmp.eq.f32.partialorder %v4602_v6, 8.507059e+37  ;;  %4665 = vmatpush.msra.mxu3 %v8198_v14  ;;  %v4641_v48 = vld [vmem:[%s8377_s15] sm:$0xff]  ;;  %v4707_v30 = vld [vmem:[%s8373_s11 + $0xb0] sm:$0xff] }
0x33a9   :  { %v5734_v62 = vpop.eup %5733  ;;  %v4703_v6 = vld [vmem:[%s8373_s11 + $0x90] sm:$0xff] }
0x33aa   :  { %v4548_v54 = vadd.f32 1.0, %v5734_v62 }
0x33ac   :  { %v5736_v58 = vpop.eup %5735  ;;  %5737 = vrcp.f32 %v4548_v54  ;;  %v4560_v29 = vand.u32 2147483648, %v4548_v54  ;;  %v4558_v61 = vand.u32 2147483647, %v4548_v54  ;;  %vm4554_vm11 = vweird.f32 %v4548_v54 }
0x33ad   :  { %v4594_v52 = vmul.f32 %v5736_v58, %v4592_v15  ;;  %vm4599_vm2 = vweird.f32 %v5736_v58  ;;  %v4642_v15 = vld [vmem:[%s8377_s15 + $0x8] sm:$0xff] }
0x33ae   :  { %vm4600_vm7 = vmor %vm4598_vm3, %vm4599_vm2  ;;  %v4561_v24 = vor.u32 1.1754944e-38, %v4560_v29  ;;  %vm4559_vm13 = vcmp.eq.f32.partialorder %v4558_v61, 8.507059e+37  ;;  %4666 = vmatpush.msra.mxu3 %v4642_v15  ;;  %v4688_v61 = vld [vmem:[%s8373_s11 + $0x18] sm:$0xff] }
0x33af   :  { %v4595_v21 = vsub.f32 1.0, %v4594_v52  ;;  %v4711_v52 = vld [vmem:[%s8373_s11 + $0xd0] sm:$0xff] }
0x33b0   :  { %4667 = vmatpush.msra.mxu3 %v4641_v48  ;;  %4769 = vmatpush.msra.mxu2 %v4711_v52 }
0x33b1   :  { %v4596_v45 = vmul.f32 %v5736_v58, %v4595_v21  ;;  %v4712_v21 = vld [vmem:[%s8373_s11 + $0xd8] sm:$0xff] }
0x33b2   :  { %v5738_v13 = vpop.eup %5737  ;;  %4788 = vmatpush.msrb.mxu3 %v4716_v18  ;;  %4770 = vmatpush.msra.mxu2 %v4707_v30 }
0x33b3   :  { %v4550_v19 = vmul.f32 %v5738_v13, %v4548_v54  ;;  %v4597_v47 = vadd.f32 %v5736_v58, %v4596_v45  ;;  %vm4555_vm9 = vweird.f32 %v5738_v13  ;;  %v4708_v45 = vld [vmem:[%s8373_s11 + $0xb8] sm:$0xff] }
0x33b4   :  { %vm4556_vm12 = vmor %vm4554_vm11, %vm4555_vm9  ;;  %4789 = vmatpush.msrb.mxu3 %v4712_v21  ;;  %4771 = vmatpush.msra.mxu2 %v4703_v6 }
0x33b5   :  { %v4551_v5 = vsub.f32 1.0, %v4550_v19  ;;  %v4601_v9 = vsel %vm4600_vm7, %v5736_v58, %v4597_v47  ;;  %v4699_v19 = vld [vmem:[%s8373_s11 + $0x70] sm:$0xff]  ;;  %v4700_v47 = vld [vmem:[%s8373_s11 + $0x78] sm:$0xff] }
0x33b6   :  { %v4606_v39 = vsel %vm4603_vm8, %v4605_v36, %v4601_v9  ;;  %4790 = vmatpush.msrb.mxu3 %v4708_v45  ;;  %v4695_v36 = vld [vmem:[%s8373_s11 + $0x50] sm:$0xff]  ;;  %4772 = vmatpush.msra.mxu2 %v4699_v19 }
0x33b7   :  { %v4618_v20 = vmul.f32 %v4616_v1, %v4606_v39  ;;  %v4552_v22 = vmul.f32 %v5738_v13, %v4551_v5  ;;  %v4696_v5 = vld [vmem:[%s8373_s11 + $0x58] sm:$0xff]  ;;  %v4691_v9 = vld [vmem:[%s8373_s11 + $0x30] sm:$0xff] }
0x33b8   :  { %v4692_v1 = vld [vmem:[%s8373_s11 + $0x38] sm:$0xff]  ;;  %4773 = vmatpush.msra.mxu2 %v4695_v36 }
0x33b9   :  { %4620 = vrot.lane.b32.xlu2 %v4618_v20, %s5790_s29  ;;  %v4553_v0 = vadd.f32 %v5738_v13, %v4552_v22  ;;  %v4687_v22 = vld [vmem:[%s8373_s11 + $0x10] sm:$0xff] }
0x33ba   :  { %4774 = vmatpush.msra.mxu2 %v4691_v9 }
0x33bb   :  { %v4557_v11 = vsel %vm4556_vm12, %v5738_v13, %v4553_v0  ;;  %v4704_v13 = vld [vmem:[%s8373_s11 + $0x98] sm:$0xff] }
0x33bc   :  { %v4562_v17 = vsel %vm4559_vm13, %v4561_v24, %v4557_v11  ;;  %4791 = vmatpush.msrb.mxu3 %v4704_v13  ;;  %4775 = vmatpush.msra.mxu2 %v4687_v22 }
0x33bd   :  { %v4574_v51 = vmul.f32 %v4572_v59, %v4562_v17 }
0x33be   :  { %4792 = vmatpush.msrb.mxu3 %v4700_v47  ;;  %4986 = vmatpush.msrb.mxu2 %v8093_v46 }
0x33bf   :  { %4576 = vrot.lane.b32.xlu1 %v4574_v51, %s5790_s29 }
0x33c0   :  { %4793 = vmatpush.msrb.mxu3 %v4696_v5  ;;  %4987 = vmatpush.msrb.mxu2 %v8102_v42 }
0x33c2   :  { %4794 = vmatpush.msrb.mxu3 %v4692_v1  ;;  %4988 = vmatpush.msrb.mxu2 %v8113_v50 }
0x33c4   :  { %4795 = vmatpush.msrb.mxu3 %v4688_v61  ;;  %4989 = vmatpush.msrb.mxu2 %v8122_v3 }
0x3402   :  { %v4567_v2 = vpop.permute.xlu2 %4566 }
0x3403   :  { %v4569_v40 = vmul.f32 %v4567_v2, %v4562_v17 }
0x3413   :  { %v4621_v34 = vpop.permute.xlu2 %4620 }
0x3414   :  { %v4611_v23 = vpop.permute.xlu0 %4610 }
0x3415   :  { %v4613_v27 = vmul.f32 %v4611_v23, %v4606_v39 }
0x3417   :  { %v8150_v7 = vadd.f32 %v4621_v34, %v4613_v27 }
0x3419   :  { %v5392_v53 = vclamps-f32 %v8150_v7, 3.0  ;;  %v4945_v7 = vld [vmem:[%s8376_s14] sm:$0x3]  ;;  %s5794_s14 = smov 16  }
0x341b   :  { %5739 = vtanh.f32 %v5392_v53 }
0x3421   :  { %v5740_v43 = vpop.eup %5739 }
0x3422   :  { %4628 = vrot.lane.b32.xlu1 %v5740_v43, %s5790_s29 }
0x3431   :  { %v4577_v33 = vpop.permute.xlu1 %4576 }
0x3432   :  { %v8156_v25 = vadd.f32 %v4577_v33, %v4569_v40 }
0x3434   :  { %v5390_v37 = vclamps-f32 %v8156_v25, 3.0 }
0x3436   :  { %5741 = vtanh.f32 %v5390_v37 }
0x343c   :  { %v5742_v56 = vpop.eup %5741 }
0x343d   :  { %4584 = vrot.lane.b32.xlu0 %v5742_v56, %s5790_s29 }
0x3494   :  { %v4629_v44 = vpop.permute.xlu1 %4628 }
0x3495   :  { %v4631_v32 = vmul.f32 %v4629_v44, %v4606_v39 }
0x3497   :  { %4637 = vrot.lane.b32.xlu0 %v4631_v32, %s5792_s0 }
0x349f   :  { %4831 = vrot.lane.b32.xlu0 %v4830_v49, %s5791_s30 }
0x34af   :  { %v4585_v35 = vpop.permute.xlu0 %4584 }
0x34b0   :  { %v4587_v26 = vmul.f32 %v4585_v35, %v4562_v17 }
0x34b2   :  { %4633 = vrot.lane.b32.xlu2 %v4587_v26, %s5791_s30 }
0x34ba   :  { %4876 = vrot.lane.b32.xlu2 %v4875_v38, %s5791_s30 }
0x3509   :  { %v4638_v62 = vpop.permute.xlu0 %4637 }
0x350c   :  { %v4634_v54 = vpop.permute.xlu2 %4633 }
0x350d   :  { %v4640_v58 = vsel %vm257_vm0, %v4634_v54, %v4638_v62 }
0x350e   :  { %5393 = vmatmul.msk.f32.vlgmr.msra.gmra.mxu3 %vm672_vm4, %v4640_v58 }
0x3511   :  { %v4832_v54 = vpop.permute.xlu0 %4831 }
0x3591   :  { %v4669_v39 = vpop.f32.mrf.mxu3 }
0x3592   :  { %v5394_v29 = vclamps-f32 %v4669_v39, 3.0 }
0x3594   :  { %v4676_v20 = vadd.f32 %v5394_v29, %v8133_v57  ;;  %4680 = vrot.lane.b32.xlu1 %v5394_v29, %s5791_s30 }
0x3596   :  { %4677 = vst.msk [vmem:[#allocation3 + $0x10] sm:$0x3] %vm1061_vm5, %v4676_v20 }
0x3597   :  { %4678 = vst.msk [vmem:[#allocation3 + $0x2] sm:$0x3] %vm1063_vm6, %v4676_v20 }
0x3606   :  { %v4681_v0 = vpop.permute.xlu1 %4680 }
0x3607   :  { %v4683_v24 = vsel %vm257_vm0, %v8133_v57, %v4681_v0 }
0x3608   :  { %v4684_v11 = vsel %vm1073_vm1, %v4683_v24, %v4681_v0 }
0x3609   :  { %5395 = vmatmul.msk.f32.vlgmr.msra.gmra.mxu0 %vm672_vm4, %v4684_v11  ;;  %5396 = vmatmul.msk.f32.vlgmr.msrb.gmra.mxu1 %vm672_vm4, %v4684_v11 }
0x360a   :  { %5397 = vmatmul.msk.f32.vlgmr.msra.gmra.mxu2 %vm672_vm4, %v4684_v11  ;;  %5398 = vmatmul.msk.f32.vlgmr.msrb.gmra.mxu3 %vm672_vm4, %v4684_v11 }
0x360b   :  { %5110 = vmatpush.msrb.mxu1 %v8166_v4 }
0x360d   :  { %5111 = vmatpush.msrb.mxu1 %v8171_v63 }
0x360f   :  { %5112 = vmatpush.msrb.mxu1 %v8177_v55 }
0x3611   :  { %5113 = vmatpush.msrb.mxu1 %v8185_v28 }
0x3613   :  { %5114 = vmatpush.msrb.mxu1 %v8192_v60 }
0x3615   :  { %5115 = vmatpush.msrb.mxu1 %v8198_v14 }
0x3617   :  { %5116 = vmatpush.msrb.mxu1 %v4642_v15  ;;  %v4877_v15 = vpop.permute.xlu2 %4876 }
0x3619   :  { %5117 = vmatpush.msrb.mxu1 %v4641_v48 }
0x3686   :  { %v4737_v46 = vpop.f32.mrf.mxu0  ;;  %v4757_v42 = vpop.f32.mrf.mxu1 }
0x3687   :  { %v4801_v50 = vrot.slane %v4737_v46, 6  ;;  %v4848_v3 = vadd.f32 %v4757_v42, %v6237_v16 }
0x3689   :  { %v4803_v57 = vadd.f32 %v4801_v50, %v8035_v41  ;;  %v5401_v59 = vmul.f32 -1.442695, %v4848_v3  ;;  %5743 = vtanh.f32 %v4848_v3 }
0x368b   :  { %v5399_v17 = vmul.f32 -1.442695, %v4803_v57  ;;  %5745 = vtanh.f32 %v4803_v57 }
0x368c   :  { %5747 = vpow2.f32 %v5401_v59  ;;  %v4948_v59 = vperm.slane %v4945_v7, 1 }
0x368d   :  { %5749 = vpow2.f32 %v5399_v17  ;;  %v4777_v42 = vpop.f32.mrf.mxu2 }
0x368f   :  { %v5744_v51 = vpop.eup %5743 }
0x3690   :  { %4870 = vrot.lane.b32.xlu1 %v5744_v51, %s5792_s0 }
0x3691   :  { %v5746_v2 = vpop.eup %5745 }
0x3692   :  { %v5748_v23 = vpop.eup %5747  ;;  %4825 = vrot.lane.b32.xlu2 %v5746_v2, %s5792_s0 }
0x3693   :  { %v5750_v27 = vpop.eup %5749  ;;  %v4852_v34 = vadd.f32 1.0, %v5748_v23  ;;  %v4797_v23 = vpop.f32.mrf.mxu3 }
0x3694   :  { %v4807_v43 = vadd.f32 1.0, %v5750_v27 }
0x3695   :  { %5751 = vrcp.f32 %v4852_v34  ;;  %v4864_v32 = vand.u32 2147483648, %v4852_v34  ;;  %v4862_v63 = vand.u32 2147483647, %v4852_v34  ;;  %vm4858_vm15 = vweird.f32 %v4852_v34 }
0x3696   :  { %5753 = vrcp.f32 %v4807_v43  ;;  %v4819_v55 = vand.u32 2147483648, %v4807_v43  ;;  %v4817_v28 = vand.u32 2147483647, %v4807_v43  ;;  %vm4813_vm3 = vweird.f32 %v4807_v43 }
0x3697   :  { %v4865_v14 = vor.u32 1.1754944e-38, %v4864_v32  ;;  %vm4863_vm7 = vcmp.eq.f32.partialorder %v4862_v63, 8.507059e+37 }
0x3698   :  { %v4820_v38 = vor.u32 1.1754944e-38, %v4819_v55  ;;  %vm4818_vm9 = vcmp.eq.f32.partialorder %v4817_v28, 8.507059e+37 }
0x369b   :  { %v5752_v16 = vpop.eup %5751 }
0x369c   :  { %v5754_v41 = vpop.eup %5753  ;;  %v4854_v40 = vmul.f32 %v5752_v16, %v4852_v34  ;;  %vm4859_vm1 = vweird.f32 %v5752_v16 }
0x369d   :  { %v4809_v33 = vmul.f32 %v5754_v41, %v4807_v43  ;;  %vm4814_vm14 = vweird.f32 %v5754_v41  ;;  %vm4860_vm2 = vmor %vm4858_vm15, %vm4859_vm1 }
0x369e   :  { %v4855_v56 = vsub.f32 1.0, %v4854_v40  ;;  %vm4815_vm8 = vmor %vm4813_vm3, %vm4814_vm14 }
0x369f   :  { %v4810_v44 = vsub.f32 1.0, %v4809_v33 }
0x36a0   :  { %v4856_v4 = vmul.f32 %v5752_v16, %v4855_v56 }
0x36a1   :  { %v4811_v49 = vmul.f32 %v5754_v41, %v4810_v44 }
0x36a2   :  { %v4857_v60 = vadd.f32 %v5752_v16, %v4856_v4 }
0x36a3   :  { %v4812_v35 = vadd.f32 %v5754_v41, %v4811_v49 }
0x36a4   :  { %v4861_v26 = vsel %vm4860_vm2, %v5752_v16, %v4857_v60 }
0x36a5   :  { %v4866_v48 = vsel %vm4863_vm7, %v4865_v14, %v4861_v26  ;;  %v4816_v62 = vsel %vm4815_vm8, %v5754_v41, %v4812_v35 }
0x36a6   :  { %v4879_v58 = vmul.f32 %v4877_v15, %v4866_v48  ;;  %v4821_v31 = vsel %vm4818_vm9, %v4820_v38, %v4816_v62 }
0x36a7   :  { %v4834_v18 = vmul.f32 %v4832_v54, %v4821_v31 }
0x36a8   :  { %4881 = vrot.lane.b32.xlu0 %v4879_v58, %s5790_s29 }
0x36a9   :  { %4836 = vrot.lane.b32.xlu1 %v4834_v18, %s5790_s29 }
0x36ec   :  { %v4826_v21 = vpop.permute.xlu2 %4825 }
0x36ed   :  { %v4828_v45 = vmul.f32 %v4826_v21, %v4821_v31 }
0x3702   :  { %v4871_v52 = vpop.permute.xlu1 %4870 }
0x3703   :  { %v4873_v30 = vmul.f32 %v4871_v52, %v4866_v48 }
0x371a   :  { %v4882_v6 = vpop.permute.xlu0 %4881 }
0x371b   :  { %v4884_v13 = vadd.f32 %v4882_v6, %v4873_v30  ;;  %v4837_v19 = vpop.permute.xlu1 %4836 }
0x371c   :  { %v4839_v47 = vadd.f32 %v4837_v19, %v4828_v45 }
0x371d   :  { %v5402_v36 = vclamps-f32 %v4884_v13, 3.0 }
0x371e   :  { %v5400_v5 = vclamps-f32 %v4839_v47, 3.0 }
0x371f   :  { %5755 = vtanh.f32 %v5402_v36 }
0x3720   :  { %5757 = vtanh.f32 %v5400_v5 }
0x3725   :  { %v5756_v9 = vpop.eup %5755 }
0x3726   :  { %v5758_v1 = vpop.eup %5757  ;;  %4889 = vrot.lane.b32.xlu2 %v5756_v9, %s5790_s29 }
0x3727   :  { %4844 = vrot.lane.b32.xlu0 %v5758_v1, %s5790_s29 }
0x372f   :  { %5021 = vrot.lane.b32.xlu0 %v5390_v37, %s5791_s30 }
0x3780   :  { %v4890_v39 = vpop.permute.xlu2 %4889 }
0x3781   :  { %v4892_v29 = vmul.f32 %v4890_v39, %v4866_v48 }
0x3783   :  { %v4898_v20 = vrot.slane %v4892_v29, 6 }
0x3785   :  { %4899 = vrot.lane.b32.xlu2 %v4898_v20, %s5792_s0 }
0x3799   :  { %v4845_v22 = vpop.permute.xlu0 %4844 }
0x379a   :  { %v4847_v61 = vmul.f32 %v4845_v22, %v4821_v31 }
0x379c   :  { %4894 = vrot.lane.b32.xlu1 %v4847_v61, %s5791_s30 }
0x37a1   :  { %v5022_v15 = vpop.permute.xlu0 %5021 }
0x37a4   :  { %5065 = vrot.lane.b32.xlu1 %v5392_v53, %s5791_s30  ;;  %v4947_v53 = vperm.slane %v4945_v7, 0 }
0x37df   :  { %v4900_v0 = vpop.permute.xlu2 %4899 }
0x380e   :  { %v4895_v24 = vpop.permute.xlu1 %4894 }
0x380f   :  { %v4902_v11 = vsel %vm257_vm0, %v4895_v24, %v4900_v0 }
0x3810   :  { %v4912_v46 = vrot.slane %v4902_v11, 2 }
0x3812   :  { %5403 = vmatmul.msk.f32.vlgmr.msrb.gmra.mxu0 %vm672_vm4, %v4912_v46 }
0x3816   :  { %v5066_v30 = vpop.permute.xlu1 %5065 }
0x388f   :  { %v4932_v25 = vpop.f32.mrf.mxu0 }
0x3890   :  { %v8301_v37 = vclamps-f32 %v4932_v25, 3.0 }
0x3892   :  { %5124 = vst.msk [vmem:[#allocation2 + $0x12] sm:$0x3] %vm1061_vm5, %v8301_v37  ;;  %5405 = vmatmul.msk.f32.vlgmr.msra.gmra.mxu1 %vm257_vm0, %v8301_v37  ;;  %5406 = vmatmul.msk.f32.vlgmr.msrb.gmra.mxu2 %vm257_vm0, %v8301_v37 }
0x3893   :  { %5125 = vst.msk [vmem:[#allocation2] sm:$0x3] %vm1063_vm6, %v8301_v37 }
0x390f   :  { %v4971_v50 = vpop.f32.mrf.mxu1 }
0x3910   :  { %v4972_v3 = vadd.f32 %v4971_v50, %v4947_v53  ;;  %v5170_v50 = vld [vmem:[%s8379_s17 + $0x10] sm:$0xff] }
0x3912   :  { %v4994_v57 = vadd.f32 %v4972_v3, %v4777_v42  ;;  %v5171_v42 = vld [vmem:[%s8379_s17 + $0x18] sm:$0xff]  ;;  %v5169_v3 = vld [vmem:[%s8379_s17 + $0x8] sm:$0xff] }
0x3913   :  { %5193 = vmatpush.msra.mxu2 %v5171_v42 }
0x3914   :  { %v5407_v17 = vmul.f32 -1.442695, %v4994_v57  ;;  %5759 = vtanh.f32 %v4994_v57  ;;  %v5168_v57 = vld [vmem:[%s8379_s17] sm:$0xff] }
0x3915   :  { %v4991_v51 = vpop.f32.mrf.mxu2  ;;  %5194 = vmatpush.msra.mxu2 %v5170_v50 }
0x3916   :  { %5761 = vpow2.f32 %v5407_v17  ;;  %v4992_v2 = vadd.f32 %v4991_v51, %v4948_v59 }
0x3917   :  { %5195 = vmatpush.msra.mxu2 %v5169_v3 }
0x3918   :  { %v5038_v27 = vadd.f32 %v4992_v2, %v4797_v23  ;;  %v5142_v23 = vstv %s5141_s8 }
0x3919   :  { %5196 = vmatpush.msra.mxu2 %v5168_v57 }
0x391a   :  { %v5760_v34 = vpop.eup %5759  ;;  %v5409_v43 = vmul.f32 -1.442695, %v5038_v27  ;;  %5763 = vtanh.f32 %v5038_v27 }
0x391b   :  { %5016 = vrot.lane.b32.xlu2 %v5760_v34, %s5792_s0  ;;  %v5147_v34 = vld [vmem:[#allocation2] sm:$0xff] }
0x391c   :  { %v5762_v16 = vpop.eup %5761  ;;  %5765 = vpow2.f32 %v5409_v43 }
0x391d   :  { %v4998_v41 = vadd.f32 1.0, %v5762_v16 }
0x391f   :  { %5767 = vrcp.f32 %v4998_v41  ;;  %v5010_v63 = vand.u32 2147483648, %v4998_v41  ;;  %v5008_v49 = vand.u32 2147483647, %v4998_v41  ;;  %vm5004_vm12 = vweird.f32 %v4998_v41 }
0x3920   :  { %v5764_v40 = vpop.eup %5763 }
0x3921   :  { %5060 = vrot.lane.b32.xlu0 %v5764_v40, %s5792_s0  ;;  %v5011_v35 = vor.u32 1.1754944e-38, %v5010_v63  ;;  %vm5009_vm1 = vcmp.eq.f32.partialorder %v5008_v49, 8.507059e+37 }
0x3922   :  { %v5766_v33 = vpop.eup %5765 }
0x3923   :  { %v5042_v56 = vadd.f32 1.0, %v5766_v33  ;;  %v5161_v33 = vstv %s5414_s10 }
0x3925   :  { %v5768_v44 = vpop.eup %5767  ;;  %5769 = vrcp.f32 %v5042_v56  ;;  %v5054_v62 = vand.u32 2147483648, %v5042_v56  ;;  %v5052_v31 = vand.u32 2147483647, %v5042_v56  ;;  %vm5048_vm15 = vweird.f32 %v5042_v56 }
0x3926   :  { %v5000_v32 = vmul.f32 %v5768_v44, %v4998_v41  ;;  %vm5005_vm11 = vweird.f32 %v5768_v44  ;;  %v5150_v41 = vstv %s5413_s20 }
0x3927   :  { %vm5006_vm13 = vmor %vm5004_vm12, %vm5005_vm11  ;;  %v5055_v52 = vor.u32 1.1754944e-38, %v5054_v62  ;;  %vm5053_vm3 = vcmp.eq.f32.partialorder %v5052_v31, 8.507059e+37  ;;  %v5151_v40 = vmul.f32 %v5150_v41, %v5147_v34 }
0x3928   :  { %v5001_v4 = vsub.f32 1.0, %v5000_v32 }
0x392a   :  { %v5002_v55 = vmul.f32 %v5768_v44, %v5001_v4  ;;  %v5148_v4 = vld [vmem:[#allocation2 + $0x8] sm:$0xff] }
0x392b   :  { %v5770_v28 = vpop.eup %5769  ;;  %v5152_v49 = vmul.f32 %v5150_v41, %v5148_v4 }
0x392c   :  { %v5044_v60 = vmul.f32 %v5770_v28, %v5042_v56  ;;  %v5003_v14 = vadd.f32 %v5768_v44, %v5002_v55  ;;  %vm5049_vm14 = vweird.f32 %v5770_v28 }
0x392d   :  { %vm5050_vm2 = vmor %vm5048_vm15, %vm5049_vm14 }
0x392e   :  { %v5045_v26 = vsub.f32 1.0, %v5044_v60  ;;  %v5007_v38 = vsel %vm5006_vm13, %v5768_v44, %v5003_v14 }
0x392f   :  { %v5012_v48 = vsel %vm5009_vm1, %v5011_v35, %v5007_v38  ;;  %v5149_v38 = vld [vmem:[#allocation2 + $0x10] sm:$0xf] }
0x3930   :  { %v5024_v54 = vmul.f32 %v5022_v15, %v5012_v48  ;;  %v5046_v58 = vmul.f32 %v5770_v28, %v5045_v26 }
0x3932   :  { %5026 = vrot.lane.b32.xlu1 %v5024_v54, %s5790_s29  ;;  %v5047_v18 = vadd.f32 %v5770_v28, %v5046_v58 }
0x3934   :  { %v5051_v21 = vsel %vm5050_vm2, %v5770_v28, %v5047_v18  ;;  %v5159_v28 = vld [vmem:[#allocation3 + $0x8] sm:$0xff] }
0x3935   :  { %v5056_v45 = vsel %vm5053_vm3, %v5055_v52, %v5051_v21  ;;  %v5163_v14 = vmul.f32 %v5161_v33, %v5159_v28 }
0x3936   :  { %v5068_v6 = vmul.f32 %v5066_v30, %v5056_v45 }
0x3938   :  { %5070 = vrot.lane.b32.xlu2 %v5068_v6, %s5790_s29 }
0x3975   :  { %v5017_v13 = vpop.permute.xlu2 %5016 }
0x3976   :  { %v5019_v39 = vmul.f32 %v5017_v13, %v5012_v48 }
0x3992   :  { %v5071_v36 = vpop.permute.xlu2 %5070 }
0x3993   :  { %v5061_v19 = vpop.permute.xlu0 %5060 }
0x3994   :  { %v5063_v47 = vmul.f32 %v5061_v19, %v5056_v45 }
0x3996   :  { %v5073_v5 = vadd.f32 %v5071_v36, %v5063_v47 }
0x3998   :  { %v5410_v9 = vclamps-f32 %v5073_v5, 3.0 }
0x399a   :  { %5771 = vtanh.f32 %v5410_v9 }
0x39a0   :  { %v5772_v1 = vpop.eup %5771 }
0x39a1   :  { %5078 = vrot.lane.b32.xlu1 %v5772_v1, %s5790_s29 }
0x39a4   :  { %v5027_v29 = vpop.permute.xlu1 %5026 }
0x39a5   :  { %v5029_v20 = vadd.f32 %v5027_v29, %v5019_v39 }
0x39a7   :  { %v5408_v22 = vclamps-f32 %v5029_v20, 3.0 }
0x39a9   :  { %5773 = vtanh.f32 %v5408_v22  ;;  %5129 = vrot.lane.b32.xlu1 %v6216_v8, %s5794_s14 }
0x39af   :  { %v5774_v61 = vpop.eup %5773 }
0x39b0   :  { %5034 = vrot.lane.b32.xlu0 %v5774_v61, %s5790_s29 }
0x3a13   :  { %v5079_v0 = vpop.permute.xlu1 %5078 }
0x3a14   :  { %v5081_v24 = vmul.f32 %v5079_v0, %v5056_v45 }
0x3a16   :  { %5087 = vrot.lane.b32.xlu0 %v5081_v24, %s5792_s0 }
0x3a1b   :  { %v5130_v2 = vpop.permute.xlu1 %5129 }
0x3a1c   :  { %v5138_v27 = vsel %vm578_vm10, %v6216_v8, %v5130_v2 }
0x3a1d   :  { %v5143_v43 = vmul.f32 %v5142_v23, %v5138_v27 }
0x3a1e   :  { %5133 = vrot.lane.b32.xlu0 %v6228_v12, %s5794_s14 }
0x3a1f   :  { %v5154_v44 = vadd.f32 %v5151_v40, %v5143_v43 }
0x3a22   :  { %v5035_v11 = vpop.permute.xlu0 %5034 }
0x3a23   :  { %v5037_v46 = vmul.f32 %v5035_v11, %v5012_v48  ;;  %v5153_v48 = vmul.f32 %v5150_v41, %v5149_v38 }
0x3a25   :  { %5083 = vrot.lane.b32.xlu2 %v5037_v46, %s5791_s30 }
0x3a2d   :  { %5131 = vrot.lane.b32.xlu2 %v6222_v10, %s5794_s14 }
0x3a7f   :  { %v5084_v25 = vpop.permute.xlu2 %5083 }
0x3a87   :  { %v5132_v16 = vpop.permute.xlu2 %5131 }
0x3a88   :  { %v5088_v7 = vpop.permute.xlu0 %5087  ;;  %v5139_v56 = vsel %vm578_vm10, %v6222_v10, %v5132_v16 }
0x3a89   :  { %v5090_v53 = vsel %vm257_vm0, %v5084_v25, %v5088_v7  ;;  %v5144_v63 = vmul.f32 %v5142_v23, %v5139_v56 }
0x3a8a   :  { %5411 = vmatmul.msk.f32.vlgmr.msrb.gmra.mxu1 %vm672_vm4, %v5090_v53 }
0x3a8b   :  { %v5155_v8 = vadd.f32 %v5152_v49, %v5144_v63 }
0x3a8d   :  { %v5166_v26 = vadd.f32 %v5163_v14, %v5155_v8 }
0x3a90   :  { %v5134_v60 = vpop.permute.xlu0 %5133 }
0x3a91   :  { %v5140_v35 = vsel %vm578_vm10, %v6228_v12, %v5134_v60  ;;  %vm5209_vm10 = vcmask 257024  }
0x3a92   :  { %v5145_v10 = vmul.f32 %v5142_v23, %v5140_v35 }
0x3a94   :  { %v5156_v54 = vadd.f32 %v5153_v48, %v5145_v10 }
0x3b07   :  { %v5119_v59 = vpop.f32.mrf.mxu1 }
0x3b08   :  { %v5412_v17 = vclamps-f32 %v5119_v59, 3.0 }
0x3b0a   :  { %v5126_v51 = vadd.f32 %v5412_v17, %v8301_v37 }
0x3b0c   :  { %5127 = vst.msk [vmem:[#allocation3 + $0x12] sm:$0x3] %vm1061_vm5, %v5126_v51 }
0x3b0d   :  { %5128 = vst.msk [vmem:[#allocation3] sm:$0x3] %vm1063_vm6, %v5126_v51 }
0x3b13   :  { %v5160_v15 = vld [vmem:[#allocation3 + $0x10] sm:$0xf] }
0x3b14   :  { %v5158_v37 = vld [vmem:[#allocation3] sm:$0xff]  ;;  %v5164_v62 = vmul.f32 %v5161_v33, %v5160_v15 }
0x3b15   :  { %v5162_v32 = vmul.f32 %v5161_v33, %v5158_v37 }
0x3b16   :  { %v5167_v58 = vadd.f32 %v5164_v62, %v5156_v54 }
0x3b17   :  { %v5165_v55 = vadd.f32 %v5162_v32, %v5154_v44 }
0x3b19   :  { %5415 = vmatmul.msk.f32.vlgmr.msra.gmra.mxu2 %vm257_vm0, %v5165_v55 }
0x3b21   :  { %5416 = vmatmul.msk.f32.gmra.mxu2 %vm257_vm0, %v5166_v26 }
0x3b29   :  { %5417 = vmatmul.msk.f32.gmra.mxu2 %vm257_vm0, %v5167_v58 }
0x3b9c   :  { %v5198_v31 = vpop.f32.mrf.mxu2 }
0x3b9d   :  { %5207 = vst.msk [vmem:[%s8380_s18] sm:$0xff] %vm257_vm0, %v5198_v31 }
0x3ba4   :  { %v5201_v18 = vpop.f32.mrf.mxu2 }
0x3ba5   :  { %5208 = vst.msk [vmem:[%s8380_s18 + $0x8] sm:$0xff] %vm257_vm0, %v5201_v18 }
0x3bac   :  { %v5204_v12 = vpop.f32.mrf.mxu2 }
0x3bad   :  { %5210 = vst.msk [vmem:[%s8380_s18 + $0x10] sm:$0xf] %vm5209_vm10, %v5204_v12 }
0x3bae   :  { %5215 = vsyncpa [#allocation5], 1 }

</bundles_post_ra>
